<compile_context>
chip_gen: v6e
topology: v6e:2x2x1
jax: 0.10.0
libtpu: 0.0.40
codegen_flags: <defaults>
</compile_context>

<pallas_src>
import math

import numpy as np
import jax
import jax.numpy as jnp
from jax.experimental import pallas as pl
from jax.experimental.pallas import tpu as pltpu

# ----------------------------- configuration --------------------------------
B = 2            # batch
N_MELS = 8
T = 16           # time steps == sequence length
N_CLASSES = 10
D_STATE = 8
D_CONV = 4
EXPAND = 2
FLUX = 1
NUM_CH = 8       # num_channels
N_LAYERS = 2

N_DIMS = N_MELS * (1 + FLUX)           # 16 freq rows fed to the CNN
H1 = N_DIMS                            # freq grid, block 1
H2 = N_DIMS // 2                       # after pool1
H3 = N_DIMS // 4                       # after pool2
D_MODEL = NUM_CH * H3                  # 32
D_INNER = EXPAND * D_MODEL             # 64
DT_RANK = math.ceil(D_MODEL / 16)      # 2
FC_PAD = 128                           # lane-dense padded classifier width

BT = B * T                             # 32 folded rows, time-major: row = t*B + b
BN = B * D_STATE                       # 16  (scan state rows per time step)
BTN = BT * D_STATE                     # 256
W1 = NUM_CH * H1                       # 128 conv-stage width, block 1
W2 = NUM_CH * H2                       # 64  conv-stage width, block 2
W_NARROW = 128
W_WIDE = 3 * W1                        # 384 (lane-stacked conv taps)
_LOG_NS = D_STATE.bit_length() - 1     # 3
_LOG_BT = BT.bit_length() - 1          # 5


# ------------------------------ weight slab packing --------------------------
class _SlabPacker:
    def __init__(self, width):
        self.width = width
        self.rows = 0
        self._items = []

    def add(self, arr):
        arr = np.asarray(arr, np.float32)
        if arr.ndim == 1:
            arr = arr[None, :]
        r, c = arr.shape
        assert c <= self.width, (c, self.width)
        off = self.rows
        self._items.append((off, arr))
        self.rows += ((r + 7) // 8) * 8       # keep row offsets sublane-aligned
        return off, r, c

    def build(self):
        slab = np.zeros((max(self.rows, 8), self.width), np.float32)
        for off, a in self._items:
            slab[off:off + a.shape[0], :a.shape[1]] = a
        return jnp.asarray(slab)


# ------------------------------ fused kernel ---------------------------------
def build_forward(off):
    """off: dict name -> (row_offset, rows, cols, is_wide) with static ints."""

    def kernel(x_ref, w128_ref, w384_ref, out_ref, hall_ref):
        f32 = jnp.float32

        def dot(a, b):
            return jnp.dot(a, b, preferred_element_type=f32)

        def w(name):
            o, r, c, is_wide = off[name]
            ref = w384_ref if is_wide else w128_ref
            return ref[o:o + r, 0:c]

        relu = lambda v: jnp.maximum(v, 0.0)
        silu = lambda v: v * jax.nn.sigmoid(v)
        one = lambda cond: jnp.where(cond, 1.0, 0.0)

        # ---------- structural 0/1 matrices built from iotas (no DMA) --------
        ri = jax.lax.broadcasted_iota(jnp.int32, (BT, BT), 0)
        ci = jax.lax.broadcasted_iota(jnp.int32, (BT, BT), 1)
        sp1 = one(ri == ci + B)          # row t reads t-1 of same batch (0 at t=0)
        sn1 = one(ci == ri + B)          # row t reads t+1 of same batch

        si = jax.lax.broadcasted_iota(jnp.int32, (3 * BT, BT), 0)
        sj = jax.lax.broadcasted_iota(jnp.int32, (3 * BT, BT), 1)
        spstack = one((si & (BT - 1)) == sj + ((si >> _LOG_BT) + 1) * B)  # [sp1;sp2;sp3]

        qi = jax.lax.broadcasted_iota(jnp.int32, (BTN, BT), 0)
        qj = jax.lax.broadcasted_iota(jnp.int32, (BTN, BT), 1)
        rep = one((qi >> _LOG_NS) == qj)             # replicate each seq row NS times

        ti_ = jax.lax.broadcasted_iota(jnp.int32, (BT, BTN), 0)
        tj_ = jax.lax.broadcasted_iota(jnp.int32, (BT, BTN), 1)
        repT = one((tj_ >> _LOG_NS) == ti_)

        ni = jax.lax.broadcasted_iota(jnp.int32, (BTN, 2 * D_STATE), 0)
        nj = jax.lax.broadcasted_iota(jnp.int32, (BTN, 2 * D_STATE), 1)
        nselB = one(nj == (ni & (D_STATE - 1)))                 # pick B column
        c2i = jax.lax.broadcasted_iota(jnp.int32, (2 * D_STATE, BTN), 0)
        c2j = jax.lax.broadcasted_iota(jnp.int32, (2 * D_STATE, BTN), 1)
        nselCT = one(c2i == (c2j & (D_STATE - 1)) + D_STATE)    # pick C column (transposed)

        fmask = one(jax.lax.broadcasted_iota(jnp.int32, (BT, 1), 0) >= B)  # t > 0

        mi = jax.lax.broadcasted_iota(jnp.int32, (N_MELS, N_DIMS), 0)
        mj = jax.lax.broadcasted_iota(jnp.int32, (N_MELS, N_DIMS), 1)
        embM = one(mj == mi)                                    # mel -> lanes [0:8)
        embF = one(mj == mi + N_MELS)                           # flux -> lanes [8:16)

        # ---------------- spectral-flux front end ---------------------------
        xb = x_ref[...]                                         # (BT, n_mels)
        flux = fmask * relu(xb - dot(sp1, xb))
        x0 = dot(xb, embM) + dot(flux, embF)                    # (BT, 16)

        # ---------------- CNN front end (banded-matmul convs) ---------------
        def conv3x3(a, mname, bname, width):
            # taps lane-stacked in the weight: P = a @ [m_prev | m_curr | m_next]
            p = dot(a, w(mname))                                # (BT, 3*width)
            return (dot(sp1, p[:, 0:width]) + p[:, width:2 * width]
                    + dot(sn1, p[:, 2 * width:3 * width]) + w(bname))

        # residual block 1 (1 -> NUM_CH channels) + MaxPool2d((2,1)) over freq
        y = relu(conv3x3(x0, 'm1a', 'b1a', W1))                          # (BT, 128)
        y = relu(conv3x3(y, 'm1b', 'b1b', W1) + dot(x0, w('msc1')))      # (BT, 128)
        p1 = jnp.maximum(dot(y, w('pe1')), dot(y, w('po1')))             # (BT, 64)

        # residual block 2 (NUM_CH -> NUM_CH, identity shortcut) + MaxPool2d((2,1))
        y = relu(conv3x3(p1, 'm2a', 'b2a', W2))                          # (BT, 64)
        y = relu(conv3x3(y, 'm2b', 'b2b', W2) + p1)                      # (BT, 64)
        seq = jnp.maximum(dot(y, w('pe2')), dot(y, w('po2')))            # (BT, D_MODEL)
        # `seq` feature order == torch reshape(C, H).permute ordering (d = c*H3 + h).

        # ---------------- Mamba layers (post-norm residual blocks) ----------
        for li in range(N_LAYERS):
            pfx = f'L{li}_'
            xz = dot(seq, w(pfx + 'w_in'))                      # (BT, 2*DI) = [x | z]
            xs = xz[:, :D_INNER]
            zg = xz[:, D_INNER:]

            # causal depthwise conv1d (kernel = D_CONV) along time, then SiLU
            wc = w(pfx + 'wconv')                               # (D_CONV, DI)
            sh = dot(spstack, xs)                               # [x[t-1]; x[t-2]; x[t-3]]
            xc = (xs * wc[3:4, :] + sh[0:BT] * wc[2:3, :]
                  + sh[BT:2 * BT] * wc[1:2, :] + sh[2 * BT:3 * BT] * wc[0:1, :]
                  + w(pfx + 'bconv'))
            xc = silu(xc)

            # dt (host-fused low-rank proj) / fused B|C projection
            dt_raw = dot(xc, w(pfx + 'wdt')) + w(pfx + 'bdt')
            dt = jnp.where(dt_raw > 20.0, dt_raw,
                           jnp.log1p(jnp.exp(jnp.minimum(dt_raw, 20.0))))   # softplus
            bc = dot(xc, w(pfx + 'wbc'))                        # (BT, 2*NS) = [B | C]

            # selective scan: everything except h = decay*h + inp hoisted out.
            bigA = dot(nselB, w(pfx + 'a16'))                   # (BTN, DI): A[d, q%NS]
            decay = jnp.exp(dot(rep, dt) * bigA)                # (BTN, DI)
            repB = rep * dot(nselB, bc.T)                       # (BTN, BT) carries B[t,n]
            binp = dot(repB, dt * xc)                           # (BTN, DI)

            h = jnp.zeros((BN, D_INNER), f32)
            for t in range(T):
                lo = t * BN
                h = decay[lo:lo + BN, :] * h + binp[lo:lo + BN, :]
                hall_ref[lo:lo + BN, :] = h

            # C readout as one matmul over the stored states
            m_read = repT * dot(bc, nselCT)                     # (BT, BTN) carries C[t,n]
            yv = dot(m_read, hall_ref[...]) + w(pfx + 'dpar') * xc   # (BT, DI)
            yv = yv * silu(zg)                                  # SiLU gate
            s = dot(yv, w(pfx + 'wout')) + seq                  # out_proj + residual
            var = jnp.mean(s * s, axis=-1, keepdims=True)
            seq = s * jax.lax.rsqrt(var + 1e-5) * w(pfx + 'rms')  # RMSNorm

        # ---------------- classifier (lane-padded to 128) --------------------
        out_ref[...] = relu(dot(seq, w('fc_w')) + w('fc_b'))

    def forward(x, w128, w384):
        assert x.shape == (B, N_MELS, T), x.shape
        # fold batch into time-major rows: row = t*B + b
        x2d = jnp.transpose(x, (2, 0, 1)).reshape(BT, N_MELS)
        out = pl.pallas_call(
            kernel,
            out_shape=jax.ShapeDtypeStruct((BT, FC_PAD), jnp.float32),
            grid_spec=pltpu.PrefetchScalarGridSpec(
                num_scalar_prefetch=0,
                grid=(1,),
                in_specs=[
                    pl.BlockSpec((BT, N_MELS), lambda i: (0, 0)),
                    pl.BlockSpec(w128.shape, lambda i: (0, 0)),
                    pl.BlockSpec(w384.shape, lambda i: (0, 0)),
                ],
                out_specs=pl.BlockSpec((BT, FC_PAD), lambda i: (0, 0)),
                scratch_shapes=[pltpu.VMEM((BTN, D_INNER), jnp.float32)],
            ),
            compiler_params=pltpu.CompilerParams(
                dimension_semantics=("arbitrary",)),
        )(x2d, w128, w384)
        out = out.reshape(T, B, FC_PAD)[:, :, :N_CLASSES]       # strip lane padding
        return jnp.transpose(out, (1, 2, 0))                    # (B, n_classes, T)

    return forward


# ------------------------------ parameters ------------------------------------
def _band_matrices(wconv, h_in):
    """3x3 conv weight (Co,Ci,3,3) -> lane-stacked (Ci*h_in, 3*Co*h_in) mixing
    matrix: columns = [tap t-1 | tap t | tap t+1]; feature = channel*h_in + freq."""
    co_n, ci_n = wconv.shape[0], wconv.shape[1]
    m = np.zeros((3, ci_n * h_in, co_n * h_in), np.float32)
    for kw in range(3):                       # time tap
        for co in range(co_n):
            for ci in range(ci_n):
                for h in range(h_in):         # output freq row
                    for kh in range(3):       # freq tap
                        hp = h + kh - 1
                        if 0 <= hp < h_in:
                            m[kw, ci * h_in + hp, co * h_in + h] = wconv[co, ci, kh, kw]
    return np.concatenate([m[0], m[1], m[2]], axis=1)


def _pool_sel(cn, h_in):
    """MaxPool2d((2,1)) + flatten as two 0/1 selection matmuls (even/odd rows)."""
    h_out = h_in // 2
    e = np.zeros((cn * h_in, cn * h_out), np.float32)
    o = np.zeros((cn * h_in, cn * h_out), np.float32)
    for c in range(cn):
        for k in range(h_out):
            e[c * h_in + 2 * k, c * h_out + k] = 1.0
            o[c * h_in + 2 * k + 1, c * h_out + k] = 1.0
    return e, o


def _resblock_arrays(key, cin, cout, h_in):
    # Assumed ResidualBlock: conv3x3 -> relu -> conv3x3 (+ 1x1/identity shortcut) -> relu
    # TODO(synk): swap in the exact ResidualBlock definition if it differs.
    k1, k2, k3, k4, k5, k6 = jax.random.split(key, 6)
    s = 0.2
    w_a = np.asarray(jax.random.normal(k1, (cout, cin, 3, 3)), np.float32) * s
    b_a = np.asarray(jax.random.normal(k2, (cout,)), np.float32) * s
    w_b = np.asarray(jax.random.normal(k3, (cout, cout, 3, 3)), np.float32) * s
    b_b = np.asarray(jax.random.normal(k4, (cout,)), np.float32) * s
    m_a = _band_matrices(w_a, h_in)
    m_b = _band_matrices(w_b, h_in)
    bias_a = np.repeat(b_a, h_in)[None, :]
    bias_b = np.repeat(b_b, h_in)[None, :]
    msc = None
    if cin != cout:                                   # 1x1 conv shortcut
        ws = np.asarray(jax.random.normal(k5, (cout, cin)), np.float32) * s
        bs = np.asarray(jax.random.normal(k6, (cout,)), np.float32) * s
        msc = np.zeros((cin * h_in, cout * h_in), np.float32)
        for co in range(cout):
            for ci in range(cin):
                for h in range(h_in):
                    msc[ci * h_in + h, co * h_in + h] = ws[co, ci]
        bias_b = bias_b + np.repeat(bs, h_in)[None, :]
    return m_a, bias_a, m_b, bias_b, msc


def _mamba_arrays(key):
    ks = jax.random.split(key, 7)
    s = 0.1
    win = np.asarray(jax.random.normal(ks[0], (2 * D_INNER, D_MODEL)), np.float32) * s
    wconv = np.asarray(jax.random.normal(ks[1], (D_INNER, D_CONV)), np.float32) * s
    bconv = np.asarray(jax.random.normal(ks[2], (D_INNER,)), np.float32) * s
    wxp = np.asarray(jax.random.normal(ks[3], (DT_RANK + 2 * D_STATE, D_INNER)), np.float32) * s
    wdt = np.asarray(jax.random.normal(ks[4], (D_INNER, DT_RANK)), np.float32) * s
    bdt = np.asarray(jax.random.normal(ks[5], (D_INNER,)), np.float32) * s
    wout = np.asarray(jax.random.normal(ks[6], (D_MODEL, D_INNER)), np.float32) * s

    w_in = win.T                                      # (D_MODEL, 2*DI): [:, :DI]=x, [:, DI:]=z
    wdt_full = wxp[:DT_RANK].T @ wdt.T                # host-fused rank-2 dt projection (DI, DI)
    wB = wxp[DT_RANK:DT_RANK + D_STATE].T             # (DI, NS)
    wC = wxp[DT_RANK + D_STATE:].T                    # (DI, NS)
    wbc = np.concatenate([wB, wC], axis=1)            # (DI, 2*NS)
    # A (S4D-real init): A[d, n] = -(n+1); stored as A^T padded to 16 rows so the
    # in-kernel nselB matmul expands it to (BTN, DI).
    a16 = np.zeros((2 * D_STATE, D_INNER), np.float32)
    a16[:D_STATE] = -np.tile(np.arange(1, D_STATE + 1, dtype=np.float32)[:, None],
                             (1, D_INNER))
    return dict(
        w_in=w_in,
        wconv=wconv.T,                                # (D_CONV, DI), row 3 = current tap
        bconv=bconv[None, :],
        wdt=wdt_full,
        bdt=bdt[None, :],
        wbc=wbc,
        a16=a16,
        dpar=np.ones((1, D_INNER), np.float32),       # D ("skip") parameter
        wout=wout.T,                                  # (DI, D_MODEL)
        rms=np.ones((1, D_MODEL), np.float32),        # RMSNorm weight
    )


def _fc_arrays(key):
    k1, k2 = jax.random.split(key)
    wfc = np.asarray(jax.random.normal(k1, (N_CLASSES, D_MODEL)), np.float32) * 0.1
    bfc = np.asarray(jax.random.normal(k2, (N_CLASSES,)), np.float32) * 0.1
    wpad = np.zeros((D_MODEL, FC_PAD), np.float32)
    wpad[:, :N_CLASSES] = wfc.T
    bpad = np.zeros((1, FC_PAD), np.float32)
    bpad[0, :N_CLASSES] = bfc
    return wpad, bpad


def make_params(key):
    kc1, kc2, km, kf = jax.random.split(key, 4)
    nar = _SlabPacker(W_NARROW)
    wide = _SlabPacker(W_WIDE)
    off = {}

    def put(name, arr, is_wide=False):
        o, r, c = (wide if is_wide else nar).add(arr)
        off[name] = (o, r, c, is_wide)

    # residual block 1 + pool1
    m1a, b1a, m1b, b1b, msc1 = _resblock_arrays(kc1, 1, NUM_CH, H1)
    put('m1a', m1a, True); put('b1a', b1a)
    put('m1b', m1b, True); put('b1b', b1b); put('msc1', msc1)
    pe1, po1 = _pool_sel(NUM_CH, H1)
    put('pe1', pe1); put('po1', po1)

    # residual block 2 + pool2 (identity shortcut)
    m2a, b2a, m2b, b2b, _ = _resblock_arrays(kc2, NUM_CH, NUM_CH, H2)
    put('m2a', m2a, True); put('b2a', b2a)
    put('m2b', m2b, True); put('b2b', b2b)
    pe2, po2 = _pool_sel(NUM_CH, H2)
    put('pe2', pe2); put('po2', po2)

    # mamba layers
    for li, k in enumerate(jax.random.split(km, N_LAYERS)):
        for nm, arr in _mamba_arrays(k).items():
            put(f'L{li}_{nm}', arr)

    # classifier
    wfc, bfc = _fc_arrays(kf)
    put('fc_w', wfc); put('fc_b', bfc)

    return {'w128': nar.build(), 'w384': wide.build(), 'off': off}


# ------------------------------ main -------------------------------------------
if __name__ == "__main__":
    key = jax.random.PRNGKey(0)
    kx, kp = jax.random.split(key)
    x = jax.random.normal(kx, (B, N_MELS, T), jnp.float32)
    params = make_params(kp)

    fwd = jax.jit(build_forward(params['off']))
    out = jax.block_until_ready(fwd(x, params['w128'], params['w384']))

    assert out.shape == (B, N_CLASSES, T), out.shape
    assert bool(jnp.all(jnp.isfinite(out)))
    print("KERNEL_OK")
</pallas_src>

<mosaic_0001>
module attributes {stable_mosaic.version = 11 : i64} {
  func.func @kernel(%arg0: i32, %arg1: memref<32x8xf32, #tpu.memory_space<vmem>>, %arg2: memref<1032x128xf32, #tpu.memory_space<vmem>>, %arg3: memref<272x384xf32, #tpu.memory_space<vmem>>, %arg4: memref<32x128xf32, #tpu.memory_space<vmem>>, %arg5: memref<256x64xf32, #tpu.memory_space<vmem>>) attributes {dimension_semantics = [#tpu.dimension_semantics<arbitrary>], iteration_bounds = array<i64: 1>, scalar_prefetch = 0 : i64, scratch_operands = 1 : i64, tpu.core_type = #tpu.core_type<tc>, window_params = [{pipeline_mode = #tpu.pipeline_mode<synchronous>, transform_indices = @transform_0, window_bounds = array<i64: 32, 8>}, {pipeline_mode = #tpu.pipeline_mode<synchronous>, transform_indices = @transform_1, window_bounds = array<i64: 1032, 128>}, {pipeline_mode = #tpu.pipeline_mode<synchronous>, transform_indices = @transform_2, window_bounds = array<i64: 272, 384>}, {pipeline_mode = #tpu.pipeline_mode<synchronous>, transform_indices = @transform_3, window_bounds = array<i64: 32, 128>}]} {
    %0 = tpu.iota {dimensions = array<i32: 0>} : vector<32x32xi32>
    %1 = tpu.iota {dimensions = array<i32: 1>} : vector<32x32xi32>
    %c2_i32 = arith.constant 2 : i32
    %2 = vector.broadcast %c2_i32 : i32 to vector<32x32xi32>
    %3 = arith.addi %1, %2 : vector<32x32xi32>
    %4 = arith.cmpi eq, %0, %3 : vector<32x32xi32>
    %cst = arith.constant 1.000000e+00 : f32
    %cst_0 = arith.constant 0.000000e+00 : f32
    %5 = vector.broadcast %cst : f32 to vector<32x32xf32>
    %6 = vector.broadcast %cst_0 : f32 to vector<32x32xf32>
    %7 = arith.select %4, %5, %6 : vector<32x32xi1>, vector<32x32xf32>
    %c2_i32_1 = arith.constant 2 : i32
    %8 = vector.broadcast %c2_i32_1 : i32 to vector<32x32xi32>
    %9 = arith.addi %0, %8 : vector<32x32xi32>
    %10 = arith.cmpi eq, %1, %9 : vector<32x32xi32>
    %cst_2 = arith.constant 1.000000e+00 : f32
    %cst_3 = arith.constant 0.000000e+00 : f32
    %11 = vector.broadcast %cst_2 : f32 to vector<32x32xf32>
    %12 = vector.broadcast %cst_3 : f32 to vector<32x32xf32>
    %13 = arith.select %10, %11, %12 : vector<32x32xi1>, vector<32x32xf32>
    %14 = tpu.iota {dimensions = array<i32: 0>} : vector<96x32xi32>
    %15 = tpu.iota {dimensions = array<i32: 1>} : vector<96x32xi32>
    %c31_i32 = arith.constant 31 : i32
    %16 = vector.broadcast %c31_i32 : i32 to vector<96x32xi32>
    %17 = arith.andi %14, %16 : vector<96x32xi32>
    %c5_i32 = arith.constant 5 : i32
    %18 = vector.broadcast %c5_i32 : i32 to vector<96x32xi32>
    %19 = arith.shrsi %14, %18 : vector<96x32xi32>
    %c1_i32 = arith.constant 1 : i32
    %20 = vector.broadcast %c1_i32 : i32 to vector<96x32xi32>
    %21 = arith.addi %19, %20 : vector<96x32xi32>
    %c2_i32_4 = arith.constant 2 : i32
    %22 = vector.broadcast %c2_i32_4 : i32 to vector<96x32xi32>
    %23 = arith.muli %21, %22 : vector<96x32xi32>
    %24 = arith.addi %15, %23 : vector<96x32xi32>
    %25 = arith.cmpi eq, %17, %24 : vector<96x32xi32>
    %cst_5 = arith.constant 1.000000e+00 : f32
    %cst_6 = arith.constant 0.000000e+00 : f32
    %26 = vector.broadcast %cst_5 : f32 to vector<96x32xf32>
    %27 = vector.broadcast %cst_6 : f32 to vector<96x32xf32>
    %28 = arith.select %25, %26, %27 : vector<96x32xi1>, vector<96x32xf32>
    %29 = tpu.iota {dimensions = array<i32: 0>} : vector<256x32xi32>
    %30 = tpu.iota {dimensions = array<i32: 1>} : vector<256x32xi32>
    %c3_i32 = arith.constant 3 : i32
    %31 = vector.broadcast %c3_i32 : i32 to vector<256x32xi32>
    %32 = arith.shrsi %29, %31 : vector<256x32xi32>
    %33 = arith.cmpi eq, %32, %30 : vector<256x32xi32>
    %cst_7 = arith.constant 1.000000e+00 : f32
    %cst_8 = arith.constant 0.000000e+00 : f32
    %34 = vector.broadcast %cst_7 : f32 to vector<256x32xf32>
    %35 = vector.broadcast %cst_8 : f32 to vector<256x32xf32>
    %36 = arith.select %33, %34, %35 : vector<256x32xi1>, vector<256x32xf32>
    %37 = tpu.iota {dimensions = array<i32: 0>} : vector<32x256xi32>
    %38 = tpu.iota {dimensions = array<i32: 1>} : vector<32x256xi32>
    %c3_i32_9 = arith.constant 3 : i32
    %39 = vector.broadcast %c3_i32_9 : i32 to vector<32x256xi32>
    %40 = arith.shrsi %38, %39 : vector<32x256xi32>
    %41 = arith.cmpi eq, %40, %37 : vector<32x256xi32>
    %cst_10 = arith.constant 1.000000e+00 : f32
    %cst_11 = arith.constant 0.000000e+00 : f32
    %42 = vector.broadcast %cst_10 : f32 to vector<32x256xf32>
    %43 = vector.broadcast %cst_11 : f32 to vector<32x256xf32>
    %44 = arith.select %41, %42, %43 : vector<32x256xi1>, vector<32x256xf32>
    %45 = tpu.iota {dimensions = array<i32: 0>} : vector<256x16xi32>
    %46 = tpu.iota {dimensions = array<i32: 1>} : vector<256x16xi32>
    %c7_i32 = arith.constant 7 : i32
    %47 = vector.broadcast %c7_i32 : i32 to vector<256x16xi32>
    %48 = arith.andi %45, %47 : vector<256x16xi32>
    %49 = arith.cmpi eq, %46, %48 : vector<256x16xi32>
    %cst_12 = arith.constant 1.000000e+00 : f32
    %cst_13 = arith.constant 0.000000e+00 : f32
    %50 = vector.broadcast %cst_12 : f32 to vector<256x16xf32>
    %51 = vector.broadcast %cst_13 : f32 to vector<256x16xf32>
    %52 = arith.select %49, %50, %51 : vector<256x16xi1>, vector<256x16xf32>
    %53 = tpu.iota {dimensions = array<i32: 0>} : vector<16x256xi32>
    %54 = tpu.iota {dimensions = array<i32: 1>} : vector<16x256xi32>
    %c7_i32_14 = arith.constant 7 : i32
    %55 = vector.broadcast %c7_i32_14 : i32 to vector<16x256xi32>
    %56 = arith.andi %54, %55 : vector<16x256xi32>
    %c8_i32 = arith.constant 8 : i32
    %57 = vector.broadcast %c8_i32 : i32 to vector<16x256xi32>
    %58 = arith.addi %56, %57 : vector<16x256xi32>
    %59 = arith.cmpi eq, %53, %58 : vector<16x256xi32>
    %cst_15 = arith.constant 1.000000e+00 : f32
    %cst_16 = arith.constant 0.000000e+00 : f32
    %60 = vector.broadcast %cst_15 : f32 to vector<16x256xf32>
    %61 = vector.broadcast %cst_16 : f32 to vector<16x256xf32>
    %62 = arith.select %59, %60, %61 : vector<16x256xi1>, vector<16x256xf32>
    %63 = tpu.iota {dimensions = array<i32: 0>} : vector<32x1xi32>
    %c2_i32_17 = arith.constant 2 : i32
    %64 = vector.broadcast %c2_i32_17 : i32 to vector<32x1xi32>
    %65 = arith.cmpi sge, %63, %64 : vector<32x1xi32>
    %cst_18 = arith.constant 1.000000e+00 : f32
    %cst_19 = arith.constant 0.000000e+00 : f32
    %66 = vector.broadcast %cst_18 : f32 to vector<32x1xf32>
    %67 = vector.broadcast %cst_19 : f32 to vector<32x1xf32>
    %68 = arith.select %65, %66, %67 : vector<32x1xi1>, vector<32x1xf32>
    %69 = tpu.iota {dimensions = array<i32: 0>} : vector<8x16xi32>
    %70 = tpu.iota {dimensions = array<i32: 1>} : vector<8x16xi32>
    %71 = arith.cmpi eq, %70, %69 : vector<8x16xi32>
    %cst_20 = arith.constant 1.000000e+00 : f32
    %cst_21 = arith.constant 0.000000e+00 : f32
    %72 = vector.broadcast %cst_20 : f32 to vector<8x16xf32>
    %73 = vector.broadcast %cst_21 : f32 to vector<8x16xf32>
    %74 = arith.select %71, %72, %73 : vector<8x16xi1>, vector<8x16xf32>
    %c8_i32_22 = arith.constant 8 : i32
    %75 = vector.broadcast %c8_i32_22 : i32 to vector<8x16xi32>
    %76 = arith.addi %69, %75 : vector<8x16xi32>
    %77 = arith.cmpi eq, %70, %76 : vector<8x16xi32>
    %cst_23 = arith.constant 1.000000e+00 : f32
    %cst_24 = arith.constant 0.000000e+00 : f32
    %78 = vector.broadcast %cst_23 : f32 to vector<8x16xf32>
    %79 = vector.broadcast %cst_24 : f32 to vector<8x16xf32>
    %80 = arith.select %77, %78, %79 : vector<8x16xi1>, vector<8x16xf32>
    %c0 = arith.constant 0 : index
    %c0_25 = arith.constant 0 : index
    %81 = vector.load %arg1[%c0, %c0_25] : memref<32x8xf32, #tpu.memory_space<vmem>>, vector<32x8xf32>
    %cst_26 = arith.constant dense<0.000000e+00> : vector<32x8xf32>
    %82 = tpu.matmul %7, %81, %cst_26 {dimension_numbers = #tpu.dot_dimension_numbers<[1], [0], [0], [1], [0, 0, 1, 1], [], []>} : vector<32x32xf32>, vector<32x8xf32>, vector<32x8xf32> -> vector<32x8xf32>
    %83 = arith.subf %81, %82 : vector<32x8xf32>
    %cst_27 = arith.constant 0.000000e+00 : f32
    %84 = vector.broadcast %cst_27 : f32 to vector<32x8xf32>
    %85 = arith.maximumf %83, %84 : vector<32x8xf32>
    %86 = vector.broadcast %68 : vector<32x1xf32> to vector<32x8xf32>
    %87 = arith.mulf %86, %85 : vector<32x8xf32>
    %cst_28 = arith.constant dense<0.000000e+00> : vector<32x16xf32>
    %88 = tpu.matmul %81, %74, %cst_28 {dimension_numbers = #tpu.dot_dimension_numbers<[1], [0], [0], [1], [0, 0, 1, 1], [], []>} : vector<32x8xf32>, vector<8x16xf32>, vector<32x16xf32> -> vector<32x16xf32>
    %cst_29 = arith.constant dense<0.000000e+00> : vector<32x16xf32>
    %89 = tpu.matmul %87, %80, %cst_29 {dimension_numbers = #tpu.dot_dimension_numbers<[1], [0], [0], [1], [0, 0, 1, 1], [], []>} : vector<32x8xf32>, vector<8x16xf32>, vector<32x16xf32> -> vector<32x16xf32>
    %90 = arith.addf %88, %89 : vector<32x16xf32>
    %c0_30 = arith.constant 0 : index
    %c0_31 = arith.constant 0 : index
    %91 = vector.load %arg3[%c0_30, %c0_31] : memref<272x384xf32, #tpu.memory_space<vmem>>, vector<16x384xf32>
    %cst_32 = arith.constant dense<0.000000e+00> : vector<32x384xf32>
    %92 = tpu.matmul %90, %91, %cst_32 {dimension_numbers = #tpu.dot_dimension_numbers<[1], [0], [0], [1], [0, 0, 1, 1], [], []>} : vector<32x16xf32>, vector<16x384xf32>, vector<32x384xf32> -> vector<32x384xf32>
    %93 = vector.extract_strided_slice %92 {offsets = [0, 0], sizes = [32, 128], strides = [1, 1]} : vector<32x384xf32> to vector<32x128xf32>
    %cst_33 = arith.constant dense<0.000000e+00> : vector<32x128xf32>
    %94 = tpu.matmul %7, %93, %cst_33 {dimension_numbers = #tpu.dot_dimension_numbers<[1], [0], [0], [1], [0, 0, 1, 1], [], []>} : vector<32x32xf32>, vector<32x128xf32>, vector<32x128xf32> -> vector<32x128xf32>
    %95 = vector.extract_strided_slice %92 {offsets = [0, 128], sizes = [32, 128], strides = [1, 1]} : vector<32x384xf32> to vector<32x128xf32>
    %96 = arith.addf %94, %95 : vector<32x128xf32>
    %97 = vector.extract_strided_slice %92 {offsets = [0, 256], sizes = [32, 128], strides = [1, 1]} : vector<32x384xf32> to vector<32x128xf32>
    %cst_34 = arith.constant dense<0.000000e+00> : vector<32x128xf32>
    %98 = tpu.matmul %13, %97, %cst_34 {dimension_numbers = #tpu.dot_dimension_numbers<[1], [0], [0], [1], [0, 0, 1, 1], [], []>} : vector<32x32xf32>, vector<32x128xf32>, vector<32x128xf32> -> vector<32x128xf32>
    %99 = arith.addf %96, %98 : vector<32x128xf32>
    %c0_35 = arith.constant 0 : index
    %c0_36 = arith.constant 0 : index
    %100 = vector.load %arg2[%c0_35, %c0_36] : memref<1032x128xf32, #tpu.memory_space<vmem>>, vector<1x128xf32>
    %101 = vector.broadcast %100 : vector<1x128xf32> to vector<32x128xf32>
    %102 = arith.addf %99, %101 : vector<32x128xf32>
    %cst_37 = arith.constant 0.000000e+00 : f32
    %103 = vector.broadcast %cst_37 : f32 to vector<32x128xf32>
    %104 = arith.maximumf %102, %103 : vector<32x128xf32>
    %c16 = arith.constant 16 : index
    %c0_38 = arith.constant 0 : index
    %105 = vector.load %arg3[%c16, %c0_38] : memref<272x384xf32, #tpu.memory_space<vmem>>, vector<128x384xf32>
    %cst_39 = arith.constant dense<0.000000e+00> : vector<32x384xf32>
    %106 = tpu.matmul %104, %105, %cst_39 {dimension_numbers = #tpu.dot_dimension_numbers<[1], [0], [0], [1], [0, 0, 1, 1], [], []>} : vector<32x128xf32>, vector<128x384xf32>, vector<32x384xf32> -> vector<32x384xf32>
    %107 = vector.extract_strided_slice %106 {offsets = [0, 0], sizes = [32, 128], strides = [1, 1]} : vector<32x384xf32> to vector<32x128xf32>
    %cst_40 = arith.constant dense<0.000000e+00> : vector<32x128xf32>
    %108 = tpu.matmul %7, %107, %cst_40 {dimension_numbers = #tpu.dot_dimension_numbers<[1], [0], [0], [1], [0, 0, 1, 1], [], []>} : vector<32x32xf32>, vector<32x128xf32>, vector<32x128xf32> -> vector<32x128xf32>
    %109 = vector.extract_strided_slice %106 {offsets = [0, 128], sizes = [32, 128], strides = [1, 1]} : vector<32x384xf32> to vector<32x128xf32>
    %110 = arith.addf %108, %109 : vector<32x128xf32>
    %111 = vector.extract_strided_slice %106 {offsets = [0, 256], sizes = [32, 128], strides = [1, 1]} : vector<32x384xf32> to vector<32x128xf32>
    %cst_41 = arith.constant dense<0.000000e+00> : vector<32x128xf32>
    %112 = tpu.matmul %13, %111, %cst_41 {dimension_numbers = #tpu.dot_dimension_numbers<[1], [0], [0], [1], [0, 0, 1, 1], [], []>} : vector<32x32xf32>, vector<32x128xf32>, vector<32x128xf32> -> vector<32x128xf32>
    %113 = arith.addf %110, %112 : vector<32x128xf32>
    %c8 = arith.constant 8 : index
    %c0_42 = arith.constant 0 : index
    %114 = vector.load %arg2[%c8, %c0_42] : memref<1032x128xf32, #tpu.memory_space<vmem>>, vector<1x128xf32>
    %115 = vector.broadcast %114 : vector<1x128xf32> to vector<32x128xf32>
    %116 = arith.addf %113, %115 : vector<32x128xf32>
    %c16_43 = arith.constant 16 : index
    %c0_44 = arith.constant 0 : index
    %117 = vector.load %arg2[%c16_43, %c0_44] : memref<1032x128xf32, #tpu.memory_space<vmem>>, vector<16x128xf32>
    %cst_45 = arith.constant dense<0.000000e+00> : vector<32x128xf32>
    %118 = tpu.matmul %90, %117, %cst_45 {dimension_numbers = #tpu.dot_dimension_numbers<[1], [0], [0], [1], [0, 0, 1, 1], [], []>} : vector<32x16xf32>, vector<16x128xf32>, vector<32x128xf32> -> vector<32x128xf32>
    %119 = arith.addf %116, %118 : vector<32x128xf32>
    %cst_46 = arith.constant 0.000000e+00 : f32
    %120 = vector.broadcast %cst_46 : f32 to vector<32x128xf32>
    %121 = arith.maximumf %119, %120 : vector<32x128xf32>
    %c32 = arith.constant 32 : index
    %c0_47 = arith.constant 0 : index
    %122 = vector.load %arg2[%c32, %c0_47] : memref<1032x128xf32, #tpu.memory_space<vmem>>, vector<128x64xf32>
    %cst_48 = arith.constant dense<0.000000e+00> : vector<32x64xf32>
    %123 = tpu.matmul %121, %122, %cst_48 {dimension_numbers = #tpu.dot_dimension_numbers<[1], [0], [0], [1], [0, 0, 1, 1], [], []>} : vector<32x128xf32>, vector<128x64xf32>, vector<32x64xf32> -> vector<32x64xf32>
    %c160 = arith.constant 160 : index
    %c0_49 = arith.constant 0 : index
    %124 = vector.load %arg2[%c160, %c0_49] : memref<1032x128xf32, #tpu.memory_space<vmem>>, vector<128x64xf32>
    %cst_50 = arith.constant dense<0.000000e+00> : vector<32x64xf32>
    %125 = tpu.matmul %121, %124, %cst_50 {dimension_numbers = #tpu.dot_dimension_numbers<[1], [0], [0], [1], [0, 0, 1, 1], [], []>} : vector<32x128xf32>, vector<128x64xf32>, vector<32x64xf32> -> vector<32x64xf32>
    %126 = arith.maximumf %123, %125 : vector<32x64xf32>
    %c144 = arith.constant 144 : index
    %c0_51 = arith.constant 0 : index
    %127 = vector.load %arg3[%c144, %c0_51] : memref<272x384xf32, #tpu.memory_space<vmem>>, vector<64x192xf32>
    %cst_52 = arith.constant dense<0.000000e+00> : vector<32x192xf32>
    %128 = tpu.matmul %126, %127, %cst_52 {dimension_numbers = #tpu.dot_dimension_numbers<[1], [0], [0], [1], [0, 0, 1, 1], [], []>} : vector<32x64xf32>, vector<64x192xf32>, vector<32x192xf32> -> vector<32x192xf32>
    %129 = vector.extract_strided_slice %128 {offsets = [0, 0], sizes = [32, 64], strides = [1, 1]} : vector<32x192xf32> to vector<32x64xf32>
    %cst_53 = arith.constant dense<0.000000e+00> : vector<32x64xf32>
    %130 = tpu.matmul %7, %129, %cst_53 {dimension_numbers = #tpu.dot_dimension_numbers<[1], [0], [0], [1], [0, 0, 1, 1], [], []>} : vector<32x32xf32>, vector<32x64xf32>, vector<32x64xf32> -> vector<32x64xf32>
    %131 = vector.extract_strided_slice %128 {offsets = [0, 64], sizes = [32, 64], strides = [1, 1]} : vector<32x192xf32> to vector<32x64xf32>
    %132 = arith.addf %130, %131 : vector<32x64xf32>
    %133 = vector.extract_strided_slice %128 {offsets = [0, 128], sizes = [32, 64], strides = [1, 1]} : vector<32x192xf32> to vector<32x64xf32>
    %cst_54 = arith.constant dense<0.000000e+00> : vector<32x64xf32>
    %134 = tpu.matmul %13, %133, %cst_54 {dimension_numbers = #tpu.dot_dimension_numbers<[1], [0], [0], [1], [0, 0, 1, 1], [], []>} : vector<32x32xf32>, vector<32x64xf32>, vector<32x64xf32> -> vector<32x64xf32>
    %135 = arith.addf %132, %134 : vector<32x64xf32>
    %c288 = arith.constant 288 : index
    %c0_55 = arith.constant 0 : index
    %136 = vector.load %arg2[%c288, %c0_55] : memref<1032x128xf32, #tpu.memory_space<vmem>>, vector<1x64xf32>
    %137 = vector.broadcast %136 : vector<1x64xf32> to vector<32x64xf32>
    %138 = arith.addf %135, %137 : vector<32x64xf32>
    %cst_56 = arith.constant 0.000000e+00 : f32
    %139 = vector.broadcast %cst_56 : f32 to vector<32x64xf32>
    %140 = arith.maximumf %138, %139 : vector<32x64xf32>
    %c208 = arith.constant 208 : index
    %c0_57 = arith.constant 0 : index
    %141 = vector.load %arg3[%c208, %c0_57] : memref<272x384xf32, #tpu.memory_space<vmem>>, vector<64x192xf32>
    %cst_58 = arith.constant dense<0.000000e+00> : vector<32x192xf32>
    %142 = tpu.matmul %140, %141, %cst_58 {dimension_numbers = #tpu.dot_dimension_numbers<[1], [0], [0], [1], [0, 0, 1, 1], [], []>} : vector<32x64xf32>, vector<64x192xf32>, vector<32x192xf32> -> vector<32x192xf32>
    %143 = vector.extract_strided_slice %142 {offsets = [0, 0], sizes = [32, 64], strides = [1, 1]} : vector<32x192xf32> to vector<32x64xf32>
    %cst_59 = arith.constant dense<0.000000e+00> : vector<32x64xf32>
    %144 = tpu.matmul %7, %143, %cst_59 {dimension_numbers = #tpu.dot_dimension_numbers<[1], [0], [0], [1], [0, 0, 1, 1], [], []>} : vector<32x32xf32>, vector<32x64xf32>, vector<32x64xf32> -> vector<32x64xf32>
    %145 = vector.extract_strided_slice %142 {offsets = [0, 64], sizes = [32, 64], strides = [1, 1]} : vector<32x192xf32> to vector<32x64xf32>
    %146 = arith.addf %144, %145 : vector<32x64xf32>
    %147 = vector.extract_strided_slice %142 {offsets = [0, 128], sizes = [32, 64], strides = [1, 1]} : vector<32x192xf32> to vector<32x64xf32>
    %cst_60 = arith.constant dense<0.000000e+00> : vector<32x64xf32>
    %148 = tpu.matmul %13, %147, %cst_60 {dimension_numbers = #tpu.dot_dimension_numbers<[1], [0], [0], [1], [0, 0, 1, 1], [], []>} : vector<32x32xf32>, vector<32x64xf32>, vector<32x64xf32> -> vector<32x64xf32>
    %149 = arith.addf %146, %148 : vector<32x64xf32>
    %c296 = arith.constant 296 : index
    %c0_61 = arith.constant 0 : index
    %150 = vector.load %arg2[%c296, %c0_61] : memref<1032x128xf32, #tpu.memory_space<vmem>>, vector<1x64xf32>
    %151 = vector.broadcast %150 : vector<1x64xf32> to vector<32x64xf32>
    %152 = arith.addf %149, %151 : vector<32x64xf32>
    %153 = arith.addf %152, %126 : vector<32x64xf32>
    %cst_62 = arith.constant 0.000000e+00 : f32
    %154 = vector.broadcast %cst_62 : f32 to vector<32x64xf32>
    %155 = arith.maximumf %153, %154 : vector<32x64xf32>
    %c304 = arith.constant 304 : index
    %c0_63 = arith.constant 0 : index
    %156 = vector.load %arg2[%c304, %c0_63] : memref<1032x128xf32, #tpu.memory_space<vmem>>, vector<64x32xf32>
    %cst_64 = arith.constant dense<0.000000e+00> : vector<32x32xf32>
    %157 = tpu.matmul %155, %156, %cst_64 {dimension_numbers = #tpu.dot_dimension_numbers<[1], [0], [0], [1], [0, 0, 1, 1], [], []>} : vector<32x64xf32>, vector<64x32xf32>, vector<32x32xf32> -> vector<32x32xf32>
    %c368 = arith.constant 368 : index
    %c0_65 = arith.constant 0 : index
    %158 = vector.load %arg2[%c368, %c0_65] : memref<1032x128xf32, #tpu.memory_space<vmem>>, vector<64x32xf32>
    %cst_66 = arith.constant dense<0.000000e+00> : vector<32x32xf32>
    %159 = tpu.matmul %155, %158, %cst_66 {dimension_numbers = #tpu.dot_dimension_numbers<[1], [0], [0], [1], [0, 0, 1, 1], [], []>} : vector<32x64xf32>, vector<64x32xf32>, vector<32x32xf32> -> vector<32x32xf32>
    %160 = arith.maximumf %157, %159 : vector<32x32xf32>
    %c432 = arith.constant 432 : index
    %c0_67 = arith.constant 0 : index
    %161 = vector.load %arg2[%c432, %c0_67] : memref<1032x128xf32, #tpu.memory_space<vmem>>, vector<32x128xf32>
    %cst_68 = arith.constant dense<0.000000e+00> : vector<32x128xf32>
    %162 = tpu.matmul %160, %161, %cst_68 {dimension_numbers = #tpu.dot_dimension_numbers<[1], [0], [0], [1], [0, 0, 1, 1], [], []>} : vector<32x32xf32>, vector<32x128xf32>, vector<32x128xf32> -> vector<32x128xf32>
    %163 = vector.extract_strided_slice %162 {offsets = [0, 0], sizes = [32, 64], strides = [1, 1]} : vector<32x128xf32> to vector<32x64xf32>
    %164 = vector.extract_strided_slice %162 {offsets = [0, 64], sizes = [32, 64], strides = [1, 1]} : vector<32x128xf32> to vector<32x64xf32>
    %c464 = arith.constant 464 : index
    %c0_69 = arith.constant 0 : index
    %165 = vector.load %arg2[%c464, %c0_69] : memref<1032x128xf32, #tpu.memory_space<vmem>>, vector<4x64xf32>
    %cst_70 = arith.constant dense<0.000000e+00> : vector<96x64xf32>
    %166 = tpu.matmul %28, %163, %cst_70 {dimension_numbers = #tpu.dot_dimension_numbers<[1], [0], [0], [1], [0, 0, 1, 1], [], []>} : vector<96x32xf32>, vector<32x64xf32>, vector<96x64xf32> -> vector<96x64xf32>
    %167 = vector.extract_strided_slice %165 {offsets = [3, 0], sizes = [1, 64], strides = [1, 1]} : vector<4x64xf32> to vector<1x64xf32>
    %168 = vector.broadcast %167 : vector<1x64xf32> to vector<32x64xf32>
    %169 = arith.mulf %163, %168 : vector<32x64xf32>
    %170 = vector.extract_strided_slice %166 {offsets = [0, 0], sizes = [32, 64], strides = [1, 1]} : vector<96x64xf32> to vector<32x64xf32>
    %171 = vector.extract_strided_slice %165 {offsets = [2, 0], sizes = [1, 64], strides = [1, 1]} : vector<4x64xf32> to vector<1x64xf32>
    %172 = vector.broadcast %171 : vector<1x64xf32> to vector<32x64xf32>
    %173 = arith.mulf %170, %172 : vector<32x64xf32>
    %174 = arith.addf %169, %173 : vector<32x64xf32>
    %175 = vector.extract_strided_slice %166 {offsets = [32, 0], sizes = [32, 64], strides = [1, 1]} : vector<96x64xf32> to vector<32x64xf32>
    %176 = vector.extract_strided_slice %165 {offsets = [1, 0], sizes = [1, 64], strides = [1, 1]} : vector<4x64xf32> to vector<1x64xf32>
    %177 = vector.broadcast %176 : vector<1x64xf32> to vector<32x64xf32>
    %178 = arith.mulf %175, %177 : vector<32x64xf32>
    %179 = arith.addf %174, %178 : vector<32x64xf32>
    %180 = vector.extract_strided_slice %166 {offsets = [64, 0], sizes = [32, 64], strides = [1, 1]} : vector<96x64xf32> to vector<32x64xf32>
    %181 = vector.extract_strided_slice %165 {offsets = [0, 0], sizes = [1, 64], strides = [1, 1]} : vector<4x64xf32> to vector<1x64xf32>
    %182 = vector.broadcast %181 : vector<1x64xf32> to vector<32x64xf32>
    %183 = arith.mulf %180, %182 : vector<32x64xf32>
    %184 = arith.addf %179, %183 : vector<32x64xf32>
    %c472 = arith.constant 472 : index
    %c0_71 = arith.constant 0 : index
    %185 = vector.load %arg2[%c472, %c0_71] : memref<1032x128xf32, #tpu.memory_space<vmem>>, vector<1x64xf32>
    %186 = vector.broadcast %185 : vector<1x64xf32> to vector<32x64xf32>
    %187 = arith.addf %184, %186 : vector<32x64xf32>
    %188 = arith.negf %187 : vector<32x64xf32>
    %189 = math.exp %188 : vector<32x64xf32>
    %cst_72 = arith.constant 1.000000e+00 : f32
    %190 = vector.broadcast %cst_72 : f32 to vector<32x64xf32>
    %191 = arith.addf %190, %189 : vector<32x64xf32>
    %192 = arith.divf %190, %191 : vector<32x64xf32>
    %193 = arith.mulf %187, %192 : vector<32x64xf32>
    %c480 = arith.constant 480 : index
    %c0_73 = arith.constant 0 : index
    %194 = vector.load %arg2[%c480, %c0_73] : memref<1032x128xf32, #tpu.memory_space<vmem>>, vector<64x64xf32>
    %cst_74 = arith.constant dense<0.000000e+00> : vector<32x64xf32>
    %195 = tpu.matmul %193, %194, %cst_74 {dimension_numbers = #tpu.dot_dimension_numbers<[1], [0], [0], [1], [0, 0, 1, 1], [], []>} : vector<32x64xf32>, vector<64x64xf32>, vector<32x64xf32> -> vector<32x64xf32>
    %c544 = arith.constant 544 : index
    %c0_75 = arith.constant 0 : index
    %196 = vector.load %arg2[%c544, %c0_75] : memref<1032x128xf32, #tpu.memory_space<vmem>>, vector<1x64xf32>
    %197 = vector.broadcast %196 : vector<1x64xf32> to vector<32x64xf32>
    %198 = arith.addf %195, %197 : vector<32x64xf32>
    %cst_76 = arith.constant 2.000000e+01 : f32
    %199 = vector.broadcast %cst_76 : f32 to vector<32x64xf32>
    %200 = arith.cmpf ogt, %198, %199 : vector<32x64xf32>
    %cst_77 = arith.constant 2.000000e+01 : f32
    %201 = vector.broadcast %cst_77 : f32 to vector<32x64xf32>
    %202 = arith.minimumf %198, %201 : vector<32x64xf32>
    %203 = math.exp %202 : vector<32x64xf32>
    %204 = math.log1p %203 : vector<32x64xf32>
    %205 = arith.select %200, %198, %204 : vector<32x64xi1>, vector<32x64xf32>
    %c552 = arith.constant 552 : index
    %c0_78 = arith.constant 0 : index
    %206 = vector.load %arg2[%c552, %c0_78] : memref<1032x128xf32, #tpu.memory_space<vmem>>, vector<64x16xf32>
    %cst_79 = arith.constant dense<0.000000e+00> : vector<32x16xf32>
    %207 = tpu.matmul %193, %206, %cst_79 {dimension_numbers = #tpu.dot_dimension_numbers<[1], [0], [0], [1], [0, 0, 1, 1], [], []>} : vector<32x64xf32>, vector<64x16xf32>, vector<32x16xf32> -> vector<32x16xf32>
    %c616 = arith.constant 616 : index
    %c0_80 = arith.constant 0 : index
    %208 = vector.load %arg2[%c616, %c0_80] : memref<1032x128xf32, #tpu.memory_space<vmem>>, vector<16x64xf32>
    %cst_81 = arith.constant dense<0.000000e+00> : vector<256x64xf32>
    %209 = tpu.matmul %52, %208, %cst_81 {dimension_numbers = #tpu.dot_dimension_numbers<[1], [0], [0], [1], [0, 0, 1, 1], [], []>} : vector<256x16xf32>, vector<16x64xf32>, vector<256x64xf32> -> vector<256x64xf32>
    %cst_82 = arith.constant dense<0.000000e+00> : vector<256x64xf32>
    %210 = tpu.matmul %36, %205, %cst_82 {dimension_numbers = #tpu.dot_dimension_numbers<[1], [0], [0], [1], [0, 0, 1, 1], [], []>} : vector<256x32xf32>, vector<32x64xf32>, vector<256x64xf32> -> vector<256x64xf32>
    %211 = arith.mulf %210, %209 : vector<256x64xf32>
    %212 = math.exp %211 : vector<256x64xf32>
    %213 = tpu.transpose %207, [1, 0] : vector<32x16xf32> -> vector<16x32xf32>
    %cst_83 = arith.constant dense<0.000000e+00> : vector<256x32xf32>
    %214 = tpu.matmul %52, %213, %cst_83 {dimension_numbers = #tpu.dot_dimension_numbers<[1], [0], [0], [1], [0, 0, 1, 1], [], []>} : vector<256x16xf32>, vector<16x32xf32>, vector<256x32xf32> -> vector<256x32xf32>
    %215 = arith.mulf %36, %214 : vector<256x32xf32>
    %216 = arith.mulf %205, %193 : vector<32x64xf32>
    %cst_84 = arith.constant dense<0.000000e+00> : vector<256x64xf32>
    %217 = tpu.matmul %215, %216, %cst_84 {dimension_numbers = #tpu.dot_dimension_numbers<[1], [0], [0], [1], [0, 0, 1, 1], [], []>} : vector<256x32xf32>, vector<32x64xf32>, vector<256x64xf32> -> vector<256x64xf32>
    %cst_85 = arith.constant 0.000000e+00 : f32
    %218 = vector.broadcast %cst_85 : f32 to vector<16x64xf32>
    %219 = vector.extract_strided_slice %212 {offsets = [0, 0], sizes = [16, 64], strides = [1, 1]} : vector<256x64xf32> to vector<16x64xf32>
    %220 = arith.mulf %219, %218 : vector<16x64xf32>
    %221 = vector.extract_strided_slice %217 {offsets = [0, 0], sizes = [16, 64], strides = [1, 1]} : vector<256x64xf32> to vector<16x64xf32>
    %222 = arith.addf %220, %221 : vector<16x64xf32>
    %c0_86 = arith.constant 0 : index
    %c0_87 = arith.constant 0 : index
    %223 = vector.load %arg5[%c0_86, %c0_87] : memref<256x64xf32, #tpu.memory_space<vmem>>, vector<16x64xf32>
    tpu.vector_store %arg5[%c0_86, %c0_87], %222 {strides = array<i32>} : memref<256x64xf32, #tpu.memory_space<vmem>>, vector<16x64xf32>,
    %224 = vector.extract_strided_slice %212 {offsets = [16, 0], sizes = [16, 64], strides = [1, 1]} : vector<256x64xf32> to vector<16x64xf32>
    %225 = arith.mulf %224, %222 : vector<16x64xf32>
    %226 = vector.extract_strided_slice %217 {offsets = [16, 0], sizes = [16, 64], strides = [1, 1]} : vector<256x64xf32> to vector<16x64xf32>
    %227 = arith.addf %225, %226 : vector<16x64xf32>
    %c16_88 = arith.constant 16 : index
    %c0_89 = arith.constant 0 : index
    %228 = vector.load %arg5[%c16_88, %c0_89] : memref<256x64xf32, #tpu.memory_space<vmem>>, vector<16x64xf32>
    tpu.vector_store %arg5[%c16_88, %c0_89], %227 {strides = array<i32>} : memref<256x64xf32, #tpu.memory_space<vmem>>, vector<16x64xf32>,
    %229 = vector.extract_strided_slice %212 {offsets = [32, 0], sizes = [16, 64], strides = [1, 1]} : vector<256x64xf32> to vector<16x64xf32>
    %230 = arith.mulf %229, %227 : vector<16x64xf32>
    %231 = vector.extract_strided_slice %217 {offsets = [32, 0], sizes = [16, 64], strides = [1, 1]} : vector<256x64xf32> to vector<16x64xf32>
    %232 = arith.addf %230, %231 : vector<16x64xf32>
    %c32_90 = arith.constant 32 : index
    %c0_91 = arith.constant 0 : index
    %233 = vector.load %arg5[%c32_90, %c0_91] : memref<256x64xf32, #tpu.memory_space<vmem>>, vector<16x64xf32>
    tpu.vector_store %arg5[%c32_90, %c0_91], %232 {strides = array<i32>} : memref<256x64xf32, #tpu.memory_space<vmem>>, vector<16x64xf32>,
    %234 = vector.extract_strided_slice %212 {offsets = [48, 0], sizes = [16, 64], strides = [1, 1]} : vector<256x64xf32> to vector<16x64xf32>
    %235 = arith.mulf %234, %232 : vector<16x64xf32>
    %236 = vector.extract_strided_slice %217 {offsets = [48, 0], sizes = [16, 64], strides = [1, 1]} : vector<256x64xf32> to vector<16x64xf32>
    %237 = arith.addf %235, %236 : vector<16x64xf32>
    %c48 = arith.constant 48 : index
    %c0_92 = arith.constant 0 : index
    %238 = vector.load %arg5[%c48, %c0_92] : memref<256x64xf32, #tpu.memory_space<vmem>>, vector<16x64xf32>
    tpu.vector_store %arg5[%c48, %c0_92], %237 {strides = array<i32>} : memref<256x64xf32, #tpu.memory_space<vmem>>, vector<16x64xf32>,
    %239 = vector.extract_strided_slice %212 {offsets = [64, 0], sizes = [16, 64], strides = [1, 1]} : vector<256x64xf32> to vector<16x64xf32>
    %240 = arith.mulf %239, %237 : vector<16x64xf32>
    %241 = vector.extract_strided_slice %217 {offsets = [64, 0], sizes = [16, 64], strides = [1, 1]} : vector<256x64xf32> to vector<16x64xf32>
    %242 = arith.addf %240, %241 : vector<16x64xf32>
    %c64 = arith.constant 64 : index
    %c0_93 = arith.constant 0 : index
    %243 = vector.load %arg5[%c64, %c0_93] : memref<256x64xf32, #tpu.memory_space<vmem>>, vector<16x64xf32>
    tpu.vector_store %arg5[%c64, %c0_93], %242 {strides = array<i32>} : memref<256x64xf32, #tpu.memory_space<vmem>>, vector<16x64xf32>,
    %244 = vector.extract_strided_slice %212 {offsets = [80, 0], sizes = [16, 64], strides = [1, 1]} : vector<256x64xf32> to vector<16x64xf32>
    %245 = arith.mulf %244, %242 : vector<16x64xf32>
    %246 = vector.extract_strided_slice %217 {offsets = [80, 0], sizes = [16, 64], strides = [1, 1]} : vector<256x64xf32> to vector<16x64xf32>
    %247 = arith.addf %245, %246 : vector<16x64xf32>
    %c80 = arith.constant 80 : index
    %c0_94 = arith.constant 0 : index
    %248 = vector.load %arg5[%c80, %c0_94] : memref<256x64xf32, #tpu.memory_space<vmem>>, vector<16x64xf32>
    tpu.vector_store %arg5[%c80, %c0_94], %247 {strides = array<i32>} : memref<256x64xf32, #tpu.memory_space<vmem>>, vector<16x64xf32>,
    %249 = vector.extract_strided_slice %212 {offsets = [96, 0], sizes = [16, 64], strides = [1, 1]} : vector<256x64xf32> to vector<16x64xf32>
    %250 = arith.mulf %249, %247 : vector<16x64xf32>
    %251 = vector.extract_strided_slice %217 {offsets = [96, 0], sizes = [16, 64], strides = [1, 1]} : vector<256x64xf32> to vector<16x64xf32>
    %252 = arith.addf %250, %251 : vector<16x64xf32>
    %c96 = arith.constant 96 : index
    %c0_95 = arith.constant 0 : index
    %253 = vector.load %arg5[%c96, %c0_95] : memref<256x64xf32, #tpu.memory_space<vmem>>, vector<16x64xf32>
    tpu.vector_store %arg5[%c96, %c0_95], %252 {strides = array<i32>} : memref<256x64xf32, #tpu.memory_space<vmem>>, vector<16x64xf32>,
    %254 = vector.extract_strided_slice %212 {offsets = [112, 0], sizes = [16, 64], strides = [1, 1]} : vector<256x64xf32> to vector<16x64xf32>
    %255 = arith.mulf %254, %252 : vector<16x64xf32>
    %256 = vector.extract_strided_slice %217 {offsets = [112, 0], sizes = [16, 64], strides = [1, 1]} : vector<256x64xf32> to vector<16x64xf32>
    %257 = arith.addf %255, %256 : vector<16x64xf32>
    %c112 = arith.constant 112 : index
    %c0_96 = arith.constant 0 : index
    %258 = vector.load %arg5[%c112, %c0_96] : memref<256x64xf32, #tpu.memory_space<vmem>>, vector<16x64xf32>
    tpu.vector_store %arg5[%c112, %c0_96], %257 {strides = array<i32>} : memref<256x64xf32, #tpu.memory_space<vmem>>, vector<16x64xf32>,
    %259 = vector.extract_strided_slice %212 {offsets = [128, 0], sizes = [16, 64], strides = [1, 1]} : vector<256x64xf32> to vector<16x64xf32>
    %260 = arith.mulf %259, %257 : vector<16x64xf32>
    %261 = vector.extract_strided_slice %217 {offsets = [128, 0], sizes = [16, 64], strides = [1, 1]} : vector<256x64xf32> to vector<16x64xf32>
    %262 = arith.addf %260, %261 : vector<16x64xf32>
    %c128 = arith.constant 128 : index
    %c0_97 = arith.constant 0 : index
    %263 = vector.load %arg5[%c128, %c0_97] : memref<256x64xf32, #tpu.memory_space<vmem>>, vector<16x64xf32>
    tpu.vector_store %arg5[%c128, %c0_97], %262 {strides = array<i32>} : memref<256x64xf32, #tpu.memory_space<vmem>>, vector<16x64xf32>,
    %264 = vector.extract_strided_slice %212 {offsets = [144, 0], sizes = [16, 64], strides = [1, 1]} : vector<256x64xf32> to vector<16x64xf32>
    %265 = arith.mulf %264, %262 : vector<16x64xf32>
    %266 = vector.extract_strided_slice %217 {offsets = [144, 0], sizes = [16, 64], strides = [1, 1]} : vector<256x64xf32> to vector<16x64xf32>
    %267 = arith.addf %265, %266 : vector<16x64xf32>
    %c144_98 = arith.constant 144 : index
    %c0_99 = arith.constant 0 : index
    %268 = vector.load %arg5[%c144_98, %c0_99] : memref<256x64xf32, #tpu.memory_space<vmem>>, vector<16x64xf32>
    tpu.vector_store %arg5[%c144_98, %c0_99], %267 {strides = array<i32>} : memref<256x64xf32, #tpu.memory_space<vmem>>, vector<16x64xf32>,
    %269 = vector.extract_strided_slice %212 {offsets = [160, 0], sizes = [16, 64], strides = [1, 1]} : vector<256x64xf32> to vector<16x64xf32>
    %270 = arith.mulf %269, %267 : vector<16x64xf32>
    %271 = vector.extract_strided_slice %217 {offsets = [160, 0], sizes = [16, 64], strides = [1, 1]} : vector<256x64xf32> to vector<16x64xf32>
    %272 = arith.addf %270, %271 : vector<16x64xf32>
    %c160_100 = arith.constant 160 : index
    %c0_101 = arith.constant 0 : index
    %273 = vector.load %arg5[%c160_100, %c0_101] : memref<256x64xf32, #tpu.memory_space<vmem>>, vector<16x64xf32>
    tpu.vector_store %arg5[%c160_100, %c0_101], %272 {strides = array<i32>} : memref<256x64xf32, #tpu.memory_space<vmem>>, vector<16x64xf32>,
    %274 = vector.extract_strided_slice %212 {offsets = [176, 0], sizes = [16, 64], strides = [1, 1]} : vector<256x64xf32> to vector<16x64xf32>
    %275 = arith.mulf %274, %272 : vector<16x64xf32>
    %276 = vector.extract_strided_slice %217 {offsets = [176, 0], sizes = [16, 64], strides = [1, 1]} : vector<256x64xf32> to vector<16x64xf32>
    %277 = arith.addf %275, %276 : vector<16x64xf32>
    %c176 = arith.constant 176 : index
    %c0_102 = arith.constant 0 : index
    %278 = vector.load %arg5[%c176, %c0_102] : memref<256x64xf32, #tpu.memory_space<vmem>>, vector<16x64xf32>
    tpu.vector_store %arg5[%c176, %c0_102], %277 {strides = array<i32>} : memref<256x64xf32, #tpu.memory_space<vmem>>, vector<16x64xf32>,
    %279 = vector.extract_strided_slice %212 {offsets = [192, 0], sizes = [16, 64], strides = [1, 1]} : vector<256x64xf32> to vector<16x64xf32>
    %280 = arith.mulf %279, %277 : vector<16x64xf32>
    %281 = vector.extract_strided_slice %217 {offsets = [192, 0], sizes = [16, 64], strides = [1, 1]} : vector<256x64xf32> to vector<16x64xf32>
    %282 = arith.addf %280, %281 : vector<16x64xf32>
    %c192 = arith.constant 192 : index
    %c0_103 = arith.constant 0 : index
    %283 = vector.load %arg5[%c192, %c0_103] : memref<256x64xf32, #tpu.memory_space<vmem>>, vector<16x64xf32>
    tpu.vector_store %arg5[%c192, %c0_103], %282 {strides = array<i32>} : memref<256x64xf32, #tpu.memory_space<vmem>>, vector<16x64xf32>,
    %284 = vector.extract_strided_slice %212 {offsets = [208, 0], sizes = [16, 64], strides = [1, 1]} : vector<256x64xf32> to vector<16x64xf32>
    %285 = arith.mulf %284, %282 : vector<16x64xf32>
    %286 = vector.extract_strided_slice %217 {offsets = [208, 0], sizes = [16, 64], strides = [1, 1]} : vector<256x64xf32> to vector<16x64xf32>
    %287 = arith.addf %285, %286 : vector<16x64xf32>
    %c208_104 = arith.constant 208 : index
    %c0_105 = arith.constant 0 : index
    %288 = vector.load %arg5[%c208_104, %c0_105] : memref<256x64xf32, #tpu.memory_space<vmem>>, vector<16x64xf32>
    tpu.vector_store %arg5[%c208_104, %c0_105], %287 {strides = array<i32>} : memref<256x64xf32, #tpu.memory_space<vmem>>, vector<16x64xf32>,
    %289 = vector.extract_strided_slice %212 {offsets = [224, 0], sizes = [16, 64], strides = [1, 1]} : vector<256x64xf32> to vector<16x64xf32>
    %290 = arith.mulf %289, %287 : vector<16x64xf32>
    %291 = vector.extract_strided_slice %217 {offsets = [224, 0], sizes = [16, 64], strides = [1, 1]} : vector<256x64xf32> to vector<16x64xf32>
    %292 = arith.addf %290, %291 : vector<16x64xf32>
    %c224 = arith.constant 224 : index
    %c0_106 = arith.constant 0 : index
    %293 = vector.load %arg5[%c224, %c0_106] : memref<256x64xf32, #tpu.memory_space<vmem>>, vector<16x64xf32>
    tpu.vector_store %arg5[%c224, %c0_106], %292 {strides = array<i32>} : memref<256x64xf32, #tpu.memory_space<vmem>>, vector<16x64xf32>,
    %294 = vector.extract_strided_slice %212 {offsets = [240, 0], sizes = [16, 64], strides = [1, 1]} : vector<256x64xf32> to vector<16x64xf32>
    %295 = arith.mulf %294, %292 : vector<16x64xf32>
    %296 = vector.extract_strided_slice %217 {offsets = [240, 0], sizes = [16, 64], strides = [1, 1]} : vector<256x64xf32> to vector<16x64xf32>
    %297 = arith.addf %295, %296 : vector<16x64xf32>
    %c240 = arith.constant 240 : index
    %c0_107 = arith.constant 0 : index
    %298 = vector.load %arg5[%c240, %c0_107] : memref<256x64xf32, #tpu.memory_space<vmem>>, vector<16x64xf32>
    tpu.vector_store %arg5[%c240, %c0_107], %297 {strides = array<i32>} : memref<256x64xf32, #tpu.memory_space<vmem>>, vector<16x64xf32>,
    %cst_108 = arith.constant dense<0.000000e+00> : vector<32x256xf32>
    %299 = tpu.matmul %207, %62, %cst_108 {dimension_numbers = #tpu.dot_dimension_numbers<[1], [0], [0], [1], [0, 0, 1, 1], [], []>} : vector<32x16xf32>, vector<16x256xf32>, vector<32x256xf32> -> vector<32x256xf32>
    %300 = arith.mulf %44, %299 : vector<32x256xf32>
    %c0_109 = arith.constant 0 : index
    %c0_110 = arith.constant 0 : index
    %301 = vector.load %arg5[%c0_109, %c0_110] : memref<256x64xf32, #tpu.memory_space<vmem>>, vector<256x64xf32>
    %cst_111 = arith.constant dense<0.000000e+00> : vector<32x64xf32>
    %302 = tpu.matmul %300, %301, %cst_111 {dimension_numbers = #tpu.dot_dimension_numbers<[1], [0], [0], [1], [0, 0, 1, 1], [], []>} : vector<32x256xf32>, vector<256x64xf32>, vector<32x64xf32> -> vector<32x64xf32>
    %c632 = arith.constant 632 : index
    %c0_112 = arith.constant 0 : index
    %303 = vector.load %arg2[%c632, %c0_112] : memref<1032x128xf32, #tpu.memory_space<vmem>>, vector<1x64xf32>
    %304 = vector.broadcast %303 : vector<1x64xf32> to vector<32x64xf32>
    %305 = arith.mulf %304, %193 : vector<32x64xf32>
    %306 = arith.addf %302, %305 : vector<32x64xf32>
    %307 = arith.negf %164 : vector<32x64xf32>
    %308 = math.exp %307 : vector<32x64xf32>
    %cst_113 = arith.constant 1.000000e+00 : f32
    %309 = vector.broadcast %cst_113 : f32 to vector<32x64xf32>
    %310 = arith.addf %309, %308 : vector<32x64xf32>
    %311 = arith.divf %309, %310 : vector<32x64xf32>
    %312 = arith.mulf %164, %311 : vector<32x64xf32>
    %313 = arith.mulf %306, %312 : vector<32x64xf32>
    %c640 = arith.constant 640 : index
    %c0_114 = arith.constant 0 : index
    %314 = vector.load %arg2[%c640, %c0_114] : memref<1032x128xf32, #tpu.memory_space<vmem>>, vector<64x32xf32>
    %cst_115 = arith.constant dense<0.000000e+00> : vector<32x32xf32>
    %315 = tpu.matmul %313, %314, %cst_115 {dimension_numbers = #tpu.dot_dimension_numbers<[1], [0], [0], [1], [0, 0, 1, 1], [], []>} : vector<32x64xf32>, vector<64x32xf32>, vector<32x32xf32> -> vector<32x32xf32>
    %316 = arith.addf %315, %160 : vector<32x32xf32>
    %317 = arith.mulf %316, %316 : vector<32x32xf32>
    %cst_116 = arith.constant dense<0.000000e+00> : vector<32xf32>
    %318 = vector.multi_reduction <add>, %317, %cst_116 [1] : vector<32x32xf32> to vector<32xf32>
    %319 = vector.shape_cast %318 : vector<32xf32> to vector<32x1xf32>
    %cst_117 = arith.constant 3.200000e+01 : f32
    %320 = vector.broadcast %cst_117 : f32 to vector<32x1xf32>
    %321 = arith.divf %319, %320 : vector<32x1xf32>
    %cst_118 = arith.constant 9.99999974E-6 : f32
    %322 = vector.broadcast %cst_118 : f32 to vector<32x1xf32>
    %323 = arith.addf %321, %322 : vector<32x1xf32>
    %324 = math.rsqrt %323 : vector<32x1xf32>
    %325 = vector.broadcast %324 : vector<32x1xf32> to vector<32x32xf32>
    %326 = arith.mulf %316, %325 : vector<32x32xf32>
    %c704 = arith.constant 704 : index
    %c0_119 = arith.constant 0 : index
    %327 = vector.load %arg2[%c704, %c0_119] : memref<1032x128xf32, #tpu.memory_space<vmem>>, vector<1x32xf32>
    %328 = vector.broadcast %327 : vector<1x32xf32> to vector<32x32xf32>
    %329 = arith.mulf %326, %328 : vector<32x32xf32>
    %c712 = arith.constant 712 : index
    %c0_120 = arith.constant 0 : index
    %330 = vector.load %arg2[%c712, %c0_120] : memref<1032x128xf32, #tpu.memory_space<vmem>>, vector<32x128xf32>
    %cst_121 = arith.constant dense<0.000000e+00> : vector<32x128xf32>
    %331 = tpu.matmul %329, %330, %cst_121 {dimension_numbers = #tpu.dot_dimension_numbers<[1], [0], [0], [1], [0, 0, 1, 1], [], []>} : vector<32x32xf32>, vector<32x128xf32>, vector<32x128xf32> -> vector<32x128xf32>
    %332 = vector.extract_strided_slice %331 {offsets = [0, 0], sizes = [32, 64], strides = [1, 1]} : vector<32x128xf32> to vector<32x64xf32>
    %333 = vector.extract_strided_slice %331 {offsets = [0, 64], sizes = [32, 64], strides = [1, 1]} : vector<32x128xf32> to vector<32x64xf32>
    %c744 = arith.constant 744 : index
    %c0_122 = arith.constant 0 : index
    %334 = vector.load %arg2[%c744, %c0_122] : memref<1032x128xf32, #tpu.memory_space<vmem>>, vector<4x64xf32>
    %cst_123 = arith.constant dense<0.000000e+00> : vector<96x64xf32>
    %335 = tpu.matmul %28, %332, %cst_123 {dimension_numbers = #tpu.dot_dimension_numbers<[1], [0], [0], [1], [0, 0, 1, 1], [], []>} : vector<96x32xf32>, vector<32x64xf32>, vector<96x64xf32> -> vector<96x64xf32>
    %336 = vector.extract_strided_slice %334 {offsets = [3, 0], sizes = [1, 64], strides = [1, 1]} : vector<4x64xf32> to vector<1x64xf32>
    %337 = vector.broadcast %336 : vector<1x64xf32> to vector<32x64xf32>
    %338 = arith.mulf %332, %337 : vector<32x64xf32>
    %339 = vector.extract_strided_slice %335 {offsets = [0, 0], sizes = [32, 64], strides = [1, 1]} : vector<96x64xf32> to vector<32x64xf32>
    %340 = vector.extract_strided_slice %334 {offsets = [2, 0], sizes = [1, 64], strides = [1, 1]} : vector<4x64xf32> to vector<1x64xf32>
    %341 = vector.broadcast %340 : vector<1x64xf32> to vector<32x64xf32>
    %342 = arith.mulf %339, %341 : vector<32x64xf32>
    %343 = arith.addf %338, %342 : vector<32x64xf32>
    %344 = vector.extract_strided_slice %335 {offsets = [32, 0], sizes = [32, 64], strides = [1, 1]} : vector<96x64xf32> to vector<32x64xf32>
    %345 = vector.extract_strided_slice %334 {offsets = [1, 0], sizes = [1, 64], strides = [1, 1]} : vector<4x64xf32> to vector<1x64xf32>
    %346 = vector.broadcast %345 : vector<1x64xf32> to vector<32x64xf32>
    %347 = arith.mulf %344, %346 : vector<32x64xf32>
    %348 = arith.addf %343, %347 : vector<32x64xf32>
    %349 = vector.extract_strided_slice %335 {offsets = [64, 0], sizes = [32, 64], strides = [1, 1]} : vector<96x64xf32> to vector<32x64xf32>
    %350 = vector.extract_strided_slice %334 {offsets = [0, 0], sizes = [1, 64], strides = [1, 1]} : vector<4x64xf32> to vector<1x64xf32>
    %351 = vector.broadcast %350 : vector<1x64xf32> to vector<32x64xf32>
    %352 = arith.mulf %349, %351 : vector<32x64xf32>
    %353 = arith.addf %348, %352 : vector<32x64xf32>
    %c752 = arith.constant 752 : index
    %c0_124 = arith.constant 0 : index
    %354 = vector.load %arg2[%c752, %c0_124] : memref<1032x128xf32, #tpu.memory_space<vmem>>, vector<1x64xf32>
    %355 = vector.broadcast %354 : vector<1x64xf32> to vector<32x64xf32>
    %356 = arith.addf %353, %355 : vector<32x64xf32>
    %357 = arith.negf %356 : vector<32x64xf32>
    %358 = math.exp %357 : vector<32x64xf32>
    %cst_125 = arith.constant 1.000000e+00 : f32
    %359 = vector.broadcast %cst_125 : f32 to vector<32x64xf32>
    %360 = arith.addf %359, %358 : vector<32x64xf32>
    %361 = arith.divf %359, %360 : vector<32x64xf32>
    %362 = arith.mulf %356, %361 : vector<32x64xf32>
    %c760 = arith.constant 760 : index
    %c0_126 = arith.constant 0 : index
    %363 = vector.load %arg2[%c760, %c0_126] : memref<1032x128xf32, #tpu.memory_space<vmem>>, vector<64x64xf32>
    %cst_127 = arith.constant dense<0.000000e+00> : vector<32x64xf32>
    %364 = tpu.matmul %362, %363, %cst_127 {dimension_numbers = #tpu.dot_dimension_numbers<[1], [0], [0], [1], [0, 0, 1, 1], [], []>} : vector<32x64xf32>, vector<64x64xf32>, vector<32x64xf32> -> vector<32x64xf32>
    %c824 = arith.constant 824 : index
    %c0_128 = arith.constant 0 : index
    %365 = vector.load %arg2[%c824, %c0_128] : memref<1032x128xf32, #tpu.memory_space<vmem>>, vector<1x64xf32>
    %366 = vector.broadcast %365 : vector<1x64xf32> to vector<32x64xf32>
    %367 = arith.addf %364, %366 : vector<32x64xf32>
    %cst_129 = arith.constant 2.000000e+01 : f32
    %368 = vector.broadcast %cst_129 : f32 to vector<32x64xf32>
    %369 = arith.cmpf ogt, %367, %368 : vector<32x64xf32>
    %cst_130 = arith.constant 2.000000e+01 : f32
    %370 = vector.broadcast %cst_130 : f32 to vector<32x64xf32>
    %371 = arith.minimumf %367, %370 : vector<32x64xf32>
    %372 = math.exp %371 : vector<32x64xf32>
    %373 = math.log1p %372 : vector<32x64xf32>
    %374 = arith.select %369, %367, %373 : vector<32x64xi1>, vector<32x64xf32>
    %c832 = arith.constant 832 : index
    %c0_131 = arith.constant 0 : index
    %375 = vector.load %arg2[%c832, %c0_131] : memref<1032x128xf32, #tpu.memory_space<vmem>>, vector<64x16xf32>
    %cst_132 = arith.constant dense<0.000000e+00> : vector<32x16xf32>
    %376 = tpu.matmul %362, %375, %cst_132 {dimension_numbers = #tpu.dot_dimension_numbers<[1], [0], [0], [1], [0, 0, 1, 1], [], []>} : vector<32x64xf32>, vector<64x16xf32>, vector<32x16xf32> -> vector<32x16xf32>
    %c896 = arith.constant 896 : index
    %c0_133 = arith.constant 0 : index
    %377 = vector.load %arg2[%c896, %c0_133] : memref<1032x128xf32, #tpu.memory_space<vmem>>, vector<16x64xf32>
    %cst_134 = arith.constant dense<0.000000e+00> : vector<256x64xf32>
    %378 = tpu.matmul %52, %377, %cst_134 {dimension_numbers = #tpu.dot_dimension_numbers<[1], [0], [0], [1], [0, 0, 1, 1], [], []>} : vector<256x16xf32>, vector<16x64xf32>, vector<256x64xf32> -> vector<256x64xf32>
    %cst_135 = arith.constant dense<0.000000e+00> : vector<256x64xf32>
    %379 = tpu.matmul %36, %374, %cst_135 {dimension_numbers = #tpu.dot_dimension_numbers<[1], [0], [0], [1], [0, 0, 1, 1], [], []>} : vector<256x32xf32>, vector<32x64xf32>, vector<256x64xf32> -> vector<256x64xf32>
    %380 = arith.mulf %379, %378 : vector<256x64xf32>
    %381 = math.exp %380 : vector<256x64xf32>
    %382 = tpu.transpose %376, [1, 0] : vector<32x16xf32> -> vector<16x32xf32>
    %cst_136 = arith.constant dense<0.000000e+00> : vector<256x32xf32>
    %383 = tpu.matmul %52, %382, %cst_136 {dimension_numbers = #tpu.dot_dimension_numbers<[1], [0], [0], [1], [0, 0, 1, 1], [], []>} : vector<256x16xf32>, vector<16x32xf32>, vector<256x32xf32> -> vector<256x32xf32>
    %384 = arith.mulf %36, %383 : vector<256x32xf32>
    %385 = arith.mulf %374, %362 : vector<32x64xf32>
    %cst_137 = arith.constant dense<0.000000e+00> : vector<256x64xf32>
    %386 = tpu.matmul %384, %385, %cst_137 {dimension_numbers = #tpu.dot_dimension_numbers<[1], [0], [0], [1], [0, 0, 1, 1], [], []>} : vector<256x32xf32>, vector<32x64xf32>, vector<256x64xf32> -> vector<256x64xf32>
    %cst_138 = arith.constant 0.000000e+00 : f32
    %387 = vector.broadcast %cst_138 : f32 to vector<16x64xf32>
    %388 = vector.extract_strided_slice %381 {offsets = [0, 0], sizes = [16, 64], strides = [1, 1]} : vector<256x64xf32> to vector<16x64xf32>
    %389 = arith.mulf %388, %387 : vector<16x64xf32>
    %390 = vector.extract_strided_slice %386 {offsets = [0, 0], sizes = [16, 64], strides = [1, 1]} : vector<256x64xf32> to vector<16x64xf32>
    %391 = arith.addf %389, %390 : vector<16x64xf32>
    %c0_139 = arith.constant 0 : index
    %c0_140 = arith.constant 0 : index
    %392 = vector.load %arg5[%c0_139, %c0_140] : memref<256x64xf32, #tpu.memory_space<vmem>>, vector<16x64xf32>
    tpu.vector_store %arg5[%c0_139, %c0_140], %391 {strides = array<i32>} : memref<256x64xf32, #tpu.memory_space<vmem>>, vector<16x64xf32>,
    %393 = vector.extract_strided_slice %381 {offsets = [16, 0], sizes = [16, 64], strides = [1, 1]} : vector<256x64xf32> to vector<16x64xf32>
    %394 = arith.mulf %393, %391 : vector<16x64xf32>
    %395 = vector.extract_strided_slice %386 {offsets = [16, 0], sizes = [16, 64], strides = [1, 1]} : vector<256x64xf32> to vector<16x64xf32>
    %396 = arith.addf %394, %395 : vector<16x64xf32>
    %c16_141 = arith.constant 16 : index
    %c0_142 = arith.constant 0 : index
    %397 = vector.load %arg5[%c16_141, %c0_142] : memref<256x64xf32, #tpu.memory_space<vmem>>, vector<16x64xf32>
    tpu.vector_store %arg5[%c16_141, %c0_142], %396 {strides = array<i32>} : memref<256x64xf32, #tpu.memory_space<vmem>>, vector<16x64xf32>,
    %398 = vector.extract_strided_slice %381 {offsets = [32, 0], sizes = [16, 64], strides = [1, 1]} : vector<256x64xf32> to vector<16x64xf32>
    %399 = arith.mulf %398, %396 : vector<16x64xf32>
    %400 = vector.extract_strided_slice %386 {offsets = [32, 0], sizes = [16, 64], strides = [1, 1]} : vector<256x64xf32> to vector<16x64xf32>
    %401 = arith.addf %399, %400 : vector<16x64xf32>
    %c32_143 = arith.constant 32 : index
    %c0_144 = arith.constant 0 : index
    %402 = vector.load %arg5[%c32_143, %c0_144] : memref<256x64xf32, #tpu.memory_space<vmem>>, vector<16x64xf32>
    tpu.vector_store %arg5[%c32_143, %c0_144], %401 {strides = array<i32>} : memref<256x64xf32, #tpu.memory_space<vmem>>, vector<16x64xf32>,
    %403 = vector.extract_strided_slice %381 {offsets = [48, 0], sizes = [16, 64], strides = [1, 1]} : vector<256x64xf32> to vector<16x64xf32>
    %404 = arith.mulf %403, %401 : vector<16x64xf32>
    %405 = vector.extract_strided_slice %386 {offsets = [48, 0], sizes = [16, 64], strides = [1, 1]} : vector<256x64xf32> to vector<16x64xf32>
    %406 = arith.addf %404, %405 : vector<16x64xf32>
    %c48_145 = arith.constant 48 : index
    %c0_146 = arith.constant 0 : index
    %407 = vector.load %arg5[%c48_145, %c0_146] : memref<256x64xf32, #tpu.memory_space<vmem>>, vector<16x64xf32>
    tpu.vector_store %arg5[%c48_145, %c0_146], %406 {strides = array<i32>} : memref<256x64xf32, #tpu.memory_space<vmem>>, vector<16x64xf32>,
    %408 = vector.extract_strided_slice %381 {offsets = [64, 0], sizes = [16, 64], strides = [1, 1]} : vector<256x64xf32> to vector<16x64xf32>
    %409 = arith.mulf %408, %406 : vector<16x64xf32>
    %410 = vector.extract_strided_slice %386 {offsets = [64, 0], sizes = [16, 64], strides = [1, 1]} : vector<256x64xf32> to vector<16x64xf32>
    %411 = arith.addf %409, %410 : vector<16x64xf32>
    %c64_147 = arith.constant 64 : index
    %c0_148 = arith.constant 0 : index
    %412 = vector.load %arg5[%c64_147, %c0_148] : memref<256x64xf32, #tpu.memory_space<vmem>>, vector<16x64xf32>
    tpu.vector_store %arg5[%c64_147, %c0_148], %411 {strides = array<i32>} : memref<256x64xf32, #tpu.memory_space<vmem>>, vector<16x64xf32>,
    %413 = vector.extract_strided_slice %381 {offsets = [80, 0], sizes = [16, 64], strides = [1, 1]} : vector<256x64xf32> to vector<16x64xf32>
    %414 = arith.mulf %413, %411 : vector<16x64xf32>
    %415 = vector.extract_strided_slice %386 {offsets = [80, 0], sizes = [16, 64], strides = [1, 1]} : vector<256x64xf32> to vector<16x64xf32>
    %416 = arith.addf %414, %415 : vector<16x64xf32>
    %c80_149 = arith.constant 80 : index
    %c0_150 = arith.constant 0 : index
    %417 = vector.load %arg5[%c80_149, %c0_150] : memref<256x64xf32, #tpu.memory_space<vmem>>, vector<16x64xf32>
    tpu.vector_store %arg5[%c80_149, %c0_150], %416 {strides = array<i32>} : memref<256x64xf32, #tpu.memory_space<vmem>>, vector<16x64xf32>,
    %418 = vector.extract_strided_slice %381 {offsets = [96, 0], sizes = [16, 64], strides = [1, 1]} : vector<256x64xf32> to vector<16x64xf32>
    %419 = arith.mulf %418, %416 : vector<16x64xf32>
    %420 = vector.extract_strided_slice %386 {offsets = [96, 0], sizes = [16, 64], strides = [1, 1]} : vector<256x64xf32> to vector<16x64xf32>
    %421 = arith.addf %419, %420 : vector<16x64xf32>
    %c96_151 = arith.constant 96 : index
    %c0_152 = arith.constant 0 : index
    %422 = vector.load %arg5[%c96_151, %c0_152] : memref<256x64xf32, #tpu.memory_space<vmem>>, vector<16x64xf32>
    tpu.vector_store %arg5[%c96_151, %c0_152], %421 {strides = array<i32>} : memref<256x64xf32, #tpu.memory_space<vmem>>, vector<16x64xf32>,
    %423 = vector.extract_strided_slice %381 {offsets = [112, 0], sizes = [16, 64], strides = [1, 1]} : vector<256x64xf32> to vector<16x64xf32>
    %424 = arith.mulf %423, %421 : vector<16x64xf32>
    %425 = vector.extract_strided_slice %386 {offsets = [112, 0], sizes = [16, 64], strides = [1, 1]} : vector<256x64xf32> to vector<16x64xf32>
    %426 = arith.addf %424, %425 : vector<16x64xf32>
    %c112_153 = arith.constant 112 : index
    %c0_154 = arith.constant 0 : index
    %427 = vector.load %arg5[%c112_153, %c0_154] : memref<256x64xf32, #tpu.memory_space<vmem>>, vector<16x64xf32>
    tpu.vector_store %arg5[%c112_153, %c0_154], %426 {strides = array<i32>} : memref<256x64xf32, #tpu.memory_space<vmem>>, vector<16x64xf32>,
    %428 = vector.extract_strided_slice %381 {offsets = [128, 0], sizes = [16, 64], strides = [1, 1]} : vector<256x64xf32> to vector<16x64xf32>
    %429 = arith.mulf %428, %426 : vector<16x64xf32>
    %430 = vector.extract_strided_slice %386 {offsets = [128, 0], sizes = [16, 64], strides = [1, 1]} : vector<256x64xf32> to vector<16x64xf32>
    %431 = arith.addf %429, %430 : vector<16x64xf32>
    %c128_155 = arith.constant 128 : index
    %c0_156 = arith.constant 0 : index
    %432 = vector.load %arg5[%c128_155, %c0_156] : memref<256x64xf32, #tpu.memory_space<vmem>>, vector<16x64xf32>
    tpu.vector_store %arg5[%c128_155, %c0_156], %431 {strides = array<i32>} : memref<256x64xf32, #tpu.memory_space<vmem>>, vector<16x64xf32>,
    %433 = vector.extract_strided_slice %381 {offsets = [144, 0], sizes = [16, 64], strides = [1, 1]} : vector<256x64xf32> to vector<16x64xf32>
    %434 = arith.mulf %433, %431 : vector<16x64xf32>
    %435 = vector.extract_strided_slice %386 {offsets = [144, 0], sizes = [16, 64], strides = [1, 1]} : vector<256x64xf32> to vector<16x64xf32>
    %436 = arith.addf %434, %435 : vector<16x64xf32>
    %c144_157 = arith.constant 144 : index
    %c0_158 = arith.constant 0 : index
    %437 = vector.load %arg5[%c144_157, %c0_158] : memref<256x64xf32, #tpu.memory_space<vmem>>, vector<16x64xf32>
    tpu.vector_store %arg5[%c144_157, %c0_158], %436 {strides = array<i32>} : memref<256x64xf32, #tpu.memory_space<vmem>>, vector<16x64xf32>,
    %438 = vector.extract_strided_slice %381 {offsets = [160, 0], sizes = [16, 64], strides = [1, 1]} : vector<256x64xf32> to vector<16x64xf32>
    %439 = arith.mulf %438, %436 : vector<16x64xf32>
    %440 = vector.extract_strided_slice %386 {offsets = [160, 0], sizes = [16, 64], strides = [1, 1]} : vector<256x64xf32> to vector<16x64xf32>
    %441 = arith.addf %439, %440 : vector<16x64xf32>
    %c160_159 = arith.constant 160 : index
    %c0_160 = arith.constant 0 : index
    %442 = vector.load %arg5[%c160_159, %c0_160] : memref<256x64xf32, #tpu.memory_space<vmem>>, vector<16x64xf32>
    tpu.vector_store %arg5[%c160_159, %c0_160], %441 {strides = array<i32>} : memref<256x64xf32, #tpu.memory_space<vmem>>, vector<16x64xf32>,
    %443 = vector.extract_strided_slice %381 {offsets = [176, 0], sizes = [16, 64], strides = [1, 1]} : vector<256x64xf32> to vector<16x64xf32>
    %444 = arith.mulf %443, %441 : vector<16x64xf32>
    %445 = vector.extract_strided_slice %386 {offsets = [176, 0], sizes = [16, 64], strides = [1, 1]} : vector<256x64xf32> to vector<16x64xf32>
    %446 = arith.addf %444, %445 : vector<16x64xf32>
    %c176_161 = arith.constant 176 : index
    %c0_162 = arith.constant 0 : index
    %447 = vector.load %arg5[%c176_161, %c0_162] : memref<256x64xf32, #tpu.memory_space<vmem>>, vector<16x64xf32>
    tpu.vector_store %arg5[%c176_161, %c0_162], %446 {strides = array<i32>} : memref<256x64xf32, #tpu.memory_space<vmem>>, vector<16x64xf32>,
    %448 = vector.extract_strided_slice %381 {offsets = [192, 0], sizes = [16, 64], strides = [1, 1]} : vector<256x64xf32> to vector<16x64xf32>
    %449 = arith.mulf %448, %446 : vector<16x64xf32>
    %450 = vector.extract_strided_slice %386 {offsets = [192, 0], sizes = [16, 64], strides = [1, 1]} : vector<256x64xf32> to vector<16x64xf32>
    %451 = arith.addf %449, %450 : vector<16x64xf32>
    %c192_163 = arith.constant 192 : index
    %c0_164 = arith.constant 0 : index
    %452 = vector.load %arg5[%c192_163, %c0_164] : memref<256x64xf32, #tpu.memory_space<vmem>>, vector<16x64xf32>
    tpu.vector_store %arg5[%c192_163, %c0_164], %451 {strides = array<i32>} : memref<256x64xf32, #tpu.memory_space<vmem>>, vector<16x64xf32>,
    %453 = vector.extract_strided_slice %381 {offsets = [208, 0], sizes = [16, 64], strides = [1, 1]} : vector<256x64xf32> to vector<16x64xf32>
    %454 = arith.mulf %453, %451 : vector<16x64xf32>
    %455 = vector.extract_strided_slice %386 {offsets = [208, 0], sizes = [16, 64], strides = [1, 1]} : vector<256x64xf32> to vector<16x64xf32>
    %456 = arith.addf %454, %455 : vector<16x64xf32>
    %c208_165 = arith.constant 208 : index
    %c0_166 = arith.constant 0 : index
    %457 = vector.load %arg5[%c208_165, %c0_166] : memref<256x64xf32, #tpu.memory_space<vmem>>, vector<16x64xf32>
    tpu.vector_store %arg5[%c208_165, %c0_166], %456 {strides = array<i32>} : memref<256x64xf32, #tpu.memory_space<vmem>>, vector<16x64xf32>,
    %458 = vector.extract_strided_slice %381 {offsets = [224, 0], sizes = [16, 64], strides = [1, 1]} : vector<256x64xf32> to vector<16x64xf32>
    %459 = arith.mulf %458, %456 : vector<16x64xf32>
    %460 = vector.extract_strided_slice %386 {offsets = [224, 0], sizes = [16, 64], strides = [1, 1]} : vector<256x64xf32> to vector<16x64xf32>
    %461 = arith.addf %459, %460 : vector<16x64xf32>
    %c224_167 = arith.constant 224 : index
    %c0_168 = arith.constant 0 : index
    %462 = vector.load %arg5[%c224_167, %c0_168] : memref<256x64xf32, #tpu.memory_space<vmem>>, vector<16x64xf32>
    tpu.vector_store %arg5[%c224_167, %c0_168], %461 {strides = array<i32>} : memref<256x64xf32, #tpu.memory_space<vmem>>, vector<16x64xf32>,
    %463 = vector.extract_strided_slice %381 {offsets = [240, 0], sizes = [16, 64], strides = [1, 1]} : vector<256x64xf32> to vector<16x64xf32>
    %464 = arith.mulf %463, %461 : vector<16x64xf32>
    %465 = vector.extract_strided_slice %386 {offsets = [240, 0], sizes = [16, 64], strides = [1, 1]} : vector<256x64xf32> to vector<16x64xf32>
    %466 = arith.addf %464, %465 : vector<16x64xf32>
    %c240_169 = arith.constant 240 : index
    %c0_170 = arith.constant 0 : index
    %467 = vector.load %arg5[%c240_169, %c0_170] : memref<256x64xf32, #tpu.memory_space<vmem>>, vector<16x64xf32>
    tpu.vector_store %arg5[%c240_169, %c0_170], %466 {strides = array<i32>} : memref<256x64xf32, #tpu.memory_space<vmem>>, vector<16x64xf32>,
    %cst_171 = arith.constant dense<0.000000e+00> : vector<32x256xf32>
    %468 = tpu.matmul %376, %62, %cst_171 {dimension_numbers = #tpu.dot_dimension_numbers<[1], [0], [0], [1], [0, 0, 1, 1], [], []>} : vector<32x16xf32>, vector<16x256xf32>, vector<32x256xf32> -> vector<32x256xf32>
    %469 = arith.mulf %44, %468 : vector<32x256xf32>
    %c0_172 = arith.constant 0 : index
    %c0_173 = arith.constant 0 : index
    %470 = vector.load %arg5[%c0_172, %c0_173] : memref<256x64xf32, #tpu.memory_space<vmem>>, vector<256x64xf32>
    %cst_174 = arith.constant dense<0.000000e+00> : vector<32x64xf32>
    %471 = tpu.matmul %469, %470, %cst_174 {dimension_numbers = #tpu.dot_dimension_numbers<[1], [0], [0], [1], [0, 0, 1, 1], [], []>} : vector<32x256xf32>, vector<256x64xf32>, vector<32x64xf32> -> vector<32x64xf32>
    %c912 = arith.constant 912 : index
    %c0_175 = arith.constant 0 : index
    %472 = vector.load %arg2[%c912, %c0_175] : memref<1032x128xf32, #tpu.memory_space<vmem>>, vector<1x64xf32>
    %473 = vector.broadcast %472 : vector<1x64xf32> to vector<32x64xf32>
    %474 = arith.mulf %473, %362 : vector<32x64xf32>
    %475 = arith.addf %471, %474 : vector<32x64xf32>
    %476 = arith.negf %333 : vector<32x64xf32>
    %477 = math.exp %476 : vector<32x64xf32>
    %cst_176 = arith.constant 1.000000e+00 : f32
    %478 = vector.broadcast %cst_176 : f32 to vector<32x64xf32>
    %479 = arith.addf %478, %477 : vector<32x64xf32>
    %480 = arith.divf %478, %479 : vector<32x64xf32>
    %481 = arith.mulf %333, %480 : vector<32x64xf32>
    %482 = arith.mulf %475, %481 : vector<32x64xf32>
    %c920 = arith.constant 920 : index
    %c0_177 = arith.constant 0 : index
    %483 = vector.load %arg2[%c920, %c0_177] : memref<1032x128xf32, #tpu.memory_space<vmem>>, vector<64x32xf32>
    %cst_178 = arith.constant dense<0.000000e+00> : vector<32x32xf32>
    %484 = tpu.matmul %482, %483, %cst_178 {dimension_numbers = #tpu.dot_dimension_numbers<[1], [0], [0], [1], [0, 0, 1, 1], [], []>} : vector<32x64xf32>, vector<64x32xf32>, vector<32x32xf32> -> vector<32x32xf32>
    %485 = arith.addf %484, %329 : vector<32x32xf32>
    %486 = arith.mulf %485, %485 : vector<32x32xf32>
    %cst_179 = arith.constant dense<0.000000e+00> : vector<32xf32>
    %487 = vector.multi_reduction <add>, %486, %cst_179 [1] : vector<32x32xf32> to vector<32xf32>
    %488 = vector.shape_cast %487 : vector<32xf32> to vector<32x1xf32>
    %cst_180 = arith.constant 3.200000e+01 : f32
    %489 = vector.broadcast %cst_180 : f32 to vector<32x1xf32>
    %490 = arith.divf %488, %489 : vector<32x1xf32>
    %cst_181 = arith.constant 9.99999974E-6 : f32
    %491 = vector.broadcast %cst_181 : f32 to vector<32x1xf32>
    %492 = arith.addf %490, %491 : vector<32x1xf32>
    %493 = math.rsqrt %492 : vector<32x1xf32>
    %494 = vector.broadcast %493 : vector<32x1xf32> to vector<32x32xf32>
    %495 = arith.mulf %485, %494 : vector<32x32xf32>
    %c984 = arith.constant 984 : index
    %c0_182 = arith.constant 0 : index
    %496 = vector.load %arg2[%c984, %c0_182] : memref<1032x128xf32, #tpu.memory_space<vmem>>, vector<1x32xf32>
    %497 = vector.broadcast %496 : vector<1x32xf32> to vector<32x32xf32>
    %498 = arith.mulf %495, %497 : vector<32x32xf32>
    %c992 = arith.constant 992 : index
    %c0_183 = arith.constant 0 : index
    %499 = vector.load %arg2[%c992, %c0_183] : memref<1032x128xf32, #tpu.memory_space<vmem>>, vector<32x128xf32>
    %cst_184 = arith.constant dense<0.000000e+00> : vector<32x128xf32>
    %500 = tpu.matmul %498, %499, %cst_184 {dimension_numbers = #tpu.dot_dimension_numbers<[1], [0], [0], [1], [0, 0, 1, 1], [], []>} : vector<32x32xf32>, vector<32x128xf32>, vector<32x128xf32> -> vector<32x128xf32>
    %c1024 = arith.constant 1024 : index
    %c0_185 = arith.constant 0 : index
    %501 = vector.load %arg2[%c1024, %c0_185] : memref<1032x128xf32, #tpu.memory_space<vmem>>, vector<1x128xf32>
    %502 = vector.broadcast %501 : vector<1x128xf32> to vector<32x128xf32>
    %503 = arith.addf %500, %502 : vector<32x128xf32>
    %cst_186 = arith.constant 0.000000e+00 : f32
    %504 = vector.broadcast %cst_186 : f32 to vector<32x128xf32>
    %505 = arith.maximumf %503, %504 : vector<32x128xf32>
    %c0_187 = arith.constant 0 : index
    %c0_188 = arith.constant 0 : index
    %506 = vector.load %arg4[%c0_187, %c0_188] : memref<32x128xf32, #tpu.memory_space<vmem>>, vector<32x128xf32>
    tpu.vector_store %arg4[%c0_187, %c0_188], %505 {strides = array<i32>} : memref<32x128xf32, #tpu.memory_space<vmem>>, vector<32x128xf32>,
    return
  }
  func.func @transform_0(%arg0: i32) -> (i32, i32) {
    %c0_i32 = arith.constant 0 : i32
    %c0_i32_0 = arith.constant 0 : i32
    %c0_i32_1 = arith.constant 0 : i32
    return %c0_i32, %c0_i32_0 : i32, i32
  }
  func.func @transform_1(%arg0: i32) -> (i32, i32) {
    %c0_i32 = arith.constant 0 : i32
    %c0_i32_0 = arith.constant 0 : i32
    %c0_i32_1 = arith.constant 0 : i32
    return %c0_i32, %c0_i32_0 : i32, i32
  }
  func.func @transform_2(%arg0: i32) -> (i32, i32) {
    %c0_i32 = arith.constant 0 : i32
    %c0_i32_0 = arith.constant 0 : i32
    %c0_i32_1 = arith.constant 0 : i32
    return %c0_i32, %c0_i32_0 : i32, i32
  }
  func.func @transform_3(%arg0: i32) -> (i32, i32) {
    %c0_i32 = arith.constant 0 : i32
    %c0_i32_0 = arith.constant 0 : i32
    %c0_i32_1 = arith.constant 0 : i32
    return %c0_i32, %c0_i32_0 : i32, i32
  }
}

</mosaic_0001>

<bundles_post_ra>
// kernel: forward.1
= control target key start
LH: loop header
LB: loop body
LE: loop exit
PB: predicated region body
PF: predicated region fallthrough
CT: control target
= control target key end

     0   :  { %8 = vsyncpa [#allocation4], 0  ;;  %s12028_s0 = inlined_call_operand.vmem [shape: f32[32,8], index: 0, kind: input, shape index: {}]   ;;  %s12029_s1 = inlined_call_operand.hbm [shape: f32[1032,128], index: 1, kind: input, shape index: {}]   ;;  %s12030_s2 = inlined_call_operand.hbm [shape: f32[272,384], index: 2, kind: input, shape index: {}]   ;;  %s12031_s3 = inlined_call_operand.vmem [shape: f32[32,128], index: 3, kind: output, shape index: {}]  }
   0x1   :  { %9 = vsyncpa [#allocation6], 0  ;;  %s9860_s12 = smov [#allocation3]  }
   0x2   :  { %s17_s13 = sshll.u32 %s9860_s12, 4  ;;  %s18_s13 = int_to_ptr.vmem [resolvable:$true] %s17_s13 }
   0x3   :  { %s9824_s14 = scalar_lea.vmem %s18_s13, 16512  ;;  %p9829_p1 = scmp.lt.s32.totalorder %s18_s13, %s18_s13 }
   0x4   :  { %p9825_p0 = scmp.ne.s32.totalorder %s18_s13, %s9824_s14  ;;  %p9830_p2 = scmp.lt.s32.totalorder %s9824_s14, %s9824_s14 }
   0x6   :  { %p9831_p3 = por %p9830_p2, %p9829_p1 }
   0x8   :  { %p9832_p4 = pnand %p9831_p3, %p9825_p0 }
   0xa   :  { %9835 = shalt.err (!%p9832_p4)
}
   0xb   :  { %s9861_s15 = smov 128   ;;  %s9862_s16 = smov 8  }
   0xc   :  { %23 = dma.hbm_to_vmem [thread:$0]  %s12029_s1, 16512, %s18_s13, [#allocation4], %s9861_s15, %s9861_s15, %s9862_s16  }
   0xd   :  { %s9863_s19 = smov [#allocation5]  }
   0xe   :  { %s29_s20 = sshll.u32 %s9863_s19, 4  ;;  %s30_s20 = int_to_ptr.vmem [resolvable:$true] %s29_s20 }
   0xf   :  { %s9844_s21 = scalar_lea.vmem %s30_s20, 13056  ;;  %p9849_p6 = scmp.lt.s32.totalorder %s30_s20, %s30_s20 }
  0x10   :  { %p9845_p5 = scmp.ne.s32.totalorder %s30_s20, %s9844_s21  ;;  %p9850_p7 = scmp.lt.s32.totalorder %s9844_s21, %s9844_s21 }
  0x12   :  { %p9851_p8 = por %p9850_p7, %p9849_p6 }
  0x14   :  { %p9852_p9 = pnand %p9851_p8, %p9845_p5 }
  0x16   :  { %9855 = shalt.err (!%p9852_p9)
}
  0x17   :  { %s9864_s22 = smov 384   ;;  %s9865_s23 = smov 24  }
  0x18   :  { %35 = dma.hbm_to_vmem [thread:$0]  %s12030_s2, 13056, %s30_s20, [#allocation6], %s9864_s22, %s9864_s22, %s9865_s23  }
  0x19   :  { %9856 = dma.done.wait [#allocation4], 16512  }
  0x1a   :  { %9857 = vsyncadd [#allocation4], 4294950784 }
  0x1b   :  { %9858 = dma.done.wait [#allocation6], 13056  }
  0x1c   :  { %9859 = vsyncadd [#allocation6], 4294954240  ;;  %v42_v0 = vlaneseq  ;;  %vm421_vm0 = vcmask 261120   ;;  %v420_v5 = vld [vmem:[%s12028_s0 + $0x18] sm:$0xff]  ;;  %v419_v6 = vld [vmem:[%s12028_s0 + $0x10] sm:$0xff]  ;;  %v12038_v7 = vmov 0.0  }
  0x1d   :  { %8581 = vmatprep.subr.mxu0 %v420_v5  ;;  %v418_v10 = vld [vmem:[%s12028_s0 + $0x8] sm:$0xff]  ;;  %v417_v12 = vld [vmem:[%s12028_s0] sm:$0xff]  ;;  %v12035_v16 = vmov 1.0   ;;  %vm531_vm8 = vcmask 64512   ;;  %v731_v33 = vld [vmem:[#allocation5 + $0x28] sm:$0xff]  ;;  %vm732_vm9 = vcmask 130048  }
  0x1e   :  { %v9895_v1 = vshrl.u32 %v42_v0, 7  ;;  %v9897_v2 = vand.u32 127, %v42_v0  ;;  %8582 = vmatpush3.msra.mxu0 %v420_v5  ;;  %v730_v31 = vld [vmem:[#allocation5 + $0x20] sm:$0xff]  ;;  %v729_v32 = vld [vmem:[#allocation5 + $0x18] sm:$0xff]  ;;  %v727_v34 = vld [vmem:[#allocation5 + $0x8] sm:$0xff]  ;;  %vm1840_vm14 = vcmask 523264  }
  0x1f   :  { %8583 = vmatprep.subr.mxu0 %v419_v6  ;;  %v726_v35 = vld [vmem:[#allocation5] sm:$0xff]  ;;  %v728_v36 = vld [vmem:[#allocation5 + $0x10] sm:$0xff]  ;;  %s9868_s0 = smov 64  }
  0x20   :  { %12236 = vst [vmem:[#allocation9_spill] sm:$0xff] %v9895_v1  ;;  %12237 = vst [vmem:[#allocation10_spill] sm:$0xff] %v9897_v2  ;;  %v49_v3 = vadd.s32 2, %v9897_v2  ;;  %v9902_v4 = vadd.s32 8, %v9895_v1  ;;  %v9914_v9 = vadd.s32 16, %v9895_v1  ;;  %v9923_v11 = vadd.s32 24, %v9895_v1  ;;  %8584 = vmatpush3.msra.mxu0 %v419_v6 }
  0x21   :  { %8585 = vmatprep.subr.mxu0 %v418_v10  ;;  %vm413_vm6 = vcmp.eq.s32.totalorder %v9897_v2, %v9895_v1  ;;  %vm405_vm7 = vcmp.ge.s32.totalorder %v9895_v1, 2  ;;  %v58_v49 = vadd.s32 2, %v9895_v1 }
  0x22   :  { %vm50_vm1 = vcmp.eq.s32.totalorder %v9895_v1, %v49_v3  ;;  %12238 = vst [vmem:[#allocation11_spill] sm:$0xff] %v9902_v4  ;;  %12239 = vst [vmem:[#allocation12_spill] sm:$0xff] %v9914_v9  ;;  %vm51_vm2 = vcmp.eq.s32.totalorder %v9902_v4, %v49_v3  ;;  %vm52_vm3 = vcmp.eq.s32.totalorder %v9914_v9, %v49_v3  ;;  %8586 = vmatpush3.msra.mxu0 %v418_v10 }
  0x23   :  { %v9911_v8 = vsel %vm50_vm1, 1.0, %v12038_v7  ;;  %12240 = vst [vmem:[#allocation13_spill] sm:$0xff] %v9923_v11  ;;  %v9930_v13 = vsel %vm51_vm2, 1.0, %v12038_v7  ;;  %8587 = vmatprep.subr.mxu0 %v417_v12  ;;  %v9933_v14 = vsel %vm52_vm3, 1.0, %v12038_v7  ;;  %vm53_vm4 = vcmp.eq.s32.totalorder %v9923_v11, %v49_v3 }
  0x24   :  { %8589 = vmatprep.mubr.msk.f32.mxu0 %vm421_vm0, %v9911_v8  ;;  %8588 = vmatpush3.msra.mxu0 %v417_v12  ;;  %v9941_v15 = vsel %vm53_vm4, 1.0, %v12038_v7  ;;  %vm415_vm5 = vcmp.eq.s32.totalorder %v9897_v2, %v9902_v4  ;;  %v409_v22 = vsel %vm405_vm7, 1.0, %v12038_v7  ;;  %vm62_vm10 = vcmp.eq.s32.totalorder %v9897_v2, %v58_v49  ;;  %v1134_v49 = vld [vmem:[#allocation5 + $0xb0] sm:$0xff] }
  0x25   :  { %8590 = vmatmul.mubr.msk.f32.vlgmr.msra.gmra.mxu0 %vm421_vm0, %v9930_v13  ;;  %8595 = vmatprep.subr.msk.mxu1 %vm415_vm5, %v12035_v16  ;;  %v9994_v50 = vsel %vm62_vm10, 1.0, %v12038_v7  ;;  %v59_v56 = vadd.s32 2, %v9902_v4  ;;  %v60_v58 = vadd.s32 2, %v9914_v9  ;;  %v61_v62 = vadd.s32 2, %v9923_v11 }
  0x26   :  { %8592 = vmatprep.mubr.msk.f32.mxu0 %vm421_vm0, %v9933_v14  ;;  %8596 = vmatpush3.msk.msra.mxu1 %vm415_vm5, %v12035_v16 }
  0x27   :  { %8603 = vmatprep.subr.msk.mxu1 %vm413_vm6, %v12035_v16  ;;  %773 = vmatprep.subr.mxu0 %v730_v31  ;;  %vm63_vm11 = vcmp.eq.s32.totalorder %v9897_v2, %v59_v56  ;;  %vm64_vm12 = vcmp.eq.s32.totalorder %v9897_v2, %v60_v58  ;;  %vm65_vm13 = vcmp.eq.s32.totalorder %v9897_v2, %v61_v62  ;;  %v1149_v31 = vld [vmem:[#allocation5 + $0x128] sm:$0xff]  ;;  %v1132_v56 = vld [vmem:[#allocation5 + $0xa0] sm:$0xff]  ;;  %v1127_v58 = vld [vmem:[#allocation5 + $0x78] sm:$0xff] }
  0x28   :  { %774 = vmatpush1.msra.mxu0 %v729_v32  ;;  %v10010_v0 = vsel %vm63_vm11, 1.0, %v12038_v7  ;;  %v1148_v32 = vld [vmem:[#allocation5 + $0x120] sm:$0xff] }
  0x29   :  { %8593 = vmatmul.mubr.msk.f32.gmra.mxu0 %vm421_vm0, %v9941_v15  ;;  %775 = vmatprep.subr.mxu0 %v727_v34  ;;  %v1146_v34 = vld [vmem:[#allocation5 + $0x110] sm:$0xff]  ;;  %v1124_v62 = vld [vmem:[#allocation5 + $0x60] sm:$0xff] }
  0x2a   :  { %809 = vmatprep.mubr.f32.mxu0 %v12038_v7  ;;  %776 = vmatpush1.msra.mxu0 %v726_v35  ;;  %v1145_v35 = vld [vmem:[#allocation5 + $0x108] sm:$0xff] }
  0xe5   :  { %v8591_v17 = vpop.f32.mrf.mxu0 }
  0xe6   :  { %v520_v20 = vsub.f32 %v418_v10, %v8591_v17  ;;  %v1164_v17 = vld [vmem:[#allocation5 + $0x1a0] sm:$0xff] }
  0xe7   :  { %v500_v18 = vpop.f32.mrf.mxu0 }
  0xe8   :  { %v519_v19 = vsub.f32 %v417_v12, %v500_v18  ;;  %v524_v27 = vmax.f32 %v520_v20, 0.0  ;;  %v1163_v18 = vld [vmem:[#allocation5 + $0x198] sm:$0xff] }
  0xe9   :  { %v8594_v21 = vpop.f32.mrf.mxu0  ;;  %v1159_v20 = vld [vmem:[#allocation5 + $0x178] sm:$0xff] }
  0xea   :  { %v523_v23 = vmax.f32 %v519_v19, 0.0  ;;  %v522_v28 = vsub.f32 %v420_v5, %v8594_v21  ;;  %v1161_v19 = vld [vmem:[#allocation5 + $0x188] sm:$0xff]  ;;  %v1160_v21 = vld [vmem:[#allocation5 + $0x180] sm:$0xff] }
  0xeb   :  { %v510_v24 = vpop.f32.mrf.mxu0 }
  0xec   :  { %v521_v25 = vsub.f32 %v419_v6, %v510_v24  ;;  %v527_v26 = vmul.f32 %v523_v23, %v409_v22  ;;  %v526_v30 = vmax.f32 %v522_v28, 0.0  ;;  %v1158_v22 = vld [vmem:[#allocation5 + $0x170] sm:$0xff]  ;;  %v1157_v23 = vld [vmem:[#allocation5 + $0x168] sm:$0xff]  ;;  %v1156_v24 = vld [vmem:[#allocation5 + $0x160] sm:$0xff] }
  0xed   :  { %v1152_v28 = vld [vmem:[#allocation5 + $0x140] sm:$0xff] }
  0xee   :  { %v525_v29 = vmax.f32 %v521_v25, 0.0  ;;  %8597 = vmatprep.mubr.msk.f32.mxu1 %vm531_vm8, %v527_v26  ;;  %v1155_v25 = vld [vmem:[#allocation5 + $0x158] sm:$0xff]  ;;  %v1154_v26 = vld [vmem:[#allocation5 + $0x150] sm:$0xff] }
  0xef   :  { %8598 = vmatmul.mubr.msk.f32.vlgmr.msra.gmra.mxu1 %vm531_vm8, %v524_v27  ;;  %v1153_v27 = vld [vmem:[#allocation5 + $0x148] sm:$0xff] }
  0xf0   :  { %8600 = vmatprep.mubr.msk.f32.mxu1 %vm531_vm8, %v525_v29  ;;  %8604 = vmatpush3.msk.msra.mxu1 %vm413_vm6, %v12035_v16  ;;  %v1151_v29 = vld [vmem:[#allocation5 + $0x138] sm:$0xff] }
  0xf1   :  { %8611 = vmatprep.subr.mxu1 %v731_v33 }
  0xf3   :  { %8601 = vmatmul.mubr.msk.f32.gmra.mxu1 %vm531_vm8, %v526_v30  ;;  %v1150_v30 = vld [vmem:[#allocation5 + $0x130] sm:$0xff] }
  0xf4   :  { %8605 = vmatprep.mubr.msk.f32.mxu1 %vm531_vm8, %v417_v12  ;;  %v1162_v12 = vld [vmem:[#allocation5 + $0x190] sm:$0xff] }
  0xf7   :  { %8606 = vmatmul.mubr.msk.f32.vlgmr.msra.gmra.mxu1 %vm531_vm8, %v418_v10  ;;  %v10021_v10 = vsel %vm65_vm13, 1.0, %v12038_v7 }
  0xf8   :  { %8608 = vmatprep.mubr.msk.f32.mxu1 %vm531_vm8, %v419_v6  ;;  %8612 = vmatpush3.msra.mxu1 %v731_v33  ;;  %v1165_v6 = vld [vmem:[#allocation5 + $0x1a8] sm:$0xff]  ;;  %v1147_v33 = vld [vmem:[#allocation5 + $0x118] sm:$0xff] }
  0xf9   :  { %8613 = vmatprep.subr.mxu1 %v728_v36 }
  0xfa   :  { %8614 = vmatpush3.msra.mxu1 %v728_v36  ;;  %v1144_v36 = vld [vmem:[#allocation5 + $0x100] sm:$0xff] }
  0xfb   :  { %8609 = vmatmul.mubr.msk.f32.gmra.mxu1 %vm531_vm8, %v420_v5  ;;  %v10013_v5 = vsel %vm64_vm12, 1.0, %v12038_v7 }
 0x1af   :  { %v8599_v37 = vpop.f32.mrf.mxu1 }
 0x1b1   :  { %v610_v38 = vpop.f32.mrf.mxu1 }
 0x1b3   :  { %v8602_v39 = vpop.f32.mrf.mxu1 }
 0x1b5   :  { %v620_v40 = vpop.f32.mrf.mxu1 }
 0x1b7   :  { %v8607_v41 = vpop.f32.mrf.mxu1 }
 0x1b8   :  { %v9964_v44 = vadd.f32 %v8607_v41, %v8599_v37  ;;  %v1143_v37 = vld [vmem:[#allocation5 + $0xf8] sm:$0xff] }
 0x1b9   :  { %v707_v42 = vpop.f32.mrf.mxu1  ;;  %v1139_v41 = vld [vmem:[#allocation5 + $0xd8] sm:$0xff] }
 0x1ba   :  { %v9962_v43 = vadd.f32 %v707_v42, %v610_v38  ;;  %v1142_v38 = vld [vmem:[#allocation5 + $0xf0] sm:$0xff] }
 0x1bb   :  { %v8610_v45 = vpop.f32.mrf.mxu1  ;;  %v1138_v42 = vld [vmem:[#allocation5 + $0xd0] sm:$0xff] }
 0x1bc   :  { %7478 = vmatmul.mubr.msk.f32.vlgmr.msra.gmra.mxu0 %vm732_vm9, %v9962_v43  ;;  %8615 = vmatprep.mubr.msk.f32.mxu1 %vm732_vm9, %v9962_v43  ;;  %v9975_v48 = vadd.f32 %v8610_v45, %v8602_v39  ;;  %v1141_v39 = vld [vmem:[#allocation5 + $0xe8] sm:$0xff] }
 0x1bd   :  { %v717_v46 = vpop.f32.mrf.mxu1  ;;  %8616 = vmatmul.mubr.msk.f32.vlgmr.msra.gmra.mxu1 %vm732_vm9, %v9964_v44  ;;  %815 = vmatprep.mubr.f32.mxu0 %v12038_v7  ;;  %v1137_v45 = vld [vmem:[#allocation5 + $0xc8] sm:$0xff] }
 0x1be   :  { %v9973_v47 = vadd.f32 %v717_v46, %v620_v40  ;;  %v1140_v40 = vld [vmem:[#allocation5 + $0xe0] sm:$0xff] }
 0x1bf   :  { %v1136_v46 = vld [vmem:[#allocation5 + $0xc0] sm:$0xff] }
 0x1c0   :  { %7479 = vmatmul.mubr.msk.f32.gmra.mxu0 %vm732_vm9, %v9964_v44  ;;  %8618 = vmatprep.mubr.msk.f32.mxu1 %vm732_vm9, %v9973_v47 }
 0x1c1   :  { %8619 = vmatmul.mubr.msk.f32.gmra.mxu1 %vm732_vm9, %v9975_v48  ;;  %821 = vmatprep.mubr.f32.mxu0 %v12038_v7 }
 0x1c2   :  { %8629 = vmatprep.mubr.msk.f32.mxu1 %vm421_vm0, %v9911_v8 }
 0x1c4   :  { %7480 = vmatmul.mubr.msk.f32.gmra.mxu0 %vm732_vm9, %v9973_v47 }
 0x1c5   :  { %827 = vmatprep.mubr.f32.mxu0 %v12038_v7 }
 0x1c8   :  { %7481 = vmatmul.mubr.msk.f32.gmra.mxu0 %vm732_vm9, %v9975_v48 }
 0x1c9   :  { %8643 = vmatprep.mubr.msk.f32.mxu0 %vm421_vm0, %v9994_v50 }
 0x27c   :  { %v811_v51 = vpop.f32.mrf.mxu0 }
 0x27d   :  { %v8617_v52 = vpop.f32.mrf.mxu1 }
 0x27e   :  { %v9998_v53 = vpop.f32.mrf.mxu0 }
 0x27f   :  { %v900_v54 = vpop.f32.mrf.mxu1 }
 0x280   :  { %v817_v55 = vpop.f32.mrf.mxu0 }
 0x281   :  { %v8620_v57 = vpop.f32.mrf.mxu1 }
 0x282   :  { %v10002_v59 = vpop.f32.mrf.mxu0  ;;  %8635 = vmatprep.subr.mxu0 %v8620_v57 }
 0x283   :  { %v910_v60 = vpop.f32.mrf.mxu1  ;;  %8636 = vmatpush3.msra.mxu0 %v8620_v57  ;;  %v1128_v57 = vld [vmem:[#allocation5 + $0x80] sm:$0xff] }
 0x284   :  { %v823_v61 = vpop.f32.mrf.mxu0  ;;  %8637 = vmatprep.subr.mxu0 %v910_v60 }
 0x285   :  { %8638 = vmatpush3.msra.mxu0 %v910_v60  ;;  %v1129_v60 = vld [vmem:[#allocation5 + $0x88] sm:$0xff] }
 0x286   :  { %v10007_v63 = vpop.f32.mrf.mxu0  ;;  %8639 = vmatprep.subr.mxu0 %v8617_v52 }
 0x287   :  { %8640 = vmatpush3.msra.mxu0 %v8617_v52  ;;  %v1135_v52 = vld [vmem:[#allocation5 + $0xb8] sm:$0xff] }
 0x288   :  { %v829_v3 = vpop.f32.mrf.mxu0  ;;  %8641 = vmatprep.subr.mxu0 %v900_v54 }
 0x289   :  { %8621 = vmatprep.subr.mxu1 %v829_v3  ;;  %8642 = vmatpush3.msra.mxu0 %v900_v54  ;;  %v1131_v54 = vld [vmem:[#allocation5 + $0x98] sm:$0xff] }
 0x28a   :  { %8622 = vmatpush3.msra.mxu1 %v829_v3  ;;  %8644 = vmatmul.mubr.msk.f32.vlgmr.msra.gmra.mxu0 %vm421_vm0, %v10010_v0  ;;  %v1126_v3 = vld [vmem:[#allocation5 + $0x70] sm:$0xff] }
 0x28b   :  { %8623 = vmatprep.subr.mxu1 %v823_v61  ;;  %8646 = vmatprep.mubr.msk.f32.mxu0 %vm421_vm0, %v10013_v5 }
 0x28c   :  { %8624 = vmatpush3.msra.mxu1 %v823_v61  ;;  %8649 = vmatprep.subr.mxu0 %v1165_v6  ;;  %v1125_v61 = vld [vmem:[#allocation5 + $0x68] sm:$0xff] }
 0x28d   :  { %8625 = vmatprep.subr.mxu1 %v817_v55  ;;  %8650 = vmatpush3.msra.mxu0 %v1165_v6  ;;  %v1122_v6 = vld [vmem:[#allocation5 + $0x50] sm:$0xff] }
 0x28e   :  { %8626 = vmatpush3.msra.mxu1 %v817_v55  ;;  %8647 = vmatmul.mubr.msk.f32.gmra.mxu0 %vm421_vm0, %v10021_v10  ;;  %v1130_v55 = vld [vmem:[#allocation5 + $0x90] sm:$0xff] }
 0x28f   :  { %8627 = vmatprep.subr.mxu1 %v811_v51  ;;  %8651 = vmatprep.subr.mxu0 %v1162_v12 }
 0x290   :  { %8628 = vmatpush3.msra.mxu1 %v811_v51  ;;  %8652 = vmatpush3.msra.mxu0 %v1162_v12  ;;  %v1133_v51 = vld [vmem:[#allocation5 + $0xa8] sm:$0xff] }
 0x291   :  { %8630 = vmatmul.mubr.msk.f32.vlgmr.msra.gmra.mxu1 %vm421_vm0, %v9930_v13  ;;  %1166 = vmatprep.subr.mxu1 %v1164_v17  ;;  %v1121_v12 = vld [vmem:[#allocation5 + $0x48] sm:$0xff]  ;;  %v1123_v17 = vld [vmem:[#allocation5 + $0x58] sm:$0xff] }
 0x292   :  { %8632 = vmatprep.mubr.msk.f32.mxu1 %vm421_vm0, %v9933_v14  ;;  %1167 = vmatpush1.msra.mxu1 %v1163_v18  ;;  %v1119_v18 = vld [vmem:[#allocation5 + $0x38] sm:$0xff] }
 0x293   :  { %1168 = vmatprep.subr.mxu1 %v1161_v19  ;;  %8653 = vmatprep.subr.mxu0 %v1159_v20  ;;  %v1118_v19 = vld [vmem:[#allocation5 + $0x30] sm:$0xff] }
 0x294   :  { %1169 = vmatpush1.msra.mxu1 %v1160_v21  ;;  %8654 = vmatpush3.msra.mxu0 %v1159_v20  ;;  %v1120_v20 = vld [vmem:[#allocation5 + $0x40] sm:$0xff]  ;;  %v831_v21 = vpop.f32.mrf.mxu0 }
 0x295   :  { %8633 = vmatmul.mubr.msk.f32.gmra.mxu1 %vm421_vm0, %v9941_v15  ;;  %1170 = vmatprep.subr.mxu1 %v1158_v22 }
 0x296   :  { %1171 = vmatpush1.msra.mxu1 %v1157_v23  ;;  %8655 = vmatprep.subr.mxu0 %v1156_v24 }
 0x297   :  { %1172 = vmatprep.subr.mxu1 %v1155_v25  ;;  %8656 = vmatpush3.msra.mxu0 %v1156_v24 }
 0x298   :  { %1173 = vmatpush1.msra.mxu1 %v1154_v26  ;;  %8657 = vmatprep.subr.mxu0 %v1153_v27 }
 0x299   :  { %1174 = vmatprep.subr.mxu1 %v1152_v28  ;;  %8658 = vmatpush3.msra.mxu0 %v1153_v27 }
 0x29a   :  { %1175 = vmatpush1.msra.mxu1 %v1151_v29  ;;  %8659 = vmatprep.subr.mxu0 %v1150_v30  ;;  %v7494_v29 = vld [vmem:[#allocation3] ss:$0 sm:$0xff] }
 0x29b   :  { %1176 = vmatprep.subr.mxu1 %v1149_v31  ;;  %8660 = vmatpush3.msra.mxu0 %v1150_v30 }
 0x29c   :  { %1177 = vmatpush1.msra.mxu1 %v1148_v32  ;;  %8661 = vmatprep.subr.mxu0 %v1147_v33 }
 0x29d   :  { %1178 = vmatprep.subr.mxu1 %v1146_v34  ;;  %8662 = vmatpush3.msra.mxu0 %v1147_v33 }
 0x29e   :  { %1179 = vmatpush1.msra.mxu1 %v1145_v35  ;;  %8663 = vmatprep.subr.mxu0 %v1144_v36 }
 0x29f   :  { %1180 = vmatprep.subr.mxu1 %v1143_v37  ;;  %8664 = vmatpush3.msra.mxu0 %v1144_v36 }
 0x2a0   :  { %1181 = vmatpush1.msra.mxu1 %v1142_v38  ;;  %8665 = vmatprep.subr.mxu0 %v1141_v39 }
 0x2a1   :  { %1182 = vmatprep.subr.mxu1 %v1140_v40  ;;  %8666 = vmatpush3.msra.mxu0 %v1141_v39 }
 0x2a2   :  { %1183 = vmatpush1.msra.mxu1 %v1139_v41  ;;  %8667 = vmatprep.subr.mxu0 %v1138_v42 }
 0x2a3   :  { %1184 = vmatprep.subr.mxu1 %v1137_v45  ;;  %8668 = vmatpush3.msra.mxu0 %v1138_v42 }
 0x2a4   :  { %1185 = vmatpush1.msra.mxu1 %v1136_v46  ;;  %1230 = vmatprep.mubr.f32.mxu1 %v12038_v7 }
 0x2a5   :  { %1186 = vmatprep.subr.mxu1 %v1134_v49  ;;  %8669 = vmatprep.subr.mxu0 %v1135_v52 }
 0x2a6   :  { %1187 = vmatpush1.msra.mxu1 %v1133_v51  ;;  %8670 = vmatpush3.msra.mxu0 %v1135_v52 }
 0x2a7   :  { %1188 = vmatprep.subr.mxu1 %v1131_v54  ;;  %8671 = vmatprep.subr.mxu0 %v1132_v56 }
 0x2a8   :  { %1189 = vmatpush1.msra.mxu1 %v1130_v55  ;;  %8672 = vmatpush3.msra.mxu0 %v1132_v56 }
 0x2a9   :  { %1190 = vmatprep.subr.mxu1 %v1128_v57  ;;  %8673 = vmatprep.subr.mxu0 %v1129_v60 }
 0x2aa   :  { %1191 = vmatpush1.msra.mxu1 %v1127_v58  ;;  %8674 = vmatpush3.msra.mxu0 %v1129_v60 }
 0x2ab   :  { %1192 = vmatprep.subr.mxu1 %v1125_v61  ;;  %8675 = vmatprep.subr.mxu0 %v1126_v3 }
 0x2ac   :  { %1193 = vmatpush1.msra.mxu1 %v1124_v62  ;;  %8676 = vmatpush3.msra.mxu0 %v1126_v3  ;;  %v1633_v62 = vld [vmem:[#allocation3 + $0x98] sm:$0xff]  ;;  %v1632_v3 = vld [vmem:[#allocation3 + $0x90] sm:$0xff] }
 0x2ad   :  { %1194 = vmatprep.subr.mxu1 %v1122_v6  ;;  %8677 = vmatprep.subr.mxu0 %v1123_v17  ;;  %v1524_v6 = vld [vmem:[#allocation3 + $0x18] sm:$0xff] }
 0x2ae   :  { %1195 = vmatpush1.msra.mxu1 %v1121_v12  ;;  %8678 = vmatpush3.msra.mxu0 %v1123_v17  ;;  %v1523_v12 = vld [vmem:[#allocation3 + $0x10] sm:$0xff]  ;;  %v1631_v17 = vld [vmem:[#allocation3 + $0x88] sm:$0xff] }
 0x2af   :  { %1196 = vmatprep.subr.mxu1 %v1119_v18  ;;  %8679 = vmatprep.subr.mxu0 %v1120_v20  ;;  %v1734_v18 = vld [vmem:[#allocation3 + $0x118] sm:$0xff] }
 0x2b0   :  { %1197 = vmatpush1.msra.mxu1 %v1118_v19  ;;  %8680 = vmatpush3.msra.mxu0 %v1120_v20  ;;  %v1630_v19 = vld [vmem:[#allocation3 + $0x80] sm:$0xff]  ;;  %v1629_v20 = vld [vmem:[#allocation3 + $0x78] sm:$0xff] }
 0x34a   :  { %v8645_v22 = vpop.f32.mrf.mxu0 }
 0x34c   :  { %v1082_v24 = vpop.f32.mrf.mxu0 }
 0x34e   :  { %v8648_v27 = vpop.f32.mrf.mxu0 }
 0x350   :  { %v1092_v36 = vpop.f32.mrf.mxu0 }
 0x351   :  { %v8631_v23 = vpop.f32.mrf.mxu1 }
 0x352   :  { %v991_v25 = vadd.f32 %v8631_v23, %v10002_v59  ;;  %v1732_v23 = vld [vmem:[#allocation3 + $0x108] sm:$0xff] }
 0x353   :  { %v985_v26 = vpop.f32.mrf.mxu1 }
 0x354   :  { %v1102_v28 = vadd.f32 %v8645_v22, %v991_v25  ;;  %v986_v30 = vadd.f32 %v985_v26, %v9998_v53  ;;  %v1628_v22 = vld [vmem:[#allocation3 + $0x70] sm:$0xff]  ;;  %v1731_v25 = vld [vmem:[#allocation3 + $0x100] sm:$0xff]  ;;  %v1730_v26 = vld [vmem:[#allocation3 + $0xf8] sm:$0xff] }
 0x355   :  { %v8634_v31 = vpop.f32.mrf.mxu1 }
 0x356   :  { %v1101_v32 = vadd.f32 %v1082_v24, %v986_v30  ;;  %v1001_v33 = vadd.f32 %v8634_v31, %v831_v21  ;;  %v1111_v34 = vadd.f32 %v7494_v29, %v1102_v28  ;;  %v1733_v21 = vld [vmem:[#allocation3 + $0x110] sm:$0xff]  ;;  %v1627_v24 = vld [vmem:[#allocation3 + $0x68] sm:$0xff]  ;;  %v1726_v28 = vld [vmem:[#allocation3 + $0xd8] sm:$0xff] }
 0x357   :  { %v995_v35 = vpop.f32.mrf.mxu1  ;;  %v1725_v30 = vld [vmem:[#allocation3 + $0xd0] sm:$0xff]  ;;  %v1623_v31 = vld [vmem:[#allocation3 + $0x48] sm:$0xff] }
 0x358   :  { %v1110_v37 = vadd.f32 %v7494_v29, %v1101_v32  ;;  %v996_v38 = vadd.f32 %v995_v35, %v10007_v63  ;;  %v1104_v39 = vadd.f32 %v8648_v27, %v1001_v33  ;;  %v1115_v42 = vmax.f32 %v1111_v34, 0.0  ;;  %v1727_v27 = vld [vmem:[#allocation3 + $0xe0] sm:$0xff]  ;;  %v1724_v32 = vld [vmem:[#allocation3 + $0xc8] sm:$0xff]  ;;  %v1621_v35 = vld [vmem:[#allocation3 + $0x38] sm:$0xff] }
 0x359   :  { %v1622_v33 = vld [vmem:[#allocation3 + $0x40] sm:$0xff] }
 0x35a   :  { %v1114_v40 = vmax.f32 %v1110_v37, 0.0  ;;  %v1103_v41 = vadd.f32 %v1092_v36, %v996_v38  ;;  %v1113_v59 = vadd.f32 %v7494_v29, %v1104_v39  ;;  %v1723_v34 = vld [vmem:[#allocation3 + $0xc0] sm:$0xff]  ;;  %v1722_v36 = vld [vmem:[#allocation3 + $0xb8] sm:$0xff]  ;;  %v1620_v37 = vld [vmem:[#allocation3 + $0x30] sm:$0xff] }
 0x35b   :  { %v1721_v38 = vld [vmem:[#allocation3 + $0xb0] sm:$0xff]  ;;  %v1619_v39 = vld [vmem:[#allocation3 + $0x28] sm:$0xff] }
 0x35c   :  { %v1112_v45 = vadd.f32 %v7494_v29, %v1103_v41  ;;  %1231 = vmatmul.mubr.f32.vlgmr.msra.gmra.mxu1 %v1114_v40  ;;  %8681 = vmatprep.mubr.f32.mxu0 %v1114_v40  ;;  %v1117_v46 = vmax.f32 %v1113_v59, 0.0  ;;  %v1624_v29 = vld [vmem:[#allocation3 + $0x50] sm:$0xff]  ;;  %v1720_v40 = vld [vmem:[#allocation3 + $0xa8] sm:$0xff]  ;;  %v1618_v41 = vld [vmem:[#allocation3 + $0x20] sm:$0xff] }
 0x35d   :  { %8682 = vmatmul.mubr.f32.vlgmr.msra.gmra.mxu0 %v1115_v42  ;;  %1236 = vmatprep.mubr.f32.mxu1 %v12038_v7  ;;  %v1839_v59 = vld [vmem:[#allocation5 + $0x260] sm:$0xff] }
 0x35e   :  { %v1116_v53 = vmax.f32 %v1112_v45, 0.0 }
 0x360   :  { %1237 = vmatmul.mubr.f32.gmra.mxu1 %v1115_v42  ;;  %8684 = vmatprep.mubr.f32.mxu0 %v1116_v53  ;;  %v1719_v42 = vld [vmem:[#allocation3 + $0xa0] sm:$0xff] }
 0x361   :  { %8685 = vmatmul.mubr.f32.gmra.mxu0 %v1117_v46  ;;  %1242 = vmatprep.mubr.f32.mxu1 %v12038_v7 }
 0x362   :  { %8695 = vmatprep.mubr.msk.f32.mxu0 %vm421_vm0, %v9911_v8 }
 0x364   :  { %1243 = vmatmul.mubr.f32.gmra.mxu1 %v1116_v53 }
 0x365   :  { %1248 = vmatprep.mubr.f32.mxu1 %v12038_v7 }
 0x368   :  { %1249 = vmatmul.mubr.f32.gmra.mxu1 %v1117_v46 }
 0x369   :  { %8709 = vmatprep.mubr.msk.f32.mxu1 %vm421_vm0, %v9994_v50 }
 0x41c   :  { %v1232_v63 = vpop.f32.mrf.mxu1 }
 0x41d   :  { %v8683_v49 = vpop.f32.mrf.mxu0 }
 0x41e   :  { %v10042_v51 = vpop.f32.mrf.mxu1 }
 0x41f   :  { %v1321_v52 = vpop.f32.mrf.mxu0 }
 0x420   :  { %v1238_v54 = vpop.f32.mrf.mxu1 }
 0x421   :  { %v8686_v55 = vpop.f32.mrf.mxu0 }
 0x422   :  { %v10044_v56 = vpop.f32.mrf.mxu1  ;;  %8701 = vmatprep.subr.mxu1 %v8686_v55 }
 0x423   :  { %v1331_v57 = vpop.f32.mrf.mxu0  ;;  %8702 = vmatpush3.msra.mxu1 %v8686_v55 }
 0x424   :  { %v1244_v58 = vpop.f32.mrf.mxu1  ;;  %8703 = vmatprep.subr.mxu1 %v1331_v57 }
 0x425   :  { %8704 = vmatpush3.msra.mxu1 %v1331_v57 }
 0x426   :  { %v10046_v60 = vpop.f32.mrf.mxu1  ;;  %8705 = vmatprep.subr.mxu1 %v8683_v49 }
 0x427   :  { %8706 = vmatpush3.msra.mxu1 %v8683_v49 }
 0x428   :  { %v1250_v61 = vpop.f32.mrf.mxu1  ;;  %8707 = vmatprep.subr.mxu1 %v1321_v52 }
 0x429   :  { %8687 = vmatprep.subr.mxu0 %v1250_v61  ;;  %8708 = vmatpush3.msra.mxu1 %v1321_v52 }
 0x42a   :  { %8688 = vmatpush3.msra.mxu0 %v1250_v61  ;;  %8710 = vmatmul.mubr.msk.f32.vlgmr.msra.gmra.mxu1 %vm421_vm0, %v10010_v0  ;;  %v1252_v45 = vpop.f32.mrf.mxu1 }
 0x42b   :  { %8689 = vmatprep.subr.mxu0 %v1244_v58  ;;  %8712 = vmatprep.mubr.msk.f32.mxu1 %vm421_vm0, %v10013_v5 }
 0x42c   :  { %8690 = vmatpush3.msra.mxu0 %v1244_v58  ;;  %8725 = vmatprep.subr.mxu1 %v1633_v62 }
 0x42d   :  { %8691 = vmatprep.subr.mxu0 %v1238_v54  ;;  %8726 = vmatpush3.msra.mxu1 %v1633_v62 }
 0x42e   :  { %8692 = vmatpush3.msra.mxu0 %v1238_v54  ;;  %8713 = vmatmul.mubr.msk.f32.gmra.mxu1 %vm421_vm0, %v10021_v10 }
 0x42f   :  { %8693 = vmatprep.subr.mxu0 %v1232_v63  ;;  %8727 = vmatprep.subr.mxu1 %v1632_v3 }
 0x430   :  { %8694 = vmatpush3.msra.mxu0 %v1232_v63  ;;  %8728 = vmatpush3.msra.mxu1 %v1632_v3  ;;  %v7503_v3 = vld [vmem:[#allocation3 + $0x8] ss:$0 sm:$0xff] }
 0x431   :  { %8696 = vmatmul.mubr.msk.f32.vlgmr.msra.gmra.mxu0 %vm421_vm0, %v9930_v13  ;;  %8715 = vmatprep.subr.mxu0 %v1524_v6 }
 0x432   :  { %8698 = vmatprep.mubr.msk.f32.mxu0 %vm421_vm0, %v9933_v14  ;;  %8716 = vmatpush3.msra.mxu0 %v1524_v6 }
 0x433   :  { %8717 = vmatprep.subr.mxu0 %v1523_v12  ;;  %8729 = vmatprep.subr.mxu1 %v1631_v17 }
 0x434   :  { %8718 = vmatpush3.msra.mxu0 %v1523_v12  ;;  %8730 = vmatpush3.msra.mxu1 %v1631_v17 }
 0x435   :  { %8699 = vmatmul.mubr.msk.f32.gmra.mxu0 %vm421_vm0, %v9941_v15  ;;  %8763 = vmatprep.subr.mxu0 %v1734_v18 }
 0x436   :  { %8719 = vmatprep.mubr.msk.f32.mxu0 %vm732_vm9, %v9962_v43  ;;  %8731 = vmatprep.subr.mxu1 %v1630_v19  ;;  %v1626_v43 = vld [vmem:[#allocation3 + $0x60] sm:$0xff] }
 0x437   :  { %8732 = vmatpush3.msra.mxu1 %v1630_v19 }
 0x438   :  { %8733 = vmatprep.subr.mxu1 %v1629_v20 }
 0x439   :  { %8720 = vmatmul.mubr.msk.f32.vlgmr.msra.gmra.mxu0 %vm732_vm9, %v9964_v44  ;;  %8734 = vmatpush3.msra.mxu1 %v1629_v20  ;;  %v1729_v44 = vld [vmem:[#allocation3 + $0xf0] sm:$0xff] }
 0x43a   :  { %8722 = vmatprep.mubr.msk.f32.mxu0 %vm732_vm9, %v9973_v47  ;;  %8764 = vmatpush3.msra.mxu0 %v1734_v18  ;;  %v1728_v47 = vld [vmem:[#allocation3 + $0xe8] sm:$0xff] }
 0x43b   :  { %8765 = vmatprep.subr.mxu0 %v1733_v21  ;;  %8735 = vmatprep.subr.mxu1 %v1628_v22 }
 0x43c   :  { %8766 = vmatpush3.msra.mxu0 %v1733_v21  ;;  %8736 = vmatpush3.msra.mxu1 %v1628_v22 }
 0x43d   :  { %8723 = vmatmul.mubr.msk.f32.gmra.mxu0 %vm732_vm9, %v9975_v48  ;;  %8767 = vmatprep.subr.mxu0 %v1732_v23  ;;  %v1625_v48 = vld [vmem:[#allocation3 + $0x58] sm:$0xff] }
 0x43e   :  { %8768 = vmatpush3.msra.mxu0 %v1732_v23  ;;  %8737 = vmatprep.subr.mxu1 %v1627_v24 }
 0x43f   :  { %8769 = vmatprep.subr.mxu0 %v1731_v25  ;;  %8738 = vmatpush3.msra.mxu1 %v1627_v24 }
 0x440   :  { %8770 = vmatpush3.msra.mxu0 %v1731_v25  ;;  %8739 = vmatprep.subr.mxu1 %v1626_v43 }
 0x441   :  { %8771 = vmatprep.subr.mxu0 %v1730_v26  ;;  %8740 = vmatpush3.msra.mxu1 %v1626_v43 }
 0x442   :  { %8772 = vmatpush3.msra.mxu0 %v1730_v26  ;;  %8741 = vmatprep.subr.mxu1 %v1625_v48 }
 0x443   :  { %8773 = vmatprep.subr.mxu0 %v1729_v44  ;;  %8742 = vmatpush3.msra.mxu1 %v1625_v48  ;;  %v1838_v48 = vld [vmem:[#allocation5 + $0x258] sm:$0xff] }
 0x444   :  { %8774 = vmatpush3.msra.mxu0 %v1729_v44  ;;  %8743 = vmatprep.subr.mxu1 %v1624_v29 }
 0x445   :  { %8775 = vmatprep.subr.mxu0 %v1728_v47  ;;  %8744 = vmatpush3.msra.mxu1 %v1624_v29 }
 0x446   :  { %8776 = vmatpush3.msra.mxu0 %v1728_v47  ;;  %8745 = vmatprep.subr.mxu1 %v1623_v31 }
 0x447   :  { %8777 = vmatprep.subr.mxu0 %v1727_v27  ;;  %8746 = vmatpush3.msra.mxu1 %v1623_v31  ;;  %v1836_v31 = vld [vmem:[#allocation5 + $0x240] sm:$0xff] }
 0x448   :  { %8778 = vmatpush3.msra.mxu0 %v1727_v27  ;;  %8747 = vmatprep.subr.mxu1 %v1622_v33 }
 0x449   :  { %8779 = vmatprep.subr.mxu0 %v1726_v28  ;;  %8748 = vmatpush3.msra.mxu1 %v1622_v33  ;;  %v1834_v33 = vld [vmem:[#allocation5 + $0x228] sm:$0xff] }
 0x44a   :  { %8780 = vmatpush3.msra.mxu0 %v1726_v28  ;;  %8749 = vmatprep.subr.mxu1 %v1621_v35 }
 0x44b   :  { %8781 = vmatprep.subr.mxu0 %v1725_v30  ;;  %8750 = vmatpush3.msra.mxu1 %v1621_v35  ;;  %v1832_v35 = vld [vmem:[#allocation5 + $0x210] sm:$0xff] }
 0x44c   :  { %8782 = vmatpush3.msra.mxu0 %v1725_v30  ;;  %8751 = vmatprep.subr.mxu1 %v1620_v37 }
 0x44d   :  { %8783 = vmatprep.subr.mxu0 %v1724_v32  ;;  %8752 = vmatpush3.msra.mxu1 %v1620_v37  ;;  %v1830_v37 = vld [vmem:[#allocation5 + $0x1f8] sm:$0xff] }
 0x44e   :  { %8784 = vmatpush3.msra.mxu0 %v1724_v32  ;;  %8753 = vmatprep.subr.mxu1 %v1619_v39  ;;  %v1835_v32 = vld [vmem:[#allocation5 + $0x230] sm:$0xff] }
 0x44f   :  { %8785 = vmatprep.subr.mxu0 %v1723_v34  ;;  %8754 = vmatpush3.msra.mxu1 %v1619_v39  ;;  %v1828_v39 = vld [vmem:[#allocation5 + $0x1e0] sm:$0xff] }
 0x450   :  { %8786 = vmatpush3.msra.mxu0 %v1723_v34  ;;  %8755 = vmatprep.subr.mxu1 %v1618_v41  ;;  %v1833_v34 = vld [vmem:[#allocation5 + $0x218] sm:$0xff] }
 0x451   :  { %8787 = vmatprep.subr.mxu0 %v1722_v36  ;;  %8756 = vmatpush3.msra.mxu1 %v1618_v41  ;;  %v1826_v41 = vld [vmem:[#allocation5 + $0x1c8] sm:$0xff] }
 0x452   :  { %8788 = vmatpush3.msra.mxu0 %v1722_v36  ;;  %1869 = vmatprep.subr.mxu1 %v1839_v59  ;;  %v1831_v36 = vld [vmem:[#allocation5 + $0x200] sm:$0xff]  ;;  %v1824_v59 = vld [vmem:[#allocation5 + $0x1b0] sm:$0xff] }
 0x453   :  { %8789 = vmatprep.subr.mxu0 %v1721_v38 }
 0x454   :  { %8790 = vmatpush3.msra.mxu0 %v1721_v38  ;;  %v1829_v38 = vld [vmem:[#allocation5 + $0x1e8] sm:$0xff] }
 0x455   :  { %8791 = vmatprep.subr.mxu0 %v1720_v40 }
 0x456   :  { %8792 = vmatpush3.msra.mxu0 %v1720_v40  ;;  %v1827_v40 = vld [vmem:[#allocation5 + $0x1d0] sm:$0xff] }
 0x457   :  { %8793 = vmatprep.subr.mxu0 %v1719_v42 }
 0x458   :  { %8794 = vmatpush3.msra.mxu0 %v1719_v42  ;;  %v1825_v42 = vld [vmem:[#allocation5 + $0x1b8] sm:$0xff] }
 0x4ea   :  { %v8711_v53 = vpop.f32.mrf.mxu1 }
 0x4ec   :  { %v1491_v46 = vpop.f32.mrf.mxu1 }
 0x4ee   :  { %v8714_v54 = vpop.f32.mrf.mxu1 }
 0x4f0   :  { %v1501_v12 = vpop.f32.mrf.mxu1 }
 0x4f1   :  { %v8697_v63 = vpop.f32.mrf.mxu0 }
 0x4f2   :  { %v1412_v49 = vadd.f32 %v8697_v63, %v10044_v56 }
 0x4f3   :  { %v1406_v52 = vpop.f32.mrf.mxu0 }
 0x4f4   :  { %v1407_v55 = vadd.f32 %v1406_v52, %v10042_v51  ;;  %v1511_v57 = vadd.f32 %v8711_v53, %v1412_v49 }
 0x4f5   :  { %v8700_v58 = vpop.f32.mrf.mxu0 }
 0x4f6   :  { %v1422_v61 = vadd.f32 %v8700_v58, %v1252_v45  ;;  %v1510_v62 = vadd.f32 %v1491_v46, %v1407_v55  ;;  %v1520_v19 = vadd.f32 %v7503_v3, %v1511_v57 }
 0x4f7   :  { %v1416_v6 = vpop.f32.mrf.mxu0 }
 0x4f8   :  { %v1417_v17 = vadd.f32 %v1416_v6, %v10046_v60  ;;  %v1513_v18 = vadd.f32 %v8714_v54, %v1422_v61  ;;  %v1519_v22 = vadd.f32 %v7503_v3, %v1510_v62  ;;  %v1837_v60 = vld [vmem:[#allocation5 + $0x248] sm:$0xff] }
 0x4f9   :  { %v8721_v20 = vpop.f32.mrf.mxu0 }
 0x4fa   :  { %v1512_v21 = vadd.f32 %v1501_v12, %v1417_v17  ;;  %v1611_v23 = vadd.f32 %v8721_v20, %v1520_v19  ;;  %v1522_v25 = vadd.f32 %v7503_v3, %v1513_v18 }
 0x4fb   :  { %v1591_v56 = vpop.f32.mrf.mxu0 }
 0x4fc   :  { %v1610_v24 = vadd.f32 %v1591_v56, %v1519_v22  ;;  %v1521_v26 = vadd.f32 %v7503_v3, %v1512_v21  ;;  %v1615_v44 = vmax.f32 %v1611_v23, 0.0  ;;  %v2160_v22 = vld [vmem:[#allocation5 + $0x320] sm:$0xff]  ;;  %v2159_v23 = vld [vmem:[#allocation5 + $0x318] sm:$0xff]  ;;  %v2158_v56 = vld [vmem:[#allocation5 + $0x308] sm:$0xff] }
 0x4fd   :  { %v8724_v43 = vpop.f32.mrf.mxu0 }
 0x4fe   :  { %v1614_v51 = vmax.f32 %v1610_v24, 0.0  ;;  %v1613_v47 = vadd.f32 %v8724_v43, %v1522_v25  ;;  %v2157_v24 = vld [vmem:[#allocation5 + $0x300] sm:$0xff]  ;;  %v2156_v25 = vld [vmem:[#allocation5 + $0x2f0] sm:$0xff]  ;;  %v2155_v43 = vld [vmem:[#allocation5 + $0x2e8] sm:$0xff] }
 0x4ff   :  { %v1601_v27 = vpop.f32.mrf.mxu0 }
 0x500   :  { %v1612_v28 = vadd.f32 %v1601_v27, %v1521_v26  ;;  %8757 = vmatprep.mubr.f32.mxu1 %v1614_v51  ;;  %8795 = vmatprep.mubr.f32.mxu0 %v1614_v51  ;;  %v1617_v30 = vmax.f32 %v1613_v47, 0.0  ;;  %v2154_v51 = vld [vmem:[#allocation5 + $0x2d8] sm:$0xff]  ;;  %v2153_v26 = vld [vmem:[#allocation5 + $0x2d0] sm:$0xff]  ;;  %v2149_v27 = vld [vmem:[#allocation5 + $0x2a0] sm:$0xff] }
 0x501   :  { %8758 = vmatmul.mubr.f32.vlgmr.msra.gmra.mxu1 %v1615_v44  ;;  %8796 = vmatmul.mubr.f32.vlgmr.msra.gmra.mxu0 %v1615_v44  ;;  %v2152_v44 = vld [vmem:[#allocation5 + $0x2c0] sm:$0xff]  ;;  %v2151_v47 = vld [vmem:[#allocation5 + $0x2b8] sm:$0xff] }
 0x502   :  { %v1616_v29 = vmax.f32 %v1612_v28, 0.0  ;;  %1870 = vmatpush1.msra.mxu1 %v1838_v48  ;;  %v2148_v48 = vld [vmem:[#allocation5 + $0x290] sm:$0xff]  ;;  %v2147_v28 = vld [vmem:[#allocation5 + $0x288] sm:$0xff] }
 0x503   :  { %1871 = vmatprep.subr.mxu1 %v1837_v60  ;;  %v2146_v60 = vld [vmem:[#allocation5 + $0x278] sm:$0xff] }
 0x504   :  { %8760 = vmatprep.mubr.f32.mxu1 %v1616_v29  ;;  %8798 = vmatprep.mubr.f32.mxu0 %v1616_v29  ;;  %v2145_v29 = vld [vmem:[#allocation5 + $0x270] sm:$0xff] }
 0x505   :  { %8761 = vmatmul.mubr.f32.gmra.mxu1 %v1617_v30  ;;  %8799 = vmatmul.mubr.f32.gmra.mxu0 %v1617_v30 }
 0x506   :  { %1872 = vmatpush1.msra.mxu1 %v1836_v31  ;;  %1917 = vmatprep.mubr.f32.mxu1 %v12038_v7 }
 0x507   :  { %1873 = vmatprep.subr.mxu1 %v1835_v32  ;;  %8809 = vmatprep.mubr.msk.f32.mxu0 %vm421_vm0, %v9911_v8 }
 0x508   :  { %1874 = vmatpush1.msra.mxu1 %v1834_v33 }
 0x509   :  { %1875 = vmatprep.subr.mxu1 %v1833_v34 }
 0x50a   :  { %1876 = vmatpush1.msra.mxu1 %v1832_v35 }
 0x50b   :  { %1877 = vmatprep.subr.mxu1 %v1831_v36 }
 0x50c   :  { %1878 = vmatpush1.msra.mxu1 %v1830_v37 }
 0x50d   :  { %1879 = vmatprep.subr.mxu1 %v1829_v38 }
 0x50e   :  { %1880 = vmatpush1.msra.mxu1 %v1828_v39 }
 0x50f   :  { %1881 = vmatprep.subr.mxu1 %v1827_v40 }
 0x510   :  { %1882 = vmatpush1.msra.mxu1 %v1826_v41 }
 0x511   :  { %1883 = vmatprep.subr.mxu1 %v1825_v42 }
 0x512   :  { %1884 = vmatpush1.msra.mxu1 %v1824_v59  ;;  %v7520_v59 = vld [vmem:[#allocation3 + $0x120] ss:$0 sm:$0xff] }
 0x513   :  { %2189 = vmatprep.subr.mxu1 %v2160_v22 }
 0x5c1   :  { %v8759_v45 = vpop.f32.mrf.mxu1  ;;  %v8797_v53 = vpop.f32.mrf.mxu0 }
 0x5c2   :  { %v10079_v55 = vmax.f32 %v8759_v45, %v8797_v53 }
 0x5c3   :  { %v1700_v46 = vpop.f32.mrf.mxu1  ;;  %v1801_v63 = vpop.f32.mrf.mxu0 }
 0x5c4   :  { %v10074_v49 = vmax.f32 %v1700_v46, %v1801_v63 }
 0x5c5   :  { %v8762_v52 = vpop.f32.mrf.mxu1  ;;  %v8800_v54 = vpop.f32.mrf.mxu0 }
 0x5c6   :  { %7508 = vmatmul.mubr.msk.f32.vlgmr.msra.gmra.mxu1 %vm1840_vm14, %v10074_v49  ;;  %v10089_v62 = vmax.f32 %v8762_v52, %v8800_v54 }
 0x5c7   :  { %1923 = vmatprep.mubr.f32.mxu1 %v12038_v7  ;;  %v1710_v57 = vpop.f32.mrf.mxu1  ;;  %v1811_v58 = vpop.f32.mrf.mxu0  ;;  %2190 = vmatpush1.msra.mxu1 %v2159_v23 }
 0x5c8   :  { %v10084_v61 = vmax.f32 %v1710_v57, %v1811_v58  ;;  %2191 = vmatprep.subr.mxu1 %v2158_v56 }
 0x5c9   :  { %2192 = vmatpush1.msra.mxu1 %v2157_v24 }
 0x5ca   :  { %7509 = vmatmul.mubr.msk.f32.gmra.mxu1 %vm1840_vm14, %v10079_v55  ;;  %2193 = vmatprep.subr.mxu1 %v2156_v25 }
 0x5cb   :  { %1929 = vmatprep.mubr.f32.mxu1 %v12038_v7  ;;  %2194 = vmatpush1.msra.mxu1 %v2155_v43 }
 0x5cc   :  { %2195 = vmatprep.subr.mxu1 %v2154_v51 }
 0x5cd   :  { %2196 = vmatpush1.msra.mxu1 %v2153_v26  ;;  %v2580_v26 = vld [vmem:[#allocation3 + $0x1a0] sm:$0xff] }
 0x5ce   :  { %7510 = vmatmul.mubr.msk.f32.gmra.mxu1 %vm1840_vm14, %v10084_v61  ;;  %2197 = vmatprep.subr.mxu1 %v2152_v44  ;;  %v2472_v44 = vld [vmem:[#allocation3 + $0x148] sm:$0xff] }
 0x5cf   :  { %1935 = vmatprep.mubr.f32.mxu1 %v12038_v7  ;;  %2198 = vmatpush1.msra.mxu1 %v2151_v47  ;;  %v2577_v47 = vld [vmem:[#allocation3 + $0x188] sm:$0xff] }
 0x5d2   :  { %7511 = vmatmul.mubr.msk.f32.gmra.mxu1 %vm1840_vm14, %v10089_v62 }
 0x5d3   :  { %2237 = vmatprep.mubr.f32.mxu1 %v12038_v7 }
 0x686   :  { %v1919_v3 = vpop.f32.mrf.mxu1 }
 0x687   :  { %1946 = vrot.lane.b32.xlu0 %v1919_v3, %s9868_s0 }
 0x688   :  { %v1921_v6 = vpop.f32.mrf.mxu1 }
 0x68a   :  { %v1925_v12 = vpop.f32.mrf.mxu1 }
 0x68b   :  { %1948 = vrot.lane.b32.xlu0 %v1925_v12, %s9868_s0 }
 0x68c   :  { %v1927_v17 = vpop.f32.mrf.mxu1 }
 0x68e   :  { %v1931_v18 = vpop.f32.mrf.mxu1 }
 0x68f   :  { %1950 = vrot.lane.b32.xlu1 %v1931_v18, %s9868_s0 }
 0x690   :  { %v1933_v19 = vpop.f32.mrf.mxu1 }
 0x692   :  { %v1937_v20 = vpop.f32.mrf.mxu1 }
 0x693   :  { %1952 = vrot.lane.b32.xlu1 %v1937_v20, %s9868_s0  ;;  %8801 = vmatprep.subr.mxu0 %v1937_v20 }
 0x694   :  { %8802 = vmatpush3.msra.mxu0 %v1937_v20  ;;  %v1939_v21 = vpop.f32.mrf.mxu1 }
 0x695   :  { %8803 = vmatprep.subr.mxu0 %v1931_v18 }
 0x696   :  { %8804 = vmatpush3.msra.mxu0 %v1931_v18 }
 0x697   :  { %8805 = vmatprep.subr.mxu0 %v1925_v12 }
 0x698   :  { %8806 = vmatpush3.msra.mxu0 %v1925_v12 }
 0x699   :  { %8807 = vmatprep.subr.mxu0 %v1919_v3 }
 0x69a   :  { %8808 = vmatpush3.msra.mxu0 %v1919_v3 }
 0x69b   :  { %8810 = vmatmul.mubr.msk.f32.vlgmr.msra.gmra.mxu0 %vm421_vm0, %v9930_v13  ;;  %8815 = vmatprep.subr.mxu0 %v1939_v21 }
 0x69c   :  { %8816 = vmatpush3.msra.mxu0 %v1939_v21  ;;  %8812 = vmatprep.mubr.msk.f32.mxu0 %vm421_vm0, %v9933_v14 }
 0x69d   :  { %8817 = vmatprep.subr.mxu0 %v1933_v19 }
 0x69e   :  { %8818 = vmatpush3.msra.mxu0 %v1933_v19 }
 0x69f   :  { %8813 = vmatmul.mubr.msk.f32.gmra.mxu0 %vm421_vm0, %v9941_v15  ;;  %8819 = vmatprep.subr.mxu0 %v1927_v17 }
 0x6a0   :  { %8820 = vmatpush3.msra.mxu0 %v1927_v17  ;;  %8823 = vmatprep.mubr.msk.f32.mxu0 %vm421_vm0, %v9994_v50 }
 0x6a1   :  { %8821 = vmatprep.subr.mxu0 %v1921_v6 }
 0x6a2   :  { %8822 = vmatpush3.msra.mxu0 %v1921_v6 }
 0x6a3   :  { %8824 = vmatmul.mubr.msk.f32.vlgmr.msra.gmra.mxu0 %vm421_vm0, %v10010_v0 }
 0x6a4   :  { %8826 = vmatprep.mubr.msk.f32.mxu0 %vm421_vm0, %v10013_v5 }
 0x6a7   :  { %8827 = vmatmul.mubr.msk.f32.gmra.mxu0 %vm421_vm0, %v10021_v10 }
 0x6a8   :  { %8837 = vmatprep.mubr.msk.f32.mxu0 %vm421_vm0, %v9911_v8  ;;  %v2150_v8 = vld [vmem:[#allocation5 + $0x2a8] sm:$0xff] }
 0x6a9   :  { %2199 = vmatprep.subr.mxu1 %v2150_v8  ;;  %v2471_v8 = vld [vmem:[#allocation3 + $0x140] sm:$0xff] }
 0x6aa   :  { %2200 = vmatpush1.msra.mxu1 %v2149_v27  ;;  %v2576_v27 = vld [vmem:[#allocation3 + $0x180] sm:$0xff] }
 0x6ab   :  { %2201 = vmatprep.subr.mxu1 %v2148_v48  ;;  %v2470_v48 = vld [vmem:[#allocation3 + $0x138] sm:$0xff] }
 0x6ac   :  { %2202 = vmatpush1.msra.mxu1 %v2147_v28  ;;  %v2575_v28 = vld [vmem:[#allocation3 + $0x178] sm:$0xff] }
 0x6ad   :  { %2203 = vmatprep.subr.mxu1 %v2146_v60  ;;  %v2469_v60 = vld [vmem:[#allocation3 + $0x130] sm:$0xff] }
 0x6ae   :  { %2204 = vmatpush1.msra.mxu1 %v2145_v29  ;;  %v2574_v29 = vld [vmem:[#allocation3 + $0x170] sm:$0xff] }
 0x6f9   :  { %v1947_v31 = vpop.permute.xlu0 %1946 }
 0x6fd   :  { %v1949_v35 = vpop.permute.xlu0 %1948 }
 0x701   :  { %v1951_v39 = vpop.permute.xlu1 %1950 }
 0x705   :  { %v1953_v58 = vpop.permute.xlu1 %1952 }
 0x75b   :  { %v8811_v30 = vpop.f32.mrf.mxu0 }
 0x75c   :  { %v2030_v37 = vadd.f32 %v8811_v30, %v1949_v35  ;;  %v2674_v30 = vld [vmem:[#allocation3 + $0x1c8] sm:$0xff] }
 0x75d   :  { %v2024_v32 = vpop.f32.mrf.mxu0 }
 0x75e   :  { %v2025_v38 = vadd.f32 %v2024_v32, %v1947_v31 }
 0x75f   :  { %v8814_v33 = vpop.f32.mrf.mxu0 }
 0x760   :  { %v2040_v3 = vadd.f32 %v8814_v33, %v1953_v58 }
 0x761   :  { %v2034_v34 = vpop.f32.mrf.mxu0 }
 0x762   :  { %v2035_v53 = vadd.f32 %v2034_v34, %v1951_v39  ;;  %v7533_v39 = vld [vmem:[#allocation3 + $0x128] ss:$0 sm:$0xff] }
 0x763   :  { %v8825_v36 = vpop.f32.mrf.mxu0 }
 0x764   :  { %v2129_v41 = vadd.f32 %v8825_v36, %v2030_v37 }
 0x765   :  { %v2109_v40 = vpop.f32.mrf.mxu0 }
 0x766   :  { %v2128_v42 = vadd.f32 %v2109_v40, %v2025_v38  ;;  %v2138_v52 = vadd.f32 %v7520_v59, %v2129_v41 }
 0x767   :  { %v8828_v45 = vpop.f32.mrf.mxu0 }
 0x768   :  { %v2137_v46 = vadd.f32 %v7520_v59, %v2128_v42  ;;  %v2142_v6 = vmax.f32 %v2138_v52, 0.0  ;;  %v2131_v12 = vadd.f32 %v8828_v45, %v2040_v3 }
 0x769   :  { %v2119_v63 = vpop.f32.mrf.mxu0 }
 0x76a   :  { %v2141_v54 = vmax.f32 %v2137_v46, 0.0  ;;  %v2130_v57 = vadd.f32 %v2119_v63, %v2035_v53  ;;  %v2140_v18 = vadd.f32 %v7520_v59, %v2131_v12 }
 0x76c   :  { %7521 = vmatmul.mubr.msk.f32.vlgmr.msra.gmra.mxu1 %vm1840_vm14, %v2141_v54  ;;  %v2139_v17 = vadd.f32 %v7520_v59, %v2130_v57  ;;  %v2144_v20 = vmax.f32 %v2140_v18, 0.0 }
 0x76d   :  { %2243 = vmatprep.mubr.f32.mxu1 %v12038_v7 }
 0x76e   :  { %v2143_v19 = vmax.f32 %v2139_v17, 0.0 }
 0x770   :  { %7522 = vmatmul.mubr.msk.f32.gmra.mxu1 %vm1840_vm14, %v2142_v6 }
 0x771   :  { %2249 = vmatprep.mubr.f32.mxu1 %v12038_v7 }
 0x774   :  { %7523 = vmatmul.mubr.msk.f32.gmra.mxu1 %vm1840_vm14, %v2143_v19 }
 0x775   :  { %2255 = vmatprep.mubr.f32.mxu1 %v12038_v7 }
 0x778   :  { %7524 = vmatmul.mubr.msk.f32.gmra.mxu1 %vm1840_vm14, %v2144_v20 }
 0x82c   :  { %v2239_v21 = vpop.f32.mrf.mxu1 }
 0x82d   :  { %2266 = vrot.lane.b32.xlu0 %v2239_v21, %s9868_s0 }
 0x82e   :  { %v2241_v22 = vpop.f32.mrf.mxu1 }
 0x830   :  { %v2245_v23 = vpop.f32.mrf.mxu1 }
 0x831   :  { %2268 = vrot.lane.b32.xlu1 %v2245_v23, %s9868_s0 }
 0x832   :  { %v2247_v56 = vpop.f32.mrf.mxu1 }
 0x834   :  { %v2251_v24 = vpop.f32.mrf.mxu1 }
 0x835   :  { %2270 = vrot.lane.b32.xlu0 %v2251_v24, %s9868_s0 }
 0x836   :  { %v2253_v25 = vpop.f32.mrf.mxu1 }
 0x838   :  { %v2257_v43 = vpop.f32.mrf.mxu1 }
 0x839   :  { %2272 = vrot.lane.b32.xlu1 %v2257_v43, %s9868_s0  ;;  %8829 = vmatprep.subr.mxu0 %v2257_v43 }
 0x83a   :  { %8830 = vmatpush3.msra.mxu0 %v2257_v43  ;;  %v2259_v51 = vpop.f32.mrf.mxu1 }
 0x83b   :  { %8831 = vmatprep.subr.mxu0 %v2251_v24 }
 0x83c   :  { %8832 = vmatpush3.msra.mxu0 %v2251_v24 }
 0x83d   :  { %8833 = vmatprep.subr.mxu0 %v2245_v23 }
 0x83e   :  { %8834 = vmatpush3.msra.mxu0 %v2245_v23 }
 0x83f   :  { %8835 = vmatprep.subr.mxu0 %v2239_v21 }
 0x840   :  { %8836 = vmatpush3.msra.mxu0 %v2239_v21 }
 0x841   :  { %8838 = vmatmul.mubr.msk.f32.vlgmr.msra.gmra.mxu0 %vm421_vm0, %v9930_v13  ;;  %8843 = vmatprep.subr.mxu0 %v2259_v51  ;;  %v2476_v13 = vld [vmem:[#allocation3 + $0x168] sm:$0xff] }
 0x842   :  { %8844 = vmatpush3.msra.mxu0 %v2259_v51  ;;  %8840 = vmatprep.mubr.msk.f32.mxu0 %vm421_vm0, %v9933_v14  ;;  %v2581_v14 = vld [vmem:[#allocation3 + $0x1a8] sm:$0xff] }
 0x843   :  { %8845 = vmatprep.subr.mxu0 %v2253_v25  ;;  %8857 = vmatprep.subr.mxu1 %v2476_v13 }
 0x844   :  { %8846 = vmatpush3.msra.mxu0 %v2253_v25  ;;  %8858 = vmatpush3.msra.mxu1 %v2476_v13 }
 0x845   :  { %8841 = vmatmul.mubr.msk.f32.gmra.mxu0 %vm421_vm0, %v9941_v15  ;;  %8847 = vmatprep.subr.mxu0 %v2247_v56  ;;  %v2475_v15 = vld [vmem:[#allocation3 + $0x160] sm:$0xff] }
 0x846   :  { %8848 = vmatpush3.msra.mxu0 %v2247_v56  ;;  %8851 = vmatprep.mubr.msk.f32.mxu0 %vm421_vm0, %v9994_v50  ;;  %v2474_v50 = vld [vmem:[#allocation3 + $0x158] sm:$0xff]  ;;  %v2671_v56 = vld [vmem:[#allocation3 + $0x1b0] sm:$0xff] }
 0x847   :  { %8849 = vmatprep.subr.mxu0 %v2241_v22  ;;  %8859 = vmatprep.subr.mxu1 %v2475_v15 }
 0x848   :  { %8850 = vmatpush3.msra.mxu0 %v2241_v22  ;;  %8860 = vmatpush3.msra.mxu1 %v2475_v15 }
 0x849   :  { %8852 = vmatmul.mubr.msk.f32.vlgmr.msra.gmra.mxu0 %vm421_vm0, %v10010_v0  ;;  %8879 = vmatprep.subr.mxu0 %v2581_v14  ;;  %v2579_v0 = vld [vmem:[#allocation3 + $0x198] sm:$0xff] }
 0x84a   :  { %8854 = vmatprep.mubr.msk.f32.mxu0 %vm421_vm0, %v10013_v5  ;;  %8880 = vmatpush3.msra.mxu0 %v2581_v14  ;;  %v2473_v5 = vld [vmem:[#allocation3 + $0x150] sm:$0xff] }
 0x84b   :  { %8881 = vmatprep.subr.mxu0 %v2580_v26  ;;  %8861 = vmatprep.subr.mxu1 %v2474_v50 }
 0x84c   :  { %8882 = vmatpush3.msra.mxu0 %v2580_v26  ;;  %8862 = vmatpush3.msra.mxu1 %v2474_v50 }
 0x84d   :  { %8855 = vmatmul.mubr.msk.f32.gmra.mxu0 %vm421_vm0, %v10021_v10  ;;  %8883 = vmatprep.subr.mxu0 %v2579_v0  ;;  %v2578_v10 = vld [vmem:[#allocation3 + $0x190] sm:$0xff] }
 0x84e   :  { %8884 = vmatpush3.msra.mxu0 %v2579_v0  ;;  %8863 = vmatprep.subr.mxu1 %v2473_v5 }
 0x84f   :  { %8885 = vmatprep.subr.mxu0 %v2578_v10  ;;  %8864 = vmatpush3.msra.mxu1 %v2473_v5 }
 0x850   :  { %8886 = vmatpush3.msra.mxu0 %v2578_v10  ;;  %8865 = vmatprep.subr.mxu1 %v2472_v44 }
 0x851   :  { %8887 = vmatprep.subr.mxu0 %v2577_v47  ;;  %8866 = vmatpush3.msra.mxu1 %v2472_v44  ;;  %v90_v44 = vshra.s32 %v9895_v1, 5 }
 0x852   :  { %8888 = vmatpush3.msra.mxu0 %v2577_v47  ;;  %8867 = vmatprep.subr.mxu1 %v2471_v8 }
 0x853   :  { %8889 = vmatprep.subr.mxu0 %v2576_v27  ;;  %8868 = vmatpush3.msra.mxu1 %v2471_v8  ;;  %v102_v47 = vadd.s32 1, %v90_v44 }
 0x854   :  { %8890 = vmatpush3.msra.mxu0 %v2576_v27  ;;  %8869 = vmatprep.subr.mxu1 %v2470_v48  ;;  %v78_v27 = vand.u32 31, %v9895_v1 }
 0x855   :  { %8891 = vmatprep.subr.mxu0 %v2575_v28  ;;  %8870 = vmatpush3.msra.mxu1 %v2470_v48  ;;  %v114_v8 = vmul.u32 2, %v102_v47  ;;  %v10237_v47 = vadd.s32 88, %v9895_v1 }
 0x856   :  { %8892 = vmatpush3.msra.mxu0 %v2575_v28  ;;  %8871 = vmatprep.subr.mxu1 %v2469_v60 }
 0x857   :  { %8893 = vmatprep.subr.mxu0 %v2574_v29  ;;  %8872 = vmatpush3.msra.mxu1 %v2469_v60  ;;  %v126_v48 = vadd.s32 %v114_v8, %v9897_v2  ;;  %v91_v60 = vshra.s32 %v9902_v4, 5 }
 0x858   :  { %8894 = vmatpush3.msra.mxu0 %v2574_v29  ;;  %8901 = vmatprep.subr.mxu1 %v2674_v30  ;;  %v92_v29 = vshra.s32 %v9914_v9, 5 }
 0x859   :  { %vm138_vm15 = vcmp.eq.s32.totalorder %v78_v27, %v126_v48 }
 0x85a   :  { %v10171_v28 = vsel %vm138_vm15, 1.0, %v12038_v7 }
 0x85b   :  { %12245 = vst [vmem:[#allocation18_spill] sm:$0xff] %v10171_v28 }
 0x89f   :  { %v2267_v37 = vpop.permute.xlu0 %2266 }
 0x8a3   :  { %v2269_v34 = vpop.permute.xlu1 %2268 }
 0x8a7   :  { %v2271_v63 = vpop.permute.xlu0 %2270 }
 0x8ab   :  { %v2273_v42 = vpop.permute.xlu1 %2272 }
 0x901   :  { %v8839_v31 = vpop.f32.mrf.mxu0 }
 0x902   :  { %v2350_v36 = vadd.f32 %v8839_v31, %v2269_v34  ;;  %v103_v31 = vadd.s32 1, %v91_v60  ;;  %v10182_v34 = vadd.s32 40, %v9895_v1 }
 0x903   :  { %v2344_v32 = vpop.f32.mrf.mxu0 }
 0x904   :  { %v2345_v40 = vadd.f32 %v2344_v32, %v2267_v37  ;;  %v104_v32 = vadd.s32 1, %v92_v29  ;;  %v115_v37 = vmul.u32 2, %v103_v31  ;;  %v83_v60 = vand.u32 31, %v10182_v34 }
 0x905   :  { %v8842_v33 = vpop.f32.mrf.mxu0 }
 0x906   :  { %v2360_v45 = vadd.f32 %v8842_v33, %v2273_v42  ;;  %v93_v33 = vshra.s32 %v9923_v11, 5 }
 0x907   :  { %v2354_v35 = vpop.f32.mrf.mxu0 }
 0x908   :  { %v2355_v54 = vadd.f32 %v2354_v35, %v2271_v63 }
 0x909   :  { %v8853_v38 = vpop.f32.mrf.mxu0 }
 0x90a   :  { %v2449_v41 = vadd.f32 %v8853_v38, %v2350_v36  ;;  %v10186_v36 = vadd.s32 48, %v9895_v1  ;;  %v116_v38 = vmul.u32 2, %v104_v32 }
 0x90b   :  { %v2429_v59 = vpop.f32.mrf.mxu0 }
 0x90c   :  { %v2458_v53 = vadd.f32 %v7533_v39, %v2449_v41  ;;  %v2448_v46 = vadd.f32 %v2429_v59, %v2345_v40  ;;  %v95_v40 = vshra.s32 %v10182_v34, 5  ;;  %v96_v42 = vshra.s32 %v10186_v36, 5 }
 0x90d   :  { %v8856_v52 = vpop.f32.mrf.mxu0  ;;  %v10191_v59 = vadd.s32 56, %v9895_v1 }
 0x90e   :  { %v2457_v57 = vadd.f32 %v7533_v39, %v2448_v46  ;;  %v2451_v58 = vadd.f32 %v8856_v52, %v2360_v45  ;;  %v2462_v3 = vadd.f32 %v2458_v53, %v10079_v55  ;;  %v79_v45 = vand.u32 31, %v9902_v4 }
 0x90f   :  { %v2439_v6 = vpop.f32.mrf.mxu0  ;;  %v127_v53 = vadd.s32 %v115_v37, %v9897_v2  ;;  %v10196_v46 = vadd.s32 64, %v9895_v1  ;;  %v80_v52 = vand.u32 31, %v9914_v9 }
 0x910   :  { %v2461_v12 = vadd.f32 %v2457_v57, %v10074_v49  ;;  %v2460_v17 = vadd.f32 %v7533_v39, %v2451_v58  ;;  %v2450_v18 = vadd.f32 %v2439_v6, %v2355_v54  ;;  %v2466_v21 = vmax.f32 %v2462_v3, 0.0 }
 0x911   :  { %v128_v54 = vadd.s32 %v116_v38, %v9897_v2  ;;  %v107_v3 = vadd.s32 1, %v95_v40  ;;  %vm10210_vm1 = vcmp.eq.s32.totalorder %v79_v45, %v127_v53  ;;  %v101_v38 = vshra.s32 %v10237_v47, 5 }
 0x912   :  { %v2465_v19 = vmax.f32 %v2461_v12, 0.0  ;;  %v2459_v20 = vadd.f32 %v7533_v39, %v2450_v18  ;;  %v2464_v22 = vadd.f32 %v2460_v17, %v10089_v62  ;;  %v2672_v62 = vld [vmem:[#allocation3 + $0x1b8] sm:$0xff]  ;;  %v105_v39 = vadd.s32 1, %v93_v33 }
 0x913   :  { %v108_v17 = vadd.s32 1, %v96_v42  ;;  %v97_v18 = vshra.s32 %v10191_v59, 5  ;;  %vm10217_vm2 = vcmp.eq.s32.totalorder %v80_v52, %v128_v54  ;;  %v10243_v8 = vsel %vm10210_vm1, 1.0, %v12038_v7 }
 0x914   :  { %v2463_v23 = vadd.f32 %v2459_v20, %v10084_v61  ;;  %8873 = vmatprep.mubr.msk.f32.mxu1 %vm1840_vm14, %v2465_v19  ;;  %8895 = vmatprep.mubr.msk.f32.mxu0 %vm1840_vm14, %v2465_v19  ;;  %v2468_v49 = vmax.f32 %v2464_v22, 0.0  ;;  %v2673_v61 = vld [vmem:[#allocation3 + $0x1c0] sm:$0xff]  ;;  %v117_v57 = vmul.u32 2, %v105_v39  ;;  %v10207_v19 = vadd.s32 72, %v9895_v1  ;;  %12250 = vst [vmem:[#allocation19_spill] sm:$0xff] %v10243_v8 }
 0x915   :  { %8874 = vmatmul.mubr.msk.f32.vlgmr.msra.gmra.mxu1 %vm1840_vm14, %v2466_v21  ;;  %8896 = vmatmul.mubr.msk.f32.vlgmr.msra.gmra.mxu0 %vm1840_vm14, %v2466_v21  ;;  %v98_v22 = vshra.s32 %v10196_v46, 5  ;;  %v10250_v48 = vsel %vm10217_vm2, 1.0, %v12038_v7  ;;  %v84_v33 = vand.u32 31, %v10186_v36  ;;  %v85_v42 = vand.u32 31, %v10191_v59 }
 0x916   :  { %v2467_v55 = vmax.f32 %v2463_v23, 0.0  ;;  %8902 = vmatpush3.msra.mxu1 %v2674_v30  ;;  %v10178_v30 = vadd.s32 32, %v9895_v1  ;;  %12251 = vst [vmem:[#allocation20_spill] sm:$0xff] %v10250_v48  ;;  %v86_v52 = vand.u32 31, %v10196_v46  ;;  %v87_v21 = vand.u32 31, %v10207_v19 }
 0x917   :  { %8903 = vmatprep.subr.mxu1 %v2673_v61  ;;  %v110_v44 = vadd.s32 1, %v98_v22 }
 0x918   :  { %8876 = vmatprep.mubr.msk.f32.mxu1 %vm1840_vm14, %v2467_v55  ;;  %8898 = vmatprep.mubr.msk.f32.mxu0 %vm1840_vm14, %v2467_v55  ;;  %v94_v35 = vshra.s32 %v10178_v30, 5 }
 0x919   :  { %8877 = vmatmul.mubr.msk.f32.gmra.mxu1 %vm1840_vm14, %v2468_v49  ;;  %8899 = vmatmul.mubr.msk.f32.gmra.mxu0 %vm1840_vm14, %v2468_v49  ;;  %v81_v49 = vand.u32 31, %v9923_v11  ;;  %v122_v37 = vmul.u32 2, %v110_v44 }
 0x91a   :  { %8904 = vmatpush3.msra.mxu1 %v2673_v61  ;;  %8923 = vmatprep.mubr.msk.f32.mxu0 %vm421_vm0, %v10171_v28  ;;  %v106_v41 = vadd.s32 1, %v94_v35  ;;  %v129_v61 = vadd.s32 %v117_v57, %v9897_v2  ;;  %v113_v57 = vadd.s32 1, %v101_v38 }
 0x91b   :  { %8905 = vmatprep.subr.mxu1 %v2672_v62  ;;  %v134_v54 = vadd.s32 %v122_v37, %v9897_v2 }
 0x91c   :  { %8906 = vmatpush3.msra.mxu1 %v2672_v62  ;;  %v118_v12 = vmul.u32 2, %v106_v41  ;;  %v10224_v62 = vadd.s32 80, %v9895_v1  ;;  %vm141_vm3 = vcmp.eq.s32.totalorder %v81_v49, %v129_v61  ;;  %v125_v49 = vmul.u32 2, %v113_v57  ;;  %v3020_v57 = vld [vmem:[#allocation3 + $0x208] sm:$0xff] }
 0x91d   :  { %8907 = vmatprep.subr.mxu1 %v2671_v56  ;;  %v10263_v40 = vsel %vm141_vm3, 1.0, %v12038_v7  ;;  %vm146_vm8 = vcmp.eq.s32.totalorder %v86_v52, %v134_v54  ;;  %v3021_v52 = vld [vmem:[#allocation3 + $0x210] sm:$0xff]  ;;  %v3187_v54 = vld [vmem:[#allocation3 + $0x258] sm:$0xff] }
 0x91e   :  { %8908 = vmatpush3.msra.mxu1 %v2671_v56  ;;  %v100_v27 = vshra.s32 %v10224_v62, 5  ;;  %12252 = vst [vmem:[#allocation21_spill] sm:$0xff] %v10263_v40  ;;  %v137_v44 = vadd.s32 %v125_v49, %v9897_v2  ;;  %v3016_v49 = vld [vmem:[#allocation3 + $0x1e8] sm:$0xff] }
 0x920   :  { %v112_v39 = vadd.s32 1, %v100_v27 }
 0x9d5   :  { %v8875_v24 = vpop.f32.mrf.mxu1  ;;  %v8897_v25 = vpop.f32.mrf.mxu0 }
 0x9d6   :  { %v10153_v14 = vmax.f32 %v8875_v24, %v8897_v25  ;;  %v82_v24 = vand.u32 31, %v10178_v30  ;;  %v119_v25 = vmul.u32 2, %v107_v3  ;;  %v124_v3 = vmul.u32 2, %v112_v39 }
 0x9d7   :  { %v2555_v43 = vpop.f32.mrf.mxu1  ;;  %v2648_v51 = vpop.f32.mrf.mxu0 }
 0x9d8   :  { %v10151_v13 = vmax.f32 %v2555_v43, %v2648_v51  ;;  %12242 = vst [vmem:[#allocation15_spill] sm:$0xff] %v10153_v14  ;;  %v130_v51 = vadd.s32 %v118_v12, %v9897_v2  ;;  %v131_v29 = vadd.s32 %v119_v25, %v9897_v2 }
 0x9d9   :  { %v8878_v15 = vpop.f32.mrf.mxu1  ;;  %v8900_v26 = vpop.f32.mrf.mxu0 }
 0x9da   :  { %12241 = vst [vmem:[#allocation14_spill] sm:$0xff] %v10151_v13  ;;  %8909 = vmatprep.mubr.msk.f32.mxu1 %vm421_vm0, %v10151_v13  ;;  %v10161_v10 = vmax.f32 %v8878_v15, %v8900_v26  ;;  %v120_v15 = vmul.u32 2, %v108_v17  ;;  %v109_v26 = vadd.s32 1, %v97_v18  ;;  %vm142_vm4 = vcmp.eq.s32.totalorder %v82_v24, %v130_v51 }
 0x9db   :  { %v2565_v50 = vpop.f32.mrf.mxu1  ;;  %v2658_v0 = vpop.f32.mrf.mxu0  ;;  %8910 = vmatmul.mubr.msk.f32.vlgmr.msra.gmra.mxu1 %vm421_vm0, %v10153_v14  ;;  %v10266_v41 = vsel %vm142_vm4, 1.0, %v12038_v7  ;;  %vm143_vm5 = vcmp.eq.s32.totalorder %v83_v60, %v131_v29  ;;  %v136_v24 = vadd.s32 %v124_v3, %v9897_v2  ;;  %v3019_v3 = vld [vmem:[#allocation3 + $0x200] sm:$0xff] }
 0x9dc   :  { %v10159_v5 = vmax.f32 %v2565_v50, %v2658_v0  ;;  %12244 = vst [vmem:[#allocation17_spill] sm:$0xff] %v10161_v10  ;;  %v99_v50 = vshra.s32 %v10207_v19, 5  ;;  %v121_v31 = vmul.u32 2, %v109_v26  ;;  %v132_v35 = vadd.s32 %v120_v15, %v9897_v2  ;;  %12253 = vst [vmem:[#allocation22_spill] sm:$0xff] %v10266_v41 }
 0x9dd   :  { %v10277_v17 = vsel %vm143_vm5, 1.0, %v12038_v7  ;;  %v10296_v26 = vsel %vm146_vm8, 1.0, %v12038_v7 }
 0x9de   :  { %12243 = vst [vmem:[#allocation16_spill] sm:$0xff] %v10159_v5  ;;  %8912 = vmatprep.mubr.msk.f32.mxu1 %vm421_vm0, %v10159_v5  ;;  %v111_v32 = vadd.s32 1, %v99_v50  ;;  %v133_v45 = vadd.s32 %v121_v31, %v9897_v2  ;;  %vm144_vm6 = vcmp.eq.s32.totalorder %v84_v33, %v132_v35  ;;  %12254 = vst [vmem:[#allocation23_spill] sm:$0xff] %v10277_v17 }
 0x9df   :  { %8913 = vmatmul.mubr.msk.f32.gmra.mxu1 %vm421_vm0, %v10161_v10  ;;  %12257 = vst [vmem:[#allocation26_spill] sm:$0xff] %v10296_v26  ;;  %v10592_v10 = vadd.s32 216, %v9895_v1 }
 0x9e0   :  { %v123_v53 = vmul.u32 2, %v111_v32  ;;  %vm145_vm7 = vcmp.eq.s32.totalorder %v85_v42, %v133_v45  ;;  %v3022_v45 = vld [vmem:[#allocation3 + $0x218] sm:$0xff] }
 0x9e1   :  { %v10293_v15 = vsel %vm145_vm7, 1.0, %v12038_v7  ;;  %8941 = vmatprep.subr.mxu1 %v3022_v45  ;;  %12303 = vst [vmem:[#allocation71_spill] sm:$0xff] %v10592_v10 }
 0x9e2   :  { %v135_v22 = vadd.s32 %v123_v53, %v9897_v2  ;;  %12256 = vst [vmem:[#allocation25_spill] sm:$0xff] %v10293_v15  ;;  %v3188_v53 = vld [vmem:[#allocation3 + $0x260] sm:$0xff]  ;;  %8942 = vmatpush3.msra.mxu1 %v3022_v45  ;;  %v12037_v45 = vsub.s32 0, %v9895_v1 }
 0x9e3   :  { %8943 = vmatprep.subr.mxu1 %v3021_v52 }
 0x9e4   :  { %vm147_vm10 = vcmp.eq.s32.totalorder %v87_v21, %v135_v22  ;;  %8944 = vmatpush3.msra.mxu1 %v3021_v52  ;;  %v3184_v21 = vld [vmem:[#allocation3 + $0x240] sm:$0xff]  ;;  %v3017_v22 = vld [vmem:[#allocation3 + $0x1f0] sm:$0xff] }
 0x9e5   :  { %v10305_v27 = vsel %vm147_vm10, 1.0, %v12038_v7  ;;  %8945 = vmatprep.subr.mxu1 %v3020_v57 }
 0x9e6   :  { %12258 = vst [vmem:[#allocation27_spill] sm:$0xff] %v10305_v27  ;;  %8946 = vmatpush3.msra.mxu1 %v3020_v57 }
 0x9e7   :  { %8947 = vmatprep.subr.mxu1 %v3019_v3 }
 0x9e8   :  { %8948 = vmatpush3.msra.mxu1 %v3019_v3 }
 0xa9b   :  { %v10198_v63 = vpop.f32.mrf.mxu1 }
 0xa9c   :  { %v7712_v58 = vmul.f32 -1.442695, %v10198_v63 }
 0xa9d   :  { %v10203_v6 = vpop.f32.mrf.mxu1 }
 0xa9e   :  { %9576 = vpow2.f32 %v7712_v58  ;;  %v7711_v20 = vmul.f32 -1.442695, %v10203_v6 }
 0xa9f   :  { %v10215_v23 = vpop.f32.mrf.mxu1 }
 0xaa0   :  { %9578 = vpow2.f32 %v7711_v20  ;;  %v7714_v56 = vmul.f32 -1.442695, %v10215_v23  ;;  %8915 = vmatprep.subr.mxu0 %v10215_v23  ;;  %v10282_v20 = vsel %vm144_vm6, 1.0, %v12038_v7 }
 0xaa1   :  { %v10229_v43 = vpop.f32.mrf.mxu1  ;;  %8916 = vmatpush3.msra.mxu0 %v10215_v23  ;;  %12255 = vst [vmem:[#allocation24_spill] sm:$0xff] %v10282_v20 }
 0xaa2   :  { %9580 = vpow2.f32 %v7714_v56  ;;  %v7713_v0 = vmul.f32 -1.442695, %v10229_v43  ;;  %8917 = vmatprep.subr.mxu0 %v10229_v43  ;;  %v88_v56 = vand.u32 31, %v10224_v62 }
 0xaa3   :  { %8918 = vmatpush3.msra.mxu0 %v10229_v43 }
 0xaa4   :  { %9582 = vpow2.f32 %v7713_v0  ;;  %8919 = vmatprep.subr.mxu0 %v10198_v63  ;;  %v89_v0 = vand.u32 31, %v10237_v47  ;;  %vm148_vm11 = vcmp.eq.s32.totalorder %v88_v56, %v136_v24  ;;  %v3015_v56 = vld [vmem:[#allocation3 + $0x1e0] sm:$0xff]  ;;  %v3181_v24 = vld [vmem:[#allocation3 + $0x228] sm:$0xff] }
 0xaa5   :  { %8920 = vmatpush3.msra.mxu0 %v10198_v63  ;;  %v10308_v60 = vsel %vm148_vm11, 1.0, %v12038_v7 }
 0xaa6   :  { %8921 = vmatprep.subr.mxu0 %v10203_v6  ;;  %12259 = vst [vmem:[#allocation28_spill] sm:$0xff] %v10308_v60  ;;  %vm149_vm12 = vcmp.eq.s32.totalorder %v89_v0, %v137_v44  ;;  %v12034_v0 = vsub.s32 2, %v9895_v1 }
 0xaa7   :  { %8922 = vmatpush3.msra.mxu0 %v10203_v6  ;;  %v10315_v29 = vsel %vm149_vm12, 1.0, %v12038_v7 }
 0xaa8   :  { %8924 = vmatmul.mubr.msk.f32.vlgmr.msra.gmra.mxu0 %vm421_vm0, %v10243_v8  ;;  %12260 = vst [vmem:[#allocation29_spill] sm:$0xff] %v10315_v29  ;;  %8963 = vmatprep.subr.mxu0 %v3188_v53  ;;  %v10585_v8 = vadd.s32 208, %v9895_v1 }
 0xaa9   :  { %8926 = vmatprep.mubr.msk.f32.mxu0 %vm421_vm0, %v10250_v48  ;;  %8964 = vmatpush3.msra.mxu0 %v3188_v53 }
 0xaaa   :  { %8965 = vmatprep.subr.mxu0 %v3187_v54  ;;  %12301 = vst [vmem:[#allocation69_spill] sm:$0xff] %v10585_v8  ;;  %v323_v14 = vand.u32 7, %v10585_v8 }
 0xaab   :  { %v9577_v58 = vpop.eup %9576  ;;  %8966 = vmatpush3.msra.mxu0 %v3187_v54 }
 0xaac   :  { %v4940_v12 = vadd.f32 1.0, %v9577_v58  ;;  %8927 = vmatmul.mubr.msk.f32.gmra.mxu0 %vm421_vm0, %v10263_v40  ;;  %v3186_v58 = vld [vmem:[#allocation3 + $0x250] sm:$0xff]  ;;  %v10579_v40 = vadd.s32 200, %v9895_v1 }
 0xaad   :  { %v9579_v18 = vpop.eup %9578  ;;  %8929 = vmatprep.mubr.msk.f32.mxu0 %vm421_vm0, %v10266_v41  ;;  %8967 = vmatprep.subr.mxu0 %v3186_v58 }
 0xaae   :  { %9584 = vrcp.f32 %v4940_v12  ;;  %v4939_v55 = vadd.f32 1.0, %v9579_v18  ;;  %8968 = vmatpush3.msra.mxu0 %v3186_v58  ;;  %v3185_v12 = vld [vmem:[#allocation3 + $0x248] sm:$0xff]  ;;  %v3018_v18 = vld [vmem:[#allocation3 + $0x1f8] sm:$0xff]  ;;  %12300 = vst [vmem:[#allocation68_spill] sm:$0xff] %v10579_v40  ;;  %v322_v48 = vand.u32 7, %v10579_v40  ;;  %v10612_v40 = vadd.s32 232, %v9895_v1 }
 0xaaf   :  { %v9581_v61 = vpop.eup %9580  ;;  %8969 = vmatprep.subr.mxu0 %v3185_v12  ;;  %8949 = vmatprep.subr.mxu1 %v3018_v18 }
 0xab0   :  { %9586 = vrcp.f32 %v4939_v55  ;;  %v4942_v25 = vadd.f32 1.0, %v9581_v61  ;;  %8930 = vmatmul.mubr.msk.f32.gmra.mxu0 %vm421_vm0, %v10277_v17  ;;  %8950 = vmatpush3.msra.mxu1 %v3018_v18  ;;  %v3183_v55 = vld [vmem:[#allocation3 + $0x238] sm:$0xff]  ;;  %v3182_v61 = vld [vmem:[#allocation3 + $0x230] sm:$0xff]  ;;  %12307 = vst [vmem:[#allocation75_spill] sm:$0xff] %v10612_v40 }
 0xab1   :  { %v9583_v51 = vpop.eup %9582  ;;  %8932 = vmatprep.mubr.msk.f32.mxu0 %vm421_vm0, %v10282_v20  ;;  %8970 = vmatpush3.msra.mxu0 %v3185_v12 }
 0xab2   :  { %9588 = vrcp.f32 %v4942_v25  ;;  %v4941_v50 = vadd.f32 1.0, %v9583_v51  ;;  %8971 = vmatprep.subr.mxu0 %v3184_v21  ;;  %8951 = vmatprep.subr.mxu1 %v3017_v22  ;;  %v10327_v25 = vld [vmem:[#allocation3 + $0x270] sm:$0xff] }
 0xab3   :  { %8972 = vmatpush3.msra.mxu0 %v3184_v21  ;;  %8952 = vmatpush3.msra.mxu1 %v3017_v22 }
 0xab4   :  { %9590 = vrcp.f32 %v4941_v50  ;;  %8933 = vmatmul.mubr.msk.f32.gmra.mxu0 %vm421_vm0, %v10293_v15  ;;  %8973 = vmatprep.subr.mxu0 %v3183_v55 }
 0xab5   :  { %8935 = vmatprep.mubr.msk.f32.mxu0 %vm421_vm0, %v10296_v26  ;;  %8974 = vmatpush3.msra.mxu0 %v3183_v55  ;;  %v10538_v26 = vadd.s32 184, %v9895_v1 }
 0xab6   :  { %8953 = vmatprep.subr.mxu1 %v3016_v49  ;;  %8975 = vmatprep.subr.mxu0 %v3182_v61 }
 0xab7   :  { %8954 = vmatpush3.msra.mxu1 %v3016_v49  ;;  %8976 = vmatpush3.msra.mxu0 %v3182_v61  ;;  %12293 = vst [vmem:[#allocation61_spill] sm:$0xff] %v10538_v26  ;;  %v320_v17 = vand.u32 7, %v10538_v26  ;;  %v10632_v26 = vadd.s32 248, %v9895_v1 }
 0xab8   :  { %8936 = vmatmul.mubr.msk.f32.gmra.mxu0 %vm421_vm0, %v10305_v27  ;;  %8955 = vmatprep.subr.mxu1 %v3015_v56 }
 0xab9   :  { %8938 = vmatprep.mubr.msk.f32.mxu0 %vm421_vm0, %v10308_v60  ;;  %8977 = vmatprep.subr.mxu0 %v3181_v24  ;;  %v10523_v60 = vadd.s32 176, %v9895_v1  ;;  %12311 = vst [vmem:[#allocation79_spill] sm:$0xff] %v10632_v26 }
 0xaba   :  { %8956 = vmatpush3.msra.mxu1 %v3015_v56  ;;  %8978 = vmatpush3.msra.mxu0 %v3181_v24 }
 0xabb   :  { %v9585_v31 = vpop.eup %9584  ;;  %8985 = vmatprep.subr.mxu1 %v10327_v25  ;;  %12290 = vst [vmem:[#allocation58_spill] sm:$0xff] %v10523_v60  ;;  %v319_v15 = vand.u32 7, %v10523_v60 }
 0xabc   :  { %8939 = vmatmul.mubr.msk.f32.gmra.mxu0 %vm421_vm0, %v10315_v29  ;;  %v4952_v32 = vmul.f32 %v9585_v31, %v10198_v63  ;;  %v12033_v31 = vsub.s32 3, %v9895_v1 }
 0xabd   :  { %v9587_v33 = vpop.eup %9586 }
 0xabe   :  { %4961 = vrot.lane.b32.xlu1 %v4952_v32, %s9868_s0  ;;  %v4951_v35 = vmul.f32 %v9587_v33, %v10203_v6  ;;  %v12032_v32 = vsub.s32 1, %v9895_v1  ;;  %v2772_v33 = vld [vmem:[#allocation3 + $0x1d0] sm:$0xf] }
 0xabf   :  { %v9589_v37 = vpop.eup %9588  ;;  %v2969_v12 = vrot.slane %v2772_v33, %v12037_v45 }
 0xac0   :  { %4959 = vrot.lane.b32.xlu0 %v4951_v35, %s9868_s0  ;;  %v4954_v38 = vmul.f32 %v9589_v37, %v10215_v23  ;;  %v2945_v37 = vrot.slane %v2772_v33, %v12034_v0 }
 0xac1   :  { %v9591_v39 = vpop.eup %9590 }
 0xac2   :  { %4965 = vrot.lane.b32.xlu1 %v4954_v38, %s9868_s0  ;;  %v4953_v42 = vmul.f32 %v9591_v39, %v10229_v43  ;;  %v2937_v39 = vrot.slane %v2772_v33, %v12033_v31 }
 0xac4   :  { %4963 = vrot.lane.b32.xlu0 %v4953_v42, %s9868_s0  ;;  %v2957_v42 = vrot.slane %v2772_v33, %v12032_v32  ;;  %v2939_v57 = vmul.f32 %v10198_v63, %v2937_v39  ;;  %v2938_v22 = vmul.f32 %v2937_v39, %v10203_v6  ;;  %v2941_v61 = vmul.f32 %v10215_v23, %v2937_v39 }
 0xac5   :  { %v2940_v63 = vmul.f32 %v2937_v39, %v10229_v43 }
 0xb68   :  { %v8925_v51 = vpop.f32.mrf.mxu0 }
 0xb69   :  { %v2947_v52 = vmul.f32 %v8925_v51, %v2945_v37 }
 0xb6a   :  { %v2875_v50 = vpop.f32.mrf.mxu0 }
 0xb6b   :  { %v2946_v58 = vmul.f32 %v2945_v37, %v2875_v50  ;;  %v2951_v21 = vadd.f32 %v2947_v52, %v2939_v57 }
 0xb6c   :  { %v8928_v44 = vpop.f32.mrf.mxu0 }
 0xb6d   :  { %v2949_v55 = vmul.f32 %v8928_v44, %v2945_v37  ;;  %v2950_v32 = vadd.f32 %v2946_v58, %v2938_v22 }
 0xb6e   :  { %v2885_v35 = vpop.f32.mrf.mxu0 }
 0xb6f   :  { %v2948_v56 = vmul.f32 %v2945_v37, %v2885_v35  ;;  %v2953_v33 = vadd.f32 %v2949_v55, %v2941_v61 }
 0xb70   :  { %v8931_v38 = vpop.f32.mrf.mxu0 }
 0xb71   :  { %v2959_v3 = vmul.f32 %v8931_v38, %v2957_v42  ;;  %v7558_v38 = vld [vmem:[#allocation3 + $0x1d8] ss:$0 sm:$0xff]  ;;  %v2952_v6 = vadd.f32 %v2948_v56, %v2940_v63 }
 0xb72   :  { %v2895_v53 = vpop.f32.mrf.mxu0 }
 0xb73   :  { %v2958_v49 = vmul.f32 %v2957_v42, %v2895_v53  ;;  %v2963_v51 = vadd.f32 %v2959_v3, %v2951_v21 }
 0xb74   :  { %v8934_v54 = vpop.f32.mrf.mxu0 }
 0xb75   :  { %v2961_v31 = vmul.f32 %v8934_v54, %v2957_v42  ;;  %v2962_v45 = vadd.f32 %v2958_v49, %v2950_v32 }
 0xb76   :  { %v2905_v18 = vpop.f32.mrf.mxu0 }
 0xb77   :  { %v2960_v50 = vmul.f32 %v2957_v42, %v2905_v18  ;;  %v2965_v53 = vadd.f32 %v2961_v31, %v2953_v33  ;;  %v298_v33 = vand.u32 7, %v9902_v4 }
 0xb78   :  { %v8937_v24 = vpop.f32.mrf.mxu0 }
 0xb79   :  { %v2971_v0 = vmul.f32 %v8937_v24, %v2969_v12  ;;  %v2964_v37 = vadd.f32 %v2960_v50, %v2952_v6  ;;  %v299_v6 = vand.u32 7, %v9914_v9  ;;  %vm330_vm15 = vcmp.eq.s32.totalorder %v9897_v2, %v298_v33 }
 0xb7a   :  { %v2915_v16 = vpop.f32.mrf.mxu0  ;;  %v10458_v33 = vadd.s32 120, %v9895_v1 }
 0xb7b   :  { %v2975_v52 = vadd.f32 %v2971_v0, %v2963_v51  ;;  %v2970_v57 = vmul.f32 %v2969_v12, %v2915_v16  ;;  %v297_v51 = vand.u32 7, %v9895_v1  ;;  %vm331_vm1 = vcmp.eq.s32.totalorder %v9897_v2, %v299_v6 }
 0xb7c   :  { %v8940_v44 = vpop.f32.mrf.mxu0  ;;  %12277 = vst [vmem:[#allocation45_spill] sm:$0xff] %v10458_v33 }
 0xb7d   :  { %v2984_v7 = vadd.f32 %v7558_v38, %v2975_v52  ;;  %v2974_v23 = vadd.f32 %v2970_v57, %v2962_v45  ;;  %v2973_v35 = vmul.f32 %v8940_v44, %v2969_v12  ;;  %v3274_v57 = vld [vmem:[#allocation3 + $0x268] sm:$0xff]  ;;  %vm329_vm13 = vcmp.eq.s32.totalorder %v9897_v2, %v297_v51 }
 0xb7e   :  { %v2925_v58 = vpop.f32.mrf.mxu0 }
 0xb7f   :  { %v7560_v3 = vmul.f32 -1.442695, %v2984_v7  ;;  %v2983_v54 = vadd.f32 %v7558_v38, %v2974_v23  ;;  %v2977_v21 = vadd.f32 %v2973_v35, %v2965_v53  ;;  %v2972_v22 = vmul.f32 %v2969_v12, %v2925_v58 }
 0xb80   :  { %v12265_v23 = vmov 0.0  }
 0xb81   :  { %9592 = vpow2.f32 %v7560_v3  ;;  %v7559_v43 = vmul.f32 -1.442695, %v2983_v54  ;;  %v2986_v39 = vadd.f32 %v7558_v38, %v2977_v21  ;;  %v2976_v42 = vadd.f32 %v2972_v22, %v2964_v37 }
 0xb82   :  { %v10368_v35 = vsel %vm329_vm13, 1.0, %v12265_v23  ;;  %v300_v37 = vand.u32 7, %v9923_v11  ;;  %v10385_v58 = vsel %vm330_vm15, 1.0, %v12265_v23  ;;  %v10388_v3 = vsel %vm331_vm1, 1.0, %v12265_v23 }
 0xb83   :  { %9594 = vpow2.f32 %v7559_v43  ;;  %v7562_v32 = vmul.f32 -1.442695, %v2986_v39  ;;  %v2985_v0 = vadd.f32 %v7558_v38, %v2976_v42  ;;  %12266 = vst [vmem:[#allocation34_spill] sm:$0xff] %v10368_v35  ;;  %12267 = vst [vmem:[#allocation35_spill] sm:$0xff] %v10385_v58  ;;  %v303_v21 = vand.u32 7, %v10186_v36 }
 0xb84   :  { %12268 = vst [vmem:[#allocation36_spill] sm:$0xff] %v10388_v3  ;;  %vm332_vm2 = vcmp.eq.s32.totalorder %v9897_v2, %v300_v37  ;;  %v305_v42 = vand.u32 7, %v10196_v46  ;;  %v312_v37 = vand.u32 7, %v10458_v33 }
 0xb85   :  { %9596 = vpow2.f32 %v7562_v32  ;;  %v7561_v16 = vmul.f32 -1.442695, %v2985_v0  ;;  %v10399_v22 = vsel %vm332_vm2, 1.0, %v12265_v23  ;;  %vm335_vm5 = vcmp.eq.s32.totalorder %v9897_v2, %v303_v21 }
 0xb86   :  { %12269 = vst [vmem:[#allocation37_spill] sm:$0xff] %v10399_v22  ;;  %vm337_vm7 = vcmp.eq.s32.totalorder %v9897_v2, %v305_v42  ;;  %v10483_v21 = vadd.s32 144, %v9895_v1  ;;  %vm344_vm1 = vcmp.eq.s32.totalorder %v9897_v2, %v312_v37 }
 0xb87   :  { %9598 = vpow2.f32 %v7561_v16  ;;  %v306_v16 = vand.u32 7, %v10207_v19 }
 0xb88   :  { %12282 = vst [vmem:[#allocation50_spill] sm:$0xff] %v10483_v21 }
 0xb89   :  { %vm338_vm8 = vcmp.eq.s32.totalorder %v9897_v2, %v306_v16 }
 0xb8e   :  { %v9593_v31 = vpop.eup %9592 }
 0xb8f   :  { %v3000_v18 = vadd.f32 1.0, %v9593_v31  ;;  %v307_v31 = vand.u32 7, %v10224_v62 }
 0xb90   :  { %v9595_v45 = vpop.eup %9594 }
 0xb91   :  { %v2999_v55 = vadd.f32 1.0, %v9595_v45  ;;  %9600 = vrcp.f32 %v3000_v18  ;;  %v10423_v18 = vadd.s32 96, %v9895_v1  ;;  %vm339_vm10 = vcmp.eq.s32.totalorder %v9897_v2, %v307_v31 }
 0xb92   :  { %v9597_v49 = vpop.eup %9596  ;;  %v10453_v51 = vsel %vm339_vm10, 1.0, %v12265_v23  ;;  %v10498_v31 = vadd.s32 152, %v9895_v1  ;;  %vm352_vm10 = vcmp.eq.s32.totalorder %v9897_v2, %v320_v17 }
 0xb93   :  { %9602 = vrcp.f32 %v2999_v55  ;;  %v3002_v61 = vadd.f32 1.0, %v9597_v49  ;;  %v10433_v55 = vsel %vm337_vm7, 1.0, %v12265_v23  ;;  %v308_v49 = vand.u32 7, %v10237_v47  ;;  %12276 = vst [vmem:[#allocation44_spill] sm:$0xff] %v10453_v51 }
 0xb94   :  { %v9599_v56 = vpop.eup %9598  ;;  %12274 = vst [vmem:[#allocation42_spill] sm:$0xff] %v10433_v55  ;;  %12285 = vst [vmem:[#allocation53_spill] sm:$0xff] %v10498_v31  ;;  %v316_v37 = vand.u32 7, %v10498_v31 }
 0xb95   :  { %v3001_v12 = vadd.f32 1.0, %v9599_v56  ;;  %9604 = vrcp.f32 %v3002_v61  ;;  %v10438_v61 = vadd.s32 104, %v9895_v1  ;;  %v309_v56 = vand.u32 7, %v10423_v18 }
 0xb96   :  { %vm340_vm11 = vcmp.eq.s32.totalorder %v9897_v2, %v308_v49  ;;  %v315_v49 = vand.u32 7, %v10483_v21  ;;  %v10676_v21 = vadd.s32 128, %v9897_v2 }
 0xb97   :  { %9606 = vrcp.f32 %v3001_v12  ;;  %v10443_v12 = vadd.s32 112, %v9895_v1  ;;  %vm341_vm12 = vcmp.eq.s32.totalorder %v9897_v2, %v309_v56  ;;  %v10470_v6 = vsel %vm340_vm11, 1.0, %v12265_v23 }
 0xb98   :  { %12279 = vst [vmem:[#allocation47_spill] sm:$0xff] %v10470_v6  ;;  %v10503_v56 = vadd.s32 160, %v9895_v1  ;;  %12319 = vst [vmem:[#allocation87_spill] sm:$0xff] %v10676_v21 }
 0xb9a   :  { %12286 = vst [vmem:[#allocation54_spill] sm:$0xff] %v10503_v56  ;;  %v317_v29 = vand.u32 7, %v10503_v56 }
 0xb9e   :  { %v9601_v24 = vpop.eup %9600 }
 0xb9f   :  { %v10349_v38 = vmul.f32 %v9601_v24, %v2984_v7  ;;  %v10450_v24 = vsel %vm338_vm8, 1.0, %v12265_v23  ;;  %vm351_vm8 = vcmp.eq.s32.totalorder %v9897_v2, %v319_v15  ;;  %v10571_v15 = vsel %vm352_vm10, 1.0, %v12265_v23 }
 0xba0   :  { %v9603_v63 = vpop.eup %9602  ;;  %12275 = vst [vmem:[#allocation43_spill] sm:$0xff] %v10450_v24  ;;  %v10563_v41 = vsel %vm351_vm8, 1.0, %v12265_v23  ;;  %12298 = vst [vmem:[#allocation66_spill] sm:$0xff] %v10571_v15 }
 0xba1   :  { %v10347_v50 = vmul.f32 %v9603_v63, %v2983_v54  ;;  %12262 = vst [vmem:[#allocation31_spill] sm:$0xff] %v10349_v38  ;;  %v302_v54 = vand.u32 7, %v10182_v34  ;;  %v310_v63 = vand.u32 7, %v10438_v61  ;;  %12297 = vst [vmem:[#allocation65_spill] sm:$0xff] %v10563_v41 }
 0xba2   :  { %v9605_v52 = vpop.eup %9604 }
 0xba3   :  { %12261 = vst [vmem:[#allocation30_spill] sm:$0xff] %v10347_v50  ;;  %8957 = vmatprep.mubr.msk.f32.mxu1 %vm1840_vm14, %v10347_v50  ;;  %8979 = vmatprep.mubr.msk.f32.mxu0 %vm1840_vm14, %v10347_v50  ;;  %v10365_v53 = vmul.f32 %v9605_v52, %v2986_v39  ;;  %vm334_vm4 = vcmp.eq.s32.totalorder %v9897_v2, %v302_v54  ;;  %v304_v39 = vand.u32 7, %v10191_v59  ;;  %v311_v52 = vand.u32 7, %v10443_v12 }
 0xba4   :  { %v9607_v44 = vpop.eup %9606  ;;  %8958 = vmatmul.mubr.msk.f32.vlgmr.msra.gmra.mxu1 %vm1840_vm14, %v10349_v38  ;;  %8980 = vmatmul.mubr.msk.f32.vlgmr.msra.gmra.mxu0 %vm1840_vm14, %v10349_v38  ;;  %v10413_v32 = vsel %vm334_vm4, 1.0, %v12265_v23  ;;  %vm342_vm13 = vcmp.eq.s32.totalorder %v9897_v2, %v310_v63  ;;  %v10510_v63 = vsel %vm344_vm1, 1.0, %v12265_v23  ;;  %vm347_vm4 = vcmp.eq.s32.totalorder %v9897_v2, %v315_v49 }
 0xba5   :  { %v10362_v7 = vmul.f32 %v9607_v44, %v2985_v0  ;;  %8986 = vmatpush3.msra.mxu1 %v10327_v25  ;;  %12264 = vst [vmem:[#allocation33_spill] sm:$0xff] %v10365_v53  ;;  %v301_v25 = vand.u32 7, %v10178_v30  ;;  %12271 = vst [vmem:[#allocation39_spill] sm:$0xff] %v10413_v32  ;;  %v10416_v0 = vsel %vm335_vm5, 1.0, %v12265_v23  ;;  %vm336_vm6 = vcmp.eq.s32.totalorder %v9897_v2, %v304_v39 }
 0xba6   :  { %8987 = vmatprep.subr.mxu1 %v3274_v57  ;;  %12272 = vst [vmem:[#allocation40_spill] sm:$0xff] %v10416_v0  ;;  %v10430_v45 = vsel %vm336_vm6, 1.0, %v12265_v23  ;;  %v10473_v44 = vsel %vm341_vm12, 1.0, %v12265_v23  ;;  %vm343_vm15 = vcmp.eq.s32.totalorder %v9897_v2, %v311_v52  ;;  %v10490_v39 = vsel %vm342_vm13, 1.0, %v12265_v23  ;;  %12287 = vst [vmem:[#allocation55_spill] sm:$0xff] %v10510_v63 }
 0xba7   :  { %12263 = vst [vmem:[#allocation32_spill] sm:$0xff] %v10362_v7  ;;  %8960 = vmatprep.mubr.msk.f32.mxu1 %vm1840_vm14, %v10362_v7  ;;  %8982 = vmatprep.mubr.msk.f32.mxu0 %vm1840_vm14, %v10362_v7  ;;  %vm333_vm3 = vcmp.eq.s32.totalorder %v9897_v2, %v301_v25  ;;  %12273 = vst [vmem:[#allocation41_spill] sm:$0xff] %v10430_v45  ;;  %v10478_v25 = vadd.s32 136, %v9895_v1  ;;  %v10493_v42 = vsel %vm343_vm15, 1.0, %v12265_v23  ;;  %v10533_v27 = vsel %vm347_vm4, 1.0, %v12265_v23 }
 0xba8   :  { %8961 = vmatmul.mubr.msk.f32.gmra.mxu1 %vm1840_vm14, %v10365_v53  ;;  %8983 = vmatmul.mubr.msk.f32.gmra.mxu0 %vm1840_vm14, %v10365_v53  ;;  %v10402_v43 = vsel %vm333_vm3, 1.0, %v12265_v23  ;;  %12280 = vst [vmem:[#allocation48_spill] sm:$0xff] %v10473_v44  ;;  %12283 = vst [vmem:[#allocation51_spill] sm:$0xff] %v10490_v39  ;;  %vm348_vm5 = vcmp.eq.s32.totalorder %v9897_v2, %v316_v37  ;;  %vm349_vm6 = vcmp.eq.s32.totalorder %v9897_v2, %v317_v29 }
 0xba9   :  { %8988 = vmatpush3.msra.mxu1 %v3274_v57  ;;  %8989 = vmatprep.mubr.msk.f32.mxu1 %vm732_vm9, %v10368_v35  ;;  %12270 = vst [vmem:[#allocation38_spill] sm:$0xff] %v10402_v43  ;;  %v10463_v57 = vadd.s32 128, %v9895_v1  ;;  %12281 = vst [vmem:[#allocation49_spill] sm:$0xff] %v10478_v25  ;;  %v314_v16 = vand.u32 7, %v10478_v25  ;;  %v10547_v20 = vsel %vm348_vm5, 1.0, %v12265_v23  ;;  %v10550_v37 = vsel %vm349_vm6, 1.0, %v12265_v23 }
 0xbaa   :  { %12284 = vst [vmem:[#allocation52_spill] sm:$0xff] %v10493_v42  ;;  %12292 = vst [vmem:[#allocation60_spill] sm:$0xff] %v10533_v27  ;;  %vm354_vm12 = vcmp.eq.s32.totalorder %v9897_v2, %v322_v48  ;;  %vm355_vm13 = vcmp.eq.s32.totalorder %v9897_v2, %v323_v14  ;;  %v10605_v48 = vadd.s32 224, %v9895_v1  ;;  %v326_v14 = vand.u32 7, %v10612_v40 }
 0xbab   :  { %12278 = vst [vmem:[#allocation46_spill] sm:$0xff] %v10463_v57  ;;  %v313_v54 = vand.u32 7, %v10463_v57  ;;  %vm346_vm3 = vcmp.eq.s32.totalorder %v9897_v2, %v314_v16  ;;  %12294 = vst [vmem:[#allocation62_spill] sm:$0xff] %v10547_v20  ;;  %v10597_v13 = vsel %vm354_vm12, 1.0, %v12265_v23  ;;  %v10608_v28 = vsel %vm355_vm13, 1.0, %v12265_v23 }
 0xbac   :  { %8990 = vmatmul.mubr.msk.f32.vlgmr.msra.gmra.mxu1 %vm732_vm9, %v10385_v58  ;;  %v10530_v16 = vsel %vm346_vm3, 1.0, %v12265_v23  ;;  %12295 = vst [vmem:[#allocation63_spill] sm:$0xff] %v10550_v37  ;;  %12304 = vst [vmem:[#allocation72_spill] sm:$0xff] %v10597_v13 }
 0xbad   :  { %8992 = vmatprep.mubr.msk.f32.mxu1 %vm732_vm9, %v10388_v3  ;;  %vm345_vm2 = vcmp.eq.s32.totalorder %v9897_v2, %v313_v54  ;;  %v10518_v54 = vadd.s32 168, %v9895_v1  ;;  %12291 = vst [vmem:[#allocation59_spill] sm:$0xff] %v10530_v16  ;;  %12305 = vst [vmem:[#allocation73_spill] sm:$0xff] %v10605_v48 }
 0xbae   :  { %v10513_v52 = vsel %vm345_vm2, 1.0, %v12265_v23  ;;  %12306 = vst [vmem:[#allocation74_spill] sm:$0xff] %v10608_v28  ;;  %vm358_vm2 = vcmp.eq.s32.totalorder %v9897_v2, %v326_v14 }
 0xbaf   :  { %12288 = vst [vmem:[#allocation56_spill] sm:$0xff] %v10513_v52  ;;  %12289 = vst [vmem:[#allocation57_spill] sm:$0xff] %v10518_v54  ;;  %v318_v49 = vand.u32 7, %v10518_v54 }
 0xbb0   :  { %8993 = vmatmul.mubr.msk.f32.gmra.mxu1 %vm732_vm9, %v10399_v22 }
 0xbb1   :  { %8995 = vmatprep.mubr.msk.f32.mxu1 %vm732_vm9, %v10402_v43  ;;  %vm350_vm7 = vcmp.eq.s32.totalorder %v9897_v2, %v318_v49  ;;  %v10576_v49 = vadd.s32 192, %v9895_v1 }
 0xbb2   :  { %v10560_v29 = vsel %vm350_vm7, 1.0, %v12265_v23 }
 0xbb3   :  { %12296 = vst [vmem:[#allocation64_spill] sm:$0xff] %v10560_v29  ;;  %12299 = vst [vmem:[#allocation67_spill] sm:$0xff] %v10576_v49  ;;  %v321_v17 = vand.u32 7, %v10576_v49 }
 0xbb4   :  { %8996 = vmatmul.mubr.msk.f32.gmra.mxu1 %vm732_vm9, %v10413_v32 }
 0xbb5   :  { %8998 = vmatprep.mubr.msk.f32.mxu1 %vm732_vm9, %v10416_v0  ;;  %vm353_vm11 = vcmp.eq.s32.totalorder %v9897_v2, %v321_v17  ;;  %v324_v17 = vand.u32 7, %v10592_v10  ;;  %v325_v10 = vand.u32 7, %v10605_v48  ;;  %v10637_v48 = vsel %vm358_vm2, 1.0, %v12265_v23 }
 0xbb6   :  { %v10588_v5 = vsel %vm353_vm11, 1.0, %v12265_v23  ;;  %12312 = vst [vmem:[#allocation80_spill] sm:$0xff] %v10637_v48 }
 0xbb7   :  { %12302 = vst [vmem:[#allocation70_spill] sm:$0xff] %v10588_v5  ;;  %vm356_vm15 = vcmp.eq.s32.totalorder %v9897_v2, %v324_v17  ;;  %vm357_vm1 = vcmp.eq.s32.totalorder %v9897_v2, %v325_v10  ;;  %v10625_v17 = vadd.s32 240, %v9895_v1  ;;  %v328_v10 = vand.u32 7, %v10632_v26 }
 0xbb8   :  { %8999 = vmatmul.mubr.msk.f32.gmra.mxu1 %vm732_vm9, %v10430_v45  ;;  %v10617_v8 = vsel %vm356_vm15, 1.0, %v12265_v23  ;;  %v10628_v49 = vsel %vm357_vm1, 1.0, %v12265_v23  ;;  %v182_v26 = vshra.s32 %v9895_v1, 3 }
 0xbb9   :  { %9001 = vmatprep.mubr.msk.f32.mxu1 %vm732_vm9, %v10433_v55  ;;  %12308 = vst [vmem:[#allocation76_spill] sm:$0xff] %v10617_v8  ;;  %12309 = vst [vmem:[#allocation77_spill] sm:$0xff] %v10625_v17  ;;  %v327_v40 = vand.u32 7, %v10625_v17  ;;  %vm360_vm4 = vcmp.eq.s32.totalorder %v9897_v2, %v328_v10  ;;  %v7563_v10 = vld [vmem:[#allocation3 + $0x220] ss:$0 sm:$0xff] }
 0xbba   :  { %12310 = vst [vmem:[#allocation78_spill] sm:$0xff] %v10628_v49  ;;  %v10651_v60 = vsel %vm360_vm4, 1.0, %v12265_v23  ;;  %vm214_vm5 = vcmp.eq.s32.totalorder %v182_v26, %v9897_v2 }
 0xbbb   :  { %vm359_vm3 = vcmp.eq.s32.totalorder %v9897_v2, %v327_v40  ;;  %12314 = vst [vmem:[#allocation82_spill] sm:$0xff] %v10651_v60  ;;  %v10660_v40 = vsel %vm214_vm5, 1.0, %v12265_v23 }
 0xbbc   :  { %9002 = vmatmul.mubr.msk.f32.gmra.mxu1 %vm732_vm9, %v10450_v24  ;;  %v10645_v14 = vsel %vm359_vm3, 1.0, %v12265_v23  ;;  %12315 = vst [vmem:[#allocation83_spill] sm:$0xff] %v10660_v40  ;;  %9045 = vmatprep.mubr.msk.f32.mxu0 %vm421_vm0, %v10660_v40 }
 0xbbd   :  { %9004 = vmatprep.mubr.msk.f32.mxu1 %vm732_vm9, %v10453_v51  ;;  %12313 = vst [vmem:[#allocation81_spill] sm:$0xff] %v10645_v14 }
 0xbc0   :  { %9005 = vmatmul.mubr.msk.f32.gmra.mxu1 %vm732_vm9, %v10470_v6 }
 0xbc1   :  { %9007 = vmatprep.mubr.msk.f32.mxu1 %vm732_vm9, %v10473_v44 }
 0xbc4   :  { %9008 = vmatmul.mubr.msk.f32.gmra.mxu1 %vm732_vm9, %v10490_v39 }
 0xbc5   :  { %9010 = vmatprep.mubr.msk.f32.mxu1 %vm732_vm9, %v10493_v42 }
 0xbc8   :  { %9011 = vmatmul.mubr.msk.f32.gmra.mxu1 %vm732_vm9, %v10510_v63 }
 0xbc9   :  { %9013 = vmatprep.mubr.msk.f32.mxu1 %vm732_vm9, %v10513_v52 }
 0xbcc   :  { %9014 = vmatmul.mubr.msk.f32.gmra.mxu1 %vm732_vm9, %v10530_v16 }
 0xbcd   :  { %9016 = vmatprep.mubr.msk.f32.mxu1 %vm732_vm9, %v10533_v27 }
 0xbd0   :  { %9017 = vmatmul.mubr.msk.f32.gmra.mxu1 %vm732_vm9, %v10547_v20 }
 0xbd1   :  { %9019 = vmatprep.mubr.msk.f32.mxu1 %vm732_vm9, %v10550_v37 }
 0xbd4   :  { %9020 = vmatmul.mubr.msk.f32.gmra.mxu1 %vm732_vm9, %v10560_v29 }
 0xbd5   :  { %9022 = vmatprep.mubr.msk.f32.mxu1 %vm732_vm9, %v10563_v41 }
 0xbd8   :  { %9023 = vmatmul.mubr.msk.f32.gmra.mxu1 %vm732_vm9, %v10571_v15 }
 0xbd9   :  { %9025 = vmatprep.mubr.msk.f32.mxu1 %vm732_vm9, %v10588_v5 }
 0xbdc   :  { %9026 = vmatmul.mubr.msk.f32.gmra.mxu1 %vm732_vm9, %v10597_v13 }
 0xbdd   :  { %9028 = vmatprep.mubr.msk.f32.mxu1 %vm732_vm9, %v10608_v28 }
 0xbe0   :  { %9029 = vmatmul.mubr.msk.f32.gmra.mxu1 %vm732_vm9, %v10617_v8 }
 0xbe1   :  { %9031 = vmatprep.mubr.msk.f32.mxu1 %vm732_vm9, %v10628_v49 }
 0xbe4   :  { %9032 = vmatmul.mubr.msk.f32.gmra.mxu1 %vm732_vm9, %v10637_v48 }
 0xbe5   :  { %9034 = vmatprep.mubr.msk.f32.mxu1 %vm732_vm9, %v10645_v14 }
 0xbe8   :  { %9035 = vmatmul.mubr.msk.f32.gmra.mxu1 %vm732_vm9, %v10651_v60 }
 0xbe9   :  { %9101 = vmatprep.mubr.msk.f32.mxu1 %vm732_vm9, %v10368_v35 }
 0xc64   :  { %v8959_v17 = vpop.f32.mrf.mxu1  ;;  %v10664_v54 = vpop.f32.mrf.mxu0 }
 0xc65   :  { %12316 = vst [vmem:[#allocation84_spill] sm:$0xff] %v10664_v54  ;;  %v10666_v56 = vadd.f32 %v8959_v17, %v7563_v10 }
 0xc66   :  { %v3106_v60 = vpop.f32.mrf.mxu1  ;;  %v10668_v31 = vpop.f32.mrf.mxu0 }
 0xc67   :  { %12317 = vst [vmem:[#allocation85_spill] sm:$0xff] %v10668_v31  ;;  %v3130_v35 = vmin.f32 %v10666_v56, 20.0  ;;  %v10671_v1 = vadd.f32 %v7563_v10, %v3106_v60  ;;  %vm3126_vm1 = vcmp.gt.f32.partialorder %v10666_v56, 20.0 }
 0xc68   :  { %v8962_v26 = vpop.f32.mrf.mxu1  ;;  %v10673_v14 = vpop.f32.mrf.mxu0 }
 0xc69   :  { %12318 = vst [vmem:[#allocation86_spill] sm:$0xff] %v10673_v14  ;;  %v3135_v40 = vmul.f32 1.442695, %v3130_v35  ;;  %v3129_v48 = vmin.f32 %v10671_v1, 20.0  ;;  %v10679_v25 = vadd.f32 %v8962_v26, %v7563_v10  ;;  %9093 = vmatprep.subr.msk.mxu1 %vm732_vm9, %v10673_v14  ;;  %v394_v35 = vand.u32 7, %v10676_v21 }
 0xc6a   :  { %v3116_v17 = vpop.f32.mrf.mxu1  ;;  %v10683_v49 = vpop.f32.mrf.mxu0  ;;  %9094 = vmatpush3.xpose.msk.msra.mxu1 %vm732_vm9, %v10673_v14  ;;  %vm3125_vm4 = vcmp.gt.f32.partialorder %v10671_v1, 20.0 }
 0xc6b   :  { %12320 = vst [vmem:[#allocation88_spill] sm:$0xff] %v10683_v49  ;;  %9608 = vpow2.f32 %v3135_v40  ;;  %v3133_v60 = vmul.f32 1.442695, %v3129_v48  ;;  %v3132_v57 = vmin.f32 %v10679_v25, 20.0  ;;  %v10688_v8 = vadd.f32 %v7563_v10, %v3116_v17  ;;  %9095 = vmatprep.subr.msk.mxu1 %vm732_vm9, %v10683_v49 }
 0xc6c   :  { %v393_v48 = vand.u32 7, %v9897_v2  ;;  %v10699_v40 = vadd.s32 8, %v394_v35  ;;  %vm3128_vm8 = vcmp.gt.f32.partialorder %v10679_v25, 20.0 }
 0xc6d   :  { %9610 = vpow2.f32 %v3133_v60  ;;  %v3139_v26 = vmul.f32 1.442695, %v3132_v57  ;;  %v3131_v33 = vmin.f32 %v10688_v8, 20.0  ;;  %vm3127_vm13 = vcmp.gt.f32.partialorder %v10688_v8, 20.0 }
 0xc6e   :  { %9096 = vmatpush3.xpose.msk.msra.mxu1 %vm732_vm9, %v10683_v49  ;;  %12321 = vst [vmem:[#allocation89_spill] sm:$0xff] %v10699_v40  ;;  %v10705_v57 = vadd.s32 8, %v393_v48  ;;  %vm400_vm6 = vcmp.eq.s32.totalorder %v9902_v4, %v10699_v40 }
 0xc6f   :  { %9612 = vpow2.f32 %v3139_v26  ;;  %v3137_v14 = vmul.f32 1.442695, %v3131_v33  ;;  %9097 = vmatprep.subr.msk.mxu1 %vm732_vm9, %v10664_v54  ;;  %v12323_v33 = vmov 1.0  }
 0xc70   :  { %12322 = vst [vmem:[#allocation90_spill] sm:$0xff] %v10705_v57  ;;  %vm399_vm7 = vcmp.eq.s32.totalorder %v9902_v4, %v10705_v57 }
 0xc71   :  { %9614 = vpow2.f32 %v3137_v14 }
 0xc72   :  { %9098 = vmatpush3.xpose.msk.msra.mxu1 %vm732_vm9, %v10664_v54 }
 0xc73   :  { %9099 = vmatprep.subr.msk.mxu1 %vm732_vm9, %v10668_v31 }
 0xc76   :  { %9100 = vmatpush3.xpose.msk.msra.mxu1 %vm732_vm9, %v10668_v31 }
 0xc77   :  { %7704 = vmatprep.subr.msk.mxu1 %vm400_vm6, %v12323_v33 }
 0xc78   :  { %v9609_v14 = vpop.eup %9608 }
 0xc79   :  { %9102 = vmatmul.mubr.msk.f32.vlgmr.msra.gmra.mxu1 %vm732_vm9, %v10385_v58  ;;  %v3150_v10 = vadd.f32 1.0, %v9609_v14  ;;  %v3156_v58 = vand.u32 2147483647, %v9609_v14 }
 0xc7a   :  { %v10719_v17 = vpop.eup %9610  ;;  %9104 = vmatprep.mubr.msk.f32.mxu1 %vm732_vm9, %v10388_v3  ;;  %7705 = vmatpush1.msk.msra.mxu1 %vm399_vm7, %v12323_v33 }
 0xc7b   :  { %v3141_v60 = vadd.f32 1.0, %v10719_v17  ;;  %4734 = vmatprep.subr.mxu1 %v12265_v23  ;;  %9616 = vlog2.f32 %v3150_v10  ;;  %v3153_v10 = vmul.f32 -0.5, %v9609_v14  ;;  %vm10755_vm12 = vcmp.lt.f32.partialorder %v3156_v58, 0.0004427343 }
 0xc7c   :  { %v9613_v35 = vpop.eup %9612  ;;  %4735 = vmatpush1.msra.mxu1 %v12265_v23 }
 0xc7d   :  { %9105 = vmatmul.mubr.msk.f32.gmra.mxu1 %vm732_vm9, %v10399_v22  ;;  %v3168_v26 = vadd.f32 1.0, %v9613_v35  ;;  %9618 = vlog2.f32 %v3141_v60  ;;  %v3171_v40 = vmul.f32 -0.5, %v9613_v35 }
 0xc7e   :  { %v9615_v48 = vpop.eup %9614  ;;  %9107 = vmatprep.mubr.msk.f32.mxu1 %vm732_vm9, %v10402_v43 }
 0xc7f   :  { %9620 = vlog2.f32 %v3168_v26  ;;  %v3159_v57 = vadd.f32 1.0, %v9615_v48  ;;  %v3162_v33 = vmul.f32 -0.5, %v9615_v48  ;;  %v3172_v60 = vadd.f32 1.0, %v3171_v40 }
 0xc80   :  { %v3144_v26 = vmul.f32 -0.5, %v10719_v17  ;;  %v3165_v3 = vand.u32 2147483647, %v9615_v48 }
 0xc81   :  { %9108 = vmatmul.mubr.msk.f32.gmra.mxu1 %vm732_vm9, %v10413_v32  ;;  %9622 = vlog2.f32 %v3159_v57  ;;  %v3174_v57 = vand.u32 2147483647, %v9613_v35  ;;  %v3173_v40 = vmul.f32 %v9613_v35, %v3172_v60  ;;  %v193_v35 = vshra.s32 %v10237_v47, 3 }
 0xc82   :  { %9110 = vmatprep.mubr.msk.f32.mxu1 %vm732_vm9, %v10416_v0  ;;  %v3154_v0 = vadd.f32 1.0, %v3153_v10  ;;  %v3145_v49 = vadd.f32 1.0, %v3144_v26  ;;  %v3147_v10 = vand.u32 2147483647, %v10719_v17  ;;  %vm3166_vm11 = vcmp.lt.f32.partialorder %v3165_v3, 0.0004427343 }
 0xc83   :  { %vm3175_vm10 = vcmp.lt.f32.partialorder %v3174_v57, 0.0004427343  ;;  %v195_v60 = vshra.s32 %v10438_v61, 3  ;;  %v12335_v26 = vld [vmem:[#allocation74_spill] sm:$0xff] }
 0xc84   :  { %vm3148_vm15 = vcmp.lt.f32.partialorder %v3147_v10, 0.0004427343  ;;  %v12340_v10 = vld [vmem:[#allocation46_spill] sm:$0xff] }
 0xc85   :  { %9111 = vmatmul.mubr.msk.f32.gmra.mxu1 %vm732_vm9, %v10430_v45  ;;  %v3163_v45 = vadd.f32 1.0, %v3162_v33  ;;  %v3155_v33 = vmul.f32 %v9609_v14, %v3154_v0  ;;  %v192_v14 = vshra.s32 %v10224_v62, 3  ;;  %v194_v62 = vshra.s32 %v10423_v18, 3 }
 0xc86   :  { %9113 = vmatprep.mubr.msk.f32.mxu1 %vm732_vm9, %v10433_v55  ;;  %v183_v55 = vshra.s32 %v9902_v4, 3  ;;  %v196_v18 = vshra.s32 %v10443_v12, 3  ;;  %v12339_v12 = vld [vmem:[#allocation76_spill] sm:$0xff] }
 0xc87   :  { %v3164_v4 = vmul.f32 %v9615_v48, %v3163_v45 }
 0xc88   :  { %v9617_v32 = vpop.eup %9616  ;;  %vm215_vm2 = vcmp.eq.s32.totalorder %v183_v55, %v9897_v2 }
 0xc89   :  { %9114 = vmatmul.mubr.msk.f32.gmra.mxu1 %vm732_vm9, %v10450_v24  ;;  %v3152_v21 = vmul.f32 0.6931472, %v9617_v32  ;;  %v184_v32 = vshra.s32 %v9914_v9, 3  ;;  %v10782_v55 = vsel %vm215_vm2, 1.0, %v12265_v23  ;;  %vm225_vm2 = vcmp.eq.s32.totalorder %v193_v35, %v9897_v2  ;;  %v12356_v35 = vld [vmem:[#allocation85_spill] sm:$0xff] }
 0xc8a   :  { %9116 = vmatprep.mubr.msk.f32.mxu1 %vm732_vm9, %v10453_v51  ;;  %v9619_v43 = vpop.eup %9618  ;;  %12326 = vst [vmem:[#allocation91_spill] sm:$0xff] %v10782_v55  ;;  %v10876_v57 = vsel %vm225_vm2, 1.0, %v12265_v23 }
 0xc8b   :  { %v3143_v28 = vmul.f32 0.6931472, %v9619_v43  ;;  %v3158_v45 = vsel %vm10755_vm12, %v3155_v33, %v3152_v21  ;;  %v3146_v43 = vmul.f32 %v10719_v17, %v3145_v49  ;;  %vm216_vm3 = vcmp.eq.s32.totalorder %v184_v32, %v9897_v2  ;;  %12336 = vst [vmem:[#allocation100_spill] sm:$0xff] %v10876_v57  ;;  %v12341_v32 = vld [vmem:[#allocation78_spill] sm:$0xff] }
 0xc8c   :  { %v9621_v22 = vpop.eup %9620 }
 0xc8d   :  { %9117 = vmatmul.mubr.msk.f32.gmra.mxu1 %vm732_vm9, %v10470_v6  ;;  %v3170_v24 = vmul.f32 0.6931472, %v9621_v22  ;;  %v3149_v3 = vsel %vm3148_vm15, %v3146_v43, %v3143_v28  ;;  %v198_v22 = vshra.s32 %v12340_v10, 3  ;;  %v12344_v43 = vld [vmem:[#allocation49_spill] sm:$0xff] }
 0xc8e   :  { %v9623_v54 = vpop.eup %9622  ;;  %9119 = vmatprep.mubr.msk.f32.mxu1 %vm732_vm9, %v10473_v44  ;;  %v3177_v28 = vsel %vm3125_vm4, %v10671_v1, %v3149_v3  ;;  %v188_v1 = vshra.s32 %v10186_v36, 3  ;;  %v189_v36 = vshra.s32 %v10191_v59, 3  ;;  %vm227_vm4 = vcmp.eq.s32.totalorder %v195_v60, %v9897_v2  ;;  %v12345_v3 = vld [vmem:[#allocation80_spill] sm:$0xff]  ;;  %v12360_v10 = vld [vmem:[#allocation61_spill] sm:$0xff] }
 0xc8f   :  { %v3176_v51 = vsel %vm3175_vm10, %v3173_v40, %v3170_v24  ;;  %v3161_v31 = vmul.f32 0.6931472, %v9623_v54  ;;  %v185_v24 = vshra.s32 %v9923_v11, 3  ;;  %v4283_v54 = vmul.f32 %v3177_v28, %v10347_v50  ;;  %v12338_v40 = vld [vmem:[#allocation45_spill] sm:$0xff] }
 0xc90   :  { %v3180_v6 = vsel %vm3128_vm8, %v10679_v25, %v3176_v51  ;;  %v10785_v51 = vsel %vm216_vm3, 1.0, %v12265_v23  ;;  %vm221_vm12 = vcmp.eq.s32.totalorder %v189_v36, %v9897_v2  ;;  %vm226_vm3 = vcmp.eq.s32.totalorder %v194_v62, %v9897_v2  ;;  %v12357_v62 = vld [vmem:[#allocation58_spill] sm:$0xff] }
 0xc91   :  { %9037 = vmatprep.subr.mxu0 %v3180_v6  ;;  %9120 = vmatmul.mubr.msk.f32.gmra.mxu1 %vm732_vm9, %v10490_v39  ;;  %v3167_v0 = vsel %vm3166_vm11, %v3164_v4, %v3161_v31  ;;  %v3178_v4 = vsel %vm3126_vm1, %v10666_v56, %v3158_v45  ;;  %v4286_v25 = vmul.f32 %v3180_v6, %v10365_v53  ;;  %v190_v56 = vshra.s32 %v10196_v46, 3 }
 0xc92   :  { %9038 = vmatpush3.msra.mxu0 %v3180_v6  ;;  %v3179_v58 = vsel %vm3127_vm13, %v10688_v8, %v3167_v0  ;;  %9122 = vmatprep.mubr.msk.f32.mxu1 %vm732_vm9, %v10493_v42  ;;  %v186_v8 = vshra.s32 %v10178_v30, 3  ;;  %vm217_vm5 = vcmp.eq.s32.totalorder %v185_v24, %v9897_v2  ;;  %v187_v30 = vshra.s32 %v10182_v34, 3 }
 0xc93   :  { %9039 = vmatprep.subr.mxu0 %v3179_v58  ;;  %v4285_v21 = vmul.f32 %v3179_v58, %v10362_v7  ;;  %v10802_v34 = vsel %vm217_vm5, 1.0, %v12265_v23  ;;  %v4284_v6 = vmul.f32 %v3178_v4, %v10349_v38  ;;  %vm220_vm11 = vcmp.eq.s32.totalorder %v188_v1, %v9897_v2 }
 0xc94   :  { %9040 = vmatpush3.msra.mxu0 %v3179_v58  ;;  %vm218_vm8 = vcmp.eq.s32.totalorder %v186_v8, %v9897_v2  ;;  %12327 = vst [vmem:[#allocation92_spill] sm:$0xff] %v10802_v34  ;;  %vm219_vm10 = vcmp.eq.s32.totalorder %v187_v30, %v9897_v2  ;;  %v10825_v49 = vsel %vm220_vm11, 1.0, %v12265_v23  ;;  %v191_v46 = vshra.s32 %v10207_v19, 3  ;;  %v12347_v8 = vld [vmem:[#allocation81_spill] sm:$0xff] }
 0xc95   :  { %9041 = vmatprep.subr.mxu0 %v3178_v4  ;;  %9123 = vmatmul.mubr.msk.f32.gmra.mxu1 %vm732_vm9, %v10510_v63  ;;  %v10806_v31 = vsel %vm218_vm8, 1.0, %v12265_v23  ;;  %v10820_v59 = vsel %vm219_vm10, 1.0, %v12265_v23  ;;  %12330 = vst [vmem:[#allocation95_spill] sm:$0xff] %v10825_v49  ;;  %vm222_vm13 = vcmp.eq.s32.totalorder %v190_v56, %v9897_v2  ;;  %v10840_v17 = vsel %vm221_vm12, 1.0, %v12265_v23  ;;  %v12350_v30 = vld [vmem:[#allocation53_spill] sm:$0xff] }
 0xc96   :  { %9042 = vmatpush3.msra.mxu0 %v3178_v4  ;;  %9125 = vmatprep.mubr.msk.f32.mxu1 %vm732_vm9, %v10513_v52  ;;  %12328 = vst [vmem:[#allocation93_spill] sm:$0xff] %v10806_v31  ;;  %12329 = vst [vmem:[#allocation94_spill] sm:$0xff] %v10820_v59  ;;  %v10843_v19 = vsel %vm222_vm13, 1.0, %v12265_v23  ;;  %vm223_vm15 = vcmp.eq.s32.totalorder %v191_v46, %v9897_v2  ;;  %vm224_vm1 = vcmp.eq.s32.totalorder %v192_v14, %v9897_v2  ;;  %v12346_v4 = vld [vmem:[#allocation50_spill] sm:$0xff]  ;;  %v12355_v46 = vld [vmem:[#allocation57_spill] sm:$0xff] }
 0xc97   :  { %9043 = vmatprep.subr.mxu0 %v3177_v28  ;;  %12331 = vst [vmem:[#allocation96_spill] sm:$0xff] %v10840_v17  ;;  %12332 = vst [vmem:[#allocation97_spill] sm:$0xff] %v10843_v19  ;;  %v10858_v48 = vsel %vm223_vm15, 1.0, %v12265_v23  ;;  %v10861_v47 = vsel %vm224_vm1, 1.0, %v12265_v23  ;;  %v10879_v61 = vsel %vm226_vm3, 1.0, %v12265_v23  ;;  %v197_v33 = vshra.s32 %v12338_v40, 3  ;;  %v10948_v40 = vpop.f32.mrf.mxu1 }
 0xc98   :  { %9044 = vmatpush3.msra.mxu0 %v3177_v28  ;;  %12333 = vst [vmem:[#allocation98_spill] sm:$0xff] %v10858_v48  ;;  %12334 = vst [vmem:[#allocation99_spill] sm:$0xff] %v10861_v47  ;;  %vm228_vm5 = vcmp.eq.s32.totalorder %v196_v18, %v9897_v2  ;;  %v10894_v0 = vsel %vm227_vm4, 1.0, %v12265_v23  ;;  %v199_v58 = vshra.s32 %v12344_v43, 3  ;;  %vm230_vm10 = vcmp.eq.s32.totalorder %v198_v22, %v9897_v2  ;;  %v12361_v43 = vld [vmem:[#allocation84_spill] sm:$0xff] }
 0xc99   :  { %9046 = vmatmul.mubr.msk.f32.vlgmr.msra.gmra.mxu0 %vm421_vm0, %v10782_v55  ;;  %9126 = vmatmul.mubr.msk.f32.gmra.mxu1 %vm732_vm9, %v10530_v16  ;;  %12337 = vst [vmem:[#allocation101_spill] sm:$0xff] %v10879_v61  ;;  %12342 = vst [vmem:[#allocation45_spill] sm:$0xff] %v10894_v0  ;;  %v10897_v45 = vsel %vm228_vm5, 1.0, %v12265_v23  ;;  %vm229_vm8 = vcmp.eq.s32.totalorder %v197_v33, %v9897_v2  ;;  %v200_v24 = vshra.s32 %v12346_v4, 3  ;;  %v201_v1 = vshra.s32 %v12350_v30, 3  ;;  %v10967_v30 = vpop.f32.mrf.mxu1 }
 0xc9a   :  { %9149 = vmatprep.subr.mxu0 %v4286_v25  ;;  %9048 = vmatprep.mubr.msk.f32.mxu0 %vm421_vm0, %v10785_v51  ;;  %12343 = vst [vmem:[#allocation46_spill] sm:$0xff] %v10897_v45  ;;  %v10912_v28 = vsel %vm229_vm8, 1.0, %v12265_v23  ;;  %vm231_vm11 = vcmp.eq.s32.totalorder %v199_v58, %v9897_v2  ;;  %v203_v14 = vshra.s32 %v12355_v46, 3  ;;  %v204_v60 = vshra.s32 %v12357_v62, 3  ;;  %v12362_v58 = vld [vmem:[#allocation67_spill] sm:$0xff]  ;;  %v12366_v46 = vld [vmem:[#allocation88_spill] sm:$0xff] }
 0xc9b   :  { %9150 = vmatpush3.msra.mxu0 %v4286_v25  ;;  %9128 = vmatprep.mubr.msk.f32.mxu1 %vm732_vm9, %v10533_v27  ;;  %12348 = vst [vmem:[#allocation49_spill] sm:$0xff] %v10912_v28  ;;  %v10915_v25 = vsel %vm230_vm10, 1.0, %v12265_v23  ;;  %vm232_vm12 = vcmp.eq.s32.totalorder %v200_v24, %v9897_v2  ;;  %v10929_v56 = vsel %vm231_vm11, 1.0, %v12265_v23  ;;  %vm233_vm13 = vcmp.eq.s32.totalorder %v201_v1, %v9897_v2 }
 0xc9c   :  { %9151 = vmatprep.subr.mxu0 %v4285_v21  ;;  %12349 = vst [vmem:[#allocation50_spill] sm:$0xff] %v10915_v25  ;;  %12353 = vst [vmem:[#allocation53_spill] sm:$0xff] %v10929_v56  ;;  %v10946_v18 = vsel %vm233_vm13, 1.0, %v12265_v23  ;;  %vm235_vm1 = vcmp.eq.s32.totalorder %v203_v14, %v9897_v2  ;;  %v205_v22 = vshra.s32 %v12360_v10, 3  ;;  %vm236_vm2 = vcmp.eq.s32.totalorder %v204_v60, %v9897_v2  ;;  %v12367_v14 = vld [vmem:[#allocation69_spill] sm:$0xff]  ;;  %v10986_v60 = vpop.f32.mrf.mxu1 }
 0xc9d   :  { %9152 = vmatpush3.msra.mxu0 %v4285_v21  ;;  %9129 = vmatmul.mubr.msk.f32.gmra.mxu1 %vm732_vm9, %v10547_v20  ;;  %v12351_v21 = vld [vmem:[#allocation82_spill] sm:$0xff]  ;;  %12358 = vst [vmem:[#allocation57_spill] sm:$0xff] %v10946_v18  ;;  %v206_v4 = vshra.s32 %v12362_v58, 3  ;;  %v10965_v24 = vsel %vm235_vm1, 1.0, %v12265_v23  ;;  %v10970_v1 = vsel %vm236_vm2, 1.0, %v12265_v23 }
 0xc9e   :  { %9049 = vmatmul.mubr.msk.f32.gmra.mxu0 %vm421_vm0, %v10802_v34  ;;  %9153 = vmatprep.subr.mxu0 %v4284_v6  ;;  %12363 = vst [vmem:[#allocation58_spill] sm:$0xff] %v10965_v24  ;;  %12364 = vst [vmem:[#allocation61_spill] sm:$0xff] %v10970_v1  ;;  %vm237_vm3 = vcmp.eq.s32.totalorder %v205_v22, %v9897_v2  ;;  %v12370_v22 = vld [vmem:[#allocation71_spill] sm:$0xff]  ;;  %v12371_v58 = vld [vmem:[#allocation86_spill] sm:$0xff] }
 0xc9f   :  { %9154 = vmatpush3.msra.mxu0 %v4284_v6  ;;  %9051 = vmatprep.mubr.msk.f32.mxu0 %vm421_vm0, %v10806_v31  ;;  %v12352_v6 = vld [vmem:[#allocation54_spill] sm:$0xff]  ;;  %vm238_vm4 = vcmp.eq.s32.totalorder %v206_v4, %v9897_v2  ;;  %v10984_v62 = vsel %vm237_vm3, 1.0, %v12265_v23  ;;  %v12372_v4 = vld [vmem:[#allocation73_spill] sm:$0xff] }
 0xca0   :  { %9155 = vmatprep.subr.mxu0 %v4283_v54  ;;  %9131 = vmatprep.mubr.msk.f32.mxu1 %vm732_vm9, %v10550_v37  ;;  %v202_v36 = vshra.s32 %v12352_v6, 3  ;;  %v12365_v6 = vld [vmem:[#allocation68_spill] sm:$0xff]  ;;  %12368 = vst [vmem:[#allocation84_spill] sm:$0xff] %v10984_v62  ;;  %v10989_v10 = vsel %vm238_vm4, 1.0, %v12265_v23 }
 0xca1   :  { %9156 = vmatpush3.msra.mxu0 %v4283_v54  ;;  %9132 = vmatmul.mubr.msk.f32.gmra.mxu1 %vm732_vm9, %v10560_v29  ;;  %v10932_v54 = vsel %vm232_vm12, 1.0, %v12265_v23  ;;  %12369 = vst [vmem:[#allocation67_spill] sm:$0xff] %v10989_v10 }
 0xca2   :  { %9052 = vmatmul.mubr.msk.f32.gmra.mxu0 %vm421_vm0, %v10820_v59  ;;  %9134 = vmatprep.mubr.msk.f32.mxu1 %vm732_vm9, %v10563_v41  ;;  %12354 = vst [vmem:[#allocation54_spill] sm:$0xff] %v10932_v54  ;;  %vm234_vm15 = vcmp.eq.s32.totalorder %v202_v36, %v9897_v2  ;;  %v207_v36 = vshra.s32 %v12365_v6, 3  ;;  %v210_v6 = vshra.s32 %v12372_v4, 3 }
 0xca3   :  { %9054 = vmatprep.mubr.msk.f32.mxu0 %vm421_vm0, %v10825_v49  ;;  %v10951_v33 = vsel %vm234_vm15, 1.0, %v12265_v23 }
 0xca4   :  { %12359 = vst [vmem:[#allocation85_spill] sm:$0xff] %v10951_v33  ;;  %vm239_vm5 = vcmp.eq.s32.totalorder %v207_v36, %v9897_v2  ;;  %vm242_vm11 = vcmp.eq.s32.totalorder %v210_v6, %v9897_v2 }
 0xca5   :  { %9135 = vmatmul.mubr.msk.f32.gmra.mxu1 %vm732_vm9, %v10571_v15 }
 0xca6   :  { %9055 = vmatmul.mubr.msk.f32.gmra.mxu0 %vm421_vm0, %v10840_v17  ;;  %9137 = vmatprep.mubr.msk.f32.mxu1 %vm732_vm9, %v10588_v5 }
 0xca7   :  { %9057 = vmatprep.mubr.msk.f32.mxu0 %vm421_vm0, %v10843_v19 }
 0xca9   :  { %9138 = vmatmul.mubr.msk.f32.gmra.mxu1 %vm732_vm9, %v10597_v13 }
 0xcaa   :  { %9058 = vmatmul.mubr.msk.f32.gmra.mxu0 %vm421_vm0, %v10858_v48  ;;  %9140 = vmatprep.mubr.msk.f32.mxu1 %vm732_vm9, %v12335_v26 }
 0xcab   :  { %9060 = vmatprep.mubr.msk.f32.mxu0 %vm421_vm0, %v10861_v47 }
 0xcad   :  { %9141 = vmatmul.mubr.msk.f32.gmra.mxu1 %vm732_vm9, %v12339_v12 }
 0xcae   :  { %9061 = vmatmul.mubr.msk.f32.gmra.mxu0 %vm421_vm0, %v10876_v57  ;;  %9143 = vmatprep.mubr.msk.f32.mxu1 %vm732_vm9, %v12341_v32 }
 0xcaf   :  { %9063 = vmatprep.mubr.msk.f32.mxu0 %vm421_vm0, %v10879_v61 }
 0xcb1   :  { %9144 = vmatmul.mubr.msk.f32.gmra.mxu1 %vm732_vm9, %v12345_v3  ;;  %v11023_v3 = vsel %vm242_vm11, 1.0, %v12265_v23 }
 0xcb2   :  { %9064 = vmatmul.mubr.msk.f32.gmra.mxu0 %vm421_vm0, %v10894_v0  ;;  %9146 = vmatprep.mubr.msk.f32.mxu1 %vm732_vm9, %v12347_v8  ;;  %12378 = vst [vmem:[#allocation71_spill] sm:$0xff] %v11023_v3 }
 0xcb3   :  { %9066 = vmatprep.mubr.msk.f32.mxu0 %vm421_vm0, %v10897_v45 }
 0xcb5   :  { %9147 = vmatmul.mubr.msk.f32.gmra.mxu1 %vm732_vm9, %v12351_v21 }
 0xcb6   :  { %9067 = vmatmul.mubr.msk.f32.gmra.mxu0 %vm421_vm0, %v10912_v28  ;;  %4768 = vmatprep.mubr.f32.mxu1 %v12265_v23 }
 0xcb7   :  { %9069 = vmatprep.mubr.msk.f32.mxu0 %vm421_vm0, %v10915_v25 }
 0xcb9   :  { %7706 = vmatmul.mubr.msk.f32.vlgmr.msra.gmra.mxu1 %vm732_vm9, %v12356_v35  ;;  %v208_v35 = vshra.s32 %v12367_v14, 3  ;;  %v11004_v14 = vpop.f32.mrf.mxu1 }
 0xcba   :  { %9070 = vmatmul.mubr.msk.f32.gmra.mxu0 %vm421_vm0, %v10929_v56  ;;  %4774 = vmatprep.mubr.f32.mxu1 %v12265_v23 }
 0xcbb   :  { %9072 = vmatprep.mubr.msk.f32.mxu0 %vm421_vm0, %v10932_v54  ;;  %vm240_vm8 = vcmp.eq.s32.totalorder %v208_v35, %v9897_v2  ;;  %v11020_v8 = vpop.f32.mrf.mxu1 }
 0xcbc   :  { %v11007_v36 = vsel %vm240_vm8, 1.0, %v12265_v23 }
 0xcbd   :  { %7707 = vmatmul.mubr.msk.f32.gmra.mxu1 %vm732_vm9, %v12361_v43  ;;  %v209_v43 = vshra.s32 %v12370_v22, 3  ;;  %12374 = vst [vmem:[#allocation88_spill] sm:$0xff] %v11007_v36  ;;  %v12375_v22 = vld [vmem:[#allocation75_spill] sm:$0xff] }
 0xcbe   :  { %9073 = vmatmul.mubr.msk.f32.gmra.mxu0 %vm421_vm0, %v10946_v18  ;;  %4780 = vmatprep.mubr.f32.mxu1 %v12265_v23  ;;  %v211_v35 = vshra.s32 %v12375_v22, 3 }
 0xcbf   :  { %9075 = vmatprep.mubr.msk.f32.mxu0 %vm421_vm0, %v10951_v33  ;;  %vm241_vm10 = vcmp.eq.s32.totalorder %v209_v43, %v9897_v2  ;;  %v12379_v43 = vld [vmem:[#allocation79_spill] sm:$0xff] }
 0xcc0   :  { %v11018_v21 = vsel %vm241_vm10, 1.0, %v12265_v23  ;;  %vm243_vm12 = vcmp.eq.s32.totalorder %v211_v35, %v9897_v2  ;;  %v213_v6 = vshra.s32 %v12379_v43, 3 }
 0xcc1   :  { %7708 = vmatmul.mubr.msk.f32.gmra.mxu1 %vm732_vm9, %v12366_v46  ;;  %v11002_v46 = vsel %vm239_vm5, 1.0, %v12265_v23  ;;  %12377 = vst [vmem:[#allocation69_spill] sm:$0xff] %v11018_v21  ;;  %v11033_v22 = vsel %vm243_vm12, 1.0, %v12265_v23 }
 0xcc2   :  { %9076 = vmatmul.mubr.msk.f32.gmra.mxu0 %vm421_vm0, %v10965_v24  ;;  %4786 = vmatprep.mubr.f32.mxu1 %v12265_v23  ;;  %12373 = vst [vmem:[#allocation68_spill] sm:$0xff] %v11002_v46  ;;  %12380 = vst [vmem:[#allocation86_spill] sm:$0xff] %v11033_v22  ;;  %vm245_vm15 = vcmp.eq.s32.totalorder %v213_v6, %v9897_v2 }
 0xcc3   :  { %9078 = vmatprep.mubr.msk.f32.mxu0 %vm421_vm0, %v10970_v1  ;;  %v11046_v35 = vsel %vm245_vm15, 1.0, %v12265_v23 }
 0xcc4   :  { %12382 = vst [vmem:[#allocation75_spill] sm:$0xff] %v11046_v35 }
 0xcc5   :  { %7709 = vmatmul.mubr.msk.f32.gmra.mxu1 %vm732_vm9, %v12371_v58  ;;  %v12376_v58 = vld [vmem:[#allocation77_spill] sm:$0xff] }
 0xcc6   :  { %9079 = vmatmul.mubr.msk.f32.gmra.mxu0 %vm421_vm0, %v10984_v62  ;;  %v212_v4 = vshra.s32 %v12376_v58, 3  ;;  %v11035_v58 = vpop.f32.mrf.mxu1 }
 0xcc7   :  { %9081 = vmatprep.mubr.msk.f32.mxu0 %vm421_vm0, %v10989_v10 }
 0xcc8   :  { %vm244_vm13 = vcmp.eq.s32.totalorder %v212_v4, %v9897_v2  ;;  %v11048_v4 = vpop.f32.mrf.mxu1 }
 0xcc9   :  { %v11038_v32 = vsel %vm244_vm13, 1.0, %v12265_v23 }
 0xcca   :  { %9082 = vmatmul.mubr.msk.f32.gmra.mxu0 %vm421_vm0, %v11002_v46  ;;  %12381 = vst [vmem:[#allocation73_spill] sm:$0xff] %v11038_v32  ;;  %v11052_v43 = vpop.f32.mrf.mxu1 }
 0xccb   :  { %9084 = vmatprep.mubr.msk.f32.mxu0 %vm421_vm0, %v11007_v36 }
 0xccc   :  { %v11054_v12 = vpop.f32.mrf.mxu1 }
 0xcce   :  { %9085 = vmatmul.mubr.msk.f32.gmra.mxu0 %vm421_vm0, %v11018_v21  ;;  %v11056_v26 = vpop.f32.mrf.mxu1 }
 0xccf   :  { %9087 = vmatprep.mubr.msk.f32.mxu0 %vm421_vm0, %v11023_v3 }
 0xcd0   :  { %v11058_v6 = vpop.f32.mrf.mxu1 }
 0xcd2   :  { %9088 = vmatmul.mubr.msk.f32.gmra.mxu0 %vm421_vm0, %v11033_v22  ;;  %v11060_v13 = vpop.f32.mrf.mxu1 }
 0xcd3   :  { %9090 = vmatprep.mubr.msk.f32.mxu0 %vm421_vm0, %v11038_v32 }
 0xcd4   :  { %v11062_v5 = vpop.f32.mrf.mxu1 }
 0xcd6   :  { %9091 = vmatmul.mubr.msk.f32.gmra.mxu0 %vm421_vm0, %v11046_v35  ;;  %v11064_v15 = vpop.f32.mrf.mxu1 }
 0xcd8   :  { %v11066_v41 = vpop.f32.mrf.mxu1 }
 0xcda   :  { %v11068_v29 = vpop.f32.mrf.mxu1 }
 0xcdc   :  { %v11070_v37 = vpop.f32.mrf.mxu1 }
 0xcde   :  { %v11072_v20 = vpop.f32.mrf.mxu1 }
 0xce0   :  { %v11074_v27 = vpop.f32.mrf.mxu1 }
 0xce2   :  { %v11076_v16 = vpop.f32.mrf.mxu1 }
 0xce3   :  { %12383 = vst [vmem:[#allocation77_spill] sm:$0xff] %v11076_v16 }
 0xce4   :  { %v11078_v52 = vpop.f32.mrf.mxu1 }
 0xce5   :  { %12384 = vst [vmem:[#allocation79_spill] sm:$0xff] %v11078_v52  ;;  %v12394_v52 = vld [vmem:[#allocation83_spill] sm:$0xff] }
 0xce6   :  { %v11080_v63 = vpop.f32.mrf.mxu1 }
 0xce7   :  { %12385 = vst [vmem:[#allocation102_spill] sm:$0xff] %v11080_v63 }
 0xce8   :  { %v11082_v42 = vpop.f32.mrf.mxu1 }
 0xce9   :  { %12386 = vst [vmem:[#allocation103_spill] sm:$0xff] %v11082_v42 }
 0xcea   :  { %v11084_v39 = vpop.f32.mrf.mxu1 }
 0xceb   :  { %12387 = vst [vmem:[#allocation104_spill] sm:$0xff] %v11084_v39 }
 0xcec   :  { %v11086_v44 = vpop.f32.mrf.mxu1 }
 0xced   :  { %12388 = vst [vmem:[#allocation105_spill] sm:$0xff] %v11086_v44 }
 0xcee   :  { %v11088_v53 = vpop.f32.mrf.mxu1 }
 0xcf0   :  { %v11090_v7 = vpop.f32.mrf.mxu1 }
 0xcf1   :  { %12389 = vst [vmem:[#allocation106_spill] sm:$0xff] %v11090_v7 }
 0xcf2   :  { %v11092_v38 = vpop.f32.mrf.mxu1 }
 0xcf3   :  { %12390 = vst [vmem:[#allocation107_spill] sm:$0xff] %v11092_v38 }
 0xcf4   :  { %v11094_v50 = vpop.f32.mrf.mxu1 }
 0xcf5   :  { %12391 = vst [vmem:[#allocation108_spill] sm:$0xff] %v11094_v50 }
 0xcf6   :  { %v11096_v11 = vpop.f32.mrf.mxu1 }
 0xcf7   :  { %12392 = vst [vmem:[#allocation109_spill] sm:$0xff] %v11096_v11 }
 0xcf8   :  { %v11098_v9 = vpop.f32.mrf.mxu1 }
 0xcfa   :  { %v11100_v2 = vpop.f32.mrf.mxu1 }
 0xcfb   :  { %12393 = vst [vmem:[#allocation110_spill] sm:$0xff] %v11100_v2 }
 0xd39   :  { %v9103_v63 = vpop.f32.mrf.mxu1 }
 0xd3a   :  { %v4252_v44 = vmul.f32 %v9103_v63, %v10782_v55 }
 0xd3b   :  { %v4092_v42 = vpop.f32.mrf.mxu1 }
 0xd3c   :  { %v4251_v39 = vmul.f32 %v4092_v42, %v12394_v52 }
 0xd3d   :  { %v9106_v16 = vpop.f32.mrf.mxu1 }
 0xd3e   :  { %9157 = vmatprep.mubr.msk.f32.mxu0 %vm421_vm0, %v4251_v39  ;;  %v4254_v11 = vmul.f32 %v9106_v16, %v10802_v34 }
 0xd3f   :  { %v4102_v7 = vpop.f32.mrf.mxu1  ;;  %9158 = vmatmul.mubr.msk.f32.vlgmr.msra.gmra.mxu0 %vm421_vm0, %v4252_v44 }
 0xd40   :  { %v4253_v50 = vmul.f32 %v4102_v7, %v10785_v51 }
 0xd41   :  { %v9109_v38 = vpop.f32.mrf.mxu1 }
 0xd42   :  { %9160 = vmatprep.mubr.msk.f32.mxu0 %vm421_vm0, %v4253_v50  ;;  %v4256_v63 = vmul.f32 %v9109_v38, %v10820_v59 }
 0xd43   :  { %v4112_v2 = vpop.f32.mrf.mxu1  ;;  %9161 = vmatmul.mubr.msk.f32.gmra.mxu0 %vm421_vm0, %v4254_v11 }
 0xd44   :  { %v4255_v42 = vmul.f32 %v4112_v2, %v10806_v31 }
 0xd45   :  { %v9112_v55 = vpop.f32.mrf.mxu1 }
 0xd46   :  { %9163 = vmatprep.mubr.msk.f32.mxu0 %vm421_vm0, %v4255_v42  ;;  %v4258_v44 = vmul.f32 %v9112_v55, %v10840_v17 }
 0xd47   :  { %v4122_v39 = vpop.f32.mrf.mxu1  ;;  %9164 = vmatmul.mubr.msk.f32.gmra.mxu0 %vm421_vm0, %v4256_v63 }
 0xd48   :  { %v4257_v7 = vmul.f32 %v4122_v39, %v10825_v49 }
 0xd49   :  { %v9115_v16 = vpop.f32.mrf.mxu1 }
 0xd4a   :  { %9166 = vmatprep.mubr.msk.f32.mxu0 %vm421_vm0, %v4257_v7  ;;  %v4260_v11 = vmul.f32 %v9115_v16, %v10858_v48 }
 0xd4b   :  { %v4132_v50 = vpop.f32.mrf.mxu1  ;;  %9167 = vmatmul.mubr.msk.f32.gmra.mxu0 %vm421_vm0, %v4258_v44 }
 0xd4c   :  { %v4259_v2 = vmul.f32 %v4132_v50, %v10843_v19 }
 0xd4d   :  { %v9118_v38 = vpop.f32.mrf.mxu1 }
 0xd4e   :  { %9169 = vmatprep.mubr.msk.f32.mxu0 %vm421_vm0, %v4259_v2  ;;  %v4262_v55 = vmul.f32 %v9118_v38, %v10876_v57 }
 0xd4f   :  { %v4142_v42 = vpop.f32.mrf.mxu1  ;;  %9170 = vmatmul.mubr.msk.f32.gmra.mxu0 %vm421_vm0, %v4260_v11 }
 0xd50   :  { %v4261_v63 = vmul.f32 %v4142_v42, %v10861_v47 }
 0xd51   :  { %v9121_v39 = vpop.f32.mrf.mxu1 }
 0xd52   :  { %9172 = vmatprep.mubr.msk.f32.mxu0 %vm421_vm0, %v4261_v63  ;;  %v4264_v16 = vmul.f32 %v9121_v39, %v10894_v0 }
 0xd53   :  { %v4152_v7 = vpop.f32.mrf.mxu1  ;;  %9173 = vmatmul.mubr.msk.f32.gmra.mxu0 %vm421_vm0, %v4262_v55 }
 0xd54   :  { %v4263_v44 = vmul.f32 %v4152_v7, %v10879_v61 }
 0xd55   :  { %v9124_v50 = vpop.f32.mrf.mxu1 }
 0xd56   :  { %9175 = vmatprep.mubr.msk.f32.mxu0 %vm421_vm0, %v4263_v44  ;;  %v4266_v38 = vmul.f32 %v9124_v50, %v10912_v28 }
 0xd57   :  { %v4162_v2 = vpop.f32.mrf.mxu1  ;;  %9176 = vmatmul.mubr.msk.f32.gmra.mxu0 %vm421_vm0, %v4264_v16 }
 0xd58   :  { %v4265_v11 = vmul.f32 %v4162_v2, %v10897_v45 }
 0xd59   :  { %v9127_v42 = vpop.f32.mrf.mxu1 }
 0xd5a   :  { %9178 = vmatprep.mubr.msk.f32.mxu0 %vm421_vm0, %v4265_v11  ;;  %v4268_v39 = vmul.f32 %v9127_v42, %v10929_v56 }
 0xd5b   :  { %v4172_v63 = vpop.f32.mrf.mxu1  ;;  %9179 = vmatmul.mubr.msk.f32.gmra.mxu0 %vm421_vm0, %v4266_v38 }
 0xd5c   :  { %v4267_v55 = vmul.f32 %v4172_v63, %v10915_v25 }
 0xd5d   :  { %v9130_v7 = vpop.f32.mrf.mxu1 }
 0xd5e   :  { %9181 = vmatprep.mubr.msk.f32.mxu0 %vm421_vm0, %v4267_v55  ;;  %v4270_v50 = vmul.f32 %v9130_v7, %v10946_v18 }
 0xd5f   :  { %v4182_v44 = vpop.f32.mrf.mxu1  ;;  %9182 = vmatmul.mubr.msk.f32.gmra.mxu0 %vm421_vm0, %v4268_v39 }
 0xd60   :  { %v4269_v16 = vmul.f32 %v4182_v44, %v10932_v54 }
 0xd61   :  { %v9133_v2 = vpop.f32.mrf.mxu1 }
 0xd62   :  { %9184 = vmatprep.mubr.msk.f32.mxu0 %vm421_vm0, %v4269_v16  ;;  %v4272_v42 = vmul.f32 %v9133_v2, %v10965_v24 }
 0xd63   :  { %v4192_v11 = vpop.f32.mrf.mxu1  ;;  %9185 = vmatmul.mubr.msk.f32.gmra.mxu0 %vm421_vm0, %v4270_v50 }
 0xd64   :  { %v4271_v38 = vmul.f32 %v4192_v11, %v10951_v33 }
 0xd65   :  { %v9136_v63 = vpop.f32.mrf.mxu1 }
 0xd66   :  { %9187 = vmatprep.mubr.msk.f32.mxu0 %vm421_vm0, %v4271_v38  ;;  %v4274_v7 = vmul.f32 %v9136_v63, %v10984_v62  ;;  %v12395_v62 = vld [vmem:[#allocation87_spill] sm:$0xff] }
 0xd67   :  { %v4202_v55 = vpop.f32.mrf.mxu1  ;;  %9188 = vmatmul.mubr.msk.f32.gmra.mxu0 %vm421_vm0, %v4272_v42 }
 0xd68   :  { %v4273_v39 = vmul.f32 %v4202_v55, %v10970_v1 }
 0xd69   :  { %v9139_v44 = vpop.f32.mrf.mxu1 }
 0xd6a   :  { %9190 = vmatprep.mubr.msk.f32.mxu0 %vm421_vm0, %v4273_v39  ;;  %v4276_v2 = vmul.f32 %v9139_v44, %v11002_v46  ;;  %v11157_v39 = vshra.s32 %v12395_v62, 3 }
 0xd6b   :  { %v4212_v16 = vpop.f32.mrf.mxu1  ;;  %9191 = vmatmul.mubr.msk.f32.gmra.mxu0 %vm421_vm0, %v4274_v7 }
 0xd6c   :  { %v4275_v50 = vmul.f32 %v4212_v16, %v10989_v10 }
 0xd6d   :  { %v9142_v11 = vpop.f32.mrf.mxu1 }
 0xd6e   :  { %9193 = vmatprep.mubr.msk.f32.mxu0 %vm421_vm0, %v4275_v50  ;;  %v4278_v63 = vmul.f32 %v9142_v11, %v11018_v21 }
 0xd6f   :  { %v4222_v38 = vpop.f32.mrf.mxu1  ;;  %9194 = vmatmul.mubr.msk.f32.gmra.mxu0 %vm421_vm0, %v4276_v2  ;;  %v12396_v2 = vld [vmem:[#allocation9_spill] sm:$0xff] }
 0xd70   :  { %v4277_v42 = vmul.f32 %v4222_v38, %v11007_v36  ;;  %vm282_vm1 = vcmp.eq.s32.totalorder %v11157_v39, %v12396_v2 }
 0xd71   :  { %v9145_v55 = vpop.f32.mrf.mxu1 }
 0xd72   :  { %9196 = vmatprep.mubr.msk.f32.mxu0 %vm421_vm0, %v4277_v42  ;;  %v4280_v16 = vmul.f32 %v9145_v55, %v11033_v22 }
 0xd73   :  { %v4232_v7 = vpop.f32.mrf.mxu1  ;;  %9197 = vmatmul.mubr.msk.f32.gmra.mxu0 %vm421_vm0, %v4278_v63  ;;  %v11172_v63 = vsel %vm282_vm1, 1.0, %v12265_v23 }
 0xd74   :  { %v4279_v44 = vmul.f32 %v4232_v7, %v11023_v3  ;;  %12397 = vst [vmem:[#allocation83_spill] sm:$0xff] %v11172_v63 }
 0xd75   :  { %v9148_v50 = vpop.f32.mrf.mxu1 }
 0xd76   :  { %9199 = vmatprep.mubr.msk.f32.mxu0 %vm421_vm0, %v4279_v44  ;;  %v4282_v38 = vmul.f32 %v9148_v50, %v11046_v35  ;;  %v9047_v44 = vpop.f32.mrf.mxu0 }
 0xd77   :  { %v4242_v11 = vpop.f32.mrf.mxu1  ;;  %9200 = vmatmul.mubr.msk.f32.gmra.mxu0 %vm421_vm0, %v4280_v16  ;;  %v3919_v0 = vmul.f32 %v9047_v44, %v10948_v40  ;;  %v4981_v44 = vld [vmem:[#allocation3 + $0x2b0] sm:$0xff] }
 0xd78   :  { %v4281_v62 = vmul.f32 %v4242_v11, %v11038_v32  ;;  %v3759_v22 = vpop.f32.mrf.mxu0 }
 0xd79   :  { %v11169_v42 = vpop.f32.mrf.mxu1  ;;  %v3918_v61 = vmul.f32 %v3759_v22, %v10967_v30  ;;  %v3952_v47 = vmul.f32 1.442695, %v3919_v0  ;;  %v4982_v22 = vld [vmem:[#allocation3 + $0x2b8] sm:$0xff] }
 0xd7a   :  { %9202 = vmatprep.mubr.msk.f32.mxu0 %vm421_vm0, %v4281_v62  ;;  %v9050_v16 = vpop.f32.mrf.mxu0  ;;  %9205 = vmatprep.subr.mxu1 %v4982_v22 }
 0xd7b   :  { %9203 = vmatmul.mubr.msk.f32.gmra.mxu0 %vm421_vm0, %v4282_v38  ;;  %v4772_v55 = vpop.f32.mrf.mxu1  ;;  %v3950_v48 = vmul.f32 1.442695, %v3918_v61  ;;  %v3921_v19 = vmul.f32 %v9050_v16, %v10986_v60  ;;  %9624 = vpow2.f32 %v3952_v47  ;;  %9206 = vmatpush3.msra.mxu1 %v4982_v22 }
 0xd7c   :  { %v4794_v7 = vmul.f32 %v4772_v55, %v11172_v63  ;;  %v3769_v3 = vpop.f32.mrf.mxu0  ;;  %9207 = vmatprep.subr.mxu1 %v4981_v44 }
 0xd7d   :  { %v3920_v49 = vmul.f32 %v3769_v3, %v11004_v14  ;;  %9626 = vpow2.f32 %v3950_v48  ;;  %v3956_v59 = vmul.f32 1.442695, %v3921_v19  ;;  %9208 = vmatpush3.msra.mxu1 %v4981_v44 }
 0xd7e   :  { %4906 = vmatprep.mubr.f32.mxu0 %v4794_v7  ;;  %v9053_v11 = vpop.f32.mrf.mxu0 }
 0xd7f   :  { %v3923_v31 = vmul.f32 %v9053_v11, %v11020_v8  ;;  %v3954_v40 = vmul.f32 1.442695, %v3920_v49  ;;  %9628 = vpow2.f32 %v3956_v59 }
 0xd80   :  { %v3779_v32 = vpop.f32.mrf.mxu0 }
 0xd81   :  { %v3922_v30 = vmul.f32 %v3779_v32, %v11035_v58  ;;  %v3960_v61 = vmul.f32 1.442695, %v3923_v31  ;;  %9630 = vpow2.f32 %v3954_v40 }
 0xd82   :  { %v9056_v50 = vpop.f32.mrf.mxu0 }
 0xd83   :  { %v3925_v0 = vmul.f32 %v9056_v50, %v11048_v4  ;;  %v3958_v19 = vmul.f32 1.442695, %v3922_v30  ;;  %9632 = vpow2.f32 %v3960_v61 }
 0xd84   :  { %v3789_v35 = vpop.f32.mrf.mxu0 }
 0xd85   :  { %v3924_v48 = vmul.f32 %v3789_v35, %v11052_v43  ;;  %v3964_v49 = vmul.f32 1.442695, %v3925_v0  ;;  %9634 = vpow2.f32 %v3958_v19 }
 0xd86   :  { %v9059_v21 = vpop.f32.mrf.mxu0 }
 0xd87   :  { %v3927_v32 = vmul.f32 %v9059_v21, %v11054_v12  ;;  %v3962_v31 = vmul.f32 1.442695, %v3924_v48  ;;  %9636 = vpow2.f32 %v3964_v49 }
 0xd88   :  { %v3799_v36 = vpop.f32.mrf.mxu0  ;;  %v9625_v59 = vpop.eup %9624 }
 0xd89   :  { %v3926_v3 = vmul.f32 %v3799_v36, %v11056_v26  ;;  %v3968_v14 = vmul.f32 1.442695, %v3927_v32  ;;  %9638 = vpow2.f32 %v3962_v31  ;;  %v4609_v43 = vmul.f32 0.0, %v9625_v59 }
 0xd8a   :  { %v9062_v46 = vpop.f32.mrf.mxu0  ;;  %v9627_v60 = vpop.eup %9626 }
 0xd8b   :  { %v3929_v58 = vmul.f32 %v9062_v46, %v11058_v6  ;;  %v3966_v4 = vmul.f32 1.442695, %v3926_v3  ;;  %v4608_v21 = vmul.f32 0.0, %v9627_v60  ;;  %9640 = vpow2.f32 %v3968_v14 }
 0xd8c   :  { %v3809_v10 = vpop.f32.mrf.mxu0  ;;  %v9629_v50 = vpop.eup %9628 }
 0xd8d   :  { %v3928_v35 = vmul.f32 %v3809_v10, %v11060_v13  ;;  %v3972_v26 = vmul.f32 1.442695, %v3929_v58  ;;  %9642 = vpow2.f32 %v3966_v4 }
 0xd8e   :  { %v11177_v1 = vpop.f32.mrf.mxu0  ;;  %v9631_v10 = vpop.eup %9630 }
 0xd8f   :  { %v3931_v36 = vmul.f32 %v11177_v1, %v11062_v5  ;;  %v3970_v30 = vmul.f32 1.442695, %v3928_v35  ;;  %9644 = vpow2.f32 %v3972_v26 }
 0xd90   :  { %v11179_v62 = vpop.f32.mrf.mxu0  ;;  %v9633_v0 = vpop.eup %9632 }
 0xd91   :  { %v3930_v46 = vmul.f32 %v11179_v62, %v11064_v15  ;;  %v3976_v61 = vmul.f32 1.442695, %v3931_v36  ;;  %9646 = vpow2.f32 %v3970_v30 }
 0xd92   :  { %v11181_v38 = vpop.f32.mrf.mxu0  ;;  %v9635_v32 = vpop.eup %9634 }
 0xd93   :  { %v3933_v22 = vmul.f32 %v11181_v38, %v11066_v41  ;;  %v3974_v62 = vmul.f32 1.442695, %v3930_v46  ;;  %9648 = vpow2.f32 %v3976_v61  ;;  %v12399_v46 = vld [vmem:[#allocation79_spill] sm:$0xff] }
 0xd94   :  { %v11183_v55 = vpop.f32.mrf.mxu0  ;;  %v9637_v60 = vpop.eup %9636 }
 0xd95   :  { %v3932_v19 = vmul.f32 %v11183_v55, %v11068_v29  ;;  %v3980_v41 = vmul.f32 1.442695, %v3933_v22  ;;  %9650 = vpow2.f32 %v3974_v62  ;;  %v12401_v62 = vld [vmem:[#allocation103_spill] sm:$0xff] }
 0xd96   :  { %v11185_v7 = vpop.f32.mrf.mxu0  ;;  %v9639_v35 = vpop.eup %9638 }
 0xd97   :  { %v3935_v3 = vmul.f32 %v11185_v7, %v11070_v37  ;;  %v3978_v29 = vmul.f32 1.442695, %v3932_v19  ;;  %9652 = vpow2.f32 %v3980_v41 }
 0xd98   :  { %v11187_v63 = vpop.f32.mrf.mxu0  ;;  %v9641_v26 = vpop.eup %9640 }
 0xd99   :  { %v3934_v14 = vmul.f32 %v11187_v63, %v11072_v20  ;;  %9654 = vpow2.f32 %v3978_v29  ;;  %v12398_v63 = vld [vmem:[#allocation77_spill] sm:$0xff] }
 0xd9a   :  { %v11189_v24 = vpop.f32.mrf.mxu0 }
 0xd9b   :  { %v3937_v37 = vmul.f32 %v11189_v24, %v11074_v27  ;;  %v3982_v20 = vmul.f32 1.442695, %v3934_v14 }
 0xd9c   :  { %v11191_v33 = vpop.f32.mrf.mxu0 }
 0xd9d   :  { %v3988_v24 = vmul.f32 1.442695, %v3937_v37 }
 0xd9e   :  { %v11193_v18 = vpop.f32.mrf.mxu0 }
 0xda0   :  { %v11195_v54 = vpop.f32.mrf.mxu0 }
 0xda2   :  { %v11197_v56 = vpop.f32.mrf.mxu0 }
 0xda4   :  { %v11199_v25 = vpop.f32.mrf.mxu0 }
 0xda6   :  { %v11201_v28 = vpop.f32.mrf.mxu0 }
 0xda8   :  { %v11203_v45 = vpop.f32.mrf.mxu0 }
 0xdaa   :  { %v11207_v57 = vpop.f32.mrf.mxu0 }
 0xdac   :  { %v11210_v17 = vpop.f32.mrf.mxu0 }
 0xdae   :  { %v11214_v34 = vpop.f32.mrf.mxu0 }
 0xdb0   :  { %v11218_v47 = vpop.f32.mrf.mxu0 }
 0xdb2   :  { %v11223_v8 = vpop.f32.mrf.mxu0 }
 0xdb4   :  { %v11226_v16 = vpop.f32.mrf.mxu0 }
 0xdff   :  { %v9159_v12 = vpop.f32.mrf.mxu0 }
 0xe00   :  { %v4611_v11 = vadd.f32 %v9159_v12, %v4609_v43  ;;  %v3984_v12 = vmul.f32 1.442695, %v3935_v3  ;;  %v12402_v3 = vld [vmem:[#allocation104_spill] sm:$0xff] }
 0xe01   :  { %v4449_v40 = vpop.f32.mrf.mxu0 }
 0xe02   :  { %4613 = vst.msk [vmem:[#allocation2 + $0x8] sm:$0xff] %vm1840_vm14, %v4611_v11  ;;  %v4610_v6 = vadd.f32 %v4608_v21, %v4449_v40  ;;  %v4615_v13 = vmul.f32 %v9629_v50, %v4611_v11  ;;  %v9643_v11 = vpop.eup %9642  ;;  %v3936_v50 = vmul.f32 %v11191_v33, %v12398_v63  ;;  %9656 = vpow2.f32 %v3984_v12 }
 0xe03   :  { %v9162_v44 = vpop.f32.mrf.mxu0  ;;  %v9645_v22 = vpop.eup %9644  ;;  %9658 = vpow2.f32 %v3982_v20 }
 0xe04   :  { %4612 = vst.msk [vmem:[#allocation2] sm:$0xff] %vm1840_vm14, %v4610_v6  ;;  %v4617_v5 = vadd.f32 %v9162_v44, %v4615_v13  ;;  %v4614_v1 = vmul.f32 %v9631_v10, %v4610_v6  ;;  %v3939_v6 = vmul.f32 %v11193_v18, %v12399_v46  ;;  %v12400_v44 = vld [vmem:[#allocation102_spill] sm:$0xff]  ;;  %v3986_v33 = vmul.f32 1.442695, %v3936_v50  ;;  %v9647_v19 = vpop.eup %9646 }
 0xe05   :  { %v4459_v15 = vpop.f32.mrf.mxu0  ;;  %v3938_v61 = vmul.f32 %v11195_v54, %v12400_v44  ;;  %9660 = vpow2.f32 %v3988_v24  ;;  %v9649_v41 = vpop.eup %9648 }
 0xe06   :  { %4619 = vst.msk [vmem:[#allocation2 + $0x18] sm:$0xff] %vm1840_vm14, %v4617_v5  ;;  %v4616_v48 = vadd.f32 %v4614_v1, %v4459_v15  ;;  %v4621_v49 = vmul.f32 %v9633_v0, %v4617_v5  ;;  %v3992_v18 = vmul.f32 1.442695, %v3939_v6  ;;  %9662 = vpow2.f32 %v3986_v33  ;;  %v9651_v29 = vpop.eup %9650 }
 0xe07   :  { %v9165_v38 = vpop.f32.mrf.mxu0  ;;  %v3990_v54 = vmul.f32 1.442695, %v3938_v61  ;;  %v9653_v14 = vpop.eup %9652 }
 0xe08   :  { %4618 = vst.msk [vmem:[#allocation2 + $0x10] sm:$0xff] %vm1840_vm14, %v4616_v48  ;;  %v4623_v31 = vadd.f32 %v9165_v38, %v4621_v49  ;;  %v4620_v59 = vmul.f32 %v9635_v32, %v4616_v48  ;;  %v3941_v48 = vmul.f32 %v11197_v56, %v12401_v62  ;;  %9664 = vpow2.f32 %v3992_v18  ;;  %v9655_v37 = vpop.eup %9654 }
 0xe09   :  { %v4469_v55 = vpop.f32.mrf.mxu0  ;;  %9666 = vpow2.f32 %v3990_v54 }
 0xe0a   :  { %4625 = vst.msk [vmem:[#allocation2 + $0x28] sm:$0xff] %vm1840_vm14, %v4623_v31  ;;  %v4622_v58 = vadd.f32 %v4620_v59, %v4469_v55  ;;  %v4627_v4 = vmul.f32 %v9637_v60, %v4623_v31  ;;  %v3940_v31 = vmul.f32 %v11199_v25, %v12402_v3  ;;  %v3996_v56 = vmul.f32 1.442695, %v3941_v48  ;;  %v12408_v3 = vld [vmem:[#allocation110_spill] sm:$0xff] }
 0xe0b   :  { %v9168_v43 = vpop.f32.mrf.mxu0 }
 0xe0c   :  { %4624 = vst.msk [vmem:[#allocation2 + $0x20] sm:$0xff] %vm1840_vm14, %v4622_v58  ;;  %v4629_v7 = vadd.f32 %v9168_v43, %v4627_v4  ;;  %v4626_v21 = vmul.f32 %v9639_v35, %v4622_v58  ;;  %v12403_v58 = vld [vmem:[#allocation105_spill] sm:$0xff]  ;;  %v3994_v25 = vmul.f32 1.442695, %v3940_v31  ;;  %9668 = vpow2.f32 %v3996_v56 }
 0xe0d   :  { %v4479_v36 = vpop.f32.mrf.mxu0  ;;  %v3943_v4 = vmul.f32 %v11201_v28, %v12403_v58  ;;  %v3948_v31 = vmul.f32 %v11226_v16, %v12408_v3 }
 0xe0e   :  { %4631 = vst.msk [vmem:[#allocation2 + $0x38] sm:$0xff] %vm1840_vm14, %v4629_v7  ;;  %v4628_v40 = vadd.f32 %v4626_v21, %v4479_v36  ;;  %v4633_v30 = vmul.f32 %v9641_v26, %v4629_v7  ;;  %v3942_v7 = vmul.f32 %v11203_v45, %v11088_v53  ;;  %v12404_v36 = vld [vmem:[#allocation106_spill] sm:$0xff]  ;;  %9670 = vpow2.f32 %v3994_v25 }
 0xe0f   :  { %v9171_v27 = vpop.f32.mrf.mxu0  ;;  %v4000_v28 = vmul.f32 1.442695, %v3943_v4  ;;  %v4010_v58 = vmul.f32 1.442695, %v3948_v31 }
 0xe10   :  { %4630 = vst.msk [vmem:[#allocation2 + $0x30] sm:$0xff] %vm1840_vm14, %v4628_v40  ;;  %v4635_v13 = vadd.f32 %v9171_v27, %v4633_v30  ;;  %v4632_v10 = vmul.f32 %v9643_v11, %v4628_v40  ;;  %v3945_v11 = vmul.f32 %v11207_v57, %v12404_v36  ;;  %v9657_v40 = vpop.eup %9656  ;;  %v12405_v30 = vld [vmem:[#allocation107_spill] sm:$0xff]  ;;  %v3998_v53 = vmul.f32 1.442695, %v3942_v7 }
 0xe11   :  { %v4489_v5 = vpop.f32.mrf.mxu0  ;;  %v3944_v46 = vmul.f32 %v11210_v17, %v12405_v30  ;;  %v9659_v24 = vpop.eup %9658  ;;  %9672 = vpow2.f32 %v4000_v28 }
 0xe12   :  { %4637 = vst.msk [vmem:[#allocation2 + $0x48] sm:$0xff] %vm1840_vm14, %v4635_v13  ;;  %v4634_v1 = vadd.f32 %v4632_v10, %v4489_v5  ;;  %v4639_v0 = vmul.f32 %v9645_v22, %v4635_v13  ;;  %v4004_v57 = vmul.f32 1.442695, %v3945_v11  ;;  %v12406_v10 = vld [vmem:[#allocation108_spill] sm:$0xff]  ;;  %v9661_v5 = vpop.eup %9660  ;;  %9674 = vpow2.f32 %v3998_v53 }
 0xe13   :  { %v9174_v15 = vpop.f32.mrf.mxu0  ;;  %v3947_v22 = vmul.f32 %v11214_v34, %v12406_v10  ;;  %v4002_v17 = vmul.f32 1.442695, %v3944_v46 }
 0xe14   :  { %4636 = vst.msk [vmem:[#allocation2 + $0x40] sm:$0xff] %vm1840_vm14, %v4634_v1  ;;  %v4641_v49 = vadd.f32 %v9174_v15, %v4639_v0  ;;  %v4638_v32 = vmul.f32 %v9647_v19, %v4634_v1  ;;  %v12407_v1 = vld [vmem:[#allocation109_spill] sm:$0xff]  ;;  %v9663_v15 = vpop.eup %9662  ;;  %9676 = vpow2.f32 %v4004_v57 }
 0xe15   :  { %v4499_v38 = vpop.f32.mrf.mxu0  ;;  %v3946_v0 = vmul.f32 %v11218_v47, %v12407_v1  ;;  %v9665_v48 = vpop.eup %9664  ;;  %v4008_v34 = vmul.f32 1.442695, %v3947_v22  ;;  %9678 = vpow2.f32 %v4002_v17 }
 0xe16   :  { %4643 = vst.msk [vmem:[#allocation2 + $0x58] sm:$0xff] %vm1840_vm14, %v4641_v49  ;;  %v4640_v59 = vadd.f32 %v4638_v32, %v4499_v38  ;;  %v4645_v60 = vmul.f32 %v9649_v41, %v4641_v49  ;;  %v3949_v49 = vmul.f32 %v11223_v8, %v11098_v9  ;;  %v9667_v38 = vpop.eup %9666 }
 0xe17   :  { %v9177_v55 = vpop.f32.mrf.mxu0  ;;  %v4006_v47 = vmul.f32 1.442695, %v3946_v0  ;;  %9680 = vpow2.f32 %v4008_v34 }
 0xe18   :  { %4642 = vst.msk [vmem:[#allocation2 + $0x50] sm:$0xff] %vm1840_vm14, %v4640_v59  ;;  %v4647_v35 = vadd.f32 %v9177_v55, %v4645_v60  ;;  %v4644_v43 = vmul.f32 %v9651_v29, %v4640_v59  ;;  %v4012_v55 = vmul.f32 1.442695, %v3949_v49 }
 0xe19   :  { %v4509_v12 = vpop.f32.mrf.mxu0  ;;  %9682 = vpow2.f32 %v4006_v47 }
 0xe1a   :  { %4649 = vst.msk [vmem:[#allocation2 + $0x68] sm:$0xff] %vm1840_vm14, %v4647_v35  ;;  %v4646_v21 = vadd.f32 %v4644_v43, %v4509_v12  ;;  %v4651_v26 = vmul.f32 %v9653_v14, %v4647_v35  ;;  %v9669_v14 = vpop.eup %9668  ;;  %9684 = vpow2.f32 %v4012_v55 }
 0xe1b   :  { %v9180_v20 = vpop.f32.mrf.mxu0  ;;  %v9671_v16 = vpop.eup %9670  ;;  %9686 = vpow2.f32 %v4010_v58 }
 0xe1c   :  { %4648 = vst.msk [vmem:[#allocation2 + $0x60] sm:$0xff] %vm1840_vm14, %v4646_v21  ;;  %v4653_v63 = vadd.f32 %v9180_v20, %v4651_v26  ;;  %v4650_v50 = vmul.f32 %v9655_v37, %v4646_v21  ;;  %v4776_v58 = vpop.f32.mrf.mxu1 }
 0xe1d   :  { %v4519_v6 = vpop.f32.mrf.mxu0 }
 0xe1e   :  { %4655 = vst.msk [vmem:[#allocation2 + $0x78] sm:$0xff] %vm1840_vm14, %v4653_v63  ;;  %v4652_v45 = vadd.f32 %v4650_v50, %v4519_v6  ;;  %v4657_v27 = vmul.f32 %v9657_v40, %v4653_v63  ;;  %v9673_v25 = vpop.eup %9672 }
 0xe1f   :  { %v9183_v13 = vpop.f32.mrf.mxu0  ;;  %v9675_v36 = vpop.eup %9674 }
 0xe20   :  { %4654 = vst.msk [vmem:[#allocation2 + $0x70] sm:$0xff] %vm1840_vm14, %v4652_v45  ;;  %v4659_v44 = vadd.f32 %v9183_v13, %v4657_v27  ;;  %v4656_v61 = vmul.f32 %v9659_v24, %v4652_v45 }
 0xe21   :  { %v4529_v33 = vpop.f32.mrf.mxu0  ;;  %v9677_v20 = vpop.eup %9676 }
 0xe22   :  { %4661 = vst.msk [vmem:[#allocation2 + $0x88] sm:$0xff] %vm1840_vm14, %v4659_v44  ;;  %v4658_v19 = vadd.f32 %v4656_v61, %v4529_v33  ;;  %v4663_v18 = vmul.f32 %v9661_v5, %v4659_v44  ;;  %v9679_v40 = vpop.eup %9678 }
 0xe23   :  { %v9186_v62 = vpop.f32.mrf.mxu0  ;;  %v4813_v3 = vld [vmem:[#allocation2 + $0x60] sm:$0xff] }
 0xe24   :  { %4660 = vst.msk [vmem:[#allocation2 + $0x80] sm:$0xff] %vm1840_vm14, %v4658_v19  ;;  %v4665_v32 = vadd.f32 %v9186_v62, %v4663_v18  ;;  %v4662_v41 = vmul.f32 %v9663_v15, %v4658_v19  ;;  %v9681_v27 = vpop.eup %9680 }
 0xe25   :  { %v4539_v54 = vpop.f32.mrf.mxu0  ;;  %v4816_v49 = vld [vmem:[#allocation2 + $0x78] sm:$0xff] }
 0xe26   :  { %4667 = vst.msk [vmem:[#allocation2 + $0x98] sm:$0xff] %vm1840_vm14, %v4665_v32  ;;  %v4664_v59 = vadd.f32 %v4662_v41, %v4539_v54  ;;  %v4669_v60 = vmul.f32 %v9665_v48, %v4665_v32  ;;  %v9683_v10 = vpop.eup %9682 }
 0xe27   :  { %v9189_v29 = vpop.f32.mrf.mxu0  ;;  %v9685_v5 = vpop.eup %9684  ;;  %v4815_v41 = vld [vmem:[#allocation2 + $0x70] sm:$0xff] }
 0xe28   :  { %4666 = vst.msk [vmem:[#allocation2 + $0x90] sm:$0xff] %vm1840_vm14, %v4664_v59  ;;  %v4671_v9 = vadd.f32 %v9189_v29, %v4669_v60  ;;  %v4668_v8 = vmul.f32 %v9667_v38, %v4664_v59  ;;  %v9687_v0 = vpop.eup %9686  ;;  %v4814_v38 = vld [vmem:[#allocation2 + $0x68] sm:$0xff]  ;;  %v4812_v59 = vld [vmem:[#allocation2 + $0x58] sm:$0xff]  ;;  %v4811_v29 = vld [vmem:[#allocation2 + $0x50] sm:$0xff] }
 0xe29   :  { %v4549_v56 = vpop.f32.mrf.mxu0 }
 0xe2a   :  { %4673 = vst.msk [vmem:[#allocation2 + $0xa8] sm:$0xff] %vm1840_vm14, %v4671_v9  ;;  %v4670_v4 = vadd.f32 %v4668_v8, %v4549_v56  ;;  %v4675_v35 = vmul.f32 %v9669_v14, %v4671_v9  ;;  %v4810_v9 = vld [vmem:[#allocation2 + $0x48] sm:$0xff]  ;;  %v4809_v14 = vld [vmem:[#allocation2 + $0x40] sm:$0xff] }
 0xe2b   :  { %v9192_v43 = vpop.f32.mrf.mxu0 }
 0xe2c   :  { %4672 = vst.msk [vmem:[#allocation2 + $0xa0] sm:$0xff] %vm1840_vm14, %v4670_v4  ;;  %v4677_v12 = vadd.f32 %v9192_v43, %v4675_v35  ;;  %v4674_v37 = vmul.f32 %v9671_v16, %v4670_v4  ;;  %v4808_v4 = vld [vmem:[#allocation2 + $0x38] sm:$0xff]  ;;  %v4807_v16 = vld [vmem:[#allocation2 + $0x30] sm:$0xff] }
 0xe2d   :  { %v4559_v7 = vpop.f32.mrf.mxu0 }
 0xe2e   :  { %4679 = vst.msk [vmem:[#allocation2 + $0xb8] sm:$0xff] %vm1840_vm14, %v4677_v12  ;;  %v4676_v21 = vadd.f32 %v4674_v37, %v4559_v7  ;;  %v4681_v26 = vmul.f32 %v9673_v25, %v4677_v12  ;;  %v12409_v12 = vld [vmem:[#allocation10_spill] sm:$0xff]  ;;  %v4778_v25 = vpop.f32.mrf.mxu1  ;;  %v4806_v7 = vld [vmem:[#allocation2 + $0x28] sm:$0xff] }
 0xe2f   :  { %v9195_v11 = vpop.f32.mrf.mxu0  ;;  %v279_v37 = vshra.s32 %v12409_v12, 3 }
 0xe30   :  { %4678 = vst.msk [vmem:[#allocation2 + $0xb0] sm:$0xff] %vm1840_vm14, %v4676_v21  ;;  %v4683_v28 = vadd.f32 %v9195_v11, %v4681_v26  ;;  %v4680_v63 = vmul.f32 %v9675_v36, %v4676_v21  ;;  %v4805_v26 = vld [vmem:[#allocation2 + $0x20] sm:$0xff]  ;;  %v4820_v36 = vld [vmem:[#allocation2 + $0x98] sm:$0xff]  ;;  %v4782_v11 = vpop.f32.mrf.mxu1 }
 0xe31   :  { %v4569_v50 = vpop.f32.mrf.mxu0  ;;  %v4822_v43 = vld [vmem:[#allocation2 + $0xa8] sm:$0xff]  ;;  %vm281_vm2 = vcmp.eq.s32.totalorder %v279_v37, %v12396_v2 }
 0xe32   :  { %4685 = vst.msk [vmem:[#allocation2 + $0xc8] sm:$0xff] %vm1840_vm14, %v4683_v28  ;;  %v4682_v30 = vadd.f32 %v4680_v63, %v4569_v50  ;;  %v4687_v46 = vmul.f32 %v9677_v20, %v4683_v28  ;;  %v4804_v20 = vld [vmem:[#allocation2 + $0x18] sm:$0xff]  ;;  %v12410_v28 = vld [vmem:[#allocation11_spill] sm:$0xff]  ;;  %v4819_v63 = vld [vmem:[#allocation2 + $0x90] sm:$0xff] }
 0xe33   :  { %v9198_v6 = vpop.f32.mrf.mxu0  ;;  %v4821_v21 = vld [vmem:[#allocation2 + $0xa0] sm:$0xff]  ;;  %vm284_vm3 = vcmp.eq.s32.totalorder %v11157_v39, %v12410_v28  ;;  %v4803_v50 = vld [vmem:[#allocation2 + $0x10] sm:$0xff]  ;;  %vm283_vm4 = vcmp.eq.s32.totalorder %v279_v37, %v12410_v28 }
 0xe34   :  { %4684 = vst.msk [vmem:[#allocation2 + $0xc0] sm:$0xff] %vm1840_vm14, %v4682_v30  ;;  %v4689_v53 = vadd.f32 %v9198_v6, %v4687_v46  ;;  %v4686_v45 = vmul.f32 %v9679_v40, %v4682_v30  ;;  %v11306_v40 = vsel %vm281_vm2, 1.0, %v12265_v23  ;;  %v4818_v30 = vld [vmem:[#allocation2 + $0x88] sm:$0xff]  ;;  %v11310_v46 = vsel %vm284_vm3, 1.0, %v12265_v23  ;;  %v4784_v6 = vpop.f32.mrf.mxu1 }
 0xe35   :  { %v4579_v24 = vpop.f32.mrf.mxu0  ;;  %v4824_v56 = vld [vmem:[#allocation2 + $0xb8] sm:$0xff]  ;;  %12411 = vst [vmem:[#allocation87_spill] sm:$0xff] %v11306_v40  ;;  %12412 = vst [vmem:[#allocation9_spill] sm:$0xff] %v11310_v46 }
 0xe36   :  { %4691 = vst.msk [vmem:[#allocation2 + $0xd8] sm:$0xff] %vm1840_vm14, %v4689_v53  ;;  %v4688_v57 = vadd.f32 %v4686_v45, %v4579_v24  ;;  %v4693_v13 = vmul.f32 %v9681_v27, %v4689_v53  ;;  %v4802_v53 = vld [vmem:[#allocation2 + $0x8] sm:$0xff]  ;;  %v12413_v45 = vld [vmem:[#allocation12_spill] sm:$0xff]  ;;  %v4817_v27 = vld [vmem:[#allocation2 + $0x80] sm:$0xff]  ;;  %v4793_v24 = vmul.f32 %v11169_v42, %v11306_v40 }
 0xe37   :  { %v9201_v22 = vpop.f32.mrf.mxu0  ;;  %v4823_v35 = vld [vmem:[#allocation2 + $0xb0] sm:$0xff]  ;;  %vm286_vm5 = vcmp.eq.s32.totalorder %v11157_v39, %v12413_v45  ;;  %vm285_vm8 = vcmp.eq.s32.totalorder %v279_v37, %v12413_v45 }
 0xe38   :  { %4690 = vst.msk [vmem:[#allocation2 + $0xd0] sm:$0xff] %vm1840_vm14, %v4688_v57  ;;  %v4695_v44 = vadd.f32 %v9201_v22, %v4693_v13  ;;  %v4692_v61 = vmul.f32 %v9683_v10, %v4688_v57  ;;  %v4801_v57 = vld [vmem:[#allocation2] sm:$0xff]  ;;  %v11317_v13 = vsel %vm283_vm4, 1.0, %v12265_v23  ;;  %v4796_v10 = vmul.f32 %v4778_v25, %v11310_v46 }
 0xe39   :  { %v4589_v17 = vpop.f32.mrf.mxu0  ;;  %v4826_v55 = vld [vmem:[#allocation2 + $0xc8] sm:$0xff]  ;;  %12414 = vst [vmem:[#allocation77_spill] sm:$0xff] %v11317_v13  ;;  %v11322_v22 = vsel %vm286_vm5, 1.0, %v12265_v23  ;;  %v4795_v42 = vmul.f32 %v4776_v58, %v11317_v13 }
 0xe3a   :  { %4697 = vst.msk [vmem:[#allocation2 + $0xe8] sm:$0xff] %vm1840_vm14, %v4695_v44  ;;  %v4694_v33 = vadd.f32 %v4692_v61, %v4589_v17  ;;  %v4699_v1 = vmul.f32 %v9685_v5, %v4695_v44  ;;  %12415 = vst [vmem:[#allocation79_spill] sm:$0xff] %v11322_v22  ;;  %v4788_v44 = vpop.f32.mrf.mxu1  ;;  %v12416_v61 = vld [vmem:[#allocation13_spill] sm:$0xff]  ;;  %v11328_v5 = vsel %vm285_vm8, 1.0, %v12265_v23  ;;  %v4798_v17 = vmul.f32 %v4784_v6, %v11322_v22 }
 0xe3b   :  { %v9204_v19 = vpop.f32.mrf.mxu0  ;;  %v4825_v8 = vld [vmem:[#allocation2 + $0xc0] sm:$0xff]  ;;  %vm288_vm10 = vcmp.eq.s32.totalorder %v11157_v39, %v12416_v61  ;;  %12417 = vst [vmem:[#allocation102_spill] sm:$0xff] %v11328_v5  ;;  %vm287_vm11 = vcmp.eq.s32.totalorder %v279_v37, %v12416_v61  ;;  %v12423_v37 = vld [vmem:[#allocation32_spill] sm:$0xff] }
 0xe3c   :  { %4696 = vst.msk [vmem:[#allocation2 + $0xe0] sm:$0xff] %vm1840_vm14, %v4694_v33  ;;  %v4701_v18 = vadd.f32 %v9204_v19, %v4699_v1  ;;  %v4698_v15 = vmul.f32 %v9687_v0, %v4694_v33  ;;  %v11333_v33 = vsel %vm288_vm10, 1.0, %v12265_v23  ;;  %v4790_v1 = vpop.f32.mrf.mxu1  ;;  %v4797_v0 = vmul.f32 %v4782_v11, %v11328_v5 }
 0xe3d   :  { %v4599_v62 = vpop.f32.mrf.mxu0  ;;  %v4828_v31 = vld [vmem:[#allocation2 + $0xd8] sm:$0xff]  ;;  %12418 = vst [vmem:[#allocation103_spill] sm:$0xff] %v11333_v33  ;;  %v11337_v39 = vsel %vm287_vm11, 1.0, %v12265_v23  ;;  %v4800_v19 = vmul.f32 %v4790_v1, %v11333_v33 }
 0xe3e   :  { %4703 = vst.msk [vmem:[#allocation2 + $0xf8] sm:$0xff] %vm1840_vm14, %v4701_v18  ;;  %v4700_v48 = vadd.f32 %v4698_v15, %v4599_v62  ;;  %12419 = vst [vmem:[#allocation104_spill] sm:$0xff] %v11337_v39  ;;  %v4799_v18 = vmul.f32 %v4788_v44, %v11337_v39  ;;  %v12420_v15 = vld [vmem:[#allocation18_spill] sm:$0xff]  ;;  %v4980_v62 = vld [vmem:[#allocation3 + $0x2a8] sm:$0xff] }
 0xe3f   :  { %v4827_v60 = vld [vmem:[#allocation2 + $0xd0] sm:$0xff]  ;;  %9209 = vmatprep.subr.mxu1 %v4980_v62  ;;  %v12426_v44 = vld [vmem:[#allocation14_spill] sm:$0xff] }
 0xe40   :  { %4702 = vst.msk [vmem:[#allocation2 + $0xf0] sm:$0xff] %vm1840_vm14, %v4700_v48  ;;  %9210 = vmatpush3.msra.mxu1 %v4980_v62  ;;  %v4979_v48 = vld [vmem:[#allocation3 + $0x2a0] sm:$0xff] }
 0xe41   :  { %v4830_v54 = vld [vmem:[#allocation2 + $0xe8] sm:$0xff]  ;;  %9211 = vmatprep.subr.mxu1 %v4979_v48 }
 0xe42   :  { %9212 = vmatpush3.msra.mxu1 %v4979_v48  ;;  %v12428_v48 = vld [vmem:[#allocation16_spill] sm:$0xff] }
 0xe43   :  { %v4829_v47 = vld [vmem:[#allocation2 + $0xe0] sm:$0xff] }
 0xe45   :  { %v4832_v34 = vld [vmem:[#allocation2 + $0xf8] sm:$0xff] }
 0xe46   :  { %8271 = vmatprep.subr.mxu0 %v4832_v34  ;;  %v4978_v34 = vld [vmem:[#allocation3 + $0x298] sm:$0xff] }
 0xe47   :  { %8272 = vmatpush3.msra.mxu0 %v4816_v49  ;;  %v4831_v32 = vld [vmem:[#allocation2 + $0xf0] sm:$0xff]  ;;  %9213 = vmatprep.subr.mxu1 %v4978_v34 }
 0xe48   :  { %8273 = vmatprep.subr.mxu0 %v4831_v32  ;;  %9214 = vmatpush3.msra.mxu1 %v4978_v34  ;;  %v4977_v49 = vld [vmem:[#allocation3 + $0x290] sm:$0xff]  ;;  %v4976_v32 = vld [vmem:[#allocation3 + $0x288] sm:$0xff] }
 0xe49   :  { %8274 = vmatpush3.msra.mxu0 %v4815_v41  ;;  %9215 = vmatprep.subr.mxu1 %v4977_v49  ;;  %v4975_v41 = vld [vmem:[#allocation3 + $0x280] sm:$0xff] }
 0xe4a   :  { %8275 = vmatprep.subr.mxu0 %v4830_v54  ;;  %9216 = vmatpush3.msra.mxu1 %v4977_v49 }
 0xe4b   :  { %8276 = vmatpush3.msra.mxu0 %v4814_v38  ;;  %9217 = vmatprep.subr.mxu1 %v4976_v32  ;;  %v7710_v38 = vld [vmem:[#allocation3 + $0x278] ss:$0 sm:$0xff] }
 0xe4c   :  { %8277 = vmatprep.subr.mxu0 %v4829_v47  ;;  %9218 = vmatpush3.msra.mxu1 %v4976_v32  ;;  %v4840_v25 = vmul.f32 %v7710_v38, %v12423_v37 }
 0xe4d   :  { %8278 = vmatpush3.msra.mxu0 %v4813_v3  ;;  %9219 = vmatprep.subr.mxu1 %v4975_v41  ;;  %v12421_v3 = vld [vmem:[#allocation30_spill] sm:$0xff] }
 0xe4e   :  { %8279 = vmatprep.subr.mxu0 %v4828_v31  ;;  %9220 = vmatpush3.msra.mxu1 %v4975_v41  ;;  %v4838_v31 = vmul.f32 %v7710_v38, %v12421_v3  ;;  %v5123_v3 = vld [vmem:[#allocation3 + $0x2d0] sm:$0xff] }
 0xe4f   :  { %8280 = vmatpush3.msra.mxu0 %v4812_v59 }
 0xe50   :  { %8281 = vmatprep.subr.mxu0 %v4827_v60 }
 0xe51   :  { %8282 = vmatpush3.msra.mxu0 %v4811_v29 }
 0xe52   :  { %8283 = vmatprep.subr.mxu0 %v4826_v55  ;;  %v4960_v55 = vpop.permute.xlu0 %4959 }
 0xe53   :  { %8284 = vmatpush3.msra.mxu0 %v4810_v9 }
 0xe54   :  { %8285 = vmatprep.subr.mxu0 %v4825_v8 }
 0xe55   :  { %8286 = vmatpush3.msra.mxu0 %v4809_v14  ;;  %v12422_v14 = vld [vmem:[#allocation31_spill] sm:$0xff] }
 0xe56   :  { %8287 = vmatprep.subr.mxu0 %v4824_v56  ;;  %v4839_v56 = vmul.f32 %v7710_v38, %v12422_v14 }
 0xe57   :  { %8288 = vmatpush3.msra.mxu0 %v4808_v4 }
 0xe58   :  { %8289 = vmatprep.subr.mxu0 %v4823_v35 }
 0xe59   :  { %8290 = vmatpush3.msra.mxu0 %v4807_v16  ;;  %v4962_v16 = vpop.permute.xlu1 %4961 }
 0xe5a   :  { %8291 = vmatprep.subr.mxu0 %v4822_v43 }
 0xe5b   :  { %8292 = vmatpush3.msra.mxu0 %v4806_v7 }
 0xe5c   :  { %8293 = vmatprep.subr.mxu0 %v4821_v21 }
 0xe5d   :  { %8294 = vmatpush3.msra.mxu0 %v4805_v26 }
 0xe5e   :  { %8295 = vmatprep.subr.mxu0 %v4820_v36  ;;  %v4964_v36 = vpop.permute.xlu0 %4963 }
 0xe5f   :  { %8296 = vmatpush3.msra.mxu0 %v4804_v20 }
 0xe60   :  { %8297 = vmatprep.subr.mxu0 %v4819_v63  ;;  %v12424_v63 = vld [vmem:[#allocation33_spill] sm:$0xff] }
 0xe61   :  { %8298 = vmatpush3.msra.mxu0 %v4803_v50  ;;  %v4841_v50 = vmul.f32 %v7710_v38, %v12424_v63  ;;  %v5125_v38 = vld [vmem:[#allocation3 + $0x2e0] sm:$0xff] }
 0xe62   :  { %8299 = vmatprep.subr.mxu0 %v4818_v30  ;;  %9227 = vmatprep.subr.mxu1 %v5125_v38 }
 0xe63   :  { %8300 = vmatpush3.msra.mxu0 %v4802_v53  ;;  %v4966_v53 = vpop.permute.xlu1 %4965 }
 0xe64   :  { %8301 = vmatprep.subr.mxu0 %v4817_v27 }
 0xe65   :  { %8302 = vmatpush3.msra.mxu0 %v4801_v57 }
 0xe66   :  { %4907 = vmatmul.mubr.f32.vlgmr.msra.gmra.mxu0 %v4793_v24  ;;  %v12425_v24 = vld [vmem:[#allocation15_spill] sm:$0xff] }
 0xe67   :  { %4911 = vmatprep.mubr.f32.mxu0 %v4796_v10 }
 0xe6a   :  { %4912 = vmatmul.mubr.f32.gmra.mxu0 %v4795_v42 }
 0xe6b   :  { %4916 = vmatprep.mubr.f32.mxu0 %v4798_v17 }
 0xe6e   :  { %4917 = vmatmul.mubr.f32.gmra.mxu0 %v4797_v0 }
 0xe6f   :  { %4921 = vmatprep.mubr.f32.mxu0 %v4800_v19 }
 0xe72   :  { %4922 = vmatmul.mubr.f32.gmra.mxu0 %v4799_v18 }
 0xe73   :  { %9249 = vmatprep.mubr.msk.f32.mxu0 %vm421_vm0, %v12420_v15  ;;  %v12427_v15 = vld [vmem:[#allocation17_spill] sm:$0xff] }
 0xf26   :  { %v8303_v54 = vpop.f32.mrf.mxu0 }
 0xf28   :  { %v8304_v47 = vpop.f32.mrf.mxu0 }
 0xf29   :  { %v8305_v59 = vadd.f32 %v8304_v47, %v8303_v54  ;;  %v5124_v47 = vld [vmem:[#allocation3 + $0x2d8] sm:$0xff] }
 0xf2a   :  { %v8306_v60 = vpop.f32.mrf.mxu0 }
 0xf2b   :  { %v4909_v29 = vadd.f32 %v8305_v59, %v4838_v31  ;;  %v5122_v31 = vld [vmem:[#allocation3 + $0x2c8] sm:$0xff] }
 0xf2c   :  { %v8307_v9 = vpop.f32.mrf.mxu0 }
 0xf2d   :  { %v4971_v8 = vmul.f32 %v4960_v55, %v4909_v29  ;;  %v8308_v58 = vadd.f32 %v8307_v9, %v8306_v60 }
 0xf2e   :  { %v8309_v4 = vpop.f32.mrf.mxu0 }
 0xf2f   :  { %v4914_v35 = vadd.f32 %v8308_v58, %v4839_v56  ;;  %9221 = vmatprep.mubr.msk.f32.mxu1 %vm1840_vm14, %v4971_v8 }
 0xf30   :  { %v8310_v43 = vpop.f32.mrf.mxu0 }
 0xf31   :  { %v4972_v12 = vmul.f32 %v4962_v16, %v4914_v35  ;;  %v8311_v7 = vadd.f32 %v8310_v43, %v8309_v4 }
 0xf32   :  { %v8312_v21 = vpop.f32.mrf.mxu0 }
 0xf33   :  { %v4919_v26 = vadd.f32 %v8311_v7, %v4840_v25  ;;  %9222 = vmatmul.mubr.msk.f32.vlgmr.msra.gmra.mxu1 %vm1840_vm14, %v4972_v12  ;;  %v7719_v7 = vld [vmem:[#allocation3 + $0x2c0] ss:$0 sm:$0xff] }
 0xf34   :  { %v8313_v11 = vpop.f32.mrf.mxu0  ;;  %9228 = vmatpush3.msra.mxu1 %v5125_v38  ;;  %v12439_v38 = vld [vmem:[#allocation25_spill] sm:$0xff] }
 0xf35   :  { %v4973_v20 = vmul.f32 %v4964_v36, %v4919_v26  ;;  %v8314_v30 = vadd.f32 %v8313_v11, %v8312_v21  ;;  %9229 = vmatprep.subr.mxu1 %v5124_v47 }
 0xf36   :  { %9230 = vmatpush3.msra.mxu1 %v5124_v47 }
 0xf37   :  { %v4924_v6 = vadd.f32 %v8314_v30, %v4841_v50  ;;  %9224 = vmatprep.mubr.msk.f32.mxu1 %vm1840_vm14, %v4973_v20  ;;  %9231 = vmatprep.subr.mxu1 %v5123_v3 }
 0xf38   :  { %9232 = vmatpush3.msra.mxu1 %v5123_v3  ;;  %v12440_v3 = vld [vmem:[#allocation26_spill] sm:$0xff] }
 0xf39   :  { %v4974_v45 = vmul.f32 %v4966_v53, %v4924_v6  ;;  %9233 = vmatprep.subr.mxu1 %v5122_v31 }
 0xf3a   :  { %9234 = vmatpush3.msra.mxu1 %v5122_v31 }
 0xf3b   :  { %9225 = vmatmul.mubr.msk.f32.gmra.mxu1 %vm1840_vm14, %v4974_v45 }
 0xff3   :  { %v9223_v27 = vpop.f32.mrf.mxu1 }
 0xff4   :  { %v5067_v57 = vadd.f32 %v9223_v27, %v12425_v24 }
 0xff5   :  { %v5061_v10 = vpop.f32.mrf.mxu1 }
 0xff6   :  { %v5062_v61 = vadd.f32 %v5061_v10, %v12426_v44  ;;  %v5081_v42 = vmul.f32 %v5067_v57, %v5067_v57 }
 0xff8   :  { %v5087_v17 = vsel %vm421_vm0, %v5081_v42, 0.0  ;;  %v5080_v1 = vmul.f32 %v5062_v61, %v5062_v61 }
 0xff9   :  { %5088 = vadd.xlane.f32.xlu1 %v5087_v17 }
 0xffa   :  { %v5084_v0 = vsel %vm421_vm0, %v5080_v1, 0.0 }
 0xffb   :  { %v9226_v19 = vpop.f32.mrf.mxu1  ;;  %5085 = vadd.xlane.f32.xlu0 %v5084_v0  ;;  %v12433_v0 = vld [vmem:[#allocation19_spill] sm:$0xff] }
 0xffc   :  { %v5077_v62 = vadd.f32 %v9226_v19, %v12427_v15  ;;  %v12434_v19 = vld [vmem:[#allocation20_spill] sm:$0xff]  ;;  %v12436_v15 = vld [vmem:[#allocation22_spill] sm:$0xff] }
 0xffd   :  { %v5071_v18 = vpop.f32.mrf.mxu1 }
 0xffe   :  { %v5072_v34 = vadd.f32 %v5071_v18, %v12428_v48  ;;  %v5083_v41 = vmul.f32 %v5077_v62, %v5077_v62  ;;  %v12435_v18 = vld [vmem:[#allocation21_spill] sm:$0xff]  ;;  %v12437_v48 = vld [vmem:[#allocation23_spill] sm:$0xff] }
0x1000   :  { %v5082_v49 = vmul.f32 %v5072_v34, %v5072_v34  ;;  %v5093_v54 = vsel %vm421_vm0, %v5083_v41, 0.0 }
0x1002   :  { %v5090_v32 = vsel %vm421_vm0, %v5082_v49, 0.0  ;;  %v12438_v49 = vld [vmem:[#allocation24_spill] sm:$0xff] }
0x1003   :  { %5091 = vadd.xlane.f32.xlu0 %v5090_v32 }
0x1007   :  { %5094 = vadd.xlane.f32.xlu0 %v5093_v54 }
0x1082   :  { %v5089_v59 = vpop.xlane.xlu1 %5088 }
0x1083   :  { %v5098_v60 = vmul.f32 0.03125, %v5089_v59 }
0x1084   :  { %v5086_v29 = vpop.xlane.xlu0 %5085 }
0x1085   :  { %v5102_v55 = vadd.f32 1e-05, %v5098_v60  ;;  %v5097_v9 = vmul.f32 0.03125, %v5086_v29  ;;  %v12441_v60 = vld [vmem:[#allocation27_spill] sm:$0xff]  ;;  %v12442_v29 = vld [vmem:[#allocation28_spill] sm:$0xff] }
0x1087   :  { %9688 = vrsqrt.f32 %v5102_v55  ;;  %v5101_v8 = vadd.f32 1e-05, %v5097_v9  ;;  %v12443_v55 = vld [vmem:[#allocation29_spill] sm:$0xff] }
0x1089   :  { %9690 = vrsqrt.f32 %v5101_v8 }
0x108c   :  { %v5092_v14 = vpop.xlane.xlu0 %5091 }
0x108d   :  { %v5099_v56 = vmul.f32 0.03125, %v5092_v14 }
0x108f   :  { %v5103_v58 = vadd.f32 1e-05, %v5099_v56 }
0x1090   :  { %v5095_v4 = vpop.xlane.xlu0 %5094 }
0x1091   :  { %9692 = vrsqrt.f32 %v5103_v58  ;;  %v5100_v35 = vmul.f32 0.03125, %v5095_v4  ;;  %v5437_v58 = vld [vmem:[#allocation3 + $0x330] sm:$0xff]  ;;  %v5603_v4 = vld [vmem:[#allocation3 + $0x378] sm:$0xff] }
0x1092   :  { %9267 = vmatprep.subr.mxu1 %v5437_v58 }
0x1093   :  { %v5104_v16 = vadd.f32 1e-05, %v5100_v35  ;;  %v5436_v35 = vld [vmem:[#allocation3 + $0x328] sm:$0xff] }
0x1094   :  { %v9689_v43 = vpop.eup %9688 }
0x1095   :  { %9694 = vrsqrt.f32 %v5104_v16  ;;  %v5110_v37 = vmul.f32 %v9689_v43, %v5067_v57  ;;  %v5602_v16 = vld [vmem:[#allocation3 + $0x370] sm:$0xff]  ;;  %v5435_v43 = vld [vmem:[#allocation3 + $0x320] sm:$0xff] }
0x1096   :  { %v9691_v12 = vpop.eup %9690 }
0x1097   :  { %v5109_v25 = vmul.f32 %v9691_v12, %v5062_v61  ;;  %v11361_v26 = vmul.f32 %v7719_v7, %v5110_v37  ;;  %v5601_v12 = vld [vmem:[#allocation3 + $0x368] sm:$0xff]  ;;  %v5434_v37 = vld [vmem:[#allocation3 + $0x318] sm:$0xff] }
0x1099   :  { %v11359_v21 = vmul.f32 %v7719_v7, %v5109_v25  ;;  %12430 = vst [vmem:[#allocation106_spill] sm:$0xff] %v11361_v26  ;;  %v5600_v25 = vld [vmem:[#allocation3 + $0x360] sm:$0xff] }
0x109b   :  { %12429 = vst [vmem:[#allocation105_spill] sm:$0xff] %v11359_v21  ;;  %9235 = vmatprep.mubr.msk.f32.mxu1 %vm421_vm0, %v11359_v21 }
0x109c   :  { %9236 = vmatmul.mubr.msk.f32.vlgmr.msra.gmra.mxu1 %vm421_vm0, %v11361_v26 }
0x109d   :  { %9268 = vmatpush3.msra.mxu1 %v5437_v58 }
0x109e   :  { %v9693_v36 = vpop.eup %9692  ;;  %9269 = vmatprep.subr.mxu1 %v5436_v35 }
0x109f   :  { %v5111_v11 = vmul.f32 %v9693_v36, %v5072_v34  ;;  %9270 = vmatpush3.msra.mxu1 %v5436_v35  ;;  %v5599_v36 = vld [vmem:[#allocation3 + $0x358] sm:$0xff] }
0x10a0   :  { %9271 = vmatprep.subr.mxu1 %v5435_v43 }
0x10a1   :  { %v11367_v20 = vmul.f32 %v7719_v7, %v5111_v11  ;;  %9272 = vmatpush3.msra.mxu1 %v5435_v43  ;;  %v5432_v11 = vld [vmem:[#allocation3 + $0x308] sm:$0xff] }
0x10a2   :  { %v9695_v63 = vpop.eup %9694  ;;  %9273 = vmatprep.subr.mxu1 %v5434_v37 }
0x10a3   :  { %12431 = vst [vmem:[#allocation107_spill] sm:$0xff] %v11367_v20  ;;  %9238 = vmatprep.mubr.msk.f32.mxu1 %vm421_vm0, %v11367_v20  ;;  %v5112_v50 = vmul.f32 %v9695_v63, %v5077_v62  ;;  %9274 = vmatpush3.msra.mxu1 %v5434_v37  ;;  %v5598_v63 = vld [vmem:[#allocation3 + $0x350] sm:$0xff] }
0x10a4   :  { %v7736_v37 = vld [vmem:[#allocation3 + $0x2f0] ss:$0 sm:$0xff] }
0x10a5   :  { %v11371_v30 = vmul.f32 %v7719_v7, %v5112_v50  ;;  %v5433_v7 = vld [vmem:[#allocation3 + $0x310] sm:$0xff]  ;;  %v5431_v50 = vld [vmem:[#allocation3 + $0x300] sm:$0xff] }
0x10a6   :  { %9275 = vmatprep.subr.mxu1 %v5433_v7 }
0x10a7   :  { %12432 = vst [vmem:[#allocation108_spill] sm:$0xff] %v11371_v30  ;;  %9239 = vmatmul.mubr.msk.f32.gmra.mxu1 %vm421_vm0, %v11371_v30 }
0x10a8   :  { %9276 = vmatpush3.msra.mxu1 %v5433_v7 }
0x10a9   :  { %9277 = vmatprep.subr.mxu1 %v5432_v11 }
0x10aa   :  { %9278 = vmatpush3.msra.mxu1 %v5432_v11 }
0x10ab   :  { %9279 = vmatprep.subr.mxu1 %v5431_v50 }
0x10ac   :  { %9280 = vmatpush3.msra.mxu1 %v5431_v50 }
0x115c   :  { %v11375_v6 = vpop.f32.mrf.mxu1 }
0x115d   :  { %v7890_v53 = vmul.f32 -1.442695, %v11375_v6 }
0x115e   :  { %v11378_v45 = vpop.f32.mrf.mxu1 }
0x115f   :  { %9696 = vpow2.f32 %v7890_v53  ;;  %v7889_v27 = vmul.f32 -1.442695, %v11378_v45  ;;  %v5597_v53 = vld [vmem:[#allocation3 + $0x348] sm:$0xff] }
0x1161   :  { %9698 = vpow2.f32 %v7889_v27  ;;  %v5430_v27 = vld [vmem:[#allocation3 + $0x2f8] sm:$0xff] }
0x1162   :  { %9281 = vmatprep.subr.mxu1 %v5430_v27 }
0x1163   :  { %9282 = vmatpush3.msra.mxu1 %v5430_v27 }
0x1167   :  { %v11381_v24 = vpop.f32.mrf.mxu1 }
0x1168   :  { %v7892_v57 = vmul.f32 -1.442695, %v11381_v24  ;;  %9241 = vmatprep.subr.mxu0 %v11381_v24 }
0x1169   :  { %v11385_v10 = vpop.f32.mrf.mxu1  ;;  %9242 = vmatpush3.msra.mxu0 %v11381_v24 }
0x116a   :  { %9700 = vpow2.f32 %v7892_v57  ;;  %v7891_v44 = vmul.f32 -1.442695, %v11385_v10  ;;  %9243 = vmatprep.subr.mxu0 %v11385_v10  ;;  %v5596_v57 = vld [vmem:[#allocation3 + $0x340] sm:$0xff] }
0x116b   :  { %9244 = vmatpush3.msra.mxu0 %v11385_v10 }
0x116c   :  { %v9697_v61 = vpop.eup %9696  ;;  %9702 = vpow2.f32 %v7891_v44  ;;  %9245 = vmatprep.subr.mxu0 %v11375_v6  ;;  %v11425_v44 = vld [vmem:[#allocation3 + $0x388] sm:$0xff] }
0x116d   :  { %v7163_v42 = vadd.f32 1.0, %v9697_v61  ;;  %9246 = vmatpush3.msra.mxu0 %v11375_v6  ;;  %9311 = vmatprep.subr.mxu1 %v11425_v44 }
0x116e   :  { %v9699_v17 = vpop.eup %9698  ;;  %9247 = vmatprep.subr.mxu0 %v11378_v45 }
0x116f   :  { %9704 = vrcp.f32 %v7163_v42  ;;  %v7162_v1 = vadd.f32 1.0, %v9699_v17  ;;  %9248 = vmatpush3.msra.mxu0 %v11378_v45 }
0x1170   :  { %9250 = vmatmul.mubr.msk.f32.vlgmr.msra.gmra.mxu0 %vm421_vm0, %v12433_v0  ;;  %9289 = vmatprep.subr.mxu0 %v5603_v4 }
0x1171   :  { %9706 = vrcp.f32 %v7162_v1  ;;  %9252 = vmatprep.mubr.msk.f32.mxu0 %vm421_vm0, %v12434_v19  ;;  %9290 = vmatpush3.msra.mxu0 %v5603_v4  ;;  %v5223_v1 = vld [vmem:[#allocation3 + $0x2e8] sm:$0xf]  ;;  %v12444_v19 = vsub.s32 2, %v12396_v2 }
0x1172   :  { %9291 = vmatprep.subr.mxu0 %v5602_v16 }
0x1173   :  { %9292 = vmatpush3.msra.mxu0 %v5602_v16 }
0x1174   :  { %9253 = vmatmul.mubr.msk.f32.gmra.mxu0 %vm421_vm0, %v12435_v18  ;;  %9293 = vmatprep.subr.mxu0 %v5601_v12  ;;  %v5360_v18 = vrot.slane %v5223_v1, %v12444_v19 }
0x1175   :  { %9255 = vmatprep.mubr.msk.f32.mxu0 %vm421_vm0, %v12436_v15  ;;  %9294 = vmatpush3.msra.mxu0 %v5601_v12 }
0x1176   :  { %9295 = vmatprep.subr.mxu0 %v5600_v25 }
0x1177   :  { %v9701_v62 = vpop.eup %9700  ;;  %9296 = vmatpush3.msra.mxu0 %v5600_v25 }
0x1178   :  { %9256 = vmatmul.mubr.msk.f32.gmra.mxu0 %vm421_vm0, %v12437_v48  ;;  %v7165_v32 = vadd.f32 1.0, %v9701_v62  ;;  %9297 = vmatprep.subr.mxu0 %v5599_v36  ;;  %v12445_v62 = vsub.s32 3, %v12396_v2 }
0x1179   :  { %v9703_v34 = vpop.eup %9702  ;;  %9258 = vmatprep.mubr.msk.f32.mxu0 %vm421_vm0, %v12438_v49  ;;  %9298 = vmatpush3.msra.mxu0 %v5599_v36 }
0x117a   :  { %v7164_v41 = vadd.f32 1.0, %v9703_v34  ;;  %9299 = vmatprep.subr.mxu0 %v5598_v63  ;;  %v5352_v48 = vrot.slane %v5223_v1, %v12445_v62  ;;  %v12446_v34 = vsub.s32 1, %v12396_v2 }
0x117b   :  { %9300 = vmatpush3.msra.mxu0 %v5598_v63 }
0x117c   :  { %v9705_v54 = vpop.eup %9704  ;;  %9708 = vrcp.f32 %v7164_v41  ;;  %9259 = vmatmul.mubr.msk.f32.gmra.mxu0 %vm421_vm0, %v12439_v38  ;;  %9301 = vmatprep.subr.mxu0 %v5597_v53  ;;  %v5372_v49 = vrot.slane %v5223_v1, %v12446_v34  ;;  %v5354_v38 = vmul.f32 %v11375_v6, %v5352_v48 }
0x117d   :  { %v7175_v47 = vmul.f32 %v9705_v54, %v11375_v6  ;;  %9261 = vmatprep.mubr.msk.f32.mxu0 %vm421_vm0, %v12440_v3  ;;  %9710 = vrcp.f32 %v7165_v32  ;;  %9302 = vmatpush3.msra.mxu0 %v5597_v53  ;;  %v5355_v6 = vmul.f32 %v5352_v48, %v11385_v10 }
0x117e   :  { %v9707_v31 = vpop.eup %9706  ;;  %9303 = vmatprep.subr.mxu0 %v5596_v57 }
0x117f   :  { %7184 = vrot.lane.b32.xlu0 %v7175_v47, %s9868_s0  ;;  %v7174_v59 = vmul.f32 %v9707_v31, %v11378_v45  ;;  %9304 = vmatpush3.msra.mxu0 %v5596_v57  ;;  %v12447_v31 = vsub.s32 0, %v12396_v2 }
0x1180   :  { %9262 = vmatmul.mubr.msk.f32.gmra.mxu0 %vm421_vm0, %v12441_v60 }
0x1181   :  { %7182 = vrot.lane.b32.xlu1 %v7174_v59, %s9868_s0  ;;  %9264 = vmatprep.mubr.msk.f32.mxu0 %vm421_vm0, %v12442_v29  ;;  %v5384_v59 = vrot.slane %v5223_v1, %v12447_v31 }
0x1184   :  { %9265 = vmatmul.mubr.msk.f32.gmra.mxu0 %vm421_vm0, %v12443_v55  ;;  %v5353_v55 = vmul.f32 %v5352_v48, %v11378_v45 }
0x1189   :  { %v9709_v9 = vpop.eup %9708 }
0x118a   :  { %v7176_v8 = vmul.f32 %v9709_v9, %v11385_v10  ;;  %v9711_v14 = vpop.eup %9710 }
0x118b   :  { %v7177_v56 = vmul.f32 %v9711_v14, %v11381_v24  ;;  %v5356_v14 = vmul.f32 %v11381_v24, %v5352_v48 }
0x118c   :  { %7186 = vrot.lane.b32.xlu1 %v7176_v8, %s9868_s0 }
0x1190   :  { %7188 = vrot.lane.b32.xlu1 %v7177_v56, %s9868_s0 }
0x1230   :  { %v9251_v61 = vpop.f32.mrf.mxu0 }
0x1231   :  { %v5362_v41 = vmul.f32 %v9251_v61, %v5360_v18 }
0x1232   :  { %v5290_v42 = vpop.f32.mrf.mxu0 }
0x1233   :  { %v5361_v47 = vmul.f32 %v5360_v18, %v5290_v42  ;;  %v5366_v29 = vadd.f32 %v5362_v41, %v5354_v38 }
0x1234   :  { %v9254_v17 = vpop.f32.mrf.mxu0 }
0x1235   :  { %v5364_v9 = vmul.f32 %v9254_v17, %v5360_v18  ;;  %v5365_v4 = vadd.f32 %v5361_v47, %v5353_v55 }
0x1236   :  { %v5300_v0 = vpop.f32.mrf.mxu0 }
0x1237   :  { %v5363_v56 = vmul.f32 %v5360_v18, %v5300_v0  ;;  %v5368_v25 = vadd.f32 %v5364_v9, %v5356_v14  ;;  %v5689_v9 = vld [vmem:[#allocation3 + $0x380] sm:$0xff] }
0x1238   :  { %v9257_v15 = vpop.f32.mrf.mxu0 }
0x1239   :  { %v5374_v3 = vmul.f32 %v9257_v15, %v5372_v49  ;;  %v5367_v45 = vadd.f32 %v5363_v56, %v5355_v6  ;;  %v12458_v6 = vld [vmem:[#allocation40_spill] sm:$0xff] }
0x123a   :  { %v5310_v32 = vpop.f32.mrf.mxu0 }
0x123b   :  { %v5373_v8 = vmul.f32 %v5372_v49, %v5310_v32  ;;  %v5378_v35 = vadd.f32 %v5374_v3, %v5366_v29 }
0x123c   :  { %v9260_v54 = vpop.f32.mrf.mxu0 }
0x123d   :  { %v5376_v16 = vmul.f32 %v9260_v54, %v5372_v49  ;;  %v5377_v7 = vadd.f32 %v5373_v8, %v5365_v4  ;;  %v12454_v4 = vld [vmem:[#allocation36_spill] sm:$0xff] }
0x123e   :  { %v5320_v60 = vpop.f32.mrf.mxu0 }
0x123f   :  { %v5375_v12 = vmul.f32 %v5372_v49, %v5320_v60  ;;  %v5380_v50 = vadd.f32 %v5376_v16, %v5368_v25  ;;  %v12456_v16 = vld [vmem:[#allocation38_spill] sm:$0xff]  ;;  %v12462_v25 = vld [vmem:[#allocation44_spill] sm:$0xff] }
0x1240   :  { %v9263_v58 = vpop.f32.mrf.mxu0 }
0x1241   :  { %v5386_v43 = vmul.f32 %v9263_v58, %v5384_v59  ;;  %v5379_v57 = vadd.f32 %v5375_v12, %v5367_v45  ;;  %v12452_v58 = vld [vmem:[#allocation34_spill] sm:$0xff]  ;;  %v12459_v12 = vld [vmem:[#allocation41_spill] sm:$0xff]  ;;  %v12466_v45 = vld [vmem:[#allocation52_spill] sm:$0xff] }
0x1242   :  { %v5330_v2 = vpop.f32.mrf.mxu0 }
0x1243   :  { %v5390_v36 = vadd.f32 %v5386_v43, %v5378_v35  ;;  %v5385_v11 = vmul.f32 %v5384_v59, %v5330_v2  ;;  %v12455_v35 = vld [vmem:[#allocation37_spill] sm:$0xff]  ;;  %v12457_v43 = vld [vmem:[#allocation39_spill] sm:$0xff] }
0x1244   :  { %v9266_v63 = vpop.f32.mrf.mxu0  ;;  %v12461_v2 = vld [vmem:[#allocation43_spill] sm:$0xff] }
0x1245   :  { %v5399_v53 = vadd.f32 %v7736_v37, %v5390_v36  ;;  %v5389_v24 = vadd.f32 %v5385_v11, %v5377_v7  ;;  %v5388_v27 = vmul.f32 %v9266_v63, %v5384_v59  ;;  %v12463_v7 = vld [vmem:[#allocation47_spill] sm:$0xff]  ;;  %v12464_v36 = vld [vmem:[#allocation48_spill] sm:$0xff] }
0x1246   :  { %v5340_v61 = vpop.f32.mrf.mxu0  ;;  %v12465_v11 = vld [vmem:[#allocation51_spill] sm:$0xff] }
0x1247   :  { %v7738_v42 = vmul.f32 -1.442695, %v5399_v53  ;;  %v5398_v17 = vadd.f32 %v7736_v37, %v5389_v24  ;;  %v5392_v1 = vadd.f32 %v5388_v27, %v5380_v50  ;;  %v5387_v0 = vmul.f32 %v5384_v59, %v5340_v61  ;;  %v12467_v63 = vld [vmem:[#allocation55_spill] sm:$0xff]  ;;  %v12468_v50 = vld [vmem:[#allocation56_spill] sm:$0xff]  ;;  %v12471_v27 = vld [vmem:[#allocation62_spill] sm:$0xff] }
0x1248   :  { %v12470_v24 = vld [vmem:[#allocation60_spill] sm:$0xff] }
0x1249   :  { %9712 = vpow2.f32 %v7738_v42  ;;  %v7737_v10 = vmul.f32 -1.442695, %v5398_v17  ;;  %v5401_v19 = vadd.f32 %v7736_v37, %v5392_v1  ;;  %v5391_v18 = vadd.f32 %v5387_v0, %v5379_v57  ;;  %v12472_v57 = vld [vmem:[#allocation63_spill] sm:$0xff]  ;;  %v12473_v61 = vld [vmem:[#allocation64_spill] sm:$0xff]  ;;  %v12474_v42 = vld [vmem:[#allocation65_spill] sm:$0xff] }
0x124a   :  { %v12476_v1 = vld [vmem:[#allocation70_spill] sm:$0xff]  ;;  %v12477_v0 = vld [vmem:[#allocation72_spill] sm:$0xff] }
0x124b   :  { %9714 = vpow2.f32 %v7737_v10  ;;  %v7740_v15 = vmul.f32 -1.442695, %v5401_v19  ;;  %v5400_v62 = vadd.f32 %v7736_v37, %v5391_v18  ;;  %v12460_v37 = vld [vmem:[#allocation42_spill] sm:$0xff] }
0x124c   :  { %v12478_v10 = vld [vmem:[#allocation74_spill] sm:$0xff] }
0x124d   :  { %9716 = vpow2.f32 %v7740_v15  ;;  %v7739_v48 = vmul.f32 -1.442695, %v5400_v62  ;;  %v12480_v18 = vld [vmem:[#allocation78_spill] sm:$0xff]  ;;  %v12481_v15 = vld [vmem:[#allocation80_spill] sm:$0xff] }
0x124f   :  { %9718 = vpow2.f32 %v7739_v48  ;;  %v12483_v48 = vld [vmem:[#allocation82_spill] sm:$0xff] }
0x1256   :  { %v9713_v34 = vpop.eup %9712 }
0x1257   :  { %v5415_v49 = vadd.f32 1.0, %v9713_v34  ;;  %v7741_v34 = vld [vmem:[#allocation3 + $0x338] ss:$0 sm:$0xff] }
0x1258   :  { %v9715_v32 = vpop.eup %9714 }
0x1259   :  { %v5414_v41 = vadd.f32 1.0, %v9715_v32  ;;  %9720 = vrcp.f32 %v5415_v49 }
0x125a   :  { %v9717_v54 = vpop.eup %9716 }
0x125b   :  { %9722 = vrcp.f32 %v5414_v41  ;;  %v5417_v38 = vadd.f32 1.0, %v9717_v54 }
0x125c   :  { %v9719_v47 = vpop.eup %9718 }
0x125d   :  { %v5416_v3 = vadd.f32 1.0, %v9719_v47  ;;  %9724 = vrcp.f32 %v5417_v38 }
0x125f   :  { %9726 = vrcp.f32 %v5416_v3 }
0x1266   :  { %v9721_v31 = vpop.eup %9720 }
0x1267   :  { %v11442_v29 = vmul.f32 %v9721_v31, %v5399_v53  ;;  %v12469_v53 = vld [vmem:[#allocation59_spill] sm:$0xff] }
0x1268   :  { %v9723_v59 = vpop.eup %9722 }
0x1269   :  { %v11440_v60 = vmul.f32 %v9723_v59, %v5398_v17  ;;  %12449 = vst [vmem:[#allocation110_spill] sm:$0xff] %v11442_v29  ;;  %v12475_v17 = vld [vmem:[#allocation66_spill] sm:$0xff] }
0x126a   :  { %v9725_v55 = vpop.eup %9724 }
0x126b   :  { %12448 = vst [vmem:[#allocation109_spill] sm:$0xff] %v11440_v60  ;;  %9283 = vmatprep.mubr.msk.f32.mxu1 %vm1840_vm14, %v11440_v60  ;;  %9305 = vmatprep.mubr.msk.f32.mxu0 %vm1840_vm14, %v11440_v60  ;;  %v11455_v56 = vmul.f32 %v9725_v55, %v5401_v19  ;;  %v12479_v19 = vld [vmem:[#allocation76_spill] sm:$0xff] }
0x126c   :  { %v9727_v8 = vpop.eup %9726  ;;  %9284 = vmatmul.mubr.msk.f32.vlgmr.msra.gmra.mxu1 %vm1840_vm14, %v11442_v29  ;;  %9306 = vmatmul.mubr.msk.f32.vlgmr.msra.gmra.mxu0 %vm1840_vm14, %v11442_v29 }
0x126d   :  { %v11452_v14 = vmul.f32 %v9727_v8, %v5400_v62  ;;  %9312 = vmatpush3.msra.mxu1 %v11425_v44  ;;  %12451 = vst [vmem:[#allocation11_spill] sm:$0xff] %v11455_v56  ;;  %v12453_v44 = vld [vmem:[#allocation35_spill] sm:$0xff]  ;;  %v12482_v62 = vld [vmem:[#allocation81_spill] sm:$0xff] }
0x126e   :  { %9313 = vmatprep.subr.mxu1 %v5689_v9 }
0x126f   :  { %12450 = vst [vmem:[#allocation10_spill] sm:$0xff] %v11452_v14  ;;  %9286 = vmatprep.mubr.msk.f32.mxu1 %vm1840_vm14, %v11452_v14  ;;  %9308 = vmatprep.mubr.msk.f32.mxu0 %vm1840_vm14, %v11452_v14 }
0x1270   :  { %9287 = vmatmul.mubr.msk.f32.gmra.mxu1 %vm1840_vm14, %v11455_v56  ;;  %9309 = vmatmul.mubr.msk.f32.gmra.mxu0 %vm1840_vm14, %v11455_v56 }
0x1271   :  { %9314 = vmatpush3.msra.mxu1 %v5689_v9  ;;  %9315 = vmatprep.mubr.msk.f32.mxu1 %vm732_vm9, %v12452_v58 }
0x1272   :  { %9371 = vmatprep.mubr.msk.f32.mxu0 %vm421_vm0, %v12394_v52 }
0x1274   :  { %9316 = vmatmul.mubr.msk.f32.vlgmr.msra.gmra.mxu1 %vm732_vm9, %v12453_v44 }
0x1275   :  { %9318 = vmatprep.mubr.msk.f32.mxu1 %vm732_vm9, %v12454_v4 }
0x1278   :  { %9319 = vmatmul.mubr.msk.f32.gmra.mxu1 %vm732_vm9, %v12455_v35 }
0x1279   :  { %9321 = vmatprep.mubr.msk.f32.mxu1 %vm732_vm9, %v12456_v16 }
0x127c   :  { %9322 = vmatmul.mubr.msk.f32.gmra.mxu1 %vm732_vm9, %v12457_v43 }
0x127d   :  { %9324 = vmatprep.mubr.msk.f32.mxu1 %vm732_vm9, %v12458_v6 }
0x1280   :  { %9325 = vmatmul.mubr.msk.f32.gmra.mxu1 %vm732_vm9, %v12459_v12 }
0x1281   :  { %9327 = vmatprep.mubr.msk.f32.mxu1 %vm732_vm9, %v12460_v37 }
0x1284   :  { %9328 = vmatmul.mubr.msk.f32.gmra.mxu1 %vm732_vm9, %v12461_v2 }
0x1285   :  { %9330 = vmatprep.mubr.msk.f32.mxu1 %vm732_vm9, %v12462_v25 }
0x1288   :  { %9331 = vmatmul.mubr.msk.f32.gmra.mxu1 %vm732_vm9, %v12463_v7 }
0x1289   :  { %9333 = vmatprep.mubr.msk.f32.mxu1 %vm732_vm9, %v12464_v36 }
0x128c   :  { %9334 = vmatmul.mubr.msk.f32.gmra.mxu1 %vm732_vm9, %v12465_v11 }
0x128d   :  { %9336 = vmatprep.mubr.msk.f32.mxu1 %vm732_vm9, %v12466_v45 }
0x1290   :  { %9337 = vmatmul.mubr.msk.f32.gmra.mxu1 %vm732_vm9, %v12467_v63 }
0x1291   :  { %9339 = vmatprep.mubr.msk.f32.mxu1 %vm732_vm9, %v12468_v50 }
0x1294   :  { %9340 = vmatmul.mubr.msk.f32.gmra.mxu1 %vm732_vm9, %v12469_v53 }
0x1295   :  { %9342 = vmatprep.mubr.msk.f32.mxu1 %vm732_vm9, %v12470_v24 }
0x1298   :  { %9343 = vmatmul.mubr.msk.f32.gmra.mxu1 %vm732_vm9, %v12471_v27 }
0x1299   :  { %9345 = vmatprep.mubr.msk.f32.mxu1 %vm732_vm9, %v12472_v57 }
0x129c   :  { %9346 = vmatmul.mubr.msk.f32.gmra.mxu1 %vm732_vm9, %v12473_v61 }
0x129d   :  { %9348 = vmatprep.mubr.msk.f32.mxu1 %vm732_vm9, %v12474_v42 }
0x12a0   :  { %9349 = vmatmul.mubr.msk.f32.gmra.mxu1 %vm732_vm9, %v12475_v17 }
0x12a1   :  { %9351 = vmatprep.mubr.msk.f32.mxu1 %vm732_vm9, %v12476_v1 }
0x12a4   :  { %9352 = vmatmul.mubr.msk.f32.gmra.mxu1 %vm732_vm9, %v12477_v0 }
0x12a5   :  { %9354 = vmatprep.mubr.msk.f32.mxu1 %vm732_vm9, %v12478_v10 }
0x12a8   :  { %9355 = vmatmul.mubr.msk.f32.gmra.mxu1 %vm732_vm9, %v12479_v19 }
0x12a9   :  { %9357 = vmatprep.mubr.msk.f32.mxu1 %vm732_vm9, %v12480_v18 }
0x12ac   :  { %9358 = vmatmul.mubr.msk.f32.gmra.mxu1 %vm732_vm9, %v12481_v15 }
0x12ad   :  { %9360 = vmatprep.mubr.msk.f32.mxu1 %vm732_vm9, %v12482_v62 }
0x12b0   :  { %9361 = vmatmul.mubr.msk.f32.gmra.mxu1 %vm732_vm9, %v12483_v48 }
0x12b1   :  { %9427 = vmatprep.mubr.msk.f32.mxu1 %vm732_vm9, %v12452_v58 }
0x132c   :  { %v9285_v49 = vpop.f32.mrf.mxu1  ;;  %v11533_v32 = vpop.f32.mrf.mxu0 }
0x132d   :  { %v11535_v41 = vadd.f32 %v9285_v49, %v7741_v34 }
0x132e   :  { %v5521_v54 = vpop.f32.mrf.mxu1  ;;  %v11537_v38 = vpop.f32.mrf.mxu0 }
0x132f   :  { %v5545_v47 = vmin.f32 %v11535_v41, 20.0  ;;  %v11540_v3 = vadd.f32 %v7741_v34, %v5521_v54  ;;  %vm5541_vm2 = vcmp.gt.f32.partialorder %v11535_v41, 20.0 }
0x1330   :  { %v9288_v31 = vpop.f32.mrf.mxu1  ;;  %v11542_v59 = vpop.f32.mrf.mxu0 }
0x1331   :  { %v5550_v55 = vmul.f32 1.442695, %v5545_v47  ;;  %v5544_v9 = vmin.f32 %v11540_v3, 20.0  ;;  %v11545_v8 = vadd.f32 %v9288_v31, %v7741_v34  ;;  %9419 = vmatprep.subr.msk.mxu1 %vm732_vm9, %v11542_v59  ;;  %vm5540_vm3 = vcmp.gt.f32.partialorder %v11540_v3, 20.0 }
0x1332   :  { %v5531_v58 = vpop.f32.mrf.mxu1  ;;  %v11549_v49 = vpop.f32.mrf.mxu0  ;;  %9420 = vmatpush3.xpose.msk.msra.mxu1 %vm732_vm9, %v11542_v59 }
0x1333   :  { %9728 = vpow2.f32 %v5550_v55  ;;  %v5548_v54 = vmul.f32 1.442695, %v5544_v9  ;;  %v5547_v20 = vmin.f32 %v11545_v8, 20.0  ;;  %v11554_v30 = vadd.f32 %v7741_v34, %v5531_v58  ;;  %9421 = vmatprep.subr.msk.mxu1 %vm732_vm9, %v11549_v49 }
0x1335   :  { %9730 = vpow2.f32 %v5548_v54  ;;  %v5554_v47 = vmul.f32 1.442695, %v5547_v20  ;;  %v5546_v31 = vmin.f32 %v11554_v30, 20.0  ;;  %v12484_v20 = vmov 1.0  }
0x1336   :  { %9422 = vmatpush3.xpose.msk.msra.mxu1 %vm732_vm9, %v11549_v49  ;;  %vm5542_vm15 = vcmp.gt.f32.partialorder %v11554_v30, 20.0 }
0x1337   :  { %9732 = vpow2.f32 %v5554_v47  ;;  %v5552_v21 = vmul.f32 1.442695, %v5546_v31  ;;  %9423 = vmatprep.subr.msk.mxu1 %vm732_vm9, %v11533_v32 }
0x1339   :  { %9734 = vpow2.f32 %v5552_v21 }
0x133a   :  { %9424 = vmatpush3.xpose.msk.msra.mxu1 %vm732_vm9, %v11533_v32 }
0x133b   :  { %9425 = vmatprep.subr.msk.mxu1 %vm732_vm9, %v11537_v38 }
0x133e   :  { %9426 = vmatpush3.xpose.msk.msra.mxu1 %vm732_vm9, %v11537_v38 }
0x133f   :  { %7882 = vmatprep.subr.msk.mxu1 %vm400_vm6, %v12484_v20  ;;  %vm5543_vm6 = vcmp.gt.f32.partialorder %v11545_v8, 20.0 }
0x1340   :  { %v9729_v55 = vpop.eup %9728 }
0x1341   :  { %9428 = vmatmul.mubr.msk.f32.vlgmr.msra.gmra.mxu1 %vm732_vm9, %v12453_v44  ;;  %v5565_v9 = vadd.f32 1.0, %v9729_v55 }
0x1342   :  { %v9731_v21 = vpop.eup %9730  ;;  %9430 = vmatprep.mubr.msk.f32.mxu1 %vm732_vm9, %v12454_v4  ;;  %7883 = vmatpush1.msk.msra.mxu1 %vm399_vm7, %v12484_v20 }
0x1343   :  { %v5556_v54 = vadd.f32 1.0, %v9731_v21  ;;  %6957 = vmatprep.subr.mxu1 %v12265_v23  ;;  %9736 = vlog2.f32 %v5565_v9  ;;  %v5559_v34 = vmul.f32 -0.5, %v9731_v21 }
0x1344   :  { %v9733_v47 = vpop.eup %9732  ;;  %6958 = vmatpush1.msra.mxu1 %v12265_v23 }
0x1345   :  { %9431 = vmatmul.mubr.msk.f32.gmra.mxu1 %vm732_vm9, %v12455_v35  ;;  %v5583_v44 = vadd.f32 1.0, %v9733_v47  ;;  %9738 = vlog2.f32 %v5556_v54  ;;  %v5586_v28 = vmul.f32 -0.5, %v9733_v47  ;;  %v5568_v35 = vmul.f32 -0.5, %v9729_v55 }
0x1346   :  { %v9735_v31 = vpop.eup %9734  ;;  %9433 = vmatprep.mubr.msk.f32.mxu1 %vm732_vm9, %v12456_v16 }
0x1347   :  { %9740 = vlog2.f32 %v5583_v44  ;;  %v5574_v4 = vadd.f32 1.0, %v9735_v31  ;;  %v5577_v20 = vmul.f32 -0.5, %v9735_v31  ;;  %v5587_v16 = vadd.f32 1.0, %v5586_v28 }
0x1348   :  { %v5580_v44 = vand.u32 2147483647, %v9735_v31 }
0x1349   :  { %9434 = vmatmul.mubr.msk.f32.gmra.mxu1 %vm732_vm9, %v12457_v43  ;;  %9742 = vlog2.f32 %v5574_v4  ;;  %v5589_v43 = vand.u32 2147483647, %v9733_v47  ;;  %v5578_v54 = vadd.f32 1.0, %v5577_v20  ;;  %v5571_v4 = vand.u32 2147483647, %v9729_v55 }
0x134a   :  { %9436 = vmatprep.mubr.msk.f32.mxu1 %vm732_vm9, %v12458_v6  ;;  %v5569_v6 = vadd.f32 1.0, %v5568_v35  ;;  %v5588_v26 = vmul.f32 %v9733_v47, %v5587_v16  ;;  %v5562_v35 = vand.u32 2147483647, %v9731_v21  ;;  %vm5581_vm12 = vcmp.lt.f32.partialorder %v5580_v44, 0.0004427343  ;;  %v12511_v16 = vld [vmem:[#allocation67_spill] sm:$0xff] }
0x134b   :  { %vm5590_vm7 = vcmp.lt.f32.partialorder %v5589_v43, 0.0004427343  ;;  %v5579_v5 = vmul.f32 %v9735_v31, %v5578_v54  ;;  %vm11605_vm13 = vcmp.lt.f32.partialorder %v5571_v4, 0.0004427343  ;;  %v12510_v31 = vld [vmem:[#allocation84_spill] sm:$0xff]  ;;  %v12514_v43 = vld [vmem:[#allocation69_spill] sm:$0xff] }
0x134c   :  { %vm5563_vm1 = vcmp.lt.f32.partialorder %v5562_v35, 0.0004427343  ;;  %v12517_v54 = vld [vmem:[#allocation73_spill] sm:$0xff]  ;;  %v12518_v44 = vld [vmem:[#allocation75_spill] sm:$0xff] }
0x134d   :  { %9437 = vmatmul.mubr.msk.f32.gmra.mxu1 %vm732_vm9, %v12459_v12 }
0x134e   :  { %9439 = vmatprep.mubr.msk.f32.mxu1 %vm732_vm9, %v12460_v37 }
0x1350   :  { %v9737_v9 = vpop.eup %9736 }
0x1351   :  { %9440 = vmatmul.mubr.msk.f32.gmra.mxu1 %vm732_vm9, %v12461_v2  ;;  %v5567_v39 = vmul.f32 0.6931472, %v9737_v9  ;;  %v5560_v2 = vadd.f32 1.0, %v5559_v34  ;;  %v12512_v34 = vld [vmem:[#allocation68_spill] sm:$0xff] }
0x1352   :  { %9442 = vmatprep.mubr.msk.f32.mxu1 %vm732_vm9, %v12462_v25  ;;  %v9739_v58 = vpop.eup %9738  ;;  %v5570_v25 = vmul.f32 %v9729_v55, %v5569_v6 }
0x1353   :  { %v5558_v22 = vmul.f32 0.6931472, %v9739_v58  ;;  %v5561_v55 = vmul.f32 %v9731_v21, %v5560_v2  ;;  %v12509_v21 = vld [vmem:[#allocation61_spill] sm:$0xff]  ;;  %v12516_v58 = vld [vmem:[#allocation86_spill] sm:$0xff] }
0x1354   :  { %v9741_v12 = vpop.eup %9740 }
0x1355   :  { %9443 = vmatmul.mubr.msk.f32.gmra.mxu1 %vm732_vm9, %v12463_v7  ;;  %v5585_v37 = vmul.f32 0.6931472, %v9741_v12 }
0x1356   :  { %v9743_v28 = vpop.eup %9742  ;;  %9445 = vmatprep.mubr.msk.f32.mxu1 %vm732_vm9, %v12464_v36 }
0x1357   :  { %v5591_v20 = vsel %vm5590_vm7, %v5588_v26, %v5585_v37  ;;  %v5576_v33 = vmul.f32 0.6931472, %v9743_v28  ;;  %v5573_v26 = vsel %vm11605_vm13, %v5570_v25, %v5567_v39 }
0x1358   :  { %v5595_v13 = vsel %vm5543_vm6, %v11545_v8, %v5591_v20  ;;  %v5564_v8 = vsel %vm5563_vm1, %v5561_v55, %v5558_v22  ;;  %v12489_v22 = vld [vmem:[#allocation91_spill] sm:$0xff] }
0x1359   :  { %9363 = vmatprep.subr.mxu0 %v5595_v13  ;;  %9446 = vmatmul.mubr.msk.f32.gmra.mxu1 %vm732_vm9, %v12465_v11  ;;  %v5582_v36 = vsel %vm5581_vm12, %v5579_v5, %v5576_v33  ;;  %v5593_v11 = vsel %vm5541_vm2, %v11535_v41, %v5573_v26  ;;  %v5592_v5 = vsel %vm5540_vm3, %v11540_v3, %v5564_v8  ;;  %v12507_v41 = vld [vmem:[#allocation85_spill] sm:$0xff]  ;;  %v12508_v3 = vld [vmem:[#allocation58_spill] sm:$0xff] }
0x135a   :  { %9364 = vmatpush3.msra.mxu0 %v5595_v13  ;;  %v5594_v47 = vsel %vm5542_vm15, %v11554_v30, %v5582_v36  ;;  %9448 = vmatprep.mubr.msk.f32.mxu1 %vm732_vm9, %v12466_v45  ;;  %v6509_v33 = vmul.f32 %v5595_v13, %v11455_v56  ;;  %v6507_v30 = vmul.f32 %v5593_v11, %v11442_v29  ;;  %v12490_v13 = vld [vmem:[#allocation92_spill] sm:$0xff] }
0x135b   :  { %9365 = vmatprep.subr.mxu0 %v5594_v47  ;;  %v6508_v39 = vmul.f32 %v5594_v47, %v11452_v14  ;;  %v6506_v45 = vmul.f32 %v5592_v5, %v11440_v60 }
0x135c   :  { %9366 = vmatpush3.msra.mxu0 %v5594_v47 }
0x135d   :  { %9367 = vmatprep.subr.mxu0 %v5593_v11  ;;  %9449 = vmatmul.mubr.msk.f32.gmra.mxu1 %vm732_vm9, %v12467_v63  ;;  %v12491_v63 = vld [vmem:[#allocation93_spill] sm:$0xff] }
0x135e   :  { %9368 = vmatpush3.msra.mxu0 %v5593_v11  ;;  %9451 = vmatprep.mubr.msk.f32.mxu1 %vm732_vm9, %v12468_v50  ;;  %v12492_v50 = vld [vmem:[#allocation94_spill] sm:$0xff] }
0x135f   :  { %9369 = vmatprep.subr.mxu0 %v5592_v5 }
0x1360   :  { %9370 = vmatpush3.msra.mxu0 %v5592_v5 }
0x1361   :  { %9372 = vmatmul.mubr.msk.f32.vlgmr.msra.gmra.mxu0 %vm421_vm0, %v12489_v22  ;;  %9452 = vmatmul.mubr.msk.f32.gmra.mxu1 %vm732_vm9, %v12469_v53  ;;  %v12493_v53 = vld [vmem:[#allocation95_spill] sm:$0xff] }
0x1362   :  { %9475 = vmatprep.subr.mxu0 %v6509_v33  ;;  %9374 = vmatprep.mubr.msk.f32.mxu0 %vm421_vm0, %v10785_v51 }
0x1363   :  { %9476 = vmatpush3.msra.mxu0 %v6509_v33  ;;  %9454 = vmatprep.mubr.msk.f32.mxu1 %vm732_vm9, %v12470_v24  ;;  %v12494_v24 = vld [vmem:[#allocation96_spill] sm:$0xff] }
0x1364   :  { %9477 = vmatprep.subr.mxu0 %v6508_v39 }
0x1365   :  { %9478 = vmatpush3.msra.mxu0 %v6508_v39  ;;  %9455 = vmatmul.mubr.msk.f32.gmra.mxu1 %vm732_vm9, %v12471_v27  ;;  %v12495_v27 = vld [vmem:[#allocation97_spill] sm:$0xff] }
0x1366   :  { %9375 = vmatmul.mubr.msk.f32.gmra.mxu0 %vm421_vm0, %v12490_v13  ;;  %9479 = vmatprep.subr.mxu0 %v6507_v30 }
0x1367   :  { %9480 = vmatpush3.msra.mxu0 %v6507_v30  ;;  %9377 = vmatprep.mubr.msk.f32.mxu0 %vm421_vm0, %v12491_v63 }
0x1368   :  { %9481 = vmatprep.subr.mxu0 %v6506_v45  ;;  %9457 = vmatprep.mubr.msk.f32.mxu1 %vm732_vm9, %v12472_v57  ;;  %v12496_v57 = vld [vmem:[#allocation98_spill] sm:$0xff] }
0x1369   :  { %9482 = vmatpush3.msra.mxu0 %v6506_v45  ;;  %9458 = vmatmul.mubr.msk.f32.gmra.mxu1 %vm732_vm9, %v12473_v61  ;;  %v12497_v61 = vld [vmem:[#allocation99_spill] sm:$0xff] }
0x136a   :  { %9378 = vmatmul.mubr.msk.f32.gmra.mxu0 %vm421_vm0, %v12492_v50  ;;  %9460 = vmatprep.mubr.msk.f32.mxu1 %vm732_vm9, %v12474_v42  ;;  %v12498_v42 = vld [vmem:[#allocation100_spill] sm:$0xff] }
0x136b   :  { %9380 = vmatprep.mubr.msk.f32.mxu0 %vm421_vm0, %v12493_v53 }
0x136d   :  { %9461 = vmatmul.mubr.msk.f32.gmra.mxu1 %vm732_vm9, %v12475_v17  ;;  %v12499_v17 = vld [vmem:[#allocation101_spill] sm:$0xff] }
0x136e   :  { %9381 = vmatmul.mubr.msk.f32.gmra.mxu0 %vm421_vm0, %v12494_v24  ;;  %9463 = vmatprep.mubr.msk.f32.mxu1 %vm732_vm9, %v12476_v1  ;;  %v12500_v1 = vld [vmem:[#allocation45_spill] sm:$0xff] }
0x136f   :  { %9383 = vmatprep.mubr.msk.f32.mxu0 %vm421_vm0, %v12495_v27 }
0x1371   :  { %9464 = vmatmul.mubr.msk.f32.gmra.mxu1 %vm732_vm9, %v12477_v0  ;;  %v12501_v0 = vld [vmem:[#allocation46_spill] sm:$0xff] }
0x1372   :  { %9384 = vmatmul.mubr.msk.f32.gmra.mxu0 %vm421_vm0, %v12496_v57  ;;  %9466 = vmatprep.mubr.msk.f32.mxu1 %vm732_vm9, %v12478_v10  ;;  %v12502_v10 = vld [vmem:[#allocation49_spill] sm:$0xff] }
0x1373   :  { %9386 = vmatprep.mubr.msk.f32.mxu0 %vm421_vm0, %v12497_v61 }
0x1375   :  { %9467 = vmatmul.mubr.msk.f32.gmra.mxu1 %vm732_vm9, %v12479_v19  ;;  %v12503_v19 = vld [vmem:[#allocation50_spill] sm:$0xff] }
0x1376   :  { %9387 = vmatmul.mubr.msk.f32.gmra.mxu0 %vm421_vm0, %v12498_v42  ;;  %9469 = vmatprep.mubr.msk.f32.mxu1 %vm732_vm9, %v12480_v18  ;;  %v12504_v18 = vld [vmem:[#allocation53_spill] sm:$0xff] }
0x1377   :  { %9389 = vmatprep.mubr.msk.f32.mxu0 %vm421_vm0, %v12499_v17 }
0x1379   :  { %9470 = vmatmul.mubr.msk.f32.gmra.mxu1 %vm732_vm9, %v12481_v15  ;;  %v12505_v15 = vld [vmem:[#allocation54_spill] sm:$0xff] }
0x137a   :  { %9390 = vmatmul.mubr.msk.f32.gmra.mxu0 %vm421_vm0, %v12500_v1  ;;  %9472 = vmatprep.mubr.msk.f32.mxu1 %vm732_vm9, %v12482_v62  ;;  %v11699_v62 = vpop.f32.mrf.mxu1 }
0x137b   :  { %9392 = vmatprep.mubr.msk.f32.mxu0 %vm421_vm0, %v12501_v0 }
0x137d   :  { %9473 = vmatmul.mubr.msk.f32.gmra.mxu1 %vm732_vm9, %v12483_v48  ;;  %v12506_v48 = vld [vmem:[#allocation57_spill] sm:$0xff] }
0x137e   :  { %9393 = vmatmul.mubr.msk.f32.gmra.mxu0 %vm421_vm0, %v12502_v10  ;;  %6991 = vmatprep.mubr.f32.mxu1 %v12265_v23 }
0x137f   :  { %9395 = vmatprep.mubr.msk.f32.mxu0 %vm421_vm0, %v12503_v19 }
0x1381   :  { %7884 = vmatmul.mubr.msk.f32.vlgmr.msra.gmra.mxu1 %vm732_vm9, %v11537_v38  ;;  %v11708_v38 = vpop.f32.mrf.mxu1 }
0x1382   :  { %9396 = vmatmul.mubr.msk.f32.gmra.mxu0 %vm421_vm0, %v12504_v18  ;;  %6997 = vmatprep.mubr.f32.mxu1 %v12265_v23 }
0x1383   :  { %9398 = vmatprep.mubr.msk.f32.mxu0 %vm421_vm0, %v12505_v15 }
0x1385   :  { %7885 = vmatmul.mubr.msk.f32.gmra.mxu1 %vm732_vm9, %v11533_v32  ;;  %v11717_v32 = vpop.f32.mrf.mxu1 }
0x1386   :  { %9399 = vmatmul.mubr.msk.f32.gmra.mxu0 %vm421_vm0, %v12506_v48  ;;  %7003 = vmatprep.mubr.f32.mxu1 %v12265_v23 }
0x1387   :  { %9401 = vmatprep.mubr.msk.f32.mxu0 %vm421_vm0, %v12507_v41 }
0x1389   :  { %7886 = vmatmul.mubr.msk.f32.gmra.mxu1 %vm732_vm9, %v11549_v49  ;;  %v11725_v49 = vpop.f32.mrf.mxu1 }
0x138a   :  { %9402 = vmatmul.mubr.msk.f32.gmra.mxu0 %vm421_vm0, %v12508_v3  ;;  %7009 = vmatprep.mubr.f32.mxu1 %v12265_v23  ;;  %v12513_v23 = vld [vmem:[#allocation88_spill] sm:$0xff] }
0x138b   :  { %9404 = vmatprep.mubr.msk.f32.mxu0 %vm421_vm0, %v12509_v21  ;;  %v11731_v9 = vpop.f32.mrf.mxu1 }
0x138d   :  { %7887 = vmatmul.mubr.msk.f32.gmra.mxu1 %vm732_vm9, %v11542_v59  ;;  %v12515_v59 = vld [vmem:[#allocation71_spill] sm:$0xff]  ;;  %v11737_v6 = vpop.f32.mrf.mxu1 }
0x138e   :  { %9405 = vmatmul.mubr.msk.f32.gmra.mxu0 %vm421_vm0, %v12510_v31 }
0x138f   :  { %9407 = vmatprep.mubr.msk.f32.mxu0 %vm421_vm0, %v12511_v16  ;;  %v11743_v12 = vpop.f32.mrf.mxu1 }
0x1391   :  { %v11747_v4 = vpop.f32.mrf.mxu1 }
0x1392   :  { %9408 = vmatmul.mubr.msk.f32.gmra.mxu0 %vm421_vm0, %v12512_v34 }
0x1393   :  { %9410 = vmatprep.mubr.msk.f32.mxu0 %vm421_vm0, %v12513_v23  ;;  %v11749_v37 = vpop.f32.mrf.mxu1 }
0x1395   :  { %v11751_v2 = vpop.f32.mrf.mxu1 }
0x1396   :  { %9411 = vmatmul.mubr.msk.f32.gmra.mxu0 %vm421_vm0, %v12514_v43 }
0x1397   :  { %9413 = vmatprep.mubr.msk.f32.mxu0 %vm421_vm0, %v12515_v59  ;;  %v11753_v28 = vpop.f32.mrf.mxu1 }
0x1399   :  { %v11755_v25 = vpop.f32.mrf.mxu1 }
0x139a   :  { %9414 = vmatmul.mubr.msk.f32.gmra.mxu0 %vm421_vm0, %v12516_v58 }
0x139b   :  { %9416 = vmatprep.mubr.msk.f32.mxu0 %vm421_vm0, %v12517_v54  ;;  %v11757_v35 = vpop.f32.mrf.mxu1 }
0x139d   :  { %v11759_v20 = vpop.f32.mrf.mxu1 }
0x139e   :  { %9417 = vmatmul.mubr.msk.f32.gmra.mxu0 %vm421_vm0, %v12518_v44 }
0x139f   :  { %v11761_v7 = vpop.f32.mrf.mxu1 }
0x13a1   :  { %v11763_v36 = vpop.f32.mrf.mxu1 }
0x13a3   :  { %v11765_v26 = vpop.f32.mrf.mxu1 }
0x13a5   :  { %v11767_v55 = vpop.f32.mrf.mxu1 }
0x13a7   :  { %v11769_v47 = vpop.f32.mrf.mxu1 }
0x13a9   :  { %v11771_v8 = vpop.f32.mrf.mxu1 }
0x13ab   :  { %v11773_v11 = vpop.f32.mrf.mxu1 }
0x13ac   :  { %12519 = vst [vmem:[#allocation12_spill] sm:$0xff] %v11773_v11 }
0x13ad   :  { %v11775_v5 = vpop.f32.mrf.mxu1 }
0x13ae   :  { %12520 = vst [vmem:[#allocation13_spill] sm:$0xff] %v11775_v5 }
0x13af   :  { %v11777_v33 = vpop.f32.mrf.mxu1 }
0x13b0   :  { %12521 = vst [vmem:[#allocation18_spill] sm:$0xff] %v11777_v33 }
0x13b1   :  { %v11779_v39 = vpop.f32.mrf.mxu1 }
0x13b2   :  { %12522 = vst [vmem:[#allocation30_spill] sm:$0xff] %v11779_v39 }
0x13b3   :  { %v11781_v30 = vpop.f32.mrf.mxu1 }
0x13b4   :  { %12523 = vst [vmem:[#allocation31_spill] sm:$0xff] %v11781_v30 }
0x13b5   :  { %v11783_v45 = vpop.f32.mrf.mxu1 }
0x13b7   :  { %v11785_v56 = vpop.f32.mrf.mxu1 }
0x13b8   :  { %12524 = vst [vmem:[#allocation32_spill] sm:$0xff] %v11785_v56 }
0x13b9   :  { %v11787_v14 = vpop.f32.mrf.mxu1 }
0x13ba   :  { %12525 = vst [vmem:[#allocation33_spill] sm:$0xff] %v11787_v14 }
0x13bb   :  { %v11789_v29 = vpop.f32.mrf.mxu1 }
0x13bc   :  { %12526 = vst [vmem:[#allocation15_spill] sm:$0xff] %v11789_v29 }
0x13bd   :  { %v11791_v60 = vpop.f32.mrf.mxu1 }
0x13be   :  { %12527 = vst [vmem:[#allocation14_spill] sm:$0xff] %v11791_v60 }
0x13bf   :  { %v11793_v46 = vpop.f32.mrf.mxu1 }
0x13c1   :  { %v11795_v40 = vpop.f32.mrf.mxu1 }
0x13c2   :  { %12528 = vst [vmem:[#allocation17_spill] sm:$0xff] %v11795_v40 }
0x1401   :  { %v9429_v5 = vpop.f32.mrf.mxu1 }
0x1402   :  { %v6475_v30 = vmul.f32 %v9429_v5, %v12489_v22 }
0x1403   :  { %v6315_v33 = vpop.f32.mrf.mxu1 }
0x1404   :  { %v6474_v39 = vmul.f32 %v6315_v33, %v12394_v52 }
0x1405   :  { %v9432_v11 = vpop.f32.mrf.mxu1 }
0x1406   :  { %9483 = vmatprep.mubr.msk.f32.mxu0 %vm421_vm0, %v6474_v39  ;;  %v6477_v60 = vmul.f32 %v9432_v11, %v12490_v13 }
0x1407   :  { %v6325_v56 = vpop.f32.mrf.mxu1  ;;  %9484 = vmatmul.mubr.msk.f32.vlgmr.msra.gmra.mxu0 %vm421_vm0, %v6475_v30 }
0x1408   :  { %v6476_v29 = vmul.f32 %v6325_v56, %v10785_v51 }
0x1409   :  { %v9435_v14 = vpop.f32.mrf.mxu1 }
0x140a   :  { %9486 = vmatprep.mubr.msk.f32.mxu0 %vm421_vm0, %v6476_v29  ;;  %v6479_v22 = vmul.f32 %v9435_v14, %v12492_v50 }
0x140b   :  { %v6335_v40 = vpop.f32.mrf.mxu1  ;;  %9487 = vmatmul.mubr.msk.f32.gmra.mxu0 %vm421_vm0, %v6477_v60 }
0x140c   :  { %v6478_v52 = vmul.f32 %v6335_v40, %v12491_v63 }
0x140d   :  { %v9438_v5 = vpop.f32.mrf.mxu1 }
0x140e   :  { %9489 = vmatprep.mubr.msk.f32.mxu0 %vm421_vm0, %v6478_v52  ;;  %v6481_v56 = vmul.f32 %v9438_v5, %v12494_v24 }
0x140f   :  { %v6345_v33 = vpop.f32.mrf.mxu1  ;;  %9490 = vmatmul.mubr.msk.f32.gmra.mxu0 %vm421_vm0, %v6479_v22 }
0x1410   :  { %v6480_v51 = vmul.f32 %v6345_v33, %v12493_v53 }
0x1411   :  { %v9441_v13 = vpop.f32.mrf.mxu1 }
0x1412   :  { %9492 = vmatprep.mubr.msk.f32.mxu0 %vm421_vm0, %v6480_v51  ;;  %v6483_v60 = vmul.f32 %v9441_v13, %v12496_v57 }
0x1413   :  { %v6355_v29 = vpop.f32.mrf.mxu1  ;;  %9493 = vmatmul.mubr.msk.f32.gmra.mxu0 %vm421_vm0, %v6481_v56 }
0x1414   :  { %v6482_v40 = vmul.f32 %v6355_v29, %v12495_v27 }
0x1415   :  { %v9444_v14 = vpop.f32.mrf.mxu1 }
0x1416   :  { %9495 = vmatprep.mubr.msk.f32.mxu0 %vm421_vm0, %v6482_v40  ;;  %v6485_v53 = vmul.f32 %v9444_v14, %v12498_v42 }
0x1417   :  { %v6365_v63 = vpop.f32.mrf.mxu1  ;;  %9496 = vmatmul.mubr.msk.f32.gmra.mxu0 %vm421_vm0, %v6483_v60 }
0x1418   :  { %v6484_v50 = vmul.f32 %v6365_v63, %v12497_v61 }
0x1419   :  { %v9447_v24 = vpop.f32.mrf.mxu1 }
0x141a   :  { %9498 = vmatprep.mubr.msk.f32.mxu0 %vm421_vm0, %v6484_v50  ;;  %v6487_v57 = vmul.f32 %v9447_v24, %v12500_v1 }
0x141b   :  { %v6375_v11 = vpop.f32.mrf.mxu1  ;;  %9499 = vmatmul.mubr.msk.f32.gmra.mxu0 %vm421_vm0, %v6485_v53 }
0x141c   :  { %v6486_v27 = vmul.f32 %v6375_v11, %v12499_v17 }
0x141d   :  { %v9450_v39 = vpop.f32.mrf.mxu1 }
0x141e   :  { %9501 = vmatprep.mubr.msk.f32.mxu0 %vm421_vm0, %v6486_v27  ;;  %v6489_v42 = vmul.f32 %v9450_v39, %v12502_v10 }
0x141f   :  { %v6385_v30 = vpop.f32.mrf.mxu1  ;;  %9502 = vmatmul.mubr.msk.f32.gmra.mxu0 %vm421_vm0, %v6487_v57 }
0x1420   :  { %v6488_v61 = vmul.f32 %v6385_v30, %v12501_v0 }
0x1421   :  { %v9453_v52 = vpop.f32.mrf.mxu1 }
0x1422   :  { %9504 = vmatprep.mubr.msk.f32.mxu0 %vm421_vm0, %v6488_v61  ;;  %v6491_v1 = vmul.f32 %v9453_v52, %v12504_v18 }
0x1423   :  { %v6395_v22 = vpop.f32.mrf.mxu1  ;;  %9505 = vmatmul.mubr.msk.f32.gmra.mxu0 %vm421_vm0, %v6489_v42 }
0x1424   :  { %v6490_v17 = vmul.f32 %v6395_v22, %v12503_v19 }
0x1425   :  { %v9456_v5 = vpop.f32.mrf.mxu1 }
0x1426   :  { %9507 = vmatprep.mubr.msk.f32.mxu0 %vm421_vm0, %v6490_v17  ;;  %v6493_v10 = vmul.f32 %v9456_v5, %v12506_v48 }
0x1427   :  { %v6405_v33 = vpop.f32.mrf.mxu1  ;;  %9508 = vmatmul.mubr.msk.f32.gmra.mxu0 %vm421_vm0, %v6491_v1 }
0x1428   :  { %v6492_v0 = vmul.f32 %v6405_v33, %v12505_v15 }
0x1429   :  { %v9459_v51 = vpop.f32.mrf.mxu1 }
0x142a   :  { %9510 = vmatprep.mubr.msk.f32.mxu0 %vm421_vm0, %v6492_v0  ;;  %v6495_v18 = vmul.f32 %v9459_v51, %v12508_v3 }
0x142b   :  { %v6415_v56 = vpop.f32.mrf.mxu1  ;;  %9511 = vmatmul.mubr.msk.f32.gmra.mxu0 %vm421_vm0, %v6493_v10 }
0x142c   :  { %v6494_v19 = vmul.f32 %v6415_v56, %v12507_v41 }
0x142d   :  { %v9462_v13 = vpop.f32.mrf.mxu1 }
0x142e   :  { %9513 = vmatprep.mubr.msk.f32.mxu0 %vm421_vm0, %v6494_v19  ;;  %v6497_v48 = vmul.f32 %v9462_v13, %v12510_v31 }
0x142f   :  { %v6425_v29 = vpop.f32.mrf.mxu1  ;;  %9514 = vmatmul.mubr.msk.f32.gmra.mxu0 %vm421_vm0, %v6495_v18 }
0x1430   :  { %v6496_v15 = vmul.f32 %v6425_v29, %v12509_v21 }
0x1431   :  { %v9465_v40 = vpop.f32.mrf.mxu1 }
0x1432   :  { %9516 = vmatprep.mubr.msk.f32.mxu0 %vm421_vm0, %v6496_v15  ;;  %v6499_v3 = vmul.f32 %v9465_v40, %v12512_v34 }
0x1433   :  { %v6435_v60 = vpop.f32.mrf.mxu1  ;;  %9517 = vmatmul.mubr.msk.f32.gmra.mxu0 %vm421_vm0, %v6497_v48 }
0x1434   :  { %v6498_v41 = vmul.f32 %v6435_v60, %v12511_v16 }
0x1435   :  { %v9468_v14 = vpop.f32.mrf.mxu1 }
0x1436   :  { %9519 = vmatprep.mubr.msk.f32.mxu0 %vm421_vm0, %v6498_v41  ;;  %v6501_v31 = vmul.f32 %v9468_v14, %v12514_v43 }
0x1437   :  { %v6445_v63 = vpop.f32.mrf.mxu1  ;;  %9520 = vmatmul.mubr.msk.f32.gmra.mxu0 %vm421_vm0, %v6499_v3 }
0x1438   :  { %v6500_v21 = vmul.f32 %v6445_v63, %v12513_v23 }
0x1439   :  { %v9471_v50 = vpop.f32.mrf.mxu1 }
0x143a   :  { %9522 = vmatprep.mubr.msk.f32.mxu0 %vm421_vm0, %v6500_v21  ;;  %v6503_v34 = vmul.f32 %v9471_v50, %v12516_v58  ;;  %v9373_v58 = vpop.f32.mrf.mxu0 }
0x143b   :  { %v6455_v53 = vpop.f32.mrf.mxu1  ;;  %9523 = vmatmul.mubr.msk.f32.gmra.mxu0 %vm421_vm0, %v6501_v31  ;;  %v6142_v14 = vmul.f32 %v9373_v58, %v11699_v62 }
0x143c   :  { %v6502_v16 = vmul.f32 %v6455_v53, %v12515_v59  ;;  %v12529_v59 = vld [vmem:[#allocation83_spill] sm:$0xff]  ;;  %v5982_v30 = vpop.f32.mrf.mxu0 }
0x143d   :  { %v9474_v24 = vpop.f32.mrf.mxu1  ;;  %v6141_v63 = vmul.f32 %v5982_v30, %v11708_v38  ;;  %v6175_v31 = vmul.f32 1.442695, %v6142_v14 }
0x143e   :  { %9525 = vmatprep.mubr.msk.f32.mxu0 %vm421_vm0, %v6502_v16  ;;  %v6505_v43 = vmul.f32 %v9474_v24, %v12518_v44  ;;  %v9376_v61 = vpop.f32.mrf.mxu0 }
0x143f   :  { %v6465_v11 = vpop.f32.mrf.mxu1  ;;  %9526 = vmatmul.mubr.msk.f32.gmra.mxu0 %vm421_vm0, %v6503_v34  ;;  %v6173_v50 = vmul.f32 1.442695, %v6141_v63  ;;  %v6144_v53 = vmul.f32 %v9376_v61, %v11717_v32  ;;  %9744 = vpow2.f32 %v6175_v31 }
0x1440   :  { %v6504_v23 = vmul.f32 %v6465_v11, %v12517_v54  ;;  %v5992_v42 = vpop.f32.mrf.mxu0 }
0x1441   :  { %v11859_v27 = vpop.f32.mrf.mxu1  ;;  %v6143_v34 = vmul.f32 %v5992_v42, %v11725_v49  ;;  %9746 = vpow2.f32 %v6173_v50  ;;  %v6179_v24 = vmul.f32 1.442695, %v6144_v53 }
0x1442   :  { %9528 = vmatprep.mubr.msk.f32.mxu0 %vm421_vm0, %v6504_v23  ;;  %v9379_v52 = vpop.f32.mrf.mxu0 }
0x1443   :  { %9529 = vmatmul.mubr.msk.f32.gmra.mxu0 %vm421_vm0, %v6505_v43  ;;  %v6995_v57 = vpop.f32.mrf.mxu1  ;;  %v6146_v11 = vmul.f32 %v9379_v52, %v11731_v9  ;;  %v6177_v62 = vmul.f32 1.442695, %v6143_v34  ;;  %v7205_v43 = vld [vmem:[#allocation3 + $0x3d0] sm:$0xff]  ;;  %9748 = vpow2.f32 %v6179_v24 }
0x1444   :  { %v7017_v39 = vmul.f32 %v6995_v57, %v12529_v59  ;;  %v6002_v22 = vpop.f32.mrf.mxu0  ;;  %v7204_v57 = vld [vmem:[#allocation3 + $0x3c8] sm:$0xff]  ;;  %9531 = vmatprep.subr.mxu1 %v7205_v43 }
0x1445   :  { %v6145_v38 = vmul.f32 %v6002_v22, %v11737_v6  ;;  %v6183_v59 = vmul.f32 1.442695, %v6146_v11  ;;  %9532 = vmatpush3.msra.mxu1 %v7205_v43  ;;  %9750 = vpow2.f32 %v6177_v62 }
0x1446   :  { %7129 = vmatprep.mubr.f32.mxu0 %v7017_v39  ;;  %v9382_v17 = vpop.f32.mrf.mxu0  ;;  %9533 = vmatprep.subr.mxu1 %v7204_v57 }
0x1447   :  { %v6148_v32 = vmul.f32 %v9382_v17, %v11743_v12  ;;  %v6181_v49 = vmul.f32 1.442695, %v6145_v38  ;;  %9534 = vmatpush3.msra.mxu1 %v7204_v57  ;;  %9752 = vpow2.f32 %v6183_v59 }
0x1448   :  { %v6012_v54 = vpop.f32.mrf.mxu0 }
0x1449   :  { %v6147_v9 = vmul.f32 %v6012_v54, %v11747_v4  ;;  %v6187_v58 = vmul.f32 1.442695, %v6148_v32  ;;  %9754 = vpow2.f32 %v6181_v49 }
0x144a   :  { %v9385_v1 = vpop.f32.mrf.mxu0 }
0x144b   :  { %v6150_v6 = vmul.f32 %v9385_v1, %v11749_v37  ;;  %v6185_v42 = vmul.f32 1.442695, %v6147_v9  ;;  %9756 = vpow2.f32 %v6187_v58 }
0x144c   :  { %v6022_v44 = vpop.f32.mrf.mxu0  ;;  %v9745_v12 = vpop.eup %9744 }
0x144d   :  { %v6149_v30 = vmul.f32 %v6022_v44, %v11751_v2  ;;  %v6191_v22 = vmul.f32 1.442695, %v6150_v6  ;;  %9758 = vpow2.f32 %v6185_v42  ;;  %v6832_v54 = vmul.f32 0.0, %v9745_v12 }
0x144e   :  { %v9388_v5 = vpop.f32.mrf.mxu0  ;;  %v9747_v52 = vpop.eup %9746 }
0x144f   :  { %v6152_v17 = vmul.f32 %v9388_v5, %v11753_v28  ;;  %v6189_v14 = vmul.f32 1.442695, %v6149_v30  ;;  %v6831_v1 = vmul.f32 0.0, %v9747_v52  ;;  %9760 = vpow2.f32 %v6191_v22 }
0x1450   :  { %v6032_v33 = vpop.f32.mrf.mxu0  ;;  %v9749_v50 = vpop.eup %9748 }
0x1451   :  { %v6151_v4 = vmul.f32 %v6032_v33, %v11755_v25  ;;  %v6195_v2 = vmul.f32 1.442695, %v6152_v17  ;;  %9762 = vpow2.f32 %v6189_v14 }
0x1452   :  { %v11864_v0 = vpop.f32.mrf.mxu0  ;;  %v9751_v33 = vpop.eup %9750 }
0x1453   :  { %v6154_v44 = vmul.f32 %v11864_v0, %v11757_v35  ;;  %v6193_v34 = vmul.f32 1.442695, %v6151_v4  ;;  %9764 = vpow2.f32 %v6195_v2 }
0x1454   :  { %v11866_v10 = vpop.f32.mrf.mxu0  ;;  %v9753_v38 = vpop.eup %9752 }
0x1455   :  { %v6153_v28 = vmul.f32 %v11866_v10, %v11759_v20  ;;  %v6199_v62 = vmul.f32 1.442695, %v6154_v44  ;;  %9766 = vpow2.f32 %v6193_v34  ;;  %v12530_v44 = vld [vmem:[#allocation12_spill] sm:$0xff] }
0x1456   :  { %v11868_v51 = vpop.f32.mrf.mxu0  ;;  %v9755_v32 = vpop.eup %9754 }
0x1457   :  { %v6156_v24 = vmul.f32 %v11868_v51, %v11761_v7  ;;  %v6197_v10 = vmul.f32 1.442695, %v6153_v28  ;;  %9768 = vpow2.f32 %v6199_v62  ;;  %v12531_v28 = vld [vmem:[#allocation13_spill] sm:$0xff]  ;;  %v12532_v62 = vld [vmem:[#allocation18_spill] sm:$0xff] }
0x1458   :  { %v11870_v56 = vpop.f32.mrf.mxu0  ;;  %v9757_v6 = vpop.eup %9756 }
0x1459   :  { %v6155_v43 = vmul.f32 %v11870_v56, %v11763_v36  ;;  %v6203_v7 = vmul.f32 1.442695, %v6156_v24  ;;  %9770 = vpow2.f32 %v6197_v10  ;;  %v12533_v10 = vld [vmem:[#allocation30_spill] sm:$0xff] }
0x145a   :  { %v11872_v19 = vpop.f32.mrf.mxu0  ;;  %v9759_v52 = vpop.eup %9758 }
0x145b   :  { %v6158_v49 = vmul.f32 %v11872_v19, %v11765_v26  ;;  %v6201_v36 = vmul.f32 1.442695, %v6155_v43  ;;  %9772 = vpow2.f32 %v6203_v7 }
0x145c   :  { %v11874_v18 = vpop.f32.mrf.mxu0  ;;  %v9761_v4 = vpop.eup %9760 }
0x145d   :  { %v6157_v30 = vmul.f32 %v11874_v18, %v11767_v55  ;;  %v6207_v17 = vmul.f32 1.442695, %v6158_v49  ;;  %9774 = vpow2.f32 %v6201_v36 }
0x145e   :  { %v11876_v13 = vpop.f32.mrf.mxu0 }
0x145f   :  { %v6160_v26 = vmul.f32 %v11876_v13, %v11769_v47  ;;  %v6205_v55 = vmul.f32 1.442695, %v6157_v30  ;;  %9776 = vpow2.f32 %v6207_v17 }
0x1460   :  { %v11878_v29 = vpop.f32.mrf.mxu0 }
0x1461   :  { %v6159_v18 = vmul.f32 %v11878_v29, %v11771_v8  ;;  %v6211_v13 = vmul.f32 1.442695, %v6160_v26  ;;  %9778 = vpow2.f32 %v6205_v55 }
0x1462   :  { %v11880_v15 = vpop.f32.mrf.mxu0 }
0x1463   :  { %v6209_v8 = vmul.f32 1.442695, %v6159_v18  ;;  %9780 = vpow2.f32 %v6211_v13 }
0x1464   :  { %v11882_v48 = vpop.f32.mrf.mxu0 }
0x1465   :  { %9782 = vpow2.f32 %v6209_v8 }
0x1466   :  { %v11884_v40 = vpop.f32.mrf.mxu0 }
0x1468   :  { %v11886_v60 = vpop.f32.mrf.mxu0 }
0x146a   :  { %v11888_v41 = vpop.f32.mrf.mxu0 }
0x146c   :  { %v11890_v3 = vpop.f32.mrf.mxu0 }
0x146e   :  { %v11894_v21 = vpop.f32.mrf.mxu0 }
0x1470   :  { %v11897_v16 = vpop.f32.mrf.mxu0 }
0x1472   :  { %v11901_v23 = vpop.f32.mrf.mxu0 }
0x1474   :  { %v11905_v39 = vpop.f32.mrf.mxu0 }
0x1476   :  { %v11910_v61 = vpop.f32.mrf.mxu0 }
0x1478   :  { %v11913_v63 = vpop.f32.mrf.mxu0 }
0x14c7   :  { %v9485_v37 = vpop.f32.mrf.mxu0 }
0x14c8   :  { %v6834_v31 = vadd.f32 %v9485_v37, %v6832_v54  ;;  %v9763_v37 = vpop.eup %9762 }
0x14c9   :  { %v6672_v53 = vpop.f32.mrf.mxu0  ;;  %v9765_v34 = vpop.eup %9764 }
0x14ca   :  { %6836 = vst.msk [vmem:[#allocation2 + $0x8] sm:$0xff] %vm1840_vm14, %v6834_v31  ;;  %v6833_v5 = vadd.f32 %v6831_v1, %v6672_v53  ;;  %v6838_v25 = vmul.f32 %v9749_v50, %v6834_v31  ;;  %v6162_v31 = vmul.f32 %v11880_v15, %v12530_v44  ;;  %v9767_v24 = vpop.eup %9766  ;;  %v12537_v44 = vld [vmem:[#allocation15_spill] sm:$0xff] }
0x14cb   :  { %v9488_v11 = vpop.f32.mrf.mxu0  ;;  %v9769_v43 = vpop.eup %9768 }
0x14cc   :  { %6835 = vst.msk [vmem:[#allocation2] sm:$0xff] %vm1840_vm14, %v6833_v5  ;;  %v6840_v35 = vadd.f32 %v9488_v11, %v6838_v25  ;;  %v6837_v0 = vmul.f32 %v9751_v33, %v6833_v5  ;;  %v6161_v5 = vmul.f32 %v11882_v48, %v12531_v28  ;;  %v6215_v15 = vmul.f32 1.442695, %v6162_v31  ;;  %v9771_v7 = vpop.eup %9770 }
0x14cd   :  { %v6682_v20 = vpop.f32.mrf.mxu0  ;;  %v9773_v49 = vpop.eup %9772  ;;  %v6170_v31 = vmul.f32 %v11901_v23, %v12537_v44 }
0x14ce   :  { %6842 = vst.msk [vmem:[#allocation2 + $0x18] sm:$0xff] %vm1840_vm14, %v6840_v35  ;;  %v6839_v57 = vadd.f32 %v6837_v0, %v6682_v20  ;;  %v6844_v59 = vmul.f32 %v9753_v38, %v6840_v35  ;;  %v6164_v35 = vmul.f32 %v11884_v40, %v12532_v62  ;;  %v6213_v48 = vmul.f32 1.442695, %v6161_v5  ;;  %v9775_v30 = vpop.eup %9774 }
0x14cf   :  { %v9491_v51 = vpop.f32.mrf.mxu0  ;;  %9784 = vpow2.f32 %v6215_v15  ;;  %v6231_v23 = vmul.f32 1.442695, %v6170_v31 }
0x14d0   :  { %6841 = vst.msk [vmem:[#allocation2 + $0x10] sm:$0xff] %vm1840_vm14, %v6839_v57  ;;  %v6846_v9 = vadd.f32 %v9491_v51, %v6844_v59  ;;  %v6843_v58 = vmul.f32 %v9755_v32, %v6839_v57  ;;  %v6163_v57 = vmul.f32 %v11886_v60, %v12533_v10  ;;  %v6219_v40 = vmul.f32 1.442695, %v6164_v35 }
0x14d1   :  { %v6692_v56 = vpop.f32.mrf.mxu0  ;;  %9786 = vpow2.f32 %v6213_v48 }
0x14d2   :  { %6848 = vst.msk [vmem:[#allocation2 + $0x28] sm:$0xff] %vm1840_vm14, %v6846_v9  ;;  %v6845_v42 = vadd.f32 %v6843_v58, %v6692_v56  ;;  %v6850_v12 = vmul.f32 %v9757_v6, %v6846_v9  ;;  %v12534_v9 = vld [vmem:[#allocation31_spill] sm:$0xff]  ;;  %v6217_v60 = vmul.f32 1.442695, %v6163_v57  ;;  %9788 = vpow2.f32 %v6219_v40 }
0x14d3   :  { %v9494_v22 = vpop.f32.mrf.mxu0  ;;  %v6166_v58 = vmul.f32 %v11888_v41, %v12534_v9 }
0x14d4   :  { %6847 = vst.msk [vmem:[#allocation2 + $0x20] sm:$0xff] %vm1840_vm14, %v6845_v42  ;;  %v6852_v19 = vadd.f32 %v9494_v22, %v6850_v12  ;;  %v6849_v14 = vmul.f32 %v9759_v52, %v6845_v42  ;;  %v6165_v42 = vmul.f32 %v11890_v3, %v11783_v45  ;;  %v12535_v22 = vld [vmem:[#allocation32_spill] sm:$0xff]  ;;  %9790 = vpow2.f32 %v6217_v60 }
0x14d5   :  { %v6702_v54 = vpop.f32.mrf.mxu0  ;;  %v6168_v17 = vmul.f32 %v11894_v21, %v12535_v22  ;;  %v6223_v41 = vmul.f32 1.442695, %v6166_v58 }
0x14d6   :  { %6854 = vst.msk [vmem:[#allocation2 + $0x38] sm:$0xff] %vm1840_vm14, %v6852_v19  ;;  %v6851_v1 = vadd.f32 %v6849_v14, %v6702_v54  ;;  %v6856_v2 = vmul.f32 %v9761_v4, %v6852_v19  ;;  %v9777_v4 = vpop.eup %9776  ;;  %v12536_v54 = vld [vmem:[#allocation33_spill] sm:$0xff]  ;;  %v6221_v45 = vmul.f32 1.442695, %v6165_v42 }
0x14d7   :  { %v9497_v47 = vpop.f32.mrf.mxu0  ;;  %v6227_v21 = vmul.f32 1.442695, %v6168_v17  ;;  %9792 = vpow2.f32 %v6223_v41 }
0x14d8   :  { %6853 = vst.msk [vmem:[#allocation2 + $0x30] sm:$0xff] %vm1840_vm14, %v6851_v1  ;;  %v6858_v50 = vadd.f32 %v9497_v47, %v6856_v2  ;;  %v6855_v53 = vmul.f32 %v9763_v37, %v6851_v1  ;;  %v6167_v37 = vmul.f32 %v11897_v16, %v12536_v54  ;;  %v9779_v1 = vpop.eup %9778  ;;  %9794 = vpow2.f32 %v6221_v45 }
0x14d9   :  { %v6712_v25 = vpop.f32.mrf.mxu0  ;;  %9796 = vpow2.f32 %v6227_v21 }
0x14da   :  { %6860 = vst.msk [vmem:[#allocation2 + $0x48] sm:$0xff] %vm1840_vm14, %v6858_v50  ;;  %v6857_v29 = vadd.f32 %v6855_v53, %v6712_v25  ;;  %v6862_v33 = vmul.f32 %v9765_v34, %v6858_v50  ;;  %v9781_v50 = vpop.eup %9780  ;;  %v6225_v16 = vmul.f32 1.442695, %v6167_v37  ;;  %v12538_v34 = vld [vmem:[#allocation14_spill] sm:$0xff] }
0x14db   :  { %v9500_v11 = vpop.f32.mrf.mxu0  ;;  %v6169_v28 = vmul.f32 %v11905_v39, %v12538_v34  ;;  %v9783_v8 = vpop.eup %9782 }
0x14dc   :  { %6859 = vst.msk [vmem:[#allocation2 + $0x40] sm:$0xff] %vm1840_vm14, %v6857_v29  ;;  %v6864_v0 = vadd.f32 %v9500_v11, %v6862_v33  ;;  %v6861_v38 = vmul.f32 %v9767_v24, %v6857_v29  ;;  %v9785_v33 = vpop.eup %9784  ;;  %v6172_v24 = vmul.f32 %v11910_v61, %v11793_v46  ;;  %9798 = vpow2.f32 %v6225_v16 }
0x14dd   :  { %v6722_v20 = vpop.f32.mrf.mxu0  ;;  %v6229_v39 = vmul.f32 1.442695, %v6169_v28  ;;  %9800 = vpow2.f32 %v6231_v23 }
0x14de   :  { %6866 = vst.msk [vmem:[#allocation2 + $0x58] sm:$0xff] %vm1840_vm14, %v6864_v0  ;;  %v6863_v59 = vadd.f32 %v6861_v38, %v6722_v20  ;;  %v6868_v32 = vmul.f32 %v9769_v43, %v6864_v0  ;;  %v9787_v35 = vpop.eup %9786  ;;  %v12539_v0 = vld [vmem:[#allocation17_spill] sm:$0xff]  ;;  %v6235_v10 = vmul.f32 1.442695, %v6172_v24 }
0x14df   :  { %v9503_v51 = vpop.f32.mrf.mxu0  ;;  %v6171_v38 = vmul.f32 %v11913_v63, %v12539_v0  ;;  %v9789_v57 = vpop.eup %9788  ;;  %9802 = vpow2.f32 %v6229_v39 }
0x14e0   :  { %6865 = vst.msk [vmem:[#allocation2 + $0x50] sm:$0xff] %vm1840_vm14, %v6863_v59  ;;  %v6870_v6 = vadd.f32 %v9503_v51, %v6868_v32  ;;  %v6867_v36 = vmul.f32 %v9771_v7, %v6863_v59  ;;  %9804 = vpow2.f32 %v6235_v10  ;;  %v6999_v10 = vpop.f32.mrf.mxu1 }
0x14e1   :  { %v6732_v56 = vpop.f32.mrf.mxu0  ;;  %v6233_v32 = vmul.f32 1.442695, %v6171_v38  ;;  %v9791_v63 = vpop.eup %9790  ;;  %v7033_v38 = vld [vmem:[#allocation2 + $0x48] sm:$0xff] }
0x14e2   :  { %6872 = vst.msk [vmem:[#allocation2 + $0x68] sm:$0xff] %vm1840_vm14, %v6870_v6  ;;  %v6869_v12 = vadd.f32 %v6867_v36, %v6732_v56  ;;  %v6874_v52 = vmul.f32 %v9773_v49, %v6870_v6 }
0x14e3   :  { %v9506_v26 = vpop.f32.mrf.mxu0  ;;  %9806 = vpow2.f32 %v6233_v32  ;;  %v7001_v32 = vpop.f32.mrf.mxu1 }
0x14e4   :  { %6871 = vst.msk [vmem:[#allocation2 + $0x60] sm:$0xff] %vm1840_vm14, %v6869_v12  ;;  %v6876_v19 = vadd.f32 %v9506_v26, %v6874_v52  ;;  %v6873_v14 = vmul.f32 %v9775_v30, %v6869_v12  ;;  %v9793_v58 = vpop.eup %9792 }
0x14e5   :  { %v6742_v55 = vpop.f32.mrf.mxu0  ;;  %v9795_v30 = vpop.eup %9794 }
0x14e6   :  { %6878 = vst.msk [vmem:[#allocation2 + $0x78] sm:$0xff] %vm1840_vm14, %v6876_v19  ;;  %v6875_v3 = vadd.f32 %v6873_v14, %v6742_v55  ;;  %v6880_v18 = vmul.f32 %v9777_v4, %v6876_v19  ;;  %v9797_v42 = vpop.eup %9796 }
0x14e7   :  { %v9509_v2 = vpop.f32.mrf.mxu0  ;;  %v7034_v39 = vld [vmem:[#allocation2 + $0x50] sm:$0xff] }
0x14e8   :  { %6877 = vst.msk [vmem:[#allocation2 + $0x70] sm:$0xff] %vm1840_vm14, %v6875_v3  ;;  %v6882_v47 = vadd.f32 %v9509_v2, %v6880_v18  ;;  %v6879_v13 = vmul.f32 %v9779_v1, %v6875_v3 }
0x14e9   :  { %v6752_v53 = vpop.f32.mrf.mxu0  ;;  %v9799_v17 = vpop.eup %9798  ;;  %v7037_v23 = vld [vmem:[#allocation2 + $0x68] sm:$0xff] }
0x14ea   :  { %6884 = vst.msk [vmem:[#allocation2 + $0x88] sm:$0xff] %vm1840_vm14, %v6882_v47  ;;  %v6881_v5 = vadd.f32 %v6879_v13, %v6752_v53  ;;  %v6886_v25 = vmul.f32 %v9781_v50, %v6882_v47  ;;  %v9801_v54 = vpop.eup %9800 }
0x14eb   :  { %v9512_v29 = vpop.f32.mrf.mxu0 }
0x14ec   :  { %6883 = vst.msk [vmem:[#allocation2 + $0x80] sm:$0xff] %vm1840_vm14, %v6881_v5  ;;  %v6888_v15 = vadd.f32 %v9512_v29, %v6886_v25  ;;  %v6885_v11 = vmul.f32 %v9783_v8, %v6881_v5  ;;  %v9803_v3 = vpop.eup %9802 }
0x14ed   :  { %v6762_v62 = vpop.f32.mrf.mxu0  ;;  %v9805_v2 = vpop.eup %9804  ;;  %v7039_v25 = vld [vmem:[#allocation2 + $0x78] sm:$0xff] }
0x14ee   :  { %6890 = vst.msk [vmem:[#allocation2 + $0x98] sm:$0xff] %vm1840_vm14, %v6888_v15  ;;  %v6887_v43 = vadd.f32 %v6885_v11, %v6762_v62  ;;  %v6892_v48 = vmul.f32 %v9785_v33, %v6888_v15  ;;  %v7036_v15 = vld [vmem:[#allocation2 + $0x60] sm:$0xff]  ;;  %v7035_v62 = vld [vmem:[#allocation2 + $0x58] sm:$0xff] }
0x14ef   :  { %v9515_v20 = vpop.f32.mrf.mxu0  ;;  %v7038_v29 = vld [vmem:[#allocation2 + $0x70] sm:$0xff] }
0x14f0   :  { %6889 = vst.msk [vmem:[#allocation2 + $0x90] sm:$0xff] %vm1840_vm14, %v6887_v43  ;;  %v6894_v46 = vadd.f32 %v9515_v20, %v6892_v48  ;;  %v6891_v61 = vmul.f32 %v9787_v35, %v6887_v43  ;;  %v9807_v13 = vpop.eup %9806  ;;  %v7032_v48 = vld [vmem:[#allocation2 + $0x40] sm:$0xff] }
0x14f1   :  { %v6772_v59 = vpop.f32.mrf.mxu0 }
0x14f2   :  { %6896 = vst.msk [vmem:[#allocation2 + $0xa8] sm:$0xff] %vm1840_vm14, %v6894_v46  ;;  %v6893_v7 = vadd.f32 %v6891_v61, %v6772_v59  ;;  %v6898_v51 = vmul.f32 %v9789_v57, %v6894_v46  ;;  %v7031_v46 = vld [vmem:[#allocation2 + $0x38] sm:$0xff]  ;;  %v7030_v57 = vld [vmem:[#allocation2 + $0x30] sm:$0xff] }
0x14f3   :  { %v9518_v49 = vpop.f32.mrf.mxu0 }
0x14f4   :  { %6895 = vst.msk [vmem:[#allocation2 + $0xa0] sm:$0xff] %vm1840_vm14, %v6893_v7  ;;  %v6900_v40 = vadd.f32 %v9518_v49, %v6898_v51  ;;  %v6897_v9 = vmul.f32 %v9791_v63, %v6893_v7  ;;  %v7029_v7 = vld [vmem:[#allocation2 + $0x28] sm:$0xff]  ;;  %v7028_v63 = vld [vmem:[#allocation2 + $0x20] sm:$0xff] }
0x14f5   :  { %v6782_v6 = vpop.f32.mrf.mxu0  ;;  %v7043_v49 = vld [vmem:[#allocation2 + $0x98] sm:$0xff] }
0x14f6   :  { %6902 = vst.msk [vmem:[#allocation2 + $0xb8] sm:$0xff] %vm1840_vm14, %v6900_v40  ;;  %v6899_v36 = vadd.f32 %v6897_v9, %v6782_v6  ;;  %v6904_v56 = vmul.f32 %v9793_v58, %v6900_v40  ;;  %v7005_v40 = vpop.f32.mrf.mxu1  ;;  %v7027_v9 = vld [vmem:[#allocation2 + $0x18] sm:$0xff]  ;;  %v7026_v6 = vld [vmem:[#allocation2 + $0x10] sm:$0xff] }
0x14f7   :  { %v9521_v60 = vpop.f32.mrf.mxu0  ;;  %v7042_v58 = vld [vmem:[#allocation2 + $0x90] sm:$0xff] }
0x14f8   :  { %6901 = vst.msk [vmem:[#allocation2 + $0xb0] sm:$0xff] %vm1840_vm14, %v6899_v36  ;;  %v6906_v12 = vadd.f32 %v9521_v60, %v6904_v56  ;;  %v6903_v52 = vmul.f32 %v9795_v30, %v6899_v36  ;;  %v7041_v36 = vld [vmem:[#allocation2 + $0x88] sm:$0xff]  ;;  %v7007_v56 = vpop.f32.mrf.mxu1  ;;  %v7040_v60 = vld [vmem:[#allocation2 + $0x80] sm:$0xff] }
0x14f9   :  { %v6792_v22 = vpop.f32.mrf.mxu0  ;;  %v7045_v59 = vld [vmem:[#allocation2 + $0xa8] sm:$0xff] }
0x14fa   :  { %6908 = vst.msk [vmem:[#allocation2 + $0xc8] sm:$0xff] %vm1840_vm14, %v6906_v12  ;;  %v6905_v26 = vadd.f32 %v6903_v52, %v6792_v22  ;;  %v6910_v41 = vmul.f32 %v9797_v42, %v6906_v12  ;;  %v7025_v30 = vld [vmem:[#allocation2 + $0x8] sm:$0xff]  ;;  %v7024_v52 = vld [vmem:[#allocation2] sm:$0xff]  ;;  %v12541_v22 = vld [vmem:[#allocation9_spill] sm:$0xff] }
0x14fb   :  { %v9524_v19 = vpop.f32.mrf.mxu0  ;;  %v7044_v51 = vld [vmem:[#allocation2 + $0xa0] sm:$0xff]  ;;  %v12540_v42 = vld [vmem:[#allocation87_spill] sm:$0xff] }
0x14fc   :  { %6907 = vst.msk [vmem:[#allocation2 + $0xc0] sm:$0xff] %vm1840_vm14, %v6905_v26  ;;  %v6912_v14 = vadd.f32 %v9524_v19, %v6910_v41  ;;  %v6909_v4 = vmul.f32 %v9799_v17, %v6905_v26  ;;  %v7016_v12 = vmul.f32 %v11859_v27, %v12540_v42  ;;  %v7019_v17 = vmul.f32 %v7001_v32, %v12541_v22  ;;  %v7011_v26 = vpop.f32.mrf.mxu1  ;;  %v12542_v41 = vld [vmem:[#allocation77_spill] sm:$0xff]  ;;  %v12546_v27 = vld [vmem:[#allocation104_spill] sm:$0xff] }
0x14fd   :  { %v6802_v37 = vpop.f32.mrf.mxu0  ;;  %v7047_v20 = vld [vmem:[#allocation2 + $0xb8] sm:$0xff]  ;;  %v7018_v19 = vmul.f32 %v6999_v10, %v12542_v41  ;;  %v12554_v41 = vld [vmem:[#allocation107_spill] sm:$0xff] }
0x14fe   :  { %6914 = vst.msk [vmem:[#allocation2 + $0xd8] sm:$0xff] %vm1840_vm14, %v6912_v14  ;;  %v6911_v55 = vadd.f32 %v6909_v4, %v6802_v37  ;;  %v6916_v45 = vmul.f32 %v9801_v54, %v6912_v14  ;;  %v12543_v14 = vld [vmem:[#allocation79_spill] sm:$0xff]  ;;  %v7013_v54 = vpop.f32.mrf.mxu1  ;;  %v12544_v37 = vld [vmem:[#allocation102_spill] sm:$0xff] }
0x14ff   :  { %v9527_v18 = vpop.f32.mrf.mxu0  ;;  %v7046_v61 = vld [vmem:[#allocation2 + $0xb0] sm:$0xff]  ;;  %v7021_v4 = vmul.f32 %v7007_v56, %v12543_v14 }
0x1500   :  { %6913 = vst.msk [vmem:[#allocation2 + $0xd0] sm:$0xff] %vm1840_vm14, %v6911_v55  ;;  %v6918_v1 = vadd.f32 %v9527_v18, %v6916_v45  ;;  %v6915_v21 = vmul.f32 %v9803_v3, %v6911_v55  ;;  %v7020_v55 = vmul.f32 %v7005_v40, %v12544_v37  ;;  %v12545_v45 = vld [vmem:[#allocation103_spill] sm:$0xff]  ;;  %v7022_v18 = vmul.f32 %v7011_v26, %v12546_v27  ;;  %v7344_v27 = vld [vmem:[#allocation3 + $0x3e0] sm:$0xff] }
0x1501   :  { %v6812_v44 = vpop.f32.mrf.mxu0  ;;  %v7049_v0 = vld [vmem:[#allocation2 + $0xc8] sm:$0xff]  ;;  %v7023_v3 = vmul.f32 %v7013_v54, %v12545_v45  ;;  %v7346_v45 = vld [vmem:[#allocation3 + $0x3f0] sm:$0xff] }
0x1502   :  { %6920 = vst.msk [vmem:[#allocation2 + $0xe8] sm:$0xff] %vm1840_vm14, %v6918_v1  ;;  %v6917_v31 = vadd.f32 %v6915_v21, %v6812_v44  ;;  %v6922_v47 = vmul.f32 %v9805_v2, %v6918_v1  ;;  %v7203_v1 = vld [vmem:[#allocation3 + $0x3c0] sm:$0xff]  ;;  %v7202_v21 = vld [vmem:[#allocation3 + $0x3b8] sm:$0xff]  ;;  %v7201_v2 = vld [vmem:[#allocation3 + $0x3b0] sm:$0xff] }
0x1503   :  { %v9530_v50 = vpop.f32.mrf.mxu0  ;;  %v7048_v43 = vld [vmem:[#allocation2 + $0xc0] sm:$0xff]  ;;  %9535 = vmatprep.subr.mxu1 %v7203_v1  ;;  %v7200_v44 = vld [vmem:[#allocation3 + $0x3a8] sm:$0xff] }
0x1504   :  { %6919 = vst.msk [vmem:[#allocation2 + $0xe0] sm:$0xff] %vm1840_vm14, %v6917_v31  ;;  %v6924_v16 = vadd.f32 %v9530_v50, %v6922_v47  ;;  %v6921_v53 = vmul.f32 %v9807_v13, %v6917_v31  ;;  %9536 = vmatpush3.msra.mxu1 %v7203_v1  ;;  %v7199_v31 = vld [vmem:[#allocation3 + $0x3a0] sm:$0xff]  ;;  %v7198_v47 = vld [vmem:[#allocation3 + $0x398] sm:$0xff]  ;;  %v7888_v50 = vld [vmem:[#allocation3 + $0x390] ss:$0 sm:$0xff] }
0x1505   :  { %v6822_v34 = vpop.f32.mrf.mxu0  ;;  %v7051_v11 = vld [vmem:[#allocation2 + $0xd8] sm:$0xff]  ;;  %9537 = vmatprep.subr.mxu1 %v7202_v21 }
0x1506   :  { %6926 = vst.msk [vmem:[#allocation2 + $0xf8] sm:$0xff] %vm1840_vm14, %v6924_v16  ;;  %v6923_v28 = vadd.f32 %v6921_v53, %v6822_v34  ;;  %9538 = vmatpush3.msra.mxu1 %v7202_v21  ;;  %v12547_v53 = vld [vmem:[#allocation109_spill] sm:$0xff] }
0x1507   :  { %v7050_v35 = vld [vmem:[#allocation2 + $0xd0] sm:$0xff]  ;;  %9539 = vmatprep.subr.mxu1 %v7201_v2  ;;  %v7061_v34 = vmul.f32 %v7888_v50, %v12547_v53 }
0x1508   :  { %6925 = vst.msk [vmem:[#allocation2 + $0xf0] sm:$0xff] %vm1840_vm14, %v6923_v28  ;;  %9540 = vmatpush3.msra.mxu1 %v7201_v2 }
0x1509   :  { %v7053_v33 = vld [vmem:[#allocation2 + $0xe8] sm:$0xff]  ;;  %9541 = vmatprep.subr.mxu1 %v7200_v44 }
0x150a   :  { %9542 = vmatpush3.msra.mxu1 %v7200_v44 }
0x150b   :  { %v7052_v24 = vld [vmem:[#allocation2 + $0xe0] sm:$0xff]  ;;  %9543 = vmatprep.subr.mxu1 %v7199_v31 }
0x150c   :  { %9544 = vmatpush3.msra.mxu1 %v7199_v31 }
0x150d   :  { %v7055_v5 = vld [vmem:[#allocation2 + $0xf8] sm:$0xff]  ;;  %9545 = vmatprep.subr.mxu1 %v7198_v47 }
0x150e   :  { %8517 = vmatprep.subr.mxu0 %v7055_v5  ;;  %9546 = vmatpush3.msra.mxu1 %v7198_v47 }
0x150f   :  { %8518 = vmatpush3.msra.mxu0 %v7039_v25  ;;  %v7054_v8 = vld [vmem:[#allocation2 + $0xf0] sm:$0xff] }
0x1510   :  { %8519 = vmatprep.subr.mxu0 %v7054_v8  ;;  %v7183_v8 = vpop.permute.xlu1 %7182 }
0x1511   :  { %8520 = vmatpush3.msra.mxu0 %v7038_v29 }
0x1512   :  { %8521 = vmatprep.subr.mxu0 %v7053_v33 }
0x1513   :  { %8522 = vmatpush3.msra.mxu0 %v7037_v23  ;;  %v12548_v23 = vld [vmem:[#allocation110_spill] sm:$0xff] }
0x1514   :  { %8523 = vmatprep.subr.mxu0 %v7052_v24  ;;  %v7062_v24 = vmul.f32 %v7888_v50, %v12548_v23 }
0x1515   :  { %8524 = vmatpush3.msra.mxu0 %v7036_v15 }
0x1516   :  { %8525 = vmatprep.subr.mxu0 %v7051_v11 }
0x1517   :  { %8526 = vmatpush3.msra.mxu0 %v7035_v62 }
0x1518   :  { %8527 = vmatprep.subr.mxu0 %v7050_v35  ;;  %v7185_v35 = vpop.permute.xlu0 %7184 }
0x1519   :  { %8528 = vmatpush3.msra.mxu0 %v7034_v39 }
0x151a   :  { %8529 = vmatprep.subr.mxu0 %v7049_v0 }
0x151b   :  { %8530 = vmatpush3.msra.mxu0 %v7033_v38  ;;  %v12549_v38 = vld [vmem:[#allocation10_spill] sm:$0xff] }
0x151c   :  { %8531 = vmatprep.subr.mxu0 %v7048_v43  ;;  %v7063_v43 = vmul.f32 %v7888_v50, %v12549_v38 }
0x151d   :  { %8532 = vmatpush3.msra.mxu0 %v7032_v48 }
0x151e   :  { %8533 = vmatprep.subr.mxu0 %v7047_v20  ;;  %v7187_v20 = vpop.permute.xlu1 %7186 }
0x151f   :  { %8534 = vmatpush3.msra.mxu0 %v7031_v46 }
0x1520   :  { %8535 = vmatprep.subr.mxu0 %v7046_v61 }
0x1521   :  { %8536 = vmatpush3.msra.mxu0 %v7030_v57 }
0x1522   :  { %8537 = vmatprep.subr.mxu0 %v7045_v59  ;;  %v12550_v59 = vld [vmem:[#allocation11_spill] sm:$0xff] }
0x1523   :  { %8538 = vmatpush3.msra.mxu0 %v7029_v7  ;;  %v7064_v32 = vmul.f32 %v7888_v50, %v12550_v59 }
0x1524   :  { %8539 = vmatprep.subr.mxu0 %v7044_v51 }
0x1525   :  { %8540 = vmatpush3.msra.mxu0 %v7028_v63  ;;  %v7189_v63 = vpop.permute.xlu1 %7188 }
0x1526   :  { %8541 = vmatprep.subr.mxu0 %v7043_v49 }
0x1527   :  { %8542 = vmatpush3.msra.mxu0 %v7027_v9  ;;  %v12551_v9 = vld [vmem:[#allocation106_spill] sm:$0xff] }
0x1528   :  { %8543 = vmatprep.subr.mxu0 %v7042_v58 }
0x1529   :  { %8544 = vmatpush3.msra.mxu0 %v7026_v6 }
0x152a   :  { %8545 = vmatprep.subr.mxu0 %v7041_v36  ;;  %v12552_v36 = vld [vmem:[#allocation105_spill] sm:$0xff] }
0x152b   :  { %8546 = vmatpush3.msra.mxu0 %v7025_v30 }
0x152c   :  { %8547 = vmatprep.subr.mxu0 %v7040_v60 }
0x152d   :  { %8548 = vmatpush3.msra.mxu0 %v7024_v52 }
0x152e   :  { %7130 = vmatmul.mubr.f32.vlgmr.msra.gmra.mxu0 %v7016_v12 }
0x152f   :  { %7134 = vmatprep.mubr.f32.mxu0 %v7019_v17  ;;  %v12553_v17 = vld [vmem:[#allocation108_spill] sm:$0xff] }
0x1532   :  { %7135 = vmatmul.mubr.f32.gmra.mxu0 %v7018_v19 }
0x1533   :  { %7139 = vmatprep.mubr.f32.mxu0 %v7021_v4 }
0x1536   :  { %7140 = vmatmul.mubr.f32.gmra.mxu0 %v7020_v55  ;;  %v7347_v55 = vld [vmem:[#allocation3 + $0x3f8] sm:$0xff] }
0x1537   :  { %7144 = vmatprep.mubr.f32.mxu0 %v7023_v3  ;;  %9553 = vmatprep.subr.mxu1 %v7347_v55  ;;  %v7345_v3 = vld [vmem:[#allocation3 + $0x3e8] sm:$0xff] }
0x153a   :  { %7145 = vmatmul.mubr.f32.gmra.mxu0 %v7022_v18 }
0x15ee   :  { %v8549_v13 = vpop.f32.mrf.mxu0 }
0x15f0   :  { %v8550_v16 = vpop.f32.mrf.mxu0 }
0x15f1   :  { %v8551_v28 = vadd.f32 %v8550_v16, %v8549_v13 }
0x15f2   :  { %v8552_v5 = vpop.f32.mrf.mxu0 }
0x15f3   :  { %v7132_v25 = vadd.f32 %v8551_v28, %v7061_v34 }
0x15f4   :  { %v8553_v29 = vpop.f32.mrf.mxu0 }
0x15f5   :  { %v7194_v33 = vmul.f32 %v7183_v8, %v7132_v25  ;;  %v8554_v15 = vadd.f32 %v8553_v29, %v8552_v5  ;;  %v7897_v29 = vld [vmem:[#allocation3 + $0x3d8] ss:$0 sm:$0xff] }
0x15f6   :  { %v8555_v11 = vpop.f32.mrf.mxu0 }
0x15f7   :  { %v7137_v62 = vadd.f32 %v8554_v15, %v7062_v24  ;;  %9547 = vmatprep.mubr.msk.f32.mxu1 %vm1840_vm14, %v7194_v33 }
0x15f8   :  { %v8556_v39 = vpop.f32.mrf.mxu0 }
0x15f9   :  { %v7195_v0 = vmul.f32 %v7185_v35, %v7137_v62  ;;  %v8557_v48 = vadd.f32 %v8556_v39, %v8555_v11 }
0x15fa   :  { %v8558_v10 = vpop.f32.mrf.mxu0 }
0x15fb   :  { %v7142_v46 = vadd.f32 %v8557_v48, %v7063_v43  ;;  %9548 = vmatmul.mubr.msk.f32.vlgmr.msra.gmra.mxu1 %vm1840_vm14, %v7195_v0  ;;  %v7898_v0 = vld [vmem:[#allocation3 + $0x400] ss:$0 sm:$0xff] }
0x15fc   :  { %v8559_v61 = vpop.f32.mrf.mxu0  ;;  %9554 = vmatpush3.msra.mxu1 %v7347_v55 }
0x15fd   :  { %v7196_v57 = vmul.f32 %v7187_v20, %v7142_v46  ;;  %v8560_v7 = vadd.f32 %v8559_v61, %v8558_v10  ;;  %9555 = vmatprep.subr.mxu1 %v7346_v45 }
0x15fe   :  { %9556 = vmatpush3.msra.mxu1 %v7346_v45 }
0x15ff   :  { %v7147_v51 = vadd.f32 %v8560_v7, %v7064_v32  ;;  %9550 = vmatprep.mubr.msk.f32.mxu1 %vm1840_vm14, %v7196_v57  ;;  %9557 = vmatprep.subr.mxu1 %v7345_v3 }
0x1600   :  { %9558 = vmatpush3.msra.mxu1 %v7345_v3 }
0x1601   :  { %v7197_v49 = vmul.f32 %v7189_v63, %v7147_v51  ;;  %9559 = vmatprep.subr.mxu1 %v7344_v27 }
0x1602   :  { %9560 = vmatpush3.msra.mxu1 %v7344_v27 }
0x1603   :  { %9551 = vmatmul.mubr.msk.f32.gmra.mxu1 %vm1840_vm14, %v7197_v49 }
0x16bb   :  { %v9549_v40 = vpop.f32.mrf.mxu1 }
0x16bc   :  { %v7290_v58 = vadd.f32 %v9549_v40, %v12551_v9 }
0x16bd   :  { %v7284_v6 = vpop.f32.mrf.mxu1 }
0x16be   :  { %v7285_v56 = vadd.f32 %v7284_v6, %v12552_v36  ;;  %v7304_v30 = vmul.f32 %v7290_v58, %v7290_v58 }
0x16c0   :  { %v7310_v60 = vsel %vm421_vm0, %v7304_v30, 0.0  ;;  %v7303_v42 = vmul.f32 %v7285_v56, %v7285_v56 }
0x16c1   :  { %7311 = vadd.xlane.f32.xlu1 %v7310_v60 }
0x16c2   :  { %v7307_v12 = vsel %vm421_vm0, %v7303_v42, 0.0 }
0x16c3   :  { %v9552_v52 = vpop.f32.mrf.mxu1  ;;  %7308 = vadd.xlane.f32.xlu0 %v7307_v12 }
0x16c4   :  { %v7300_v26 = vadd.f32 %v9552_v52, %v12553_v17 }
0x16c5   :  { %v7294_v22 = vpop.f32.mrf.mxu1 }
0x16c6   :  { %v7295_v19 = vadd.f32 %v7294_v22, %v12554_v41  ;;  %v7306_v54 = vmul.f32 %v7300_v26, %v7300_v26 }
0x16c8   :  { %v7305_v14 = vmul.f32 %v7295_v19, %v7295_v19  ;;  %v7316_v37 = vsel %vm421_vm0, %v7306_v54, 0.0 }
0x16ca   :  { %v7313_v4 = vsel %vm421_vm0, %v7305_v14, 0.0 }
0x16cb   :  { %7314 = vadd.xlane.f32.xlu0 %v7313_v4 }
0x16cf   :  { %7317 = vadd.xlane.f32.xlu0 %v7316_v37 }
0x174a   :  { %v7312_v18 = vpop.xlane.xlu1 %7311 }
0x174b   :  { %v7320_v1 = vmul.f32 0.03125, %v7312_v18 }
0x174c   :  { %v7309_v21 = vpop.xlane.xlu0 %7308 }
0x174d   :  { %v7324_v2 = vadd.f32 1e-05, %v7320_v1  ;;  %v7319_v44 = vmul.f32 0.03125, %v7309_v21 }
0x174f   :  { %9808 = vrsqrt.f32 %v7324_v2  ;;  %v7323_v31 = vadd.f32 1e-05, %v7319_v44 }
0x1751   :  { %9810 = vrsqrt.f32 %v7323_v31 }
0x1754   :  { %v7315_v47 = vpop.xlane.xlu0 %7314 }
0x1755   :  { %v7321_v13 = vmul.f32 0.03125, %v7315_v47 }
0x1757   :  { %v7325_v50 = vadd.f32 1e-05, %v7321_v13 }
0x1758   :  { %v7318_v16 = vpop.xlane.xlu0 %7317 }
0x1759   :  { %9812 = vrsqrt.f32 %v7325_v50  ;;  %v7322_v53 = vmul.f32 0.03125, %v7318_v16 }
0x175b   :  { %v7326_v34 = vadd.f32 1e-05, %v7322_v53 }
0x175c   :  { %v9809_v28 = vpop.eup %9808 }
0x175d   :  { %9814 = vrsqrt.f32 %v7326_v34  ;;  %v7332_v25 = vmul.f32 %v9809_v28, %v7290_v58 }
0x175e   :  { %v9811_v5 = vpop.eup %9810 }
0x175f   :  { %v7331_v8 = vmul.f32 %v9811_v5, %v7285_v56  ;;  %v7341_v23 = vmul.f32 %v7897_v29, %v7332_v25 }
0x1761   :  { %v7340_v33 = vmul.f32 %v7897_v29, %v7331_v8 }
0x1763   :  { %9561 = vmatprep.mubr.msk.f32.mxu1 %vm421_vm0, %v7340_v33 }
0x1764   :  { %9562 = vmatmul.mubr.msk.f32.vlgmr.msra.gmra.mxu1 %vm421_vm0, %v7341_v23 }
0x1766   :  { %v9813_v24 = vpop.eup %9812 }
0x1767   :  { %v7333_v15 = vmul.f32 %v9813_v24, %v7295_v19 }
0x1769   :  { %v7342_v11 = vmul.f32 %v7897_v29, %v7333_v15 }
0x176a   :  { %v9815_v62 = vpop.eup %9814 }
0x176b   :  { %9564 = vmatprep.mubr.msk.f32.mxu1 %vm421_vm0, %v7342_v11  ;;  %v7334_v35 = vmul.f32 %v9815_v62, %v7300_v26 }
0x176d   :  { %v7343_v39 = vmul.f32 %v7897_v29, %v7334_v35 }
0x176f   :  { %9565 = vmatmul.mubr.msk.f32.gmra.mxu1 %vm421_vm0, %v7343_v39 }
0x1824   :  { %v9563_v38 = vpop.f32.mrf.mxu1 }
0x1825   :  { %v7437_v43 = vadd.f32 %v9563_v38, %v7898_v0 }
0x1826   :  { %v7431_v48 = vpop.f32.mrf.mxu1 }
0x1827   :  { %v7451_v20 = vmax.f32 %v7437_v43, 0.0  ;;  %v7432_v10 = vadd.f32 %v7898_v0, %v7431_v48 }
0x1829   :  { %7455 = vst [vmem:[%s12031_s3 + $0x8] sm:$0xff] %v7451_v20  ;;  %v7450_v46 = vmax.f32 %v7432_v10, 0.0 }
0x182b   :  { %7454 = vst [vmem:[%s12031_s3] sm:$0xff] %v7450_v46 }
0x182f   :  { %v9566_v61 = vpop.f32.mrf.mxu1 }
0x1830   :  { %v7447_v57 = vadd.f32 %v9566_v61, %v7898_v0 }
0x1831   :  { %v7441_v59 = vpop.f32.mrf.mxu1 }
0x1832   :  { %v7453_v32 = vmax.f32 %v7447_v57, 0.0  ;;  %v7442_v7 = vadd.f32 %v7898_v0, %v7441_v59 }
0x1834   :  { %7457 = vst [vmem:[%s12031_s3 + $0x18] sm:$0xff] %v7453_v32  ;;  %v7452_v51 = vmax.f32 %v7442_v7, 0.0 }
0x1836   :  { %7456 = vst [vmem:[%s12031_s3 + $0x10] sm:$0xff] %v7452_v51 }
0x1837   :  { %7462 = vsyncpa [#allocation4], 1 }
0x1838   :  { %7463 = vsyncpa [#allocation6], 1 }

</bundles_post_ra>
